<compile_context>
chip_gen: v7x
topology: tpu7x:2x2x1
jax: 0.10.0
libtpu: 0.0.40
codegen_flags: <defaults>
</compile_context>

<pallas_src>
import functools

import jax
import jax.numpy as jnp
from jax.experimental import pallas as pl
from jax.experimental.pallas import tpu as pltpu

EPS = 1e-5                      # nn.InstanceNorm2d default eps
_VMEM_LIMIT = 32 * 1024 * 1024  # safe on v5e/v6e/v7x; tiles below use ~2 MiB
# Conservative tile sizes that fit every generation with double buffering.
# (v5e tuning note: tn=128 is slightly better for its 4x128 MXU.)
_TM, _TN, _TK = 256, 256, 256


def _round_up(x, m):
    return (x + m - 1) // m * m


# ----------------------------------------------------------------------------
# Tiled matmul kernel: (M,K)bf16 @ (K,N)bf16 + bias, optional ReLU / tanh epilogue
# ----------------------------------------------------------------------------
def _matmul_kernel(a_ref, b_ref, bias_ref, o_ref, acc_ref, *, epilogue):
    k = pl.program_id(2)

    @pl.when(k == 0)
    def _():
        acc_ref[...] = jnp.zeros_like(acc_ref)

    acc_ref[...] += jnp.dot(a_ref[...], b_ref[...],
                            preferred_element_type=jnp.float32)

    @pl.when(k == pl.num_programs(2) - 1)
    def _():
        y = acc_ref[...] + bias_ref[...]
        if epilogue == "relu":
            y = jnp.maximum(y, 0.0)
        elif epilogue == "tanh":
            y = jnp.tanh(y)
        o_ref[...] = y.astype(o_ref.dtype)


def matmul_bias_act(a, b, bias, *, epilogue="none"):
    """a (M,K), b (K,N), bias (N,) -> (M, Np) f32 with Np = round_up(N,128).

    Column padding is kept (lane-dense output); padded columns are exactly 0
    (or tanh(0)=0) because the padded weights/bias are zero.
    """
    M, K = a.shape
    K2, N = b.shape
    assert K == K2
    Mp = _round_up(M, 8)
    Kp = _round_up(K, 128)
    Np = _round_up(N, 128)
    tm = min(_TM, Mp)
    tn = min(_TN, Np)
    tk = min(_TK, Kp)
    Mp = _round_up(Mp, tm)
    Kp = _round_up(Kp, tk)
    Np = _round_up(Np, tn)

    a_p = jnp.pad(a.astype(jnp.bfloat16), ((0, Mp - M), (0, Kp - K)))
    b_p = jnp.pad(b.astype(jnp.bfloat16), ((0, Kp - K), (0, Np - N)))
    bias_p = jnp.pad(bias.astype(jnp.float32), (0, Np - N)).reshape(1, Np)

    out = pl.pallas_call(
        functools.partial(_matmul_kernel, epilogue=epilogue),
        out_shape=jax.ShapeDtypeStruct((Mp, Np), jnp.float32),
        grid=(Mp // tm, Np // tn, Kp // tk),
        in_specs=[
            pl.BlockSpec((tm, tk), lambda i, j, k: (i, k)),
            pl.BlockSpec((tk, tn), lambda i, j, k: (k, j)),
            pl.BlockSpec((1, tn), lambda i, j, k: (0, j)),
        ],
        out_specs=pl.BlockSpec((tm, tn), lambda i, j, k: (i, j)),
        scratch_shapes=[pltpu.VMEM((tm, tn), jnp.float32)],
        compiler_params=pltpu.CompilerParams(
            dimension_semantics=("parallel", "parallel", "arbitrary"),
            vmem_limit_bytes=_VMEM_LIMIT),
    )(a_p, b_p, bias_p)
    return out[:M, :]   # drop M padding rows; keep lane-dense padded channels


# ----------------------------------------------------------------------------
# InstanceNorm kernels (channel-last), tiled over (batch, channel-tiles)
# ----------------------------------------------------------------------------
def _in_act_kernel(x_ref, o_ref, *, relu):
    x = x_ref[0].astype(jnp.float32)            # (HW, tc)
    inv_hw = 1.0 / x.shape[0]
    s = jnp.sum(x, axis=0, keepdims=True)
    ss = jnp.sum(x * x, axis=0, keepdims=True)
    mean = s * inv_hw
    var = jnp.maximum(ss * inv_hw - mean * mean, 0.0)
    y = (x - mean) * jax.lax.rsqrt(var + EPS)
    if relu:
        y = jnp.maximum(y, 0.0)
    o_ref[0] = y.astype(o_ref.dtype)


def _in_res_relu_kernel(x_ref, r_ref, o_ref):
    x = x_ref[0].astype(jnp.float32)
    inv_hw = 1.0 / x.shape[0]
    s = jnp.sum(x, axis=0, keepdims=True)
    ss = jnp.sum(x * x, axis=0, keepdims=True)
    mean = s * inv_hw
    var = jnp.maximum(ss * inv_hw - mean * mean, 0.0)
    y = (x - mean) * jax.lax.rsqrt(var + EPS)
    y = y + r_ref[0].astype(jnp.float32)
    o_ref[0] = jnp.maximum(y, 0.0).astype(o_ref.dtype)


def _in_pallas(kernel, args, N, HW, Cp):
    tc = 128 if Cp % 128 == 0 else Cp
    spec = pl.BlockSpec((1, HW, tc), lambda n, c: (n, 0, c))
    return pl.pallas_call(
        kernel,
        out_shape=jax.ShapeDtypeStruct((N, HW, Cp), jnp.bfloat16),
        grid=(N, Cp // tc),
        in_specs=[spec] * len(args),
        out_specs=spec,
        compiler_params=pltpu.CompilerParams(
            dimension_semantics=("parallel", "parallel"),
            vmem_limit_bytes=_VMEM_LIMIT),
    )(*args)


def instance_norm_act(x, relu=True):
    """InstanceNorm2d (affine=False) + optional ReLU on NHWC, emits bf16."""
    N, H, W, Cp = x.shape
    y = _in_pallas(functools.partial(_in_act_kernel, relu=relu),
                   (x.reshape(N, H * W, Cp),), N, H * W, Cp)
    return y.reshape(N, H, W, Cp)


def instance_norm_residual_relu(x, res):
    """Fused InstanceNorm -> (+ residual) -> ReLU (residual-block tail)."""
    N, H, W, Cp = x.shape
    y = _in_pallas(_in_res_relu_kernel,
                   (x.reshape(N, H * W, Cp), res.reshape(N, H * W, Cp)),
                   N, H * W, Cp)
    return y.reshape(N, H, W, Cp)


# ----------------------------------------------------------------------------
# Conv / ConvTranspose via channel-last im2col + Pallas matmul
# ----------------------------------------------------------------------------
def _im2col_nhwc(x, K, stride, pad):
    """x (N,H,W,C) -> (N*Ho*Wo, K*K*C); column order (kh, kw, c)."""
    N, H, W, C = x.shape
    xp = jnp.pad(x, ((0, 0), (pad, pad), (pad, pad), (0, 0)))
    Ho = (H + 2 * pad - K) // stride + 1
    Wo = (W + 2 * pad - K) // stride + 1
    cols = []
    for kh in range(K):
        for kw in range(K):
            cols.append(xp[:, kh:kh + stride * Ho:stride,
                           kw:kw + stride * Wo:stride, :])
    p = jnp.concatenate(cols, axis=-1)            # (N, Ho, Wo, K*K*C)
    return p.reshape(N * Ho * Wo, K * K * C), Ho, Wo


def conv2d_nhwc(x, w, b, stride, pad, epilogue="none"):
    """x NHWC (channels possibly padded); w (Cout,Cin,K,K) PyTorch; b (Cout,)."""
    Cout, Cin, K, _ = w.shape
    N = x.shape[0]
    x = x[..., :Cin].astype(jnp.bfloat16)         # drop channel padding, bf16 operands
    patches, Ho, Wo = _im2col_nhwc(x, K, stride, pad)
    wm = jnp.transpose(w, (2, 3, 1, 0)).reshape(K * K * Cin, Cout)
    out = matmul_bias_act(patches, wm.astype(jnp.bfloat16), b, epilogue=epilogue)
    return out.reshape(N, Ho, Wo, out.shape[1])   # channels stay lane-dense padded


def conv_transpose2d_nhwc(x, w_t, b):
    """ConvTranspose2d(k=3, stride=2, padding=1, output_padding=1), NHWC.

    Decomposed into 4 output phases (oy%2, ox%2); each phase is a small matmul
    over its non-zero taps, so the 4x zero-dilated tensor is never materialized.
    """
    Cin, Cout, K, _ = w_t.shape
    assert K == 3
    N, H, W, _ = x.shape
    x = x[..., :Cin].astype(jnp.bfloat16)
    xe = jnp.pad(x, ((0, 0), (0, 1), (0, 1), (0, 0)))   # high-side zero halo
    w = w_t.astype(jnp.bfloat16)                        # (Cin, Cout, K, K)
    taps_even = ((1, 0),)          # (kernel tap, input row/col offset)
    taps_odd = ((0, 1), (2, 0))
    phase_rows = []
    Cp = None
    for taps_y in (taps_even, taps_odd):
        phase_cols = []
        for taps_x in (taps_even, taps_odd):
            cols, wrows = [], []
            for ky, dy in taps_y:
                for kx, dx in taps_x:
                    cols.append(xe[:, dy:dy + H, dx:dx + W, :])
                    wrows.append(w[:, :, ky, kx])       # (Cin, Cout)
            patches = jnp.concatenate(cols, axis=-1).reshape(
                N * H * W, len(cols) * Cin)
            wm = jnp.concatenate(wrows, axis=0)         # (T*Cin, Cout)
            y = matmul_bias_act(patches, wm, b)         # (N*H*W, Cp) f32
            Cp = y.shape[1]
            phase_cols.append(y.reshape(N, H, W, Cp))
        phase_rows.append(jnp.stack(phase_cols, axis=3))    # (N,H,W,2,Cp)
    t = jnp.stack(phase_rows, axis=2)                        # (N,H,2,W,2,Cp)
    return t.reshape(N, 2 * H, 2 * W, Cp)


# ----------------------------------------------------------------------------
# Parameters (deterministic init; shapes from the PyTorch module)
# ----------------------------------------------------------------------------
def _init_conv(key, cout, cin, k):
    kw, kb = jax.random.split(key)
    scale = 1.0 / jnp.sqrt(cin * k * k)
    w = jax.random.uniform(kw, (cout, cin, k, k), jnp.float32, -scale, scale)
    b = jax.random.uniform(kb, (cout,), jnp.float32, -scale, scale)
    return w, b


def _init_convT(key, cin, cout, k):
    kw, kb = jax.random.split(key)
    scale = 1.0 / jnp.sqrt(cin * k * k)
    w = jax.random.uniform(kw, (cin, cout, k, k), jnp.float32, -scale, scale)
    b = jax.random.uniform(kb, (cout,), jnp.float32, -scale, scale)
    return w, b


def init_params(key, res_blocks_length=9):
    keys = jax.random.split(key, 6 + 2 * res_blocks_length)
    params = {}
    params["ds1"] = _init_conv(keys[0], 64, 3, 9)      # Conv2d(3, 64, 9, 1, 4)
    params["ds2"] = _init_conv(keys[1], 128, 64, 3)    # Conv2d(64, 128, 3, 2, 1)
    params["ds3"] = _init_conv(keys[2], 256, 128, 3)   # Conv2d(128, 256, 3, 2, 1)
    res = []
    for i in range(res_blocks_length):
        c1 = _init_conv(keys[3 + 2 * i], 256, 256, 3)
        c2 = _init_conv(keys[4 + 2 * i], 256, 256, 3)
        res.append((c1, c2))
    params["res"] = res
    base = 3 + 2 * res_blocks_length
    params["us1"] = _init_convT(keys[base], 256, 128, 3)     # ConvT(256,128,3,2,1,1)
    params["us2"] = _init_convT(keys[base + 1], 128, 64, 3)  # ConvT(128,64,3,2,1,1)
    params["us3"] = _init_conv(keys[base + 2], 3, 64, 9)     # Conv2d(64, 3, 9, 1, 4)
    return params


# ----------------------------------------------------------------------------
# Forward pass (== DefaultGenerator.forward); NCHW in / NCHW out
# ----------------------------------------------------------------------------
def default_generator_forward(params, x_nchw):
    x = jnp.transpose(x_nchw, (0, 2, 3, 1))     # NHWC once at entry

    # --- DownSamplingInput ---
    w, b = params["ds1"]
    x = instance_norm_act(conv2d_nhwc(x, w, b, stride=1, pad=4))
    w, b = params["ds2"]
    x = instance_norm_act(conv2d_nhwc(x, w, b, stride=2, pad=1))
    w, b = params["ds3"]
    x = instance_norm_act(conv2d_nhwc(x, w, b, stride=2, pad=1))

    # --- 9 x InstanseResidualBlock ---
    for (w1, b1), (w2, b2) in params["res"]:
        inp = x
        h = instance_norm_act(conv2d_nhwc(x, w1, b1, stride=1, pad=1))
        h = conv2d_nhwc(h, w2, b2, stride=1, pad=1)
        x = instance_norm_residual_relu(h, inp)   # IN -> +input -> ReLU (fused)

    # --- UpSamplingOutput ---
    w, b = params["us1"]
    x = instance_norm_act(conv_transpose2d_nhwc(x, w, b))
    w, b = params["us2"]
    x = instance_norm_act(conv_transpose2d_nhwc(x, w, b))
    w, b = params["us3"]
    y = conv2d_nhwc(x, w, b, stride=1, pad=4, epilogue="tanh")  # tanh fused in matmul
    y = y[..., :3]                               # drop lane-padding channels
    return jnp.transpose(y, (0, 3, 1, 2)).astype(jnp.float32)   # back to NCHW


if __name__ == "__main__":
    key = jax.random.PRNGKey(0)
    pkey, xkey = jax.random.split(key)
    params = init_params(pkey, res_blocks_length=9)
    # Small NCHW input consistent with the module (3 input channels, spatial % 4 == 0).
    x = jax.random.normal(xkey, (2, 3, 16, 16), dtype=jnp.float32)

    fwd = jax.jit(default_generator_forward)
    out = fwd(params, x)
    jax.block_until_ready(out)

    assert out.shape == (2, 3, 16, 16), out.shape
    assert out.dtype == jnp.float32
    assert bool(jnp.all(jnp.isfinite(out)))
    assert bool(jnp.all(jnp.abs(out) <= 1.0))   # tanh output range
    print("KERNEL_OK")
</pallas_src>

<mosaic_0001>
module attributes {stable_mosaic.version = 11 : i64} {
  func.func @_matmul_kernel(%arg0: i32, %arg1: i32, %arg2: i32, %arg3: memref<256x256xbf16, #tpu.memory_space<vmem>>, %arg4: memref<256x128xbf16, #tpu.memory_space<vmem>>, %arg5: memref<1x128xf32, #tpu.memory_space<vmem>>, %arg6: memref<256x128xf32, #tpu.memory_space<vmem>>, %arg7: memref<256x128xf32, #tpu.memory_space<vmem>>) attributes {dimension_semantics = [#tpu.dimension_semantics<parallel>, #tpu.dimension_semantics<parallel>, #tpu.dimension_semantics<arbitrary>], iteration_bounds = array<i64: 2, 1, 1>, scalar_prefetch = 0 : i64, scratch_operands = 1 : i64, tpu.core_type = #tpu.core_type<tc>, window_params = [{transform_indices = @transform_0, window_bounds = array<i64: 256, 256>}, {transform_indices = @transform_1, window_bounds = array<i64: 256, 128>}, {transform_indices = @transform_2, window_bounds = array<i64: 1, 128>}, {transform_indices = @transform_3, window_bounds = array<i64: 256, 128>}]} {
    %c0_i32 = arith.constant 0 : i32
    %0 = arith.cmpi eq, %arg2, %c0_i32 : i32
    %1 = arith.extui %0 : i1 to i32
    %c0_i32_0 = arith.constant 0 : i32
    %2 = arith.cmpi ne, %1, %c0_i32_0 : i32
    scf.if %2 {
      %cst_10 = arith.constant 0.000000e+00 : f32
      %12 = vector.broadcast %cst_10 : f32 to vector<256x128xf32>
      %c0_11 = arith.constant 0 : index
      %c0_12 = arith.constant 0 : index
      %13 = vector.load %arg7[%c0_11, %c0_12] : memref<256x128xf32, #tpu.memory_space<vmem>>, vector<256x128xf32>
      tpu.vector_store %arg7[%c0_11, %c0_12], %12 {strides = array<i32>} : memref<256x128xf32, #tpu.memory_space<vmem>>, vector<256x128xf32>,
    } else {
    }
    %c0 = arith.constant 0 : index
    %c0_1 = arith.constant 0 : index
    %3 = vector.load %arg7[%c0, %c0_1] : memref<256x128xf32, #tpu.memory_space<vmem>>, vector<256x128xf32>
    %c0_2 = arith.constant 0 : index
    %c0_3 = arith.constant 0 : index
    %4 = vector.load %arg3[%c0_2, %c0_3] : memref<256x256xbf16, #tpu.memory_space<vmem>>, vector<256x256xbf16>
    %c0_4 = arith.constant 0 : index
    %c0_5 = arith.constant 0 : index
    %5 = vector.load %arg4[%c0_4, %c0_5] : memref<256x128xbf16, #tpu.memory_space<vmem>>, vector<256x128xbf16>
    %cst = arith.constant dense<0.000000e+00> : vector<256x128xf32>
    %6 = tpu.matmul %4, %5, %cst {dimension_numbers = #tpu.dot_dimension_numbers<[1], [0], [0], [1], [0, 0, 1, 1], [], []>} : vector<256x256xbf16>, vector<256x128xbf16>, vector<256x128xf32> -> vector<256x128xf32>
    %7 = arith.addf %3, %6 : vector<256x128xf32>
    %c0_6 = arith.constant 0 : index
    %c0_7 = arith.constant 0 : index
    %8 = vector.load %arg7[%c0_6, %c0_7] : memref<256x128xf32, #tpu.memory_space<vmem>>, vector<256x128xf32>
    tpu.vector_store %arg7[%c0_6, %c0_7], %7 {strides = array<i32>} : memref<256x128xf32, #tpu.memory_space<vmem>>, vector<256x128xf32>,
    %c0_i32_8 = arith.constant 0 : i32
    %9 = arith.cmpi eq, %arg2, %c0_i32_8 : i32
    %10 = arith.extui %9 : i1 to i32
    %c0_i32_9 = arith.constant 0 : i32
    %11 = arith.cmpi ne, %10, %c0_i32_9 : i32
    scf.if %11 {
      %c0_10 = arith.constant 0 : index
      %c0_11 = arith.constant 0 : index
      %12 = vector.load %arg7[%c0_10, %c0_11] : memref<256x128xf32, #tpu.memory_space<vmem>>, vector<256x128xf32>
      %c0_12 = arith.constant 0 : index
      %c0_13 = arith.constant 0 : index
      %13 = vector.load %arg5[%c0_12, %c0_13] : memref<1x128xf32, #tpu.memory_space<vmem>>, vector<1x128xf32>
      %14 = vector.broadcast %13 : vector<1x128xf32> to vector<256x128xf32>
      %15 = arith.addf %12, %14 : vector<256x128xf32>
      %c0_14 = arith.constant 0 : index
      %c0_15 = arith.constant 0 : index
      %16 = vector.load %arg6[%c0_14, %c0_15] : memref<256x128xf32, #tpu.memory_space<vmem>>, vector<256x128xf32>
      tpu.vector_store %arg6[%c0_14, %c0_15], %15 {strides = array<i32>} : memref<256x128xf32, #tpu.memory_space<vmem>>, vector<256x128xf32>,
    } else {
    }
    return
  }
  func.func @transform_0(%arg0: i32, %arg1: i32, %arg2: i32) -> (i32, i32) {
    %c0_i32 = arith.constant 0 : i32
    return %arg0, %arg2 : i32, i32
  }
  func.func @transform_1(%arg0: i32, %arg1: i32, %arg2: i32) -> (i32, i32) {
    %c0_i32 = arith.constant 0 : i32
    return %arg2, %arg1 : i32, i32
  }
  func.func @transform_2(%arg0: i32, %arg1: i32, %arg2: i32) -> (i32, i32) {
    %c0_i32 = arith.constant 0 : i32
    %c0_i32_0 = arith.constant 0 : i32
    return %c0_i32, %arg1 : i32, i32
  }
  func.func @transform_3(%arg0: i32, %arg1: i32, %arg2: i32) -> (i32, i32) {
    %c0_i32 = arith.constant 0 : i32
    return %arg0, %arg1 : i32, i32
  }
}

module attributes {stable_mosaic.version = 11 : i64} {
  func.func @_in_act_kernel(%arg0: i32, %arg1: i32, %arg2: memref<1x256x128xf32, #tpu.memory_space<vmem>>, %arg3: memref<1x256x128xbf16, #tpu.memory_space<vmem>>) attributes {dimension_semantics = [#tpu.dimension_semantics<parallel>, #tpu.dimension_semantics<parallel>], iteration_bounds = array<i64: 2, 1>, scalar_prefetch = 0 : i64, scratch_operands = 0 : i64, tpu.core_type = #tpu.core_type<tc>, window_params = [{transform_indices = @transform_0, window_bounds = array<i64: 1, 256, 128>}, {transform_indices = @transform_1, window_bounds = array<i64: 1, 256, 128>}]} {
    %c0 = arith.constant 0 : index
    %c0_0 = arith.constant 0 : index
    %c0_1 = arith.constant 0 : index
    %0 = vector.load %arg2[%c0, %c0_0, %c0_1] : memref<1x256x128xf32, #tpu.memory_space<vmem>>, vector<1x256x128xf32>
    %1 = vector.shape_cast %0 : vector<1x256x128xf32> to vector<256x128xf32>
    %cst = arith.constant dense<0.000000e+00> : vector<128xf32>
    %2 = vector.multi_reduction <add>, %1, %cst [0] : vector<256x128xf32> to vector<128xf32>
    %3 = vector.shape_cast %2 : vector<128xf32> to vector<1x128xf32>
    %4 = arith.mulf %1, %1 : vector<256x128xf32>
    %cst_2 = arith.constant dense<0.000000e+00> : vector<128xf32>
    %5 = vector.multi_reduction <add>, %4, %cst_2 [0] : vector<256x128xf32> to vector<128xf32>
    %6 = vector.shape_cast %5 : vector<128xf32> to vector<1x128xf32>
    %cst_3 = arith.constant 3.906250e-03 : f32
    %7 = vector.broadcast %cst_3 : f32 to vector<1x128xf32>
    %8 = arith.mulf %3, %7 : vector<1x128xf32>
    %cst_4 = arith.constant 3.906250e-03 : f32
    %9 = vector.broadcast %cst_4 : f32 to vector<1x128xf32>
    %10 = arith.mulf %6, %9 : vector<1x128xf32>
    %11 = arith.mulf %8, %8 : vector<1x128xf32>
    %12 = arith.subf %10, %11 : vector<1x128xf32>
    %cst_5 = arith.constant 0.000000e+00 : f32
    %13 = vector.broadcast %cst_5 : f32 to vector<1x128xf32>
    %14 = arith.maximumf %12, %13 : vector<1x128xf32>
    %15 = vector.broadcast %8 : vector<1x128xf32> to vector<256x128xf32>
    %16 = arith.subf %1, %15 : vector<256x128xf32>
    %cst_6 = arith.constant 9.99999974E-6 : f32
    %17 = vector.broadcast %cst_6 : f32 to vector<1x128xf32>
    %18 = arith.addf %14, %17 : vector<1x128xf32>
    %19 = math.rsqrt %18 : vector<1x128xf32>
    %20 = vector.broadcast %19 : vector<1x128xf32> to vector<256x128xf32>
    %21 = arith.mulf %16, %20 : vector<256x128xf32>
    %cst_7 = arith.constant 0.000000e+00 : f32
    %22 = vector.broadcast %cst_7 : f32 to vector<256x128xf32>
    %23 = arith.maximumf %21, %22 : vector<256x128xf32>
    %24 = arith.truncf %23 : vector<256x128xf32> to vector<256x128xbf16>
    %c0_8 = arith.constant 0 : index
    %c0_9 = arith.constant 0 : index
    %c0_10 = arith.constant 0 : index
    %25 = vector.load %arg3[%c0_8, %c0_9, %c0_10] : memref<1x256x128xbf16, #tpu.memory_space<vmem>>, vector<1x256x128xbf16>
    %26 = vector.shape_cast %25 : vector<1x256x128xbf16> to vector<256x128xbf16>
    %27 = vector.shape_cast %24 : vector<256x128xbf16> to vector<1x256x128xbf16>
    tpu.vector_store %arg3[%c0_8, %c0_9, %c0_10], %27 {strides = array<i32>} : memref<1x256x128xbf16, #tpu.memory_space<vmem>>, vector<1x256x128xbf16>,
    return
  }
  func.func @transform_0(%arg0: i32, %arg1: i32) -> (i32, i32, i32) {
    %c0_i32 = arith.constant 0 : i32
    %c0_i32_0 = arith.constant 0 : i32
    return %arg0, %c0_i32, %arg1 : i32, i32, i32
  }
  func.func @transform_1(%arg0: i32, %arg1: i32) -> (i32, i32, i32) {
    %c0_i32 = arith.constant 0 : i32
    %c0_i32_0 = arith.constant 0 : i32
    return %arg0, %c0_i32, %arg1 : i32, i32, i32
  }
}

module attributes {stable_mosaic.version = 11 : i64} {
  func.func @_matmul_kernel(%arg0: i32, %arg1: i32, %arg2: i32, %arg3: memref<128x256xbf16, #tpu.memory_space<vmem>>, %arg4: memref<256x128xbf16, #tpu.memory_space<vmem>>, %arg5: memref<1x128xf32, #tpu.memory_space<vmem>>, %arg6: memref<128x128xf32, #tpu.memory_space<vmem>>, %arg7: memref<128x128xf32, #tpu.memory_space<vmem>>) attributes {dimension_semantics = [#tpu.dimension_semantics<parallel>, #tpu.dimension_semantics<parallel>, #tpu.dimension_semantics<arbitrary>], iteration_bounds = array<i64: 1, 1, 3>, scalar_prefetch = 0 : i64, scratch_operands = 1 : i64, tpu.core_type = #tpu.core_type<tc>, window_params = [{transform_indices = @transform_0, window_bounds = array<i64: 128, 256>}, {transform_indices = @transform_1, window_bounds = array<i64: 256, 128>}, {transform_indices = @transform_2, window_bounds = array<i64: 1, 128>}, {transform_indices = @transform_3, window_bounds = array<i64: 128, 128>}]} {
    %c0_i32 = arith.constant 0 : i32
    %0 = arith.cmpi eq, %arg2, %c0_i32 : i32
    %1 = arith.extui %0 : i1 to i32
    %c0_i32_0 = arith.constant 0 : i32
    %2 = arith.cmpi ne, %1, %c0_i32_0 : i32
    scf.if %2 {
      %cst_9 = arith.constant 0.000000e+00 : f32
      %12 = vector.broadcast %cst_9 : f32 to vector<128x128xf32>
      %c0_10 = arith.constant 0 : index
      %c0_11 = arith.constant 0 : index
      %13 = vector.load %arg7[%c0_10, %c0_11] : memref<128x128xf32, #tpu.memory_space<vmem>>, vector<128x128xf32>
      tpu.vector_store %arg7[%c0_10, %c0_11], %12 {strides = array<i32>} : memref<128x128xf32, #tpu.memory_space<vmem>>, vector<128x128xf32>,
    } else {
    }
    %c0 = arith.constant 0 : index
    %c0_1 = arith.constant 0 : index
    %3 = vector.load %arg7[%c0, %c0_1] : memref<128x128xf32, #tpu.memory_space<vmem>>, vector<128x128xf32>
    %c0_2 = arith.constant 0 : index
    %c0_3 = arith.constant 0 : index
    %4 = vector.load %arg3[%c0_2, %c0_3] : memref<128x256xbf16, #tpu.memory_space<vmem>>, vector<128x256xbf16>
    %c0_4 = arith.constant 0 : index
    %c0_5 = arith.constant 0 : index
    %5 = vector.load %arg4[%c0_4, %c0_5] : memref<256x128xbf16, #tpu.memory_space<vmem>>, vector<256x128xbf16>
    %cst = arith.constant dense<0.000000e+00> : vector<128x128xf32>
    %6 = tpu.matmul %4, %5, %cst {dimension_numbers = #tpu.dot_dimension_numbers<[1], [0], [0], [1], [0, 0, 1, 1], [], []>} : vector<128x256xbf16>, vector<256x128xbf16>, vector<128x128xf32> -> vector<128x128xf32>
    %7 = arith.addf %3, %6 : vector<128x128xf32>
    %c0_6 = arith.constant 0 : index
    %c0_7 = arith.constant 0 : index
    %8 = vector.load %arg7[%c0_6, %c0_7] : memref<128x128xf32, #tpu.memory_space<vmem>>, vector<128x128xf32>
    tpu.vector_store %arg7[%c0_6, %c0_7], %7 {strides = array<i32>} : memref<128x128xf32, #tpu.memory_space<vmem>>, vector<128x128xf32>,
    %c2_i32 = arith.constant 2 : i32
    %9 = arith.cmpi eq, %arg2, %c2_i32 : i32
    %10 = arith.extui %9 : i1 to i32
    %c0_i32_8 = arith.constant 0 : i32
    %11 = arith.cmpi ne, %10, %c0_i32_8 : i32
    scf.if %11 {
      %c0_9 = arith.constant 0 : index
      %c0_10 = arith.constant 0 : index
      %12 = vector.load %arg7[%c0_9, %c0_10] : memref<128x128xf32, #tpu.memory_space<vmem>>, vector<128x128xf32>
      %c0_11 = arith.constant 0 : index
      %c0_12 = arith.constant 0 : index
      %13 = vector.load %arg5[%c0_11, %c0_12] : memref<1x128xf32, #tpu.memory_space<vmem>>, vector<1x128xf32>
      %14 = vector.broadcast %13 : vector<1x128xf32> to vector<128x128xf32>
      %15 = arith.addf %12, %14 : vector<128x128xf32>
      %c0_13 = arith.constant 0 : index
      %c0_14 = arith.constant 0 : index
      %16 = vector.load %arg6[%c0_13, %c0_14] : memref<128x128xf32, #tpu.memory_space<vmem>>, vector<128x128xf32>
      tpu.vector_store %arg6[%c0_13, %c0_14], %15 {strides = array<i32>} : memref<128x128xf32, #tpu.memory_space<vmem>>, vector<128x128xf32>,
    } else {
    }
    return
  }
  func.func @transform_0(%arg0: i32, %arg1: i32, %arg2: i32) -> (i32, i32) {
    %c0_i32 = arith.constant 0 : i32
    return %arg0, %arg2 : i32, i32
  }
  func.func @transform_1(%arg0: i32, %arg1: i32, %arg2: i32) -> (i32, i32) {
    %c0_i32 = arith.constant 0 : i32
    return %arg2, %arg1 : i32, i32
  }
  func.func @transform_2(%arg0: i32, %arg1: i32, %arg2: i32) -> (i32, i32) {
    %c0_i32 = arith.constant 0 : i32
    %c0_i32_0 = arith.constant 0 : i32
    return %c0_i32, %arg1 : i32, i32
  }
  func.func @transform_3(%arg0: i32, %arg1: i32, %arg2: i32) -> (i32, i32) {
    %c0_i32 = arith.constant 0 : i32
    return %arg0, %arg1 : i32, i32
  }
}

module attributes {stable_mosaic.version = 11 : i64} {
  func.func @_in_act_kernel(%arg0: i32, %arg1: i32, %arg2: memref<1x64x128xf32, #tpu.memory_space<vmem>>, %arg3: memref<1x64x128xbf16, #tpu.memory_space<vmem>>) attributes {dimension_semantics = [#tpu.dimension_semantics<parallel>, #tpu.dimension_semantics<parallel>], iteration_bounds = array<i64: 2, 1>, scalar_prefetch = 0 : i64, scratch_operands = 0 : i64, tpu.core_type = #tpu.core_type<tc>, window_params = [{transform_indices = @transform_0, window_bounds = array<i64: 1, 64, 128>}, {transform_indices = @transform_1, window_bounds = array<i64: 1, 64, 128>}]} {
    %c0 = arith.constant 0 : index
    %c0_0 = arith.constant 0 : index
    %c0_1 = arith.constant 0 : index
    %0 = vector.load %arg2[%c0, %c0_0, %c0_1] : memref<1x64x128xf32, #tpu.memory_space<vmem>>, vector<1x64x128xf32>
    %1 = vector.shape_cast %0 : vector<1x64x128xf32> to vector<64x128xf32>
    %cst = arith.constant dense<0.000000e+00> : vector<128xf32>
    %2 = vector.multi_reduction <add>, %1, %cst [0] : vector<64x128xf32> to vector<128xf32>
    %3 = vector.shape_cast %2 : vector<128xf32> to vector<1x128xf32>
    %4 = arith.mulf %1, %1 : vector<64x128xf32>
    %cst_2 = arith.constant dense<0.000000e+00> : vector<128xf32>
    %5 = vector.multi_reduction <add>, %4, %cst_2 [0] : vector<64x128xf32> to vector<128xf32>
    %6 = vector.shape_cast %5 : vector<128xf32> to vector<1x128xf32>
    %cst_3 = arith.constant 1.562500e-02 : f32
    %7 = vector.broadcast %cst_3 : f32 to vector<1x128xf32>
    %8 = arith.mulf %3, %7 : vector<1x128xf32>
    %cst_4 = arith.constant 1.562500e-02 : f32
    %9 = vector.broadcast %cst_4 : f32 to vector<1x128xf32>
    %10 = arith.mulf %6, %9 : vector<1x128xf32>
    %11 = arith.mulf %8, %8 : vector<1x128xf32>
    %12 = arith.subf %10, %11 : vector<1x128xf32>
    %cst_5 = arith.constant 0.000000e+00 : f32
    %13 = vector.broadcast %cst_5 : f32 to vector<1x128xf32>
    %14 = arith.maximumf %12, %13 : vector<1x128xf32>
    %15 = vector.broadcast %8 : vector<1x128xf32> to vector<64x128xf32>
    %16 = arith.subf %1, %15 : vector<64x128xf32>
    %cst_6 = arith.constant 9.99999974E-6 : f32
    %17 = vector.broadcast %cst_6 : f32 to vector<1x128xf32>
    %18 = arith.addf %14, %17 : vector<1x128xf32>
    %19 = math.rsqrt %18 : vector<1x128xf32>
    %20 = vector.broadcast %19 : vector<1x128xf32> to vector<64x128xf32>
    %21 = arith.mulf %16, %20 : vector<64x128xf32>
    %cst_7 = arith.constant 0.000000e+00 : f32
    %22 = vector.broadcast %cst_7 : f32 to vector<64x128xf32>
    %23 = arith.maximumf %21, %22 : vector<64x128xf32>
    %24 = arith.truncf %23 : vector<64x128xf32> to vector<64x128xbf16>
    %c0_8 = arith.constant 0 : index
    %c0_9 = arith.constant 0 : index
    %c0_10 = arith.constant 0 : index
    %25 = vector.load %arg3[%c0_8, %c0_9, %c0_10] : memref<1x64x128xbf16, #tpu.memory_space<vmem>>, vector<1x64x128xbf16>
    %26 = vector.shape_cast %25 : vector<1x64x128xbf16> to vector<64x128xbf16>
    %27 = vector.shape_cast %24 : vector<64x128xbf16> to vector<1x64x128xbf16>
    tpu.vector_store %arg3[%c0_8, %c0_9, %c0_10], %27 {strides = array<i32>} : memref<1x64x128xbf16, #tpu.memory_space<vmem>>, vector<1x64x128xbf16>,
    return
  }
  func.func @transform_0(%arg0: i32, %arg1: i32) -> (i32, i32, i32) {
    %c0_i32 = arith.constant 0 : i32
    %c0_i32_0 = arith.constant 0 : i32
    return %arg0, %c0_i32, %arg1 : i32, i32, i32
  }
  func.func @transform_1(%arg0: i32, %arg1: i32) -> (i32, i32, i32) {
    %c0_i32 = arith.constant 0 : i32
    %c0_i32_0 = arith.constant 0 : i32
    return %arg0, %c0_i32, %arg1 : i32, i32, i32
  }
}

module attributes {stable_mosaic.version = 11 : i64} {
  func.func @_matmul_kernel(%arg0: i32, %arg1: i32, %arg2: i32, %arg3: memref<32x256xbf16, #tpu.memory_space<vmem>>, %arg4: memref<256x256xbf16, #tpu.memory_space<vmem>>, %arg5: memref<1x256xf32, #tpu.memory_space<vmem>>, %arg6: memref<32x256xf32, #tpu.memory_space<vmem>>, %arg7: memref<32x256xf32, #tpu.memory_space<vmem>>) attributes {dimension_semantics = [#tpu.dimension_semantics<parallel>, #tpu.dimension_semantics<parallel>, #tpu.dimension_semantics<arbitrary>], iteration_bounds = array<i64: 1, 1, 5>, scalar_prefetch = 0 : i64, scratch_operands = 1 : i64, tpu.core_type = #tpu.core_type<tc>, window_params = [{transform_indices = @transform_0, window_bounds = array<i64: 32, 256>}, {transform_indices = @transform_1, window_bounds = array<i64: 256, 256>}, {transform_indices = @transform_2, window_bounds = array<i64: 1, 256>}, {transform_indices = @transform_3, window_bounds = array<i64: 32, 256>}]} {
    %c0_i32 = arith.constant 0 : i32
    %0 = arith.cmpi eq, %arg2, %c0_i32 : i32
    %1 = arith.extui %0 : i1 to i32
    %c0_i32_0 = arith.constant 0 : i32
    %2 = arith.cmpi ne, %1, %c0_i32_0 : i32
    scf.if %2 {
      %cst_9 = arith.constant 0.000000e+00 : f32
      %12 = vector.broadcast %cst_9 : f32 to vector<32x256xf32>
      %c0_10 = arith.constant 0 : index
      %c0_11 = arith.constant 0 : index
      %13 = vector.load %arg7[%c0_10, %c0_11] : memref<32x256xf32, #tpu.memory_space<vmem>>, vector<32x256xf32>
      tpu.vector_store %arg7[%c0_10, %c0_11], %12 {strides = array<i32>} : memref<32x256xf32, #tpu.memory_space<vmem>>, vector<32x256xf32>,
    } else {
    }
    %c0 = arith.constant 0 : index
    %c0_1 = arith.constant 0 : index
    %3 = vector.load %arg7[%c0, %c0_1] : memref<32x256xf32, #tpu.memory_space<vmem>>, vector<32x256xf32>
    %c0_2 = arith.constant 0 : index
    %c0_3 = arith.constant 0 : index
    %4 = vector.load %arg3[%c0_2, %c0_3] : memref<32x256xbf16, #tpu.memory_space<vmem>>, vector<32x256xbf16>
    %c0_4 = arith.constant 0 : index
    %c0_5 = arith.constant 0 : index
    %5 = vector.load %arg4[%c0_4, %c0_5] : memref<256x256xbf16, #tpu.memory_space<vmem>>, vector<256x256xbf16>
    %cst = arith.constant dense<0.000000e+00> : vector<32x256xf32>
    %6 = tpu.matmul %4, %5, %cst {dimension_numbers = #tpu.dot_dimension_numbers<[1], [0], [0], [1], [0, 0, 1, 1], [], []>} : vector<32x256xbf16>, vector<256x256xbf16>, vector<32x256xf32> -> vector<32x256xf32>
    %7 = arith.addf %3, %6 : vector<32x256xf32>
    %c0_6 = arith.constant 0 : index
    %c0_7 = arith.constant 0 : index
    %8 = vector.load %arg7[%c0_6, %c0_7] : memref<32x256xf32, #tpu.memory_space<vmem>>, vector<32x256xf32>
    tpu.vector_store %arg7[%c0_6, %c0_7], %7 {strides = array<i32>} : memref<32x256xf32, #tpu.memory_space<vmem>>, vector<32x256xf32>,
    %c4_i32 = arith.constant 4 : i32
    %9 = arith.cmpi eq, %arg2, %c4_i32 : i32
    %10 = arith.extui %9 : i1 to i32
    %c0_i32_8 = arith.constant 0 : i32
    %11 = arith.cmpi ne, %10, %c0_i32_8 : i32
    scf.if %11 {
      %c0_9 = arith.constant 0 : index
      %c0_10 = arith.constant 0 : index
      %12 = vector.load %arg7[%c0_9, %c0_10] : memref<32x256xf32, #tpu.memory_space<vmem>>, vector<32x256xf32>
      %c0_11 = arith.constant 0 : index
      %c0_12 = arith.constant 0 : index
      %13 = vector.load %arg5[%c0_11, %c0_12] : memref<1x256xf32, #tpu.memory_space<vmem>>, vector<1x256xf32>
      %14 = vector.broadcast %13 : vector<1x256xf32> to vector<32x256xf32>
      %15 = arith.addf %12, %14 : vector<32x256xf32>
      %c0_13 = arith.constant 0 : index
      %c0_14 = arith.constant 0 : index
      %16 = vector.load %arg6[%c0_13, %c0_14] : memref<32x256xf32, #tpu.memory_space<vmem>>, vector<32x256xf32>
      tpu.vector_store %arg6[%c0_13, %c0_14], %15 {strides = array<i32>} : memref<32x256xf32, #tpu.memory_space<vmem>>, vector<32x256xf32>,
    } else {
    }
    return
  }
  func.func @transform_0(%arg0: i32, %arg1: i32, %arg2: i32) -> (i32, i32) {
    %c0_i32 = arith.constant 0 : i32
    return %arg0, %arg2 : i32, i32
  }
  func.func @transform_1(%arg0: i32, %arg1: i32, %arg2: i32) -> (i32, i32) {
    %c0_i32 = arith.constant 0 : i32
    return %arg2, %arg1 : i32, i32
  }
  func.func @transform_2(%arg0: i32, %arg1: i32, %arg2: i32) -> (i32, i32) {
    %c0_i32 = arith.constant 0 : i32
    %c0_i32_0 = arith.constant 0 : i32
    return %c0_i32, %arg1 : i32, i32
  }
  func.func @transform_3(%arg0: i32, %arg1: i32, %arg2: i32) -> (i32, i32) {
    %c0_i32 = arith.constant 0 : i32
    return %arg0, %arg1 : i32, i32
  }
}

module attributes {stable_mosaic.version = 11 : i64} {
  func.func @_in_act_kernel(%arg0: i32, %arg1: i32, %arg2: memref<1x16x128xf32, #tpu.memory_space<vmem>>, %arg3: memref<1x16x128xbf16, #tpu.memory_space<vmem>>) attributes {dimension_semantics = [#tpu.dimension_semantics<parallel>, #tpu.dimension_semantics<parallel>], iteration_bounds = array<i64: 2, 2>, scalar_prefetch = 0 : i64, scratch_operands = 0 : i64, tpu.core_type = #tpu.core_type<tc>, window_params = [{transform_indices = @transform_0, window_bounds = array<i64: 1, 16, 128>}, {transform_indices = @transform_1, window_bounds = array<i64: 1, 16, 128>}]} {
    %c0 = arith.constant 0 : index
    %c0_0 = arith.constant 0 : index
    %c0_1 = arith.constant 0 : index
    %0 = vector.load %arg2[%c0, %c0_0, %c0_1] : memref<1x16x128xf32, #tpu.memory_space<vmem>>, vector<1x16x128xf32>
    %1 = vector.shape_cast %0 : vector<1x16x128xf32> to vector<16x128xf32>
    %cst = arith.constant dense<0.000000e+00> : vector<128xf32>
    %2 = vector.multi_reduction <add>, %1, %cst [0] : vector<16x128xf32> to vector<128xf32>
    %3 = vector.shape_cast %2 : vector<128xf32> to vector<1x128xf32>
    %4 = arith.mulf %1, %1 : vector<16x128xf32>
    %cst_2 = arith.constant dense<0.000000e+00> : vector<128xf32>
    %5 = vector.multi_reduction <add>, %4, %cst_2 [0] : vector<16x128xf32> to vector<128xf32>
    %6 = vector.shape_cast %5 : vector<128xf32> to vector<1x128xf32>
    %cst_3 = arith.constant 6.250000e-02 : f32
    %7 = vector.broadcast %cst_3 : f32 to vector<1x128xf32>
    %8 = arith.mulf %3, %7 : vector<1x128xf32>
    %cst_4 = arith.constant 6.250000e-02 : f32
    %9 = vector.broadcast %cst_4 : f32 to vector<1x128xf32>
    %10 = arith.mulf %6, %9 : vector<1x128xf32>
    %11 = arith.mulf %8, %8 : vector<1x128xf32>
    %12 = arith.subf %10, %11 : vector<1x128xf32>
    %cst_5 = arith.constant 0.000000e+00 : f32
    %13 = vector.broadcast %cst_5 : f32 to vector<1x128xf32>
    %14 = arith.maximumf %12, %13 : vector<1x128xf32>
    %15 = vector.broadcast %8 : vector<1x128xf32> to vector<16x128xf32>
    %16 = arith.subf %1, %15 : vector<16x128xf32>
    %cst_6 = arith.constant 9.99999974E-6 : f32
    %17 = vector.broadcast %cst_6 : f32 to vector<1x128xf32>
    %18 = arith.addf %14, %17 : vector<1x128xf32>
    %19 = math.rsqrt %18 : vector<1x128xf32>
    %20 = vector.broadcast %19 : vector<1x128xf32> to vector<16x128xf32>
    %21 = arith.mulf %16, %20 : vector<16x128xf32>
    %cst_7 = arith.constant 0.000000e+00 : f32
    %22 = vector.broadcast %cst_7 : f32 to vector<16x128xf32>
    %23 = arith.maximumf %21, %22 : vector<16x128xf32>
    %24 = arith.truncf %23 : vector<16x128xf32> to vector<16x128xbf16>
    %c0_8 = arith.constant 0 : index
    %c0_9 = arith.constant 0 : index
    %c0_10 = arith.constant 0 : index
    %25 = vector.load %arg3[%c0_8, %c0_9, %c0_10] : memref<1x16x128xbf16, #tpu.memory_space<vmem>>, vector<1x16x128xbf16>
    %26 = vector.shape_cast %25 : vector<1x16x128xbf16> to vector<16x128xbf16>
    %27 = vector.shape_cast %24 : vector<16x128xbf16> to vector<1x16x128xbf16>
    tpu.vector_store %arg3[%c0_8, %c0_9, %c0_10], %27 {strides = array<i32>} : memref<1x16x128xbf16, #tpu.memory_space<vmem>>, vector<1x16x128xbf16>,
    return
  }
  func.func @transform_0(%arg0: i32, %arg1: i32) -> (i32, i32, i32) {
    %c0_i32 = arith.constant 0 : i32
    %c0_i32_0 = arith.constant 0 : i32
    return %arg0, %c0_i32, %arg1 : i32, i32, i32
  }
  func.func @transform_1(%arg0: i32, %arg1: i32) -> (i32, i32, i32) {
    %c0_i32 = arith.constant 0 : i32
    %c0_i32_0 = arith.constant 0 : i32
    return %arg0, %c0_i32, %arg1 : i32, i32, i32
  }
}

module attributes {stable_mosaic.version = 11 : i64} {
  func.func @_matmul_kernel(%arg0: i32, %arg1: i32, %arg2: i32, %arg3: memref<32x256xbf16, #tpu.memory_space<vmem>>, %arg4: memref<256x256xbf16, #tpu.memory_space<vmem>>, %arg5: memref<1x256xf32, #tpu.memory_space<vmem>>, %arg6: memref<32x256xf32, #tpu.memory_space<vmem>>, %arg7: memref<32x256xf32, #tpu.memory_space<vmem>>) attributes {dimension_semantics = [#tpu.dimension_semantics<parallel>, #tpu.dimension_semantics<parallel>, #tpu.dimension_semantics<arbitrary>], iteration_bounds = array<i64: 1, 1, 9>, scalar_prefetch = 0 : i64, scratch_operands = 1 : i64, tpu.core_type = #tpu.core_type<tc>, window_params = [{transform_indices = @transform_0, window_bounds = array<i64: 32, 256>}, {transform_indices = @transform_1, window_bounds = array<i64: 256, 256>}, {transform_indices = @transform_2, window_bounds = array<i64: 1, 256>}, {transform_indices = @transform_3, window_bounds = array<i64: 32, 256>}]} {
    %c0_i32 = arith.constant 0 : i32
    %0 = arith.cmpi eq, %arg2, %c0_i32 : i32
    %1 = arith.extui %0 : i1 to i32
    %c0_i32_0 = arith.constant 0 : i32
    %2 = arith.cmpi ne, %1, %c0_i32_0 : i32
    scf.if %2 {
      %cst_9 = arith.constant 0.000000e+00 : f32
      %12 = vector.broadcast %cst_9 : f32 to vector<32x256xf32>
      %c0_10 = arith.constant 0 : index
      %c0_11 = arith.constant 0 : index
      %13 = vector.load %arg7[%c0_10, %c0_11] : memref<32x256xf32, #tpu.memory_space<vmem>>, vector<32x256xf32>
      tpu.vector_store %arg7[%c0_10, %c0_11], %12 {strides = array<i32>} : memref<32x256xf32, #tpu.memory_space<vmem>>, vector<32x256xf32>,
    } else {
    }
    %c0 = arith.constant 0 : index
    %c0_1 = arith.constant 0 : index
    %3 = vector.load %arg7[%c0, %c0_1] : memref<32x256xf32, #tpu.memory_space<vmem>>, vector<32x256xf32>
    %c0_2 = arith.constant 0 : index
    %c0_3 = arith.constant 0 : index
    %4 = vector.load %arg3[%c0_2, %c0_3] : memref<32x256xbf16, #tpu.memory_space<vmem>>, vector<32x256xbf16>
    %c0_4 = arith.constant 0 : index
    %c0_5 = arith.constant 0 : index
    %5 = vector.load %arg4[%c0_4, %c0_5] : memref<256x256xbf16, #tpu.memory_space<vmem>>, vector<256x256xbf16>
    %cst = arith.constant dense<0.000000e+00> : vector<32x256xf32>
    %6 = tpu.matmul %4, %5, %cst {dimension_numbers = #tpu.dot_dimension_numbers<[1], [0], [0], [1], [0, 0, 1, 1], [], []>} : vector<32x256xbf16>, vector<256x256xbf16>, vector<32x256xf32> -> vector<32x256xf32>
    %7 = arith.addf %3, %6 : vector<32x256xf32>
    %c0_6 = arith.constant 0 : index
    %c0_7 = arith.constant 0 : index
    %8 = vector.load %arg7[%c0_6, %c0_7] : memref<32x256xf32, #tpu.memory_space<vmem>>, vector<32x256xf32>
    tpu.vector_store %arg7[%c0_6, %c0_7], %7 {strides = array<i32>} : memref<32x256xf32, #tpu.memory_space<vmem>>, vector<32x256xf32>,
    %c8_i32 = arith.constant 8 : i32
    %9 = arith.cmpi eq, %arg2, %c8_i32 : i32
    %10 = arith.extui %9 : i1 to i32
    %c0_i32_8 = arith.constant 0 : i32
    %11 = arith.cmpi ne, %10, %c0_i32_8 : i32
    scf.if %11 {
      %c0_9 = arith.constant 0 : index
      %c0_10 = arith.constant 0 : index
      %12 = vector.load %arg7[%c0_9, %c0_10] : memref<32x256xf32, #tpu.memory_space<vmem>>, vector<32x256xf32>
      %c0_11 = arith.constant 0 : index
      %c0_12 = arith.constant 0 : index
      %13 = vector.load %arg5[%c0_11, %c0_12] : memref<1x256xf32, #tpu.memory_space<vmem>>, vector<1x256xf32>
      %14 = vector.broadcast %13 : vector<1x256xf32> to vector<32x256xf32>
      %15 = arith.addf %12, %14 : vector<32x256xf32>
      %c0_13 = arith.constant 0 : index
      %c0_14 = arith.constant 0 : index
      %16 = vector.load %arg6[%c0_13, %c0_14] : memref<32x256xf32, #tpu.memory_space<vmem>>, vector<32x256xf32>
      tpu.vector_store %arg6[%c0_13, %c0_14], %15 {strides = array<i32>} : memref<32x256xf32, #tpu.memory_space<vmem>>, vector<32x256xf32>,
    } else {
    }
    return
  }
  func.func @transform_0(%arg0: i32, %arg1: i32, %arg2: i32) -> (i32, i32) {
    %c0_i32 = arith.constant 0 : i32
    return %arg0, %arg2 : i32, i32
  }
  func.func @transform_1(%arg0: i32, %arg1: i32, %arg2: i32) -> (i32, i32) {
    %c0_i32 = arith.constant 0 : i32
    return %arg2, %arg1 : i32, i32
  }
  func.func @transform_2(%arg0: i32, %arg1: i32, %arg2: i32) -> (i32, i32) {
    %c0_i32 = arith.constant 0 : i32
    %c0_i32_0 = arith.constant 0 : i32
    return %c0_i32, %arg1 : i32, i32
  }
  func.func @transform_3(%arg0: i32, %arg1: i32, %arg2: i32) -> (i32, i32) {
    %c0_i32 = arith.constant 0 : i32
    return %arg0, %arg1 : i32, i32
  }
}

module attributes {stable_mosaic.version = 11 : i64} {
  func.func @_in_res_relu_kernel(%arg0: i32, %arg1: i32, %arg2: memref<1x16x128xf32, #tpu.memory_space<vmem>>, %arg3: memref<1x16x128xbf16, #tpu.memory_space<vmem>>, %arg4: memref<1x16x128xbf16, #tpu.memory_space<vmem>>) attributes {dimension_semantics = [#tpu.dimension_semantics<parallel>, #tpu.dimension_semantics<parallel>], iteration_bounds = array<i64: 2, 2>, scalar_prefetch = 0 : i64, scratch_operands = 0 : i64, tpu.core_type = #tpu.core_type<tc>, window_params = [{transform_indices = @transform_0, window_bounds = array<i64: 1, 16, 128>}, {transform_indices = @transform_1, window_bounds = array<i64: 1, 16, 128>}, {transform_indices = @transform_2, window_bounds = array<i64: 1, 16, 128>}]} {
    %c0 = arith.constant 0 : index
    %c0_0 = arith.constant 0 : index
    %c0_1 = arith.constant 0 : index
    %0 = vector.load %arg2[%c0, %c0_0, %c0_1] : memref<1x16x128xf32, #tpu.memory_space<vmem>>, vector<1x16x128xf32>
    %1 = vector.shape_cast %0 : vector<1x16x128xf32> to vector<16x128xf32>
    %cst = arith.constant dense<0.000000e+00> : vector<128xf32>
    %2 = vector.multi_reduction <add>, %1, %cst [0] : vector<16x128xf32> to vector<128xf32>
    %3 = vector.shape_cast %2 : vector<128xf32> to vector<1x128xf32>
    %4 = arith.mulf %1, %1 : vector<16x128xf32>
    %cst_2 = arith.constant dense<0.000000e+00> : vector<128xf32>
    %5 = vector.multi_reduction <add>, %4, %cst_2 [0] : vector<16x128xf32> to vector<128xf32>
    %6 = vector.shape_cast %5 : vector<128xf32> to vector<1x128xf32>
    %cst_3 = arith.constant 6.250000e-02 : f32
    %7 = vector.broadcast %cst_3 : f32 to vector<1x128xf32>
    %8 = arith.mulf %3, %7 : vector<1x128xf32>
    %cst_4 = arith.constant 6.250000e-02 : f32
    %9 = vector.broadcast %cst_4 : f32 to vector<1x128xf32>
    %10 = arith.mulf %6, %9 : vector<1x128xf32>
    %11 = arith.mulf %8, %8 : vector<1x128xf32>
    %12 = arith.subf %10, %11 : vector<1x128xf32>
    %cst_5 = arith.constant 0.000000e+00 : f32
    %13 = vector.broadcast %cst_5 : f32 to vector<1x128xf32>
    %14 = arith.maximumf %12, %13 : vector<1x128xf32>
    %15 = vector.broadcast %8 : vector<1x128xf32> to vector<16x128xf32>
    %16 = arith.subf %1, %15 : vector<16x128xf32>
    %cst_6 = arith.constant 9.99999974E-6 : f32
    %17 = vector.broadcast %cst_6 : f32 to vector<1x128xf32>
    %18 = arith.addf %14, %17 : vector<1x128xf32>
    %19 = math.rsqrt %18 : vector<1x128xf32>
    %20 = vector.broadcast %19 : vector<1x128xf32> to vector<16x128xf32>
    %21 = arith.mulf %16, %20 : vector<16x128xf32>
    %c0_7 = arith.constant 0 : index
    %c0_8 = arith.constant 0 : index
    %c0_9 = arith.constant 0 : index
    %22 = vector.load %arg3[%c0_7, %c0_8, %c0_9] : memref<1x16x128xbf16, #tpu.memory_space<vmem>>, vector<1x16x128xbf16>
    %23 = vector.shape_cast %22 : vector<1x16x128xbf16> to vector<16x128xbf16>
    %24 = arith.extf %23 : vector<16x128xbf16> to vector<16x128xf32>
    %25 = arith.addf %21, %24 : vector<16x128xf32>
    %cst_10 = arith.constant 0.000000e+00 : f32
    %26 = vector.broadcast %cst_10 : f32 to vector<16x128xf32>
    %27 = arith.maximumf %25, %26 : vector<16x128xf32>
    %28 = arith.truncf %27 : vector<16x128xf32> to vector<16x128xbf16>
    %c0_11 = arith.constant 0 : index
    %c0_12 = arith.constant 0 : index
    %c0_13 = arith.constant 0 : index
    %29 = vector.load %arg4[%c0_11, %c0_12, %c0_13] : memref<1x16x128xbf16, #tpu.memory_space<vmem>>, vector<1x16x128xbf16>
    %30 = vector.shape_cast %29 : vector<1x16x128xbf16> to vector<16x128xbf16>
    %31 = vector.shape_cast %28 : vector<16x128xbf16> to vector<1x16x128xbf16>
    tpu.vector_store %arg4[%c0_11, %c0_12, %c0_13], %31 {strides = array<i32>} : memref<1x16x128xbf16, #tpu.memory_space<vmem>>, vector<1x16x128xbf16>,
    return
  }
  func.func @transform_0(%arg0: i32, %arg1: i32) -> (i32, i32, i32) {
    %c0_i32 = arith.constant 0 : i32
    %c0_i32_0 = arith.constant 0 : i32
    return %arg0, %c0_i32, %arg1 : i32, i32, i32
  }
  func.func @transform_1(%arg0: i32, %arg1: i32) -> (i32, i32, i32) {
    %c0_i32 = arith.constant 0 : i32
    %c0_i32_0 = arith.constant 0 : i32
    return %arg0, %c0_i32, %arg1 : i32, i32, i32
  }
  func.func @transform_2(%arg0: i32, %arg1: i32) -> (i32, i32, i32) {
    %c0_i32 = arith.constant 0 : i32
    %c0_i32_0 = arith.constant 0 : i32
    return %arg0, %c0_i32, %arg1 : i32, i32, i32
  }
}

module attributes {stable_mosaic.version = 11 : i64} {
  func.func @_matmul_kernel(%arg0: i32, %arg1: i32, %arg2: i32, %arg3: memref<32x256xbf16, #tpu.memory_space<vmem>>, %arg4: memref<256x128xbf16, #tpu.memory_space<vmem>>, %arg5: memref<1x128xf32, #tpu.memory_space<vmem>>, %arg6: memref<32x128xf32, #tpu.memory_space<vmem>>, %arg7: memref<32x128xf32, #tpu.memory_space<vmem>>) attributes {dimension_semantics = [#tpu.dimension_semantics<parallel>, #tpu.dimension_semantics<parallel>, #tpu.dimension_semantics<arbitrary>], iteration_bounds = array<i64: 1, 1, 2>, scalar_prefetch = 0 : i64, scratch_operands = 1 : i64, tpu.core_type = #tpu.core_type<tc>, window_params = [{transform_indices = @transform_0, window_bounds = array<i64: 32, 256>}, {transform_indices = @transform_1, window_bounds = array<i64: 256, 128>}, {transform_indices = @transform_2, window_bounds = array<i64: 1, 128>}, {transform_indices = @transform_3, window_bounds = array<i64: 32, 128>}]} {
    %c0_i32 = arith.constant 0 : i32
    %0 = arith.cmpi eq, %arg2, %c0_i32 : i32
    %1 = arith.extui %0 : i1 to i32
    %c0_i32_0 = arith.constant 0 : i32
    %2 = arith.cmpi ne, %1, %c0_i32_0 : i32
    scf.if %2 {
      %cst_9 = arith.constant 0.000000e+00 : f32
      %12 = vector.broadcast %cst_9 : f32 to vector<32x128xf32>
      %c0_10 = arith.constant 0 : index
      %c0_11 = arith.constant 0 : index
      %13 = vector.load %arg7[%c0_10, %c0_11] : memref<32x128xf32, #tpu.memory_space<vmem>>, vector<32x128xf32>
      tpu.vector_store %arg7[%c0_10, %c0_11], %12 {strides = array<i32>} : memref<32x128xf32, #tpu.memory_space<vmem>>, vector<32x128xf32>,
    } else {
    }
    %c0 = arith.constant 0 : index
    %c0_1 = arith.constant 0 : index
    %3 = vector.load %arg7[%c0, %c0_1] : memref<32x128xf32, #tpu.memory_space<vmem>>, vector<32x128xf32>
    %c0_2 = arith.constant 0 : index
    %c0_3 = arith.constant 0 : index
    %4 = vector.load %arg3[%c0_2, %c0_3] : memref<32x256xbf16, #tpu.memory_space<vmem>>, vector<32x256xbf16>
    %c0_4 = arith.constant 0 : index
    %c0_5 = arith.constant 0 : index
    %5 = vector.load %arg4[%c0_4, %c0_5] : memref<256x128xbf16, #tpu.memory_space<vmem>>, vector<256x128xbf16>
    %cst = arith.constant dense<0.000000e+00> : vector<32x128xf32>
    %6 = tpu.matmul %4, %5, %cst {dimension_numbers = #tpu.dot_dimension_numbers<[1], [0], [0], [1], [0, 0, 1, 1], [], []>} : vector<32x256xbf16>, vector<256x128xbf16>, vector<32x128xf32> -> vector<32x128xf32>
    %7 = arith.addf %3, %6 : vector<32x128xf32>
    %c0_6 = arith.constant 0 : index
    %c0_7 = arith.constant 0 : index
    %8 = vector.load %arg7[%c0_6, %c0_7] : memref<32x128xf32, #tpu.memory_space<vmem>>, vector<32x128xf32>
    tpu.vector_store %arg7[%c0_6, %c0_7], %7 {strides = array<i32>} : memref<32x128xf32, #tpu.memory_space<vmem>>, vector<32x128xf32>,
    %c1_i32 = arith.constant 1 : i32
    %9 = arith.cmpi eq, %arg2, %c1_i32 : i32
    %10 = arith.extui %9 : i1 to i32
    %c0_i32_8 = arith.constant 0 : i32
    %11 = arith.cmpi ne, %10, %c0_i32_8 : i32
    scf.if %11 {
      %c0_9 = arith.constant 0 : index
      %c0_10 = arith.constant 0 : index
      %12 = vector.load %arg7[%c0_9, %c0_10] : memref<32x128xf32, #tpu.memory_space<vmem>>, vector<32x128xf32>
      %c0_11 = arith.constant 0 : index
      %c0_12 = arith.constant 0 : index
      %13 = vector.load %arg5[%c0_11, %c0_12] : memref<1x128xf32, #tpu.memory_space<vmem>>, vector<1x128xf32>
      %14 = vector.broadcast %13 : vector<1x128xf32> to vector<32x128xf32>
      %15 = arith.addf %12, %14 : vector<32x128xf32>
      %c0_13 = arith.constant 0 : index
      %c0_14 = arith.constant 0 : index
      %16 = vector.load %arg6[%c0_13, %c0_14] : memref<32x128xf32, #tpu.memory_space<vmem>>, vector<32x128xf32>
      tpu.vector_store %arg6[%c0_13, %c0_14], %15 {strides = array<i32>} : memref<32x128xf32, #tpu.memory_space<vmem>>, vector<32x128xf32>,
    } else {
    }
    return
  }
  func.func @transform_0(%arg0: i32, %arg1: i32, %arg2: i32) -> (i32, i32) {
    %c0_i32 = arith.constant 0 : i32
    return %arg0, %arg2 : i32, i32
  }
  func.func @transform_1(%arg0: i32, %arg1: i32, %arg2: i32) -> (i32, i32) {
    %c0_i32 = arith.constant 0 : i32
    return %arg2, %arg1 : i32, i32
  }
  func.func @transform_2(%arg0: i32, %arg1: i32, %arg2: i32) -> (i32, i32) {
    %c0_i32 = arith.constant 0 : i32
    %c0_i32_0 = arith.constant 0 : i32
    return %c0_i32, %arg1 : i32, i32
  }
  func.func @transform_3(%arg0: i32, %arg1: i32, %arg2: i32) -> (i32, i32) {
    %c0_i32 = arith.constant 0 : i32
    return %arg0, %arg1 : i32, i32
  }
}

module attributes {stable_mosaic.version = 11 : i64} {
  func.func @_matmul_kernel(%arg0: i32, %arg1: i32, %arg2: i32, %arg3: memref<32x256xbf16, #tpu.memory_space<vmem>>, %arg4: memref<256x128xbf16, #tpu.memory_space<vmem>>, %arg5: memref<1x128xf32, #tpu.memory_space<vmem>>, %arg6: memref<32x128xf32, #tpu.memory_space<vmem>>, %arg7: memref<32x128xf32, #tpu.memory_space<vmem>>) attributes {dimension_semantics = [#tpu.dimension_semantics<parallel>, #tpu.dimension_semantics<parallel>, #tpu.dimension_semantics<arbitrary>], iteration_bounds = array<i64: 1, 1, 1>, scalar_prefetch = 0 : i64, scratch_operands = 1 : i64, tpu.core_type = #tpu.core_type<tc>, window_params = [{transform_indices = @transform_0, window_bounds = array<i64: 32, 256>}, {transform_indices = @transform_1, window_bounds = array<i64: 256, 128>}, {transform_indices = @transform_2, window_bounds = array<i64: 1, 128>}, {transform_indices = @transform_3, window_bounds = array<i64: 32, 128>}]} {
    %c0_i32 = arith.constant 0 : i32
    %0 = arith.cmpi eq, %arg2, %c0_i32 : i32
    %1 = arith.extui %0 : i1 to i32
    %c0_i32_0 = arith.constant 0 : i32
    %2 = arith.cmpi ne, %1, %c0_i32_0 : i32
    scf.if %2 {
      %cst_10 = arith.constant 0.000000e+00 : f32
      %12 = vector.broadcast %cst_10 : f32 to vector<32x128xf32>
      %c0_11 = arith.constant 0 : index
      %c0_12 = arith.constant 0 : index
      %13 = vector.load %arg7[%c0_11, %c0_12] : memref<32x128xf32, #tpu.memory_space<vmem>>, vector<32x128xf32>
      tpu.vector_store %arg7[%c0_11, %c0_12], %12 {strides = array<i32>} : memref<32x128xf32, #tpu.memory_space<vmem>>, vector<32x128xf32>,
    } else {
    }
    %c0 = arith.constant 0 : index
    %c0_1 = arith.constant 0 : index
    %3 = vector.load %arg7[%c0, %c0_1] : memref<32x128xf32, #tpu.memory_space<vmem>>, vector<32x128xf32>
    %c0_2 = arith.constant 0 : index
    %c0_3 = arith.constant 0 : index
    %4 = vector.load %arg3[%c0_2, %c0_3] : memref<32x256xbf16, #tpu.memory_space<vmem>>, vector<32x256xbf16>
    %c0_4 = arith.constant 0 : index
    %c0_5 = arith.constant 0 : index
    %5 = vector.load %arg4[%c0_4, %c0_5] : memref<256x128xbf16, #tpu.memory_space<vmem>>, vector<256x128xbf16>
    %cst = arith.constant dense<0.000000e+00> : vector<32x128xf32>
    %6 = tpu.matmul %4, %5, %cst {dimension_numbers = #tpu.dot_dimension_numbers<[1], [0], [0], [1], [0, 0, 1, 1], [], []>} : vector<32x256xbf16>, vector<256x128xbf16>, vector<32x128xf32> -> vector<32x128xf32>
    %7 = arith.addf %3, %6 : vector<32x128xf32>
    %c0_6 = arith.constant 0 : index
    %c0_7 = arith.constant 0 : index
    %8 = vector.load %arg7[%c0_6, %c0_7] : memref<32x128xf32, #tpu.memory_space<vmem>>, vector<32x128xf32>
    tpu.vector_store %arg7[%c0_6, %c0_7], %7 {strides = array<i32>} : memref<32x128xf32, #tpu.memory_space<vmem>>, vector<32x128xf32>,
    %c0_i32_8 = arith.constant 0 : i32
    %9 = arith.cmpi eq, %arg2, %c0_i32_8 : i32
    %10 = arith.extui %9 : i1 to i32
    %c0_i32_9 = arith.constant 0 : i32
    %11 = arith.cmpi ne, %10, %c0_i32_9 : i32
    scf.if %11 {
      %c0_10 = arith.constant 0 : index
      %c0_11 = arith.constant 0 : index
      %12 = vector.load %arg7[%c0_10, %c0_11] : memref<32x128xf32, #tpu.memory_space<vmem>>, vector<32x128xf32>
      %c0_12 = arith.constant 0 : index
      %c0_13 = arith.constant 0 : index
      %13 = vector.load %arg5[%c0_12, %c0_13] : memref<1x128xf32, #tpu.memory_space<vmem>>, vector<1x128xf32>
      %14 = vector.broadcast %13 : vector<1x128xf32> to vector<32x128xf32>
      %15 = arith.addf %12, %14 : vector<32x128xf32>
      %c0_14 = arith.constant 0 : index
      %c0_15 = arith.constant 0 : index
      %16 = vector.load %arg6[%c0_14, %c0_15] : memref<32x128xf32, #tpu.memory_space<vmem>>, vector<32x128xf32>
      tpu.vector_store %arg6[%c0_14, %c0_15], %15 {strides = array<i32>} : memref<32x128xf32, #tpu.memory_space<vmem>>, vector<32x128xf32>,
    } else {
    }
    return
  }
  func.func @transform_0(%arg0: i32, %arg1: i32, %arg2: i32) -> (i32, i32) {
    %c0_i32 = arith.constant 0 : i32
    return %arg0, %arg2 : i32, i32
  }
  func.func @transform_1(%arg0: i32, %arg1: i32, %arg2: i32) -> (i32, i32) {
    %c0_i32 = arith.constant 0 : i32
    return %arg2, %arg1 : i32, i32
  }
  func.func @transform_2(%arg0: i32, %arg1: i32, %arg2: i32) -> (i32, i32) {
    %c0_i32 = arith.constant 0 : i32
    %c0_i32_0 = arith.constant 0 : i32
    return %c0_i32, %arg1 : i32, i32
  }
  func.func @transform_3(%arg0: i32, %arg1: i32, %arg2: i32) -> (i32, i32) {
    %c0_i32 = arith.constant 0 : i32
    return %arg0, %arg1 : i32, i32
  }
}

module attributes {stable_mosaic.version = 11 : i64} {
  func.func @_matmul_kernel(%arg0: i32, %arg1: i32, %arg2: i32, %arg3: memref<32x256xbf16, #tpu.memory_space<vmem>>, %arg4: memref<256x128xbf16, #tpu.memory_space<vmem>>, %arg5: memref<1x128xf32, #tpu.memory_space<vmem>>, %arg6: memref<32x128xf32, #tpu.memory_space<vmem>>, %arg7: memref<32x128xf32, #tpu.memory_space<vmem>>) attributes {dimension_semantics = [#tpu.dimension_semantics<parallel>, #tpu.dimension_semantics<parallel>, #tpu.dimension_semantics<arbitrary>], iteration_bounds = array<i64: 1, 1, 4>, scalar_prefetch = 0 : i64, scratch_operands = 1 : i64, tpu.core_type = #tpu.core_type<tc>, window_params = [{transform_indices = @transform_0, window_bounds = array<i64: 32, 256>}, {transform_indices = @transform_1, window_bounds = array<i64: 256, 128>}, {transform_indices = @transform_2, window_bounds = array<i64: 1, 128>}, {transform_indices = @transform_3, window_bounds = array<i64: 32, 128>}]} {
    %c0_i32 = arith.constant 0 : i32
    %0 = arith.cmpi eq, %arg2, %c0_i32 : i32
    %1 = arith.extui %0 : i1 to i32
    %c0_i32_0 = arith.constant 0 : i32
    %2 = arith.cmpi ne, %1, %c0_i32_0 : i32
    scf.if %2 {
      %cst_9 = arith.constant 0.000000e+00 : f32
      %12 = vector.broadcast %cst_9 : f32 to vector<32x128xf32>
      %c0_10 = arith.constant 0 : index
      %c0_11 = arith.constant 0 : index
      %13 = vector.load %arg7[%c0_10, %c0_11] : memref<32x128xf32, #tpu.memory_space<vmem>>, vector<32x128xf32>
      tpu.vector_store %arg7[%c0_10, %c0_11], %12 {strides = array<i32>} : memref<32x128xf32, #tpu.memory_space<vmem>>, vector<32x128xf32>,
    } else {
    }
    %c0 = arith.constant 0 : index
    %c0_1 = arith.constant 0 : index
    %3 = vector.load %arg7[%c0, %c0_1] : memref<32x128xf32, #tpu.memory_space<vmem>>, vector<32x128xf32>
    %c0_2 = arith.constant 0 : index
    %c0_3 = arith.constant 0 : index
    %4 = vector.load %arg3[%c0_2, %c0_3] : memref<32x256xbf16, #tpu.memory_space<vmem>>, vector<32x256xbf16>
    %c0_4 = arith.constant 0 : index
    %c0_5 = arith.constant 0 : index
    %5 = vector.load %arg4[%c0_4, %c0_5] : memref<256x128xbf16, #tpu.memory_space<vmem>>, vector<256x128xbf16>
    %cst = arith.constant dense<0.000000e+00> : vector<32x128xf32>
    %6 = tpu.matmul %4, %5, %cst {dimension_numbers = #tpu.dot_dimension_numbers<[1], [0], [0], [1], [0, 0, 1, 1], [], []>} : vector<32x256xbf16>, vector<256x128xbf16>, vector<32x128xf32> -> vector<32x128xf32>
    %7 = arith.addf %3, %6 : vector<32x128xf32>
    %c0_6 = arith.constant 0 : index
    %c0_7 = arith.constant 0 : index
    %8 = vector.load %arg7[%c0_6, %c0_7] : memref<32x128xf32, #tpu.memory_space<vmem>>, vector<32x128xf32>
    tpu.vector_store %arg7[%c0_6, %c0_7], %7 {strides = array<i32>} : memref<32x128xf32, #tpu.memory_space<vmem>>, vector<32x128xf32>,
    %c3_i32 = arith.constant 3 : i32
    %9 = arith.cmpi eq, %arg2, %c3_i32 : i32
    %10 = arith.extui %9 : i1 to i32
    %c0_i32_8 = arith.constant 0 : i32
    %11 = arith.cmpi ne, %10, %c0_i32_8 : i32
    scf.if %11 {
      %c0_9 = arith.constant 0 : index
      %c0_10 = arith.constant 0 : index
      %12 = vector.load %arg7[%c0_9, %c0_10] : memref<32x128xf32, #tpu.memory_space<vmem>>, vector<32x128xf32>
      %c0_11 = arith.constant 0 : index
      %c0_12 = arith.constant 0 : index
      %13 = vector.load %arg5[%c0_11, %c0_12] : memref<1x128xf32, #tpu.memory_space<vmem>>, vector<1x128xf32>
      %14 = vector.broadcast %13 : vector<1x128xf32> to vector<32x128xf32>
      %15 = arith.addf %12, %14 : vector<32x128xf32>
      %c0_13 = arith.constant 0 : index
      %c0_14 = arith.constant 0 : index
      %16 = vector.load %arg6[%c0_13, %c0_14] : memref<32x128xf32, #tpu.memory_space<vmem>>, vector<32x128xf32>
      tpu.vector_store %arg6[%c0_13, %c0_14], %15 {strides = array<i32>} : memref<32x128xf32, #tpu.memory_space<vmem>>, vector<32x128xf32>,
    } else {
    }
    return
  }
  func.func @transform_0(%arg0: i32, %arg1: i32, %arg2: i32) -> (i32, i32) {
    %c0_i32 = arith.constant 0 : i32
    return %arg0, %arg2 : i32, i32
  }
  func.func @transform_1(%arg0: i32, %arg1: i32, %arg2: i32) -> (i32, i32) {
    %c0_i32 = arith.constant 0 : i32
    return %arg2, %arg1 : i32, i32
  }
  func.func @transform_2(%arg0: i32, %arg1: i32, %arg2: i32) -> (i32, i32) {
    %c0_i32 = arith.constant 0 : i32
    %c0_i32_0 = arith.constant 0 : i32
    return %c0_i32, %arg1 : i32, i32
  }
  func.func @transform_3(%arg0: i32, %arg1: i32, %arg2: i32) -> (i32, i32) {
    %c0_i32 = arith.constant 0 : i32
    return %arg0, %arg1 : i32, i32
  }
}

module attributes {stable_mosaic.version = 11 : i64} {
  func.func @_matmul_kernel(%arg0: i32, %arg1: i32, %arg2: i32, %arg3: memref<128x256xbf16, #tpu.memory_space<vmem>>, %arg4: memref<256x128xbf16, #tpu.memory_space<vmem>>, %arg5: memref<1x128xf32, #tpu.memory_space<vmem>>, %arg6: memref<128x128xf32, #tpu.memory_space<vmem>>, %arg7: memref<128x128xf32, #tpu.memory_space<vmem>>) attributes {dimension_semantics = [#tpu.dimension_semantics<parallel>, #tpu.dimension_semantics<parallel>, #tpu.dimension_semantics<arbitrary>], iteration_bounds = array<i64: 1, 1, 1>, scalar_prefetch = 0 : i64, scratch_operands = 1 : i64, tpu.core_type = #tpu.core_type<tc>, window_params = [{transform_indices = @transform_0, window_bounds = array<i64: 128, 256>}, {transform_indices = @transform_1, window_bounds = array<i64: 256, 128>}, {transform_indices = @transform_2, window_bounds = array<i64: 1, 128>}, {transform_indices = @transform_3, window_bounds = array<i64: 128, 128>}]} {
    %c0_i32 = arith.constant 0 : i32
    %0 = arith.cmpi eq, %arg2, %c0_i32 : i32
    %1 = arith.extui %0 : i1 to i32
    %c0_i32_0 = arith.constant 0 : i32
    %2 = arith.cmpi ne, %1, %c0_i32_0 : i32
    scf.if %2 {
      %cst_10 = arith.constant 0.000000e+00 : f32
      %12 = vector.broadcast %cst_10 : f32 to vector<128x128xf32>
      %c0_11 = arith.constant 0 : index
      %c0_12 = arith.constant 0 : index
      %13 = vector.load %arg7[%c0_11, %c0_12] : memref<128x128xf32, #tpu.memory_space<vmem>>, vector<128x128xf32>
      tpu.vector_store %arg7[%c0_11, %c0_12], %12 {strides = array<i32>} : memref<128x128xf32, #tpu.memory_space<vmem>>, vector<128x128xf32>,
    } else {
    }
    %c0 = arith.constant 0 : index
    %c0_1 = arith.constant 0 : index
    %3 = vector.load %arg7[%c0, %c0_1] : memref<128x128xf32, #tpu.memory_space<vmem>>, vector<128x128xf32>
    %c0_2 = arith.constant 0 : index
    %c0_3 = arith.constant 0 : index
    %4 = vector.load %arg3[%c0_2, %c0_3] : memref<128x256xbf16, #tpu.memory_space<vmem>>, vector<128x256xbf16>
    %c0_4 = arith.constant 0 : index
    %c0_5 = arith.constant 0 : index
    %5 = vector.load %arg4[%c0_4, %c0_5] : memref<256x128xbf16, #tpu.memory_space<vmem>>, vector<256x128xbf16>
    %cst = arith.constant dense<0.000000e+00> : vector<128x128xf32>
    %6 = tpu.matmul %4, %5, %cst {dimension_numbers = #tpu.dot_dimension_numbers<[1], [0], [0], [1], [0, 0, 1, 1], [], []>} : vector<128x256xbf16>, vector<256x128xbf16>, vector<128x128xf32> -> vector<128x128xf32>
    %7 = arith.addf %3, %6 : vector<128x128xf32>
    %c0_6 = arith.constant 0 : index
    %c0_7 = arith.constant 0 : index
    %8 = vector.load %arg7[%c0_6, %c0_7] : memref<128x128xf32, #tpu.memory_space<vmem>>, vector<128x128xf32>
    tpu.vector_store %arg7[%c0_6, %c0_7], %7 {strides = array<i32>} : memref<128x128xf32, #tpu.memory_space<vmem>>, vector<128x128xf32>,
    %c0_i32_8 = arith.constant 0 : i32
    %9 = arith.cmpi eq, %arg2, %c0_i32_8 : i32
    %10 = arith.extui %9 : i1 to i32
    %c0_i32_9 = arith.constant 0 : i32
    %11 = arith.cmpi ne, %10, %c0_i32_9 : i32
    scf.if %11 {
      %c0_10 = arith.constant 0 : index
      %c0_11 = arith.constant 0 : index
      %12 = vector.load %arg7[%c0_10, %c0_11] : memref<128x128xf32, #tpu.memory_space<vmem>>, vector<128x128xf32>
      %c0_12 = arith.constant 0 : index
      %c0_13 = arith.constant 0 : index
      %13 = vector.load %arg5[%c0_12, %c0_13] : memref<1x128xf32, #tpu.memory_space<vmem>>, vector<1x128xf32>
      %14 = vector.broadcast %13 : vector<1x128xf32> to vector<128x128xf32>
      %15 = arith.addf %12, %14 : vector<128x128xf32>
      %c0_14 = arith.constant 0 : index
      %c0_15 = arith.constant 0 : index
      %16 = vector.load %arg6[%c0_14, %c0_15] : memref<128x128xf32, #tpu.memory_space<vmem>>, vector<128x128xf32>
      tpu.vector_store %arg6[%c0_14, %c0_15], %15 {strides = array<i32>} : memref<128x128xf32, #tpu.memory_space<vmem>>, vector<128x128xf32>,
    } else {
    }
    return
  }
  func.func @transform_0(%arg0: i32, %arg1: i32, %arg2: i32) -> (i32, i32) {
    %c0_i32 = arith.constant 0 : i32
    return %arg0, %arg2 : i32, i32
  }
  func.func @transform_1(%arg0: i32, %arg1: i32, %arg2: i32) -> (i32, i32) {
    %c0_i32 = arith.constant 0 : i32
    return %arg2, %arg1 : i32, i32
  }
  func.func @transform_2(%arg0: i32, %arg1: i32, %arg2: i32) -> (i32, i32) {
    %c0_i32 = arith.constant 0 : i32
    %c0_i32_0 = arith.constant 0 : i32
    return %c0_i32, %arg1 : i32, i32
  }
  func.func @transform_3(%arg0: i32, %arg1: i32, %arg2: i32) -> (i32, i32) {
    %c0_i32 = arith.constant 0 : i32
    return %arg0, %arg1 : i32, i32
  }
}

module attributes {stable_mosaic.version = 11 : i64} {
  func.func @_matmul_kernel(%arg0: i32, %arg1: i32, %arg2: i32, %arg3: memref<128x128xbf16, #tpu.memory_space<vmem>>, %arg4: memref<128x128xbf16, #tpu.memory_space<vmem>>, %arg5: memref<1x128xf32, #tpu.memory_space<vmem>>, %arg6: memref<128x128xf32, #tpu.memory_space<vmem>>, %arg7: memref<128x128xf32, #tpu.memory_space<vmem>>) attributes {dimension_semantics = [#tpu.dimension_semantics<parallel>, #tpu.dimension_semantics<parallel>, #tpu.dimension_semantics<arbitrary>], iteration_bounds = array<i64: 1, 1, 1>, scalar_prefetch = 0 : i64, scratch_operands = 1 : i64, tpu.core_type = #tpu.core_type<tc>, window_params = [{transform_indices = @transform_0, window_bounds = array<i64: 128, 128>}, {transform_indices = @transform_1, window_bounds = array<i64: 128, 128>}, {transform_indices = @transform_2, window_bounds = array<i64: 1, 128>}, {transform_indices = @transform_3, window_bounds = array<i64: 128, 128>}]} {
    %c0_i32 = arith.constant 0 : i32
    %0 = arith.cmpi eq, %arg2, %c0_i32 : i32
    %1 = arith.extui %0 : i1 to i32
    %c0_i32_0 = arith.constant 0 : i32
    %2 = arith.cmpi ne, %1, %c0_i32_0 : i32
    scf.if %2 {
      %cst_10 = arith.constant 0.000000e+00 : f32
      %12 = vector.broadcast %cst_10 : f32 to vector<128x128xf32>
      %c0_11 = arith.constant 0 : index
      %c0_12 = arith.constant 0 : index
      %13 = vector.load %arg7[%c0_11, %c0_12] : memref<128x128xf32, #tpu.memory_space<vmem>>, vector<128x128xf32>
      tpu.vector_store %arg7[%c0_11, %c0_12], %12 {strides = array<i32>} : memref<128x128xf32, #tpu.memory_space<vmem>>, vector<128x128xf32>,
    } else {
    }
    %c0 = arith.constant 0 : index
    %c0_1 = arith.constant 0 : index
    %3 = vector.load %arg7[%c0, %c0_1] : memref<128x128xf32, #tpu.memory_space<vmem>>, vector<128x128xf32>
    %c0_2 = arith.constant 0 : index
    %c0_3 = arith.constant 0 : index
    %4 = vector.load %arg3[%c0_2, %c0_3] : memref<128x128xbf16, #tpu.memory_space<vmem>>, vector<128x128xbf16>
    %c0_4 = arith.constant 0 : index
    %c0_5 = arith.constant 0 : index
    %5 = vector.load %arg4[%c0_4, %c0_5] : memref<128x128xbf16, #tpu.memory_space<vmem>>, vector<128x128xbf16>
    %cst = arith.constant dense<0.000000e+00> : vector<128x128xf32>
    %6 = tpu.matmul %4, %5, %cst {dimension_numbers = #tpu.dot_dimension_numbers<[1], [0], [0], [1], [0, 0, 1, 1], [], []>} : vector<128x128xbf16>, vector<128x128xbf16>, vector<128x128xf32> -> vector<128x128xf32>
    %7 = arith.addf %3, %6 : vector<128x128xf32>
    %c0_6 = arith.constant 0 : index
    %c0_7 = arith.constant 0 : index
    %8 = vector.load %arg7[%c0_6, %c0_7] : memref<128x128xf32, #tpu.memory_space<vmem>>, vector<128x128xf32>
    tpu.vector_store %arg7[%c0_6, %c0_7], %7 {strides = array<i32>} : memref<128x128xf32, #tpu.memory_space<vmem>>, vector<128x128xf32>,
    %c0_i32_8 = arith.constant 0 : i32
    %9 = arith.cmpi eq, %arg2, %c0_i32_8 : i32
    %10 = arith.extui %9 : i1 to i32
    %c0_i32_9 = arith.constant 0 : i32
    %11 = arith.cmpi ne, %10, %c0_i32_9 : i32
    scf.if %11 {
      %c0_10 = arith.constant 0 : index
      %c0_11 = arith.constant 0 : index
      %12 = vector.load %arg7[%c0_10, %c0_11] : memref<128x128xf32, #tpu.memory_space<vmem>>, vector<128x128xf32>
      %c0_12 = arith.constant 0 : index
      %c0_13 = arith.constant 0 : index
      %13 = vector.load %arg5[%c0_12, %c0_13] : memref<1x128xf32, #tpu.memory_space<vmem>>, vector<1x128xf32>
      %14 = vector.broadcast %13 : vector<1x128xf32> to vector<128x128xf32>
      %15 = arith.addf %12, %14 : vector<128x128xf32>
      %c0_14 = arith.constant 0 : index
      %c0_15 = arith.constant 0 : index
      %16 = vector.load %arg6[%c0_14, %c0_15] : memref<128x128xf32, #tpu.memory_space<vmem>>, vector<128x128xf32>
      tpu.vector_store %arg6[%c0_14, %c0_15], %15 {strides = array<i32>} : memref<128x128xf32, #tpu.memory_space<vmem>>, vector<128x128xf32>,
    } else {
    }
    return
  }
  func.func @transform_0(%arg0: i32, %arg1: i32, %arg2: i32) -> (i32, i32) {
    %c0_i32 = arith.constant 0 : i32
    return %arg0, %arg2 : i32, i32
  }
  func.func @transform_1(%arg0: i32, %arg1: i32, %arg2: i32) -> (i32, i32) {
    %c0_i32 = arith.constant 0 : i32
    return %arg2, %arg1 : i32, i32
  }
  func.func @transform_2(%arg0: i32, %arg1: i32, %arg2: i32) -> (i32, i32) {
    %c0_i32 = arith.constant 0 : i32
    %c0_i32_0 = arith.constant 0 : i32
    return %c0_i32, %arg1 : i32, i32
  }
  func.func @transform_3(%arg0: i32, %arg1: i32, %arg2: i32) -> (i32, i32) {
    %c0_i32 = arith.constant 0 : i32
    return %arg0, %arg1 : i32, i32
  }
}

module attributes {stable_mosaic.version = 11 : i64} {
  func.func @_matmul_kernel(%arg0: i32, %arg1: i32, %arg2: i32, %arg3: memref<128x256xbf16, #tpu.memory_space<vmem>>, %arg4: memref<256x128xbf16, #tpu.memory_space<vmem>>, %arg5: memref<1x128xf32, #tpu.memory_space<vmem>>, %arg6: memref<128x128xf32, #tpu.memory_space<vmem>>, %arg7: memref<128x128xf32, #tpu.memory_space<vmem>>) attributes {dimension_semantics = [#tpu.dimension_semantics<parallel>, #tpu.dimension_semantics<parallel>, #tpu.dimension_semantics<arbitrary>], iteration_bounds = array<i64: 1, 1, 2>, scalar_prefetch = 0 : i64, scratch_operands = 1 : i64, tpu.core_type = #tpu.core_type<tc>, window_params = [{transform_indices = @transform_0, window_bounds = array<i64: 128, 256>}, {transform_indices = @transform_1, window_bounds = array<i64: 256, 128>}, {transform_indices = @transform_2, window_bounds = array<i64: 1, 128>}, {transform_indices = @transform_3, window_bounds = array<i64: 128, 128>}]} {
    %c0_i32 = arith.constant 0 : i32
    %0 = arith.cmpi eq, %arg2, %c0_i32 : i32
    %1 = arith.extui %0 : i1 to i32
    %c0_i32_0 = arith.constant 0 : i32
    %2 = arith.cmpi ne, %1, %c0_i32_0 : i32
    scf.if %2 {
      %cst_9 = arith.constant 0.000000e+00 : f32
      %12 = vector.broadcast %cst_9 : f32 to vector<128x128xf32>
      %c0_10 = arith.constant 0 : index
      %c0_11 = arith.constant 0 : index
      %13 = vector.load %arg7[%c0_10, %c0_11] : memref<128x128xf32, #tpu.memory_space<vmem>>, vector<128x128xf32>
      tpu.vector_store %arg7[%c0_10, %c0_11], %12 {strides = array<i32>} : memref<128x128xf32, #tpu.memory_space<vmem>>, vector<128x128xf32>,
    } else {
    }
    %c0 = arith.constant 0 : index
    %c0_1 = arith.constant 0 : index
    %3 = vector.load %arg7[%c0, %c0_1] : memref<128x128xf32, #tpu.memory_space<vmem>>, vector<128x128xf32>
    %c0_2 = arith.constant 0 : index
    %c0_3 = arith.constant 0 : index
    %4 = vector.load %arg3[%c0_2, %c0_3] : memref<128x256xbf16, #tpu.memory_space<vmem>>, vector<128x256xbf16>
    %c0_4 = arith.constant 0 : index
    %c0_5 = arith.constant 0 : index
    %5 = vector.load %arg4[%c0_4, %c0_5] : memref<256x128xbf16, #tpu.memory_space<vmem>>, vector<256x128xbf16>
    %cst = arith.constant dense<0.000000e+00> : vector<128x128xf32>
    %6 = tpu.matmul %4, %5, %cst {dimension_numbers = #tpu.dot_dimension_numbers<[1], [0], [0], [1], [0, 0, 1, 1], [], []>} : vector<128x256xbf16>, vector<256x128xbf16>, vector<128x128xf32> -> vector<128x128xf32>
    %7 = arith.addf %3, %6 : vector<128x128xf32>
    %c0_6 = arith.constant 0 : index
    %c0_7 = arith.constant 0 : index
    %8 = vector.load %arg7[%c0_6, %c0_7] : memref<128x128xf32, #tpu.memory_space<vmem>>, vector<128x128xf32>
    tpu.vector_store %arg7[%c0_6, %c0_7], %7 {strides = array<i32>} : memref<128x128xf32, #tpu.memory_space<vmem>>, vector<128x128xf32>,
    %c1_i32 = arith.constant 1 : i32
    %9 = arith.cmpi eq, %arg2, %c1_i32 : i32
    %10 = arith.extui %9 : i1 to i32
    %c0_i32_8 = arith.constant 0 : i32
    %11 = arith.cmpi ne, %10, %c0_i32_8 : i32
    scf.if %11 {
      %c0_9 = arith.constant 0 : index
      %c0_10 = arith.constant 0 : index
      %12 = vector.load %arg7[%c0_9, %c0_10] : memref<128x128xf32, #tpu.memory_space<vmem>>, vector<128x128xf32>
      %c0_11 = arith.constant 0 : index
      %c0_12 = arith.constant 0 : index
      %13 = vector.load %arg5[%c0_11, %c0_12] : memref<1x128xf32, #tpu.memory_space<vmem>>, vector<1x128xf32>
      %14 = vector.broadcast %13 : vector<1x128xf32> to vector<128x128xf32>
      %15 = arith.addf %12, %14 : vector<128x128xf32>
      %c0_13 = arith.constant 0 : index
      %c0_14 = arith.constant 0 : index
      %16 = vector.load %arg6[%c0_13, %c0_14] : memref<128x128xf32, #tpu.memory_space<vmem>>, vector<128x128xf32>
      tpu.vector_store %arg6[%c0_13, %c0_14], %15 {strides = array<i32>} : memref<128x128xf32, #tpu.memory_space<vmem>>, vector<128x128xf32>,
    } else {
    }
    return
  }
  func.func @transform_0(%arg0: i32, %arg1: i32, %arg2: i32) -> (i32, i32) {
    %c0_i32 = arith.constant 0 : i32
    return %arg0, %arg2 : i32, i32
  }
  func.func @transform_1(%arg0: i32, %arg1: i32, %arg2: i32) -> (i32, i32) {
    %c0_i32 = arith.constant 0 : i32
    return %arg2, %arg1 : i32, i32
  }
  func.func @transform_2(%arg0: i32, %arg1: i32, %arg2: i32) -> (i32, i32) {
    %c0_i32 = arith.constant 0 : i32
    %c0_i32_0 = arith.constant 0 : i32
    return %c0_i32, %arg1 : i32, i32
  }
  func.func @transform_3(%arg0: i32, %arg1: i32, %arg2: i32) -> (i32, i32) {
    %c0_i32 = arith.constant 0 : i32
    return %arg0, %arg1 : i32, i32
  }
}

module attributes {stable_mosaic.version = 11 : i64} {
  func.func @_matmul_kernel(%arg0: i32, %arg1: i32, %arg2: i32, %arg3: memref<256x256xbf16, #tpu.memory_space<vmem>>, %arg4: memref<256x128xbf16, #tpu.memory_space<vmem>>, %arg5: memref<1x128xf32, #tpu.memory_space<vmem>>, %arg6: memref<256x128xf32, #tpu.memory_space<vmem>>, %arg7: memref<256x128xf32, #tpu.memory_space<vmem>>) attributes {dimension_semantics = [#tpu.dimension_semantics<parallel>, #tpu.dimension_semantics<parallel>, #tpu.dimension_semantics<arbitrary>], iteration_bounds = array<i64: 2, 1, 21>, scalar_prefetch = 0 : i64, scratch_operands = 1 : i64, tpu.core_type = #tpu.core_type<tc>, window_params = [{transform_indices = @transform_0, window_bounds = array<i64: 256, 256>}, {transform_indices = @transform_1, window_bounds = array<i64: 256, 128>}, {transform_indices = @transform_2, window_bounds = array<i64: 1, 128>}, {transform_indices = @transform_3, window_bounds = array<i64: 256, 128>}]} {
    %c0_i32 = arith.constant 0 : i32
    %0 = arith.cmpi eq, %arg2, %c0_i32 : i32
    %1 = arith.extui %0 : i1 to i32
    %c0_i32_0 = arith.constant 0 : i32
    %2 = arith.cmpi ne, %1, %c0_i32_0 : i32
    scf.if %2 {
      %cst_9 = arith.constant 0.000000e+00 : f32
      %12 = vector.broadcast %cst_9 : f32 to vector<256x128xf32>
      %c0_10 = arith.constant 0 : index
      %c0_11 = arith.constant 0 : index
      %13 = vector.load %arg7[%c0_10, %c0_11] : memref<256x128xf32, #tpu.memory_space<vmem>>, vector<256x128xf32>
      tpu.vector_store %arg7[%c0_10, %c0_11], %12 {strides = array<i32>} : memref<256x128xf32, #tpu.memory_space<vmem>>, vector<256x128xf32>,
    } else {
    }
    %c0 = arith.constant 0 : index
    %c0_1 = arith.constant 0 : index
    %3 = vector.load %arg7[%c0, %c0_1] : memref<256x128xf32, #tpu.memory_space<vmem>>, vector<256x128xf32>
    %c0_2 = arith.constant 0 : index
    %c0_3 = arith.constant 0 : index
    %4 = vector.load %arg3[%c0_2, %c0_3] : memref<256x256xbf16, #tpu.memory_space<vmem>>, vector<256x256xbf16>
    %c0_4 = arith.constant 0 : index
    %c0_5 = arith.constant 0 : index
    %5 = vector.load %arg4[%c0_4, %c0_5] : memref<256x128xbf16, #tpu.memory_space<vmem>>, vector<256x128xbf16>
    %cst = arith.constant dense<0.000000e+00> : vector<256x128xf32>
    %6 = tpu.matmul %4, %5, %cst {dimension_numbers = #tpu.dot_dimension_numbers<[1], [0], [0], [1], [0, 0, 1, 1], [], []>} : vector<256x256xbf16>, vector<256x128xbf16>, vector<256x128xf32> -> vector<256x128xf32>
    %7 = arith.addf %3, %6 : vector<256x128xf32>
    %c0_6 = arith.constant 0 : index
    %c0_7 = arith.constant 0 : index
    %8 = vector.load %arg7[%c0_6, %c0_7] : memref<256x128xf32, #tpu.memory_space<vmem>>, vector<256x128xf32>
    tpu.vector_store %arg7[%c0_6, %c0_7], %7 {strides = array<i32>} : memref<256x128xf32, #tpu.memory_space<vmem>>, vector<256x128xf32>,
    %c20_i32 = arith.constant 20 : i32
    %9 = arith.cmpi eq, %arg2, %c20_i32 : i32
    %10 = arith.extui %9 : i1 to i32
    %c0_i32_8 = arith.constant 0 : i32
    %11 = arith.cmpi ne, %10, %c0_i32_8 : i32
    scf.if %11 {
      %c0_9 = arith.constant 0 : index
      %c0_10 = arith.constant 0 : index
      %12 = vector.load %arg7[%c0_9, %c0_10] : memref<256x128xf32, #tpu.memory_space<vmem>>, vector<256x128xf32>
      %c0_11 = arith.constant 0 : index
      %c0_12 = arith.constant 0 : index
      %13 = vector.load %arg5[%c0_11, %c0_12] : memref<1x128xf32, #tpu.memory_space<vmem>>, vector<1x128xf32>
      %14 = vector.broadcast %13 : vector<1x128xf32> to vector<256x128xf32>
      %15 = arith.addf %12, %14 : vector<256x128xf32>
      %16 = math.tanh %15 : vector<256x128xf32>
      %c0_13 = arith.constant 0 : index
      %c0_14 = arith.constant 0 : index
      %17 = vector.load %arg6[%c0_13, %c0_14] : memref<256x128xf32, #tpu.memory_space<vmem>>, vector<256x128xf32>
      tpu.vector_store %arg6[%c0_13, %c0_14], %16 {strides = array<i32>} : memref<256x128xf32, #tpu.memory_space<vmem>>, vector<256x128xf32>,
    } else {
    }
    return
  }
  func.func @transform_0(%arg0: i32, %arg1: i32, %arg2: i32) -> (i32, i32) {
    %c0_i32 = arith.constant 0 : i32
    return %arg0, %arg2 : i32, i32
  }
  func.func @transform_1(%arg0: i32, %arg1: i32, %arg2: i32) -> (i32, i32) {
    %c0_i32 = arith.constant 0 : i32
    return %arg2, %arg1 : i32, i32
  }
  func.func @transform_2(%arg0: i32, %arg1: i32, %arg2: i32) -> (i32, i32) {
    %c0_i32 = arith.constant 0 : i32
    %c0_i32_0 = arith.constant 0 : i32
    return %c0_i32, %arg1 : i32, i32
  }
  func.func @transform_3(%arg0: i32, %arg1: i32, %arg2: i32) -> (i32, i32) {
    %c0_i32 = arith.constant 0 : i32
    return %arg0, %arg1 : i32, i32
  }
}

</mosaic_0001>

<bundles_post_ra>
// kernel: default_generator_forward.54
= control target key start
LH: loop header
LB: loop body
LE: loop exit
PB: predicated region body
PF: predicated region fallthrough
CT: control target
= control target key end

     0   :  { %s864_s6 = smov 0   ;;  %s866_s7 = smov 0   ;;  %s1257_s0 = inlined_call_operand.vmem [shape: f32[2,256,128], index: 0, kind: input, shape index: {}]   ;;  %s1258_s1 = inlined_call_operand.vmem [shape: bf16[2,256,128], index: 1, kind: output, shape index: {}]  }
   0x1   :  { %s868_s8 = smov 0  }
   0x2 LB: > { %s23_s9 = sadd.s32 1, %s848_s7  ;;  %p636_p0 = scmp.ge.s32.totalorder %s852_s8, 1  ;;  %s852_s8 = sphi %s868_s8, %s11_s8   ;;  %s848_s7 = sphi %s866_s7, %s1260_s7   ;;  %s844_s6 = sphi %s864_s6, %s1259_s6  }
   0x3   : > { %p25_p1 = scmp.ge.s32.totalorder %s23_s9, 2  ;;  %p106_p2 = scmp.lt.s32.totalorder %s852_s8, 3 }
   0x5   : > { %s1262_s9 = smov (%p25_p1, %s23_s9), 0  ;;  %p107_p3 = pnand %p636_p0, %p106_p2 }
   0x6   : > { %p132_p4 = scmp.lt.s32.totalorder (!%p107_p3), %s844_s6, 1 }
   0x7   : > { %110 = sbr.rel (%p107_p3) target bundleno = 137 (0x89), region = 24 }
   0xe   : > { %s1264_s6 = smov (!%p132_p4, %s844_s6), 1 }
   0xf   : > { %s675_s10 = sshll.u32 %s1264_s6, 8  ;;  %s676_s14 = sshll.u32 %s1264_s6, 7 }
  0x10   : > { %s888_s13 = scalar_lea.vmem %s1257_s0, %s675_s10  ;;  %s1164_s17 = scalar_lea.vmem %s1258_s1, %s676_s14 }
  0x11   : > { %v891_v0 = vld [vmem:[%s888_s13] sm:$0xff]  ;;  %v894_v1 = vld [vmem:[%s888_s13 + $0x8] sm:$0xff]  ;;  %v897_v2 = vld [vmem:[%s888_s13 + $0x10] sm:$0xff] }
  0x12   : > { %v900_v3 = vld [vmem:[%s888_s13 + $0x18] sm:$0xff]  ;;  %v180_v4 = vadd.f32 %v894_v1, %v891_v0  ;;  %v217_v5 = vmul.f32 %v891_v0, %v891_v0  ;;  %v218_v6 = vmul.f32 %v894_v1, %v894_v1  ;;  %v219_v7 = vmul.f32 %v897_v2, %v897_v2  ;;  %v911_v8 = vld [vmem:[%s888_s13 + $0x20] sm:$0xff]  ;;  %v917_v12 = vld [vmem:[%s888_s13 + $0x28] sm:$0xff] }
  0x13   : > { %v220_v10 = vmul.f32 %v900_v3, %v900_v3  ;;  %v221_v14 = vmul.f32 %v911_v8, %v911_v8  ;;  %v923_v16 = vld [vmem:[%s888_s13 + $0x30] sm:$0xff]  ;;  %v222_v18 = vmul.f32 %v917_v12, %v917_v12  ;;  %v929_v20 = vld [vmem:[%s888_s13 + $0x38] sm:$0xff]  ;;  %v935_v24 = vld [vmem:[%s888_s13 + $0x40] sm:$0xff] }
  0x14   : > { %v181_v9 = vadd.f32 %v180_v4, %v897_v2  ;;  %v249_v11 = vadd.f32 %v218_v6, %v217_v5  ;;  %v223_v22 = vmul.f32 %v923_v16, %v923_v16  ;;  %v224_v26 = vmul.f32 %v929_v20, %v929_v20  ;;  %v941_v28 = vld [vmem:[%s888_s13 + $0x48] sm:$0xff]  ;;  %v947_v32 = vld [vmem:[%s888_s13 + $0x50] sm:$0xff]  ;;  %v953_v36 = vld [vmem:[%s888_s13 + $0x58] sm:$0xff] }
  0x15   : > { %v225_v30 = vmul.f32 %v935_v24, %v935_v24  ;;  %v226_v34 = vmul.f32 %v941_v28, %v941_v28  ;;  %v227_v38 = vmul.f32 %v947_v32, %v947_v32  ;;  %v959_v40 = vld [vmem:[%s888_s13 + $0x60] sm:$0xff]  ;;  %v228_v42 = vmul.f32 %v953_v36, %v953_v36  ;;  %v965_v44 = vld [vmem:[%s888_s13 + $0x68] sm:$0xff]  ;;  %v971_v48 = vld [vmem:[%s888_s13 + $0x70] sm:$0xff] }
  0x16   : > { %v182_v13 = vadd.f32 %v181_v9, %v900_v3  ;;  %v250_v15 = vadd.f32 %v249_v11, %v219_v7  ;;  %v229_v46 = vmul.f32 %v959_v40, %v959_v40  ;;  %v230_v50 = vmul.f32 %v965_v44, %v965_v44  ;;  %v977_v52 = vld [vmem:[%s888_s13 + $0x78] sm:$0xff]  ;;  %v983_v56 = vld [vmem:[%s888_s13 + $0x80] sm:$0xff]  ;;  %v989_v60 = vld [vmem:[%s888_s13 + $0x88] sm:$0xff] }
  0x17   : > { %v231_v54 = vmul.f32 %v971_v48, %v971_v48  ;;  %v232_v58 = vmul.f32 %v977_v52, %v977_v52  ;;  %v233_v62 = vmul.f32 %v983_v56, %v983_v56  ;;  %v995_v4 = vld [vmem:[%s888_s13 + $0x90] sm:$0xff]  ;;  %v234_v6 = vmul.f32 %v989_v60, %v989_v60  ;;  %v1001_v9 = vld [vmem:[%s888_s13 + $0x98] sm:$0xff] }
  0x18   : > { %v183_v17 = vadd.f32 %v182_v13, %v911_v8  ;;  %v251_v19 = vadd.f32 %v250_v15, %v220_v10  ;;  %v235_v11 = vmul.f32 %v995_v4, %v995_v4 }
  0x1a   : > { %v184_v21 = vadd.f32 %v183_v17, %v917_v12  ;;  %v252_v23 = vadd.f32 %v251_v19, %v221_v14  ;;  %v1007_v14 = vld [vmem:[%s888_s13 + $0xa0] sm:$0xff]  ;;  %v236_v17 = vmul.f32 %v1001_v9, %v1001_v9  ;;  %v1013_v19 = vld [vmem:[%s888_s13 + $0xa8] sm:$0xff] }
  0x1c   : > { %v185_v25 = vadd.f32 %v184_v21, %v923_v16  ;;  %v253_v27 = vadd.f32 %v252_v23, %v222_v18 }
  0x1e   : > { %v186_v29 = vadd.f32 %v185_v25, %v929_v20  ;;  %v254_v31 = vadd.f32 %v253_v27, %v223_v22  ;;  %v237_v22 = vmul.f32 %v1007_v14, %v1007_v14  ;;  %v1019_v25 = vld [vmem:[%s888_s13 + $0xb0] sm:$0xff]  ;;  %v238_v27 = vmul.f32 %v1013_v19, %v1013_v19 }
  0x20   : > { %v187_v33 = vadd.f32 %v186_v29, %v935_v24  ;;  %v255_v35 = vadd.f32 %v254_v31, %v224_v26 }
  0x22   : > { %v188_v37 = vadd.f32 %v187_v33, %v941_v28  ;;  %v256_v39 = vadd.f32 %v255_v35, %v225_v30  ;;  %v1025_v30 = vld [vmem:[%s888_s13 + $0xb8] sm:$0xff]  ;;  %v239_v33 = vmul.f32 %v1019_v25, %v1019_v25  ;;  %v1031_v35 = vld [vmem:[%s888_s13 + $0xc0] sm:$0xff] }
  0x24   : > { %v189_v41 = vadd.f32 %v188_v37, %v947_v32  ;;  %v257_v43 = vadd.f32 %v256_v39, %v226_v34 }
  0x26   : > { %v190_v45 = vadd.f32 %v189_v41, %v953_v36  ;;  %v258_v47 = vadd.f32 %v257_v43, %v227_v38  ;;  %v240_v38 = vmul.f32 %v1025_v30, %v1025_v30  ;;  %v1037_v41 = vld [vmem:[%s888_s13 + $0xc8] sm:$0xff]  ;;  %v241_v43 = vmul.f32 %v1031_v35, %v1031_v35 }
  0x28   : > { %v191_v49 = vadd.f32 %v190_v45, %v959_v40  ;;  %v259_v51 = vadd.f32 %v258_v47, %v228_v42 }
  0x2a   : > { %v192_v53 = vadd.f32 %v191_v49, %v965_v44  ;;  %v260_v55 = vadd.f32 %v259_v51, %v229_v46  ;;  %v1043_v46 = vld [vmem:[%s888_s13 + $0xd0] sm:$0xff]  ;;  %v242_v49 = vmul.f32 %v1037_v41, %v1037_v41  ;;  %v1049_v51 = vld [vmem:[%s888_s13 + $0xd8] sm:$0xff] }
  0x2c   : > { %v193_v57 = vadd.f32 %v192_v53, %v971_v48  ;;  %v261_v59 = vadd.f32 %v260_v55, %v230_v50 }
  0x2e   : > { %v194_v61 = vadd.f32 %v193_v57, %v977_v52  ;;  %v262_v63 = vadd.f32 %v261_v59, %v231_v54  ;;  %v243_v54 = vmul.f32 %v1043_v46, %v1043_v46  ;;  %v1055_v57 = vld [vmem:[%s888_s13 + $0xe0] sm:$0xff]  ;;  %v244_v59 = vmul.f32 %v1049_v51, %v1049_v51 }
  0x30   : > { %v195_v5 = vadd.f32 %v194_v61, %v983_v56  ;;  %v263_v7 = vadd.f32 %v262_v63, %v232_v58 }
  0x32   : > { %v196_v10 = vadd.f32 %v195_v5, %v989_v60  ;;  %v264_v13 = vadd.f32 %v263_v7, %v233_v62  ;;  %v1061_v62 = vld [vmem:[%s888_s13 + $0xe8] sm:$0xff]  ;;  %v245_v5 = vmul.f32 %v1055_v57, %v1055_v57  ;;  %v1067_v7 = vld [vmem:[%s888_s13 + $0xf0] sm:$0xff] }
  0x34   : > { %v197_v15 = vadd.f32 %v196_v10, %v995_v4  ;;  %v265_v18 = vadd.f32 %v264_v13, %v234_v6 }
  0x36   : > { %v198_v21 = vadd.f32 %v197_v15, %v1001_v9  ;;  %v266_v23 = vadd.f32 %v265_v18, %v235_v11  ;;  %v246_v11 = vmul.f32 %v1061_v62, %v1061_v62  ;;  %v1073_v15 = vld [vmem:[%s888_s13 + $0xf8] sm:$0xff]  ;;  %v247_v18 = vmul.f32 %v1067_v7, %v1067_v7 }
  0x38   : > { %v199_v26 = vadd.f32 %v198_v21, %v1007_v14  ;;  %v267_v29 = vadd.f32 %v266_v23, %v236_v17  ;;  %v248_v23 = vmul.f32 %v1073_v15, %v1073_v15 }
  0x3a   : > { %v200_v31 = vadd.f32 %v199_v26, %v1013_v19  ;;  %v268_v34 = vadd.f32 %v267_v29, %v237_v22 }
  0x3c   : > { %v201_v37 = vadd.f32 %v200_v31, %v1019_v25  ;;  %v269_v39 = vadd.f32 %v268_v34, %v238_v27 }
  0x3e   : > { %v202_v42 = vadd.f32 %v201_v37, %v1025_v30  ;;  %v270_v45 = vadd.f32 %v269_v39, %v239_v33 }
  0x40   : > { %v203_v47 = vadd.f32 %v202_v42, %v1031_v35  ;;  %v271_v50 = vadd.f32 %v270_v45, %v240_v38 }
  0x42   : > { %v204_v53 = vadd.f32 %v203_v47, %v1037_v41  ;;  %v272_v55 = vadd.f32 %v271_v50, %v241_v43 }
  0x44   : > { %v205_v58 = vadd.f32 %v204_v53, %v1043_v46  ;;  %v273_v61 = vadd.f32 %v272_v55, %v242_v49 }
  0x46   : > { %v206_v63 = vadd.f32 %v205_v58, %v1049_v51  ;;  %v274_v6 = vadd.f32 %v273_v61, %v243_v54 }
  0x48   : > { %v207_v10 = vadd.f32 %v206_v63, %v1055_v57  ;;  %v275_v13 = vadd.f32 %v274_v6, %v244_v59 }
  0x4a   : > { %v208_v17 = vadd.f32 %v207_v10, %v1061_v62  ;;  %v276_v21 = vadd.f32 %v275_v13, %v245_v5 }
  0x4c   : > { %v209_v22 = vadd.f32 %v208_v17, %v1067_v7  ;;  %v277_v26 = vadd.f32 %v276_v21, %v246_v11 }
  0x4e   : > { %v210_v27 = vadd.f32 %v209_v22, %v1073_v15  ;;  %v278_v29 = vadd.f32 %v277_v26, %v247_v18 }
  0x50   : > { %v211_v31 = vrot.slane %v210_v27, 4  ;;  %v279_v33 = vadd.f32 %v278_v29, %v248_v23 }
  0x52   : > { %v212_v34 = vadd.f32 %v211_v31, %v210_v27  ;;  %v280_v37 = vrot.slane %v279_v33, 4 }
  0x54   : > { %v213_v38 = vrot.slane %v212_v34, 2  ;;  %v281_v39 = vadd.f32 %v280_v37, %v279_v33 }
  0x56   : > { %v214_v42 = vadd.f32 %v213_v38, %v212_v34  ;;  %v282_v43 = vrot.slane %v281_v39, 2 }
  0x58   : > { %v215_v45 = vrot.slane %v214_v42, 1  ;;  %v283_v47 = vadd.f32 %v282_v43, %v281_v39 }
  0x5a   : > { %v216_v49 = vadd.f32 %v215_v45, %v214_v42  ;;  %v284_v50 = vrot.slane %v283_v47, 1 }
  0x5c   : > { %v1082_v53 = vmul.f32 0.00390625, %v216_v49  ;;  %v285_v54 = vadd.f32 %v284_v50, %v283_v47 }
  0x5e   : > { %v288_v55 = vmul.f32 %v1082_v53, %v1082_v53  ;;  %v287_v58 = vmul.f32 0.00390625, %v285_v54  ;;  %v291_v5 = vsub.f32 %v891_v0, %v1082_v53  ;;  %v292_v6 = vsub.f32 %v894_v1, %v1082_v53 }
  0x5f   : > { %v293_v10 = vsub.f32 %v897_v2, %v1082_v53  ;;  %v294_v11 = vsub.f32 %v900_v3, %v1082_v53  ;;  %v295_v13 = vsub.f32 %v911_v8, %v1082_v53  ;;  %v296_v17 = vsub.f32 %v917_v12, %v1082_v53 }
  0x60   : > { %v289_v59 = vsub.f32 %v287_v58, %v288_v55  ;;  %v297_v18 = vsub.f32 %v923_v16, %v1082_v53  ;;  %v298_v0 = vsub.f32 %v929_v20, %v1082_v53  ;;  %v299_v1 = vsub.f32 %v935_v24, %v1082_v53 }
  0x61   : > { %v300_v2 = vsub.f32 %v941_v28, %v1082_v53  ;;  %v301_v3 = vsub.f32 %v947_v32, %v1082_v53  ;;  %v302_v8 = vsub.f32 %v953_v36, %v1082_v53  ;;  %v303_v12 = vsub.f32 %v959_v40, %v1082_v53 }
  0x62   : > { %v290_v61 = vmax.f32 %v289_v59, 0.0  ;;  %v304_v16 = vsub.f32 %v965_v44, %v1082_v53  ;;  %v305_v20 = vsub.f32 %v971_v48, %v1082_v53  ;;  %v306_v24 = vsub.f32 %v977_v52, %v1082_v53 }
  0x63   : > { %v307_v28 = vsub.f32 %v983_v56, %v1082_v53  ;;  %v308_v32 = vsub.f32 %v989_v60, %v1082_v53  ;;  %v309_v36 = vsub.f32 %v995_v4, %v1082_v53  ;;  %v310_v40 = vsub.f32 %v1001_v9, %v1082_v53 }
  0x64   : > { %v323_v63 = vadd.f32 1e-05, %v290_v61  ;;  %v311_v44 = vsub.f32 %v1007_v14, %v1082_v53  ;;  %v312_v48 = vsub.f32 %v1013_v19, %v1082_v53  ;;  %v313_v52 = vsub.f32 %v1019_v25, %v1082_v53 }
  0x65   : > { %v314_v56 = vsub.f32 %v1025_v30, %v1082_v53  ;;  %v315_v60 = vsub.f32 %v1031_v35, %v1082_v53  ;;  %v316_v21 = vsub.f32 %v1037_v41, %v1082_v53  ;;  %v317_v22 = vsub.f32 %v1043_v46, %v1082_v53 }
  0x66   : > { %828 = vrsqrt.f32 %v323_v63  ;;  %v318_v23 = vsub.f32 %v1049_v51, %v1082_v53  ;;  %v319_v27 = vsub.f32 %v1055_v57, %v1082_v53  ;;  %v320_v29 = vsub.f32 %v1061_v62, %v1082_v53 }
  0x67   : > { %v321_v31 = vsub.f32 %v1067_v7, %v1082_v53  ;;  %v322_v33 = vsub.f32 %v1073_v15, %v1082_v53 }
  0x70   : > { %v1142_v26 = vpop.eup %828 }
  0x71   : > { %v325_v34 = vmul.f32 %v1142_v26, %v291_v5  ;;  %v326_v37 = vmul.f32 %v1142_v26, %v292_v6  ;;  %v327_v38 = vmul.f32 %v1142_v26, %v293_v10  ;;  %v328_v39 = vmul.f32 %v1142_v26, %v294_v11 }
  0x72   : > { %v329_v42 = vmul.f32 %v1142_v26, %v295_v13  ;;  %v330_v43 = vmul.f32 %v1142_v26, %v296_v17  ;;  %v331_v45 = vmul.f32 %v1142_v26, %v297_v18  ;;  %v332_v47 = vmul.f32 %v1142_v26, %v298_v0 }
  0x73   : > { %v357_v49 = vmax.f32 %v325_v34, 0.0  ;;  %v358_v50 = vmax.f32 %v326_v37, 0.0  ;;  %v359_v54 = vmax.f32 %v327_v38, 0.0  ;;  %v360_v55 = vmax.f32 %v328_v39, 0.0 }
  0x74   : > { %v361_v58 = vmax.f32 %v329_v42, 0.0  ;;  %v362_v59 = vmax.f32 %v330_v43, 0.0  ;;  %v363_v61 = vmax.f32 %v331_v45, 0.0  ;;  %v364_v63 = vmax.f32 %v332_v47, 0.0 }
  0x75   : > { %v712_v5 = vpack.c.bf16 %v358_v50, %v357_v49  ;;  %v717_v6 = vpack.c.bf16 %v360_v55, %v359_v54  ;;  %v333_v10 = vmul.f32 %v1142_v26, %v299_v1  ;;  %v334_v11 = vmul.f32 %v1142_v26, %v300_v2 }
  0x76   : > { %v722_v13 = vpack.c.bf16 %v362_v59, %v361_v58  ;;  %v727_v17 = vpack.c.bf16 %v364_v63, %v363_v61  ;;  %v335_v18 = vmul.f32 %v1142_v26, %v301_v3  ;;  %v336_v0 = vmul.f32 %v1142_v26, %v302_v8 }
  0x77   : > { %713 = vst [vmem:[%s1164_s17] sm:$0xff] %v712_v5   ;;  %789 = vst [vmem:[%s1164_s17 + $0x8] sm:$0xff] %v717_v6   ;;  %v365_v34 = vmax.f32 %v333_v10, 0.0  ;;  %v366_v37 = vmax.f32 %v334_v11, 0.0  ;;  %v337_v38 = vmul.f32 %v1142_v26, %v303_v12  ;;  %v338_v39 = vmul.f32 %v1142_v26, %v304_v16 }
  0x78   : > { %790 = vst [vmem:[%s1164_s17 + $0x10] sm:$0xff] %v722_v13   ;;  %791 = vst [vmem:[%s1164_s17 + $0x18] sm:$0xff] %v727_v17   ;;  %v367_v1 = vmax.f32 %v335_v18, 0.0  ;;  %v368_v42 = vmax.f32 %v336_v0, 0.0  ;;  %v339_v2 = vmul.f32 %v1142_v26, %v305_v20  ;;  %v340_v3 = vmul.f32 %v1142_v26, %v306_v24 }
  0x79   : > { %v732_v43 = vpack.c.bf16 %v366_v37, %v365_v34  ;;  %v369_v8 = vmax.f32 %v337_v38, 0.0  ;;  %v370_v45 = vmax.f32 %v338_v39, 0.0  ;;  %v341_v47 = vmul.f32 %v1142_v26, %v307_v28 }
  0x7a   : > { %v737_v49 = vpack.c.bf16 %v368_v42, %v367_v1  ;;  %v371_v12 = vmax.f32 %v339_v2, 0.0  ;;  %v372_v50 = vmax.f32 %v340_v3, 0.0  ;;  %v342_v16 = vmul.f32 %v1142_v26, %v308_v32 }
  0x7b   : > { %792 = vst [vmem:[%s1164_s17 + $0x20] sm:$0xff] %v732_v43   ;;  %v742_v54 = vpack.c.bf16 %v370_v45, %v369_v8  ;;  %v373_v55 = vmax.f32 %v341_v47, 0.0  ;;  %v343_v20 = vmul.f32 %v1142_v26, %v309_v36  ;;  %v344_v24 = vmul.f32 %v1142_v26, %v310_v40 }
  0x7c   : > { %793 = vst [vmem:[%s1164_s17 + $0x28] sm:$0xff] %v737_v49   ;;  %v747_v28 = vpack.c.bf16 %v372_v50, %v371_v12  ;;  %v374_v58 = vmax.f32 %v342_v16, 0.0  ;;  %v345_v32 = vmul.f32 %v1142_v26, %v311_v44  ;;  %v346_v4 = vmul.f32 %v1142_v26, %v312_v48 }
  0x7d   : > { %794 = vst [vmem:[%s1164_s17 + $0x30] sm:$0xff] %v742_v54   ;;  %v375_v36 = vmax.f32 %v343_v20, 0.0  ;;  %v376_v59 = vmax.f32 %v344_v24, 0.0  ;;  %v347_v9 = vmul.f32 %v1142_v26, %v313_v52  ;;  %v348_v14 = vmul.f32 %v1142_v26, %v314_v56 }
  0x7e   : > { %795 = vst [vmem:[%s1164_s17 + $0x38] sm:$0xff] %v747_v28   ;;  %v752_v40 = vpack.c.bf16 %v374_v58, %v373_v55  ;;  %v377_v19 = vmax.f32 %v345_v32, 0.0  ;;  %v378_v44 = vmax.f32 %v346_v4, 0.0  ;;  %v349_v48 = vmul.f32 %v1142_v26, %v315_v60 }
  0x7f   : > { %v757_v61 = vpack.c.bf16 %v376_v59, %v375_v36  ;;  %v379_v25 = vmax.f32 %v347_v9, 0.0  ;;  %v380_v63 = vmax.f32 %v348_v14, 0.0  ;;  %v350_v30 = vmul.f32 %v1142_v26, %v316_v21 }
  0x80   : > { %796 = vst [vmem:[%s1164_s17 + $0x40] sm:$0xff] %v752_v40   ;;  %v762_v52 = vpack.c.bf16 %v378_v44, %v377_v19  ;;  %v381_v56 = vmax.f32 %v349_v48, 0.0  ;;  %v351_v35 = vmul.f32 %v1142_v26, %v317_v22  ;;  %v352_v60 = vmul.f32 %v1142_v26, %v318_v23 }
  0x81   : > { %797 = vst [vmem:[%s1164_s17 + $0x48] sm:$0xff] %v757_v61   ;;  %v767_v5 = vpack.c.bf16 %v380_v63, %v379_v25  ;;  %v382_v41 = vmax.f32 %v350_v30, 0.0  ;;  %v353_v21 = vmul.f32 %v1142_v26, %v319_v27  ;;  %v354_v46 = vmul.f32 %v1142_v26, %v320_v29 }
  0x82   : > { %798 = vst [vmem:[%s1164_s17 + $0x50] sm:$0xff] %v762_v52   ;;  %v383_v51 = vmax.f32 %v351_v35, 0.0  ;;  %v384_v22 = vmax.f32 %v352_v60, 0.0  ;;  %v355_v23 = vmul.f32 %v1142_v26, %v321_v31  ;;  %v356_v57 = vmul.f32 %v1142_v26, %v322_v33 }
  0x83   : > { %799 = vst [vmem:[%s1164_s17 + $0x58] sm:$0xff] %v767_v5   ;;  %v772_v62 = vpack.c.bf16 %v382_v41, %v381_v56  ;;  %v385_v27 = vmax.f32 %v353_v21, 0.0  ;;  %v386_v6 = vmax.f32 %v354_v46, 0.0 }
  0x84   : > { %v777_v29 = vpack.c.bf16 %v384_v22, %v383_v51  ;;  %v387_v10 = vmax.f32 %v355_v23, 0.0  ;;  %v388_v11 = vmax.f32 %v356_v57, 0.0 }
  0x85   : > { %800 = vst [vmem:[%s1164_s17 + $0x60] sm:$0xff] %v772_v62   ;;  %v782_v13 = vpack.c.bf16 %v386_v6, %v385_v27 }
  0x86   : > { %801 = vst [vmem:[%s1164_s17 + $0x68] sm:$0xff] %v777_v29   ;;  %v787_v17 = vpack.c.bf16 %v388_v11, %v387_v10 }
  0x87   : > { %802 = vst [vmem:[%s1164_s17 + $0x70] sm:$0xff] %v782_v13  }
  0x88   : > { %803 = vst [vmem:[%s1164_s17 + $0x78] sm:$0xff] %v787_v17  }
  0x89 PF: > { %s11_s8 = sadd.s32 1, %s852_s8   ;;  %s1259_s6 = smov %s848_s7 }
  0x8a   : > { %p8_p5 = scmp.ge.s32.totalorder %s11_s8, 4   ;;  %s1260_s7 = smov %s1262_s9 }
  0x8c   :  { %10 = sbr.rel (!%p8_p5) target bundleno = 2 (0x2), region = 54 }

// kernel: default_generator_forward.53
= control target key start
LH: loop header
LB: loop body
LE: loop exit
PB: predicated region body
PF: predicated region fallthrough
CT: control target
= control target key end

     0   :  { %s1425_s12 = smov 0   ;;  %s1427_s13 = smov 0   ;;  %s1618_s0 = inlined_call_operand.vmem [shape: bf16[512,256], index: 0, kind: input, shape index: {}]   ;;  %s1619_s1 = inlined_call_operand.vmem [shape: bf16[256,128], index: 1, kind: input, shape index: {}]   ;;  %s1620_s2 = inlined_call_operand.vmem [shape: f32[1,128], index: 2, kind: input, shape index: {}]   ;;  %s1621_s3 = inlined_call_operand.vmem [shape: f32[512,128], index: 3, kind: output, shape index: {}]  }
   0x1   :  { %s1429_s14 = smov 0  }
   0x2 LB: > { %s32_s15 = sadd.s32 1, %s1399_s13  ;;  %p1107_p0 = scmp.ge.s32.totalorder %s1403_s14, 1  ;;  %s1403_s14 = sphi %s1429_s14, %s13_s14   ;;  %s1399_s13 = sphi %s1427_s13, %s1623_s13   ;;  %s1395_s12 = sphi %s1425_s12, %s1622_s12  }
   0x3   : > { %p34_p1 = scmp.ge.s32.totalorder %s32_s15, 2  ;;  %p191_p2 = scmp.lt.s32.totalorder %s1403_s14, 3 }
   0x5   : > { %s1625_s15 = smov (%p34_p1, %s32_s15), 0  ;;  %p192_p3 = pnand %p1107_p0, %p191_p2 }
   0x6   : > { %v1317_v0 = vld [vmem:[%s1619_s1 + $0x40] sm:$0xff] (!%p192_p3)   ;;  %s1108_s18 = sshll.u32 (!%p192_p3), %s1395_s12, 5  ;;  %v1319_v2 = vld [vmem:[%s1619_s1 + $0x48] sm:$0xff] (!%p192_p3)   ;;  %v1321_v4 = vld [vmem:[%s1619_s1 + $0x50] sm:$0xff] (!%p192_p3)  }
   0x7   : > { %195 = sbr.rel (%p192_p3) target bundleno = 315 (0x13b), region = 32  ;;  %v1318_v1 = vld [vmem:[%s1619_s1] sm:$0xff] (!%p192_p3)   ;;  %1165 = vmatprep.subr.bf16.mxu0 (!%p192_p3), %v1317_v0  ;;  %1277 = vmatprep.subr.bf16.mxu1 (!%p192_p3), %v1317_v0  ;;  %v1320_v3 = vld [vmem:[%s1619_s1 + $0x8] sm:$0xff] (!%p192_p3)   ;;  %p236_p4 = scmp.lt.s32.totalorder (!%p192_p3), %s1108_s18, 63  ;;  %v1322_v5 = vld [vmem:[%s1619_s1 + $0x10] sm:$0xff] (!%p192_p3)  }
   0x8   : > { %1166 = vmatpush3.bf16.msra.mxu0 (!%p192_p3), %v1318_v1  ;;  %1285 = vmatpush3.bf16.msra.mxu1 (!%p192_p3), %v1318_v1  ;;  %v1323_v6 = vld [vmem:[%s1619_s1 + $0x58] sm:$0xff] (!%p192_p3)   ;;  %v1325_v8 = vld [vmem:[%s1619_s1 + $0x60] sm:$0xff] (!%p192_p3)   ;;  %v1327_v10 = vld [vmem:[%s1619_s1 + $0x68] sm:$0xff] (!%p192_p3)  }
   0x9   : > { %1167 = vmatprep.subr.bf16.mxu0 (!%p192_p3), %v1319_v2  ;;  %1278 = vmatprep.subr.bf16.mxu1 (!%p192_p3), %v1319_v2  ;;  %v1324_v7 = vld [vmem:[%s1619_s1 + $0x18] sm:$0xff] (!%p192_p3)   ;;  %v1326_v9 = vld [vmem:[%s1619_s1 + $0x20] sm:$0xff] (!%p192_p3)   ;;  %v1328_v13 = vld [vmem:[%s1619_s1 + $0x28] sm:$0xff] (!%p192_p3)  }
   0xa   : > { %v1329_v14 = vld [vmem:[%s1619_s1 + $0x70] sm:$0xff] (!%p192_p3)   ;;  %v1331_v16 = vld [vmem:[%s1619_s1 + $0x78] sm:$0xff] (!%p192_p3)   ;;  %v1536_v51 = vld [vmem:[%s1620_s2] ss:$0 sm:$0xff] (!%p192_p3) }
   0xb   : > { %v1330_v15 = vld [vmem:[%s1619_s1 + $0x30] sm:$0xff] (!%p192_p3)   ;;  %v1332_v17 = vld [vmem:[%s1619_s1 + $0x38] sm:$0xff] (!%p192_p3)  }
   0xc   : > { %1168 = vmatpush3.bf16.msra.mxu0 (!%p192_p3), %v1320_v3  ;;  %1286 = vmatpush3.bf16.msra.mxu1 (!%p192_p3), %v1320_v3 }
   0xd   : > { %1169 = vmatprep.subr.bf16.mxu0 (!%p192_p3), %v1321_v4  ;;  %1279 = vmatprep.subr.bf16.mxu1 (!%p192_p3), %v1321_v4 }
   0xe   : > { %s1627_s18 = smov (!%p236_p4, %s1108_s18), 63 }
   0xf   : > { %s1164_s6 = sshll.u32 %s1627_s18, 3 }
  0x10   : > { %1170 = vmatpush3.bf16.msra.mxu0 %v1322_v5  ;;  %1287 = vmatpush3.bf16.msra.mxu1 %v1322_v5  ;;  %s1478_s11 = scalar_lea.vmem %s1618_s0, %s1164_s6  ;;  %s1543_s8 = scalar_lea.vmem %s1621_s3, %s1164_s6 }
  0x11   : > { %1171 = vmatprep.subr.bf16.mxu0 %v1323_v6  ;;  %1280 = vmatprep.subr.bf16.mxu1 %v1323_v6  ;;  %v1335_v11 = vld [vmem:[%s1478_s11 + $0x4] ss:$8 sps:$4 sm:$0xff]   ;;  %v1333_v18 = vld [vmem:[%s1478_s11] ss:$8 sps:$4 sm:$0xff]   ;;  %v1339_v20 = vld [vmem:[%s1478_s11 + $0x14] ss:$8 sps:$4 sm:$0xff]  }
  0x12   : > { %v1338_v12 = vld [vmem:[%s1478_s11 + $0x84] ss:$8 sps:$4 sm:$0xff]   ;;  %688 = vmatprep.mubr.bf16.mxu0 %v1335_v11  ;;  %v1336_v19 = vld [vmem:[%s1478_s11 + $0x80] ss:$8 sps:$4 sm:$0xff]   ;;  %v1341_v21 = vld [vmem:[%s1478_s11 + $0x94] ss:$8 sps:$4 sm:$0xff]  }
  0x13   : > { %752 = vmatprep.mubr.bf16.mxu1 %v1338_v12  ;;  %v1343_v22 = vld [vmem:[%s1478_s11 + $0x10] ss:$8 sps:$4 sm:$0xff]   ;;  %v1345_v24 = vld [vmem:[%s1478_s11 + $0x24] ss:$8 sps:$4 sm:$0xff]   ;;  %v1349_v26 = vld [vmem:[%s1478_s11 + $0x20] ss:$8 sps:$4 sm:$0xff]  }
  0x14   : > { %1172 = vmatpush3.bf16.msra.mxu0 %v1324_v7  ;;  %1288 = vmatpush3.bf16.msra.mxu1 %v1324_v7  ;;  %v1344_v23 = vld [vmem:[%s1478_s11 + $0x90] ss:$8 sps:$4 sm:$0xff]   ;;  %v1347_v25 = vld [vmem:[%s1478_s11 + $0xa4] ss:$8 sps:$4 sm:$0xff]   ;;  %v1350_v27 = vld [vmem:[%s1478_s11 + $0xa0] ss:$8 sps:$4 sm:$0xff]  }
  0x15   : > { %1173 = vmatprep.subr.bf16.mxu0 %v1325_v8  ;;  %1281 = vmatprep.subr.bf16.mxu1 %v1325_v8  ;;  %v1351_v28 = vld [vmem:[%s1478_s11 + $0x34] ss:$8 sps:$4 sm:$0xff]   ;;  %v1355_v30 = vld [vmem:[%s1478_s11 + $0x30] ss:$8 sps:$4 sm:$0xff]   ;;  %v1357_v32 = vld [vmem:[%s1478_s11 + $0x44] ss:$8 sps:$4 sm:$0xff]  }
  0x16   : > { %v1353_v29 = vld [vmem:[%s1478_s11 + $0xb4] ss:$8 sps:$4 sm:$0xff]   ;;  %v1356_v31 = vld [vmem:[%s1478_s11 + $0xb0] ss:$8 sps:$4 sm:$0xff]   ;;  %v1359_v33 = vld [vmem:[%s1478_s11 + $0xc4] ss:$8 sps:$4 sm:$0xff]  }
  0x17   : > { %v1361_v34 = vld [vmem:[%s1478_s11 + $0x40] ss:$8 sps:$4 sm:$0xff]   ;;  %v1363_v36 = vld [vmem:[%s1478_s11 + $0x54] ss:$8 sps:$4 sm:$0xff]   ;;  %v1367_v38 = vld [vmem:[%s1478_s11 + $0x50] ss:$8 sps:$4 sm:$0xff]  }
  0x18   : > { %1174 = vmatpush3.bf16.msra.mxu0 %v1326_v9  ;;  %1289 = vmatpush3.bf16.msra.mxu1 %v1326_v9  ;;  %v1362_v35 = vld [vmem:[%s1478_s11 + $0xc0] ss:$8 sps:$4 sm:$0xff]   ;;  %v1365_v37 = vld [vmem:[%s1478_s11 + $0xd4] ss:$8 sps:$4 sm:$0xff]   ;;  %v1368_v39 = vld [vmem:[%s1478_s11 + $0xd0] ss:$8 sps:$4 sm:$0xff]  }
  0x19   : > { %1175 = vmatprep.subr.bf16.mxu0 %v1327_v10  ;;  %1282 = vmatprep.subr.bf16.mxu1 %v1327_v10  ;;  %v1369_v40 = vld [vmem:[%s1478_s11 + $0x64] ss:$8 sps:$4 sm:$0xff]   ;;  %v1373_v42 = vld [vmem:[%s1478_s11 + $0x60] ss:$8 sps:$4 sm:$0xff]   ;;  %v1375_v44 = vld [vmem:[%s1478_s11 + $0x74] ss:$8 sps:$4 sm:$0xff]  }
  0x1a   : > { %v1371_v41 = vld [vmem:[%s1478_s11 + $0xe4] ss:$8 sps:$4 sm:$0xff]   ;;  %v1374_v43 = vld [vmem:[%s1478_s11 + $0xe0] ss:$8 sps:$4 sm:$0xff]   ;;  %v1377_v45 = vld [vmem:[%s1478_s11 + $0xf4] ss:$8 sps:$4 sm:$0xff]  }
  0x1b   : > { %v1379_v46 = vld [vmem:[%s1478_s11 + $0x70] ss:$8 sps:$4 sm:$0xff]  }
  0x1c   : > { %1176 = vmatpush3.bf16.msra.mxu0 %v1328_v13  ;;  %1290 = vmatpush3.bf16.msra.mxu1 %v1328_v13  ;;  %v1380_v47 = vld [vmem:[%s1478_s11 + $0xf0] ss:$8 sps:$4 sm:$0xff]  }
  0x1d   : > { %1177 = vmatprep.subr.bf16.mxu0 %v1329_v14  ;;  %1283 = vmatprep.subr.bf16.mxu1 %v1329_v14 }
  0x20   : > { %1178 = vmatpush3.bf16.msra.mxu0 %v1330_v15  ;;  %1291 = vmatpush3.bf16.msra.mxu1 %v1330_v15 }
  0x21   : > { %1179 = vmatprep.subr.bf16.mxu0 %v1331_v16  ;;  %1284 = vmatprep.subr.bf16.mxu1 %v1331_v16 }
  0x24   : > { %1180 = vmatpush3.bf16.msra.mxu0 %v1332_v17  ;;  %1292 = vmatpush3.bf16.msra.mxu1 %v1332_v17 }
  0x27   : > { %689 = vmatmul.mubr.bf16.vlgmr.msra.gmra.mrb[0].mxu0 %v1333_v18  ;;  %753 = vmatmul.mubr.bf16.vlgmr.msra.gmra.mrb[0].mxu1 %v1336_v19 }
  0x28   : > { %696 = vmatprep.mubr.bf16.mxu0 %v1339_v20  ;;  %760 = vmatprep.mubr.bf16.mxu1 %v1341_v21 }
  0x2f   : > { %697 = vmatmul.mubr.bf16.gmra.mrb[4].mxu0 %v1343_v22  ;;  %761 = vmatmul.mubr.bf16.gmra.mrb[4].mxu1 %v1344_v23 }
  0x30   : > { %704 = vmatprep.mubr.bf16.mxu0 %v1345_v24  ;;  %768 = vmatprep.mubr.bf16.mxu1 %v1347_v25 }
  0x37   : > { %705 = vmatmul.mubr.bf16.gmra.mrb[8].mxu0 %v1349_v26  ;;  %769 = vmatmul.mubr.bf16.gmra.mrb[8].mxu1 %v1350_v27 }
  0x38   : > { %712 = vmatprep.mubr.bf16.mxu0 %v1351_v28  ;;  %776 = vmatprep.mubr.bf16.mxu1 %v1353_v29 }
  0x3f   : > { %713 = vmatmul.mubr.bf16.gmra.mrb[12].mxu0 %v1355_v30  ;;  %777 = vmatmul.mubr.bf16.gmra.mrb[12].mxu1 %v1356_v31 }
  0x40   : > { %720 = vmatprep.mubr.bf16.mxu0 %v1357_v32  ;;  %784 = vmatprep.mubr.bf16.mxu1 %v1359_v33 }
  0x47   : > { %721 = vmatmul.mubr.bf16.gmra.mrb[16].mxu0 %v1361_v34  ;;  %785 = vmatmul.mubr.bf16.gmra.mrb[16].mxu1 %v1362_v35 }
  0x48   : > { %728 = vmatprep.mubr.bf16.mxu0 %v1363_v36  ;;  %792 = vmatprep.mubr.bf16.mxu1 %v1365_v37 }
  0x4f   : > { %729 = vmatmul.mubr.bf16.gmra.mrb[20].mxu0 %v1367_v38  ;;  %793 = vmatmul.mubr.bf16.gmra.mrb[20].mxu1 %v1368_v39 }
  0x50   : > { %736 = vmatprep.mubr.bf16.mxu0 %v1369_v40  ;;  %800 = vmatprep.mubr.bf16.mxu1 %v1371_v41 }
  0x57   : > { %737 = vmatmul.mubr.bf16.gmra.mrb[24].mxu0 %v1373_v42  ;;  %801 = vmatmul.mubr.bf16.gmra.mrb[24].mxu1 %v1374_v43 }
  0x58   : > { %744 = vmatprep.mubr.bf16.mxu0 %v1375_v44  ;;  %808 = vmatprep.mubr.bf16.mxu1 %v1377_v45 }
  0x5f   : > { %745 = vmatmul.mubr.bf16.gmra.mrb[28].mxu0 %v1379_v46  ;;  %809 = vmatmul.mubr.bf16.gmra.mrb[28].mxu1 %v1380_v47 }
  0xfa   : > { %v1181_v48 = vpop.f32.mrb[0].mxu0  ;;  %v1229_v49 = vpop.f32.mrb[0].mxu1 }
  0xfb   : > { %v1182_v50 = vpop.f32.mrb[1].mxu0  ;;  %v1230_v52 = vpop.f32.mrb[1].mxu1 }
  0xfc   : > { %v1183_v53 = vadd.f32 %v1182_v50, %v1181_v48  ;;  %v1231_v54 = vadd.f32 %v1230_v52, %v1229_v49  ;;  %v1184_v55 = vpop.f32.mrb[2].mxu0  ;;  %v1232_v56 = vpop.f32.mrb[2].mxu1 }
  0xfd   : > { %v1185_v57 = vpop.f32.mrb[3].mxu0  ;;  %v1233_v58 = vpop.f32.mrb[3].mxu1 }
  0xfe   : > { %v923_v59 = vadd.f32 %v1183_v53, %v1536_v51  ;;  %v939_v60 = vadd.f32 %v1231_v54, %v1536_v51  ;;  %v1186_v61 = vadd.f32 %v1185_v57, %v1184_v55  ;;  %v1234_v62 = vadd.f32 %v1233_v58, %v1232_v56 }
 0x100   : > { %955 = vst [vmem:[%s1543_s8] sm:$0xff] %v923_v59  ;;  %971 = vst [vmem:[%s1543_s8 + $0x80] sm:$0xff] %v939_v60  ;;  %v924_v63 = vadd.f32 %v1186_v61, %v1536_v51  ;;  %v940_v0 = vadd.f32 %v1234_v62, %v1536_v51 }
 0x102   : > { %956 = vst [vmem:[%s1543_s8 + $0x8] sm:$0xff] %v924_v63  ;;  %972 = vst [vmem:[%s1543_s8 + $0x88] sm:$0xff] %v940_v0  ;;  %v1187_v1 = vpop.f32.mrb[4].mxu0  ;;  %v1235_v2 = vpop.f32.mrb[4].mxu1 }
 0x103   : > { %v1188_v3 = vpop.f32.mrb[5].mxu0  ;;  %v1236_v4 = vpop.f32.mrb[5].mxu1 }
 0x104   : > { %v1189_v5 = vadd.f32 %v1188_v3, %v1187_v1  ;;  %v1237_v6 = vadd.f32 %v1236_v4, %v1235_v2  ;;  %v1190_v7 = vpop.f32.mrb[6].mxu0  ;;  %v1238_v8 = vpop.f32.mrb[6].mxu1 }
 0x105   : > { %v1191_v9 = vpop.f32.mrb[7].mxu0  ;;  %v1239_v10 = vpop.f32.mrb[7].mxu1 }
 0x106   : > { %v925_v11 = vadd.f32 %v1189_v5, %v1536_v51  ;;  %v941_v12 = vadd.f32 %v1237_v6, %v1536_v51  ;;  %v1192_v13 = vadd.f32 %v1191_v9, %v1190_v7  ;;  %v1240_v14 = vadd.f32 %v1239_v10, %v1238_v8 }
 0x108   : > { %957 = vst [vmem:[%s1543_s8 + $0x10] sm:$0xff] %v925_v11  ;;  %973 = vst [vmem:[%s1543_s8 + $0x90] sm:$0xff] %v941_v12  ;;  %v926_v15 = vadd.f32 %v1192_v13, %v1536_v51  ;;  %v942_v16 = vadd.f32 %v1240_v14, %v1536_v51 }
 0x10a   : > { %958 = vst [vmem:[%s1543_s8 + $0x18] sm:$0xff] %v926_v15  ;;  %974 = vst [vmem:[%s1543_s8 + $0x98] sm:$0xff] %v942_v16  ;;  %v1193_v17 = vpop.f32.mrb[8].mxu0  ;;  %v1241_v18 = vpop.f32.mrb[8].mxu1 }
 0x10b   : > { %v1194_v19 = vpop.f32.mrb[9].mxu0  ;;  %v1242_v20 = vpop.f32.mrb[9].mxu1 }
 0x10c   : > { %v1195_v21 = vadd.f32 %v1194_v19, %v1193_v17  ;;  %v1243_v22 = vadd.f32 %v1242_v20, %v1241_v18  ;;  %v1196_v23 = vpop.f32.mrb[10].mxu0  ;;  %v1244_v24 = vpop.f32.mrb[10].mxu1 }
 0x10d   : > { %v1197_v25 = vpop.f32.mrb[11].mxu0  ;;  %v1245_v26 = vpop.f32.mrb[11].mxu1 }
 0x10e   : > { %v927_v27 = vadd.f32 %v1195_v21, %v1536_v51  ;;  %v943_v28 = vadd.f32 %v1243_v22, %v1536_v51  ;;  %v1198_v29 = vadd.f32 %v1197_v25, %v1196_v23  ;;  %v1246_v30 = vadd.f32 %v1245_v26, %v1244_v24 }
 0x110   : > { %959 = vst [vmem:[%s1543_s8 + $0x20] sm:$0xff] %v927_v27  ;;  %975 = vst [vmem:[%s1543_s8 + $0xa0] sm:$0xff] %v943_v28  ;;  %v928_v31 = vadd.f32 %v1198_v29, %v1536_v51  ;;  %v944_v32 = vadd.f32 %v1246_v30, %v1536_v51 }
 0x112   : > { %960 = vst [vmem:[%s1543_s8 + $0x28] sm:$0xff] %v928_v31  ;;  %976 = vst [vmem:[%s1543_s8 + $0xa8] sm:$0xff] %v944_v32  ;;  %v1199_v33 = vpop.f32.mrb[12].mxu0  ;;  %v1247_v34 = vpop.f32.mrb[12].mxu1 }
 0x113   : > { %v1200_v35 = vpop.f32.mrb[13].mxu0  ;;  %v1248_v36 = vpop.f32.mrb[13].mxu1 }
 0x114   : > { %v1201_v37 = vadd.f32 %v1200_v35, %v1199_v33  ;;  %v1249_v38 = vadd.f32 %v1248_v36, %v1247_v34  ;;  %v1202_v39 = vpop.f32.mrb[14].mxu0  ;;  %v1250_v40 = vpop.f32.mrb[14].mxu1 }
 0x115   : > { %v1203_v41 = vpop.f32.mrb[15].mxu0  ;;  %v1251_v42 = vpop.f32.mrb[15].mxu1 }
 0x116   : > { %v929_v43 = vadd.f32 %v1201_v37, %v1536_v51  ;;  %v945_v44 = vadd.f32 %v1249_v38, %v1536_v51  ;;  %v1204_v45 = vadd.f32 %v1203_v41, %v1202_v39  ;;  %v1252_v46 = vadd.f32 %v1251_v42, %v1250_v40 }
 0x118   : > { %961 = vst [vmem:[%s1543_s8 + $0x30] sm:$0xff] %v929_v43  ;;  %977 = vst [vmem:[%s1543_s8 + $0xb0] sm:$0xff] %v945_v44  ;;  %v930_v47 = vadd.f32 %v1204_v45, %v1536_v51  ;;  %v946_v48 = vadd.f32 %v1252_v46, %v1536_v51 }
 0x11a   : > { %962 = vst [vmem:[%s1543_s8 + $0x38] sm:$0xff] %v930_v47  ;;  %978 = vst [vmem:[%s1543_s8 + $0xb8] sm:$0xff] %v946_v48  ;;  %v1205_v49 = vpop.f32.mrb[16].mxu0  ;;  %v1253_v50 = vpop.f32.mrb[16].mxu1 }
 0x11b   : > { %v1206_v52 = vpop.f32.mrb[17].mxu0  ;;  %v1254_v53 = vpop.f32.mrb[17].mxu1 }
 0x11c   : > { %v1207_v54 = vadd.f32 %v1206_v52, %v1205_v49  ;;  %v1255_v55 = vadd.f32 %v1254_v53, %v1253_v50  ;;  %v1208_v56 = vpop.f32.mrb[18].mxu0  ;;  %v1256_v57 = vpop.f32.mrb[18].mxu1 }
 0x11d   : > { %v1209_v58 = vpop.f32.mrb[19].mxu0  ;;  %v1257_v59 = vpop.f32.mrb[19].mxu1 }
 0x11e   : > { %v931_v60 = vadd.f32 %v1207_v54, %v1536_v51  ;;  %v947_v61 = vadd.f32 %v1255_v55, %v1536_v51  ;;  %v1210_v62 = vadd.f32 %v1209_v58, %v1208_v56  ;;  %v1258_v63 = vadd.f32 %v1257_v59, %v1256_v57 }
 0x120   : > { %963 = vst [vmem:[%s1543_s8 + $0x40] sm:$0xff] %v931_v60  ;;  %979 = vst [vmem:[%s1543_s8 + $0xc0] sm:$0xff] %v947_v61  ;;  %v932_v0 = vadd.f32 %v1210_v62, %v1536_v51  ;;  %v948_v1 = vadd.f32 %v1258_v63, %v1536_v51 }
 0x122   : > { %964 = vst [vmem:[%s1543_s8 + $0x48] sm:$0xff] %v932_v0  ;;  %980 = vst [vmem:[%s1543_s8 + $0xc8] sm:$0xff] %v948_v1  ;;  %v1211_v2 = vpop.f32.mrb[20].mxu0  ;;  %v1259_v3 = vpop.f32.mrb[20].mxu1 }
 0x123   : > { %v1212_v4 = vpop.f32.mrb[21].mxu0  ;;  %v1260_v5 = vpop.f32.mrb[21].mxu1 }
 0x124   : > { %v1213_v6 = vadd.f32 %v1212_v4, %v1211_v2  ;;  %v1261_v7 = vadd.f32 %v1260_v5, %v1259_v3  ;;  %v1214_v8 = vpop.f32.mrb[22].mxu0  ;;  %v1262_v9 = vpop.f32.mrb[22].mxu1 }
 0x125   : > { %v1215_v10 = vpop.f32.mrb[23].mxu0  ;;  %v1263_v11 = vpop.f32.mrb[23].mxu1 }
 0x126   : > { %v933_v12 = vadd.f32 %v1213_v6, %v1536_v51  ;;  %v949_v13 = vadd.f32 %v1261_v7, %v1536_v51  ;;  %v1216_v14 = vadd.f32 %v1215_v10, %v1214_v8  ;;  %v1264_v15 = vadd.f32 %v1263_v11, %v1262_v9 }
 0x128   : > { %965 = vst [vmem:[%s1543_s8 + $0x50] sm:$0xff] %v933_v12  ;;  %981 = vst [vmem:[%s1543_s8 + $0xd0] sm:$0xff] %v949_v13  ;;  %v934_v16 = vadd.f32 %v1216_v14, %v1536_v51  ;;  %v950_v17 = vadd.f32 %v1264_v15, %v1536_v51 }
 0x12a   : > { %966 = vst [vmem:[%s1543_s8 + $0x58] sm:$0xff] %v934_v16  ;;  %982 = vst [vmem:[%s1543_s8 + $0xd8] sm:$0xff] %v950_v17  ;;  %v1217_v18 = vpop.f32.mrb[24].mxu0  ;;  %v1265_v19 = vpop.f32.mrb[24].mxu1 }
 0x12b   : > { %v1218_v20 = vpop.f32.mrb[25].mxu0  ;;  %v1266_v21 = vpop.f32.mrb[25].mxu1 }
 0x12c   : > { %v1219_v22 = vadd.f32 %v1218_v20, %v1217_v18  ;;  %v1267_v23 = vadd.f32 %v1266_v21, %v1265_v19  ;;  %v1220_v24 = vpop.f32.mrb[26].mxu0  ;;  %v1268_v25 = vpop.f32.mrb[26].mxu1 }
 0x12d   : > { %v1221_v26 = vpop.f32.mrb[27].mxu0  ;;  %v1269_v27 = vpop.f32.mrb[27].mxu1 }
 0x12e   : > { %v935_v28 = vadd.f32 %v1219_v22, %v1536_v51  ;;  %v951_v29 = vadd.f32 %v1267_v23, %v1536_v51  ;;  %v1222_v30 = vadd.f32 %v1221_v26, %v1220_v24  ;;  %v1270_v31 = vadd.f32 %v1269_v27, %v1268_v25 }
 0x130   : > { %967 = vst [vmem:[%s1543_s8 + $0x60] sm:$0xff] %v935_v28  ;;  %983 = vst [vmem:[%s1543_s8 + $0xe0] sm:$0xff] %v951_v29  ;;  %v936_v32 = vadd.f32 %v1222_v30, %v1536_v51  ;;  %v952_v33 = vadd.f32 %v1270_v31, %v1536_v51 }
 0x132   : > { %968 = vst [vmem:[%s1543_s8 + $0x68] sm:$0xff] %v936_v32  ;;  %984 = vst [vmem:[%s1543_s8 + $0xe8] sm:$0xff] %v952_v33  ;;  %v1223_v34 = vpop.f32.mrb[28].mxu0  ;;  %v1271_v35 = vpop.f32.mrb[28].mxu1 }
 0x133   : > { %v1224_v36 = vpop.f32.mrb[29].mxu0  ;;  %v1272_v37 = vpop.f32.mrb[29].mxu1 }
 0x134   : > { %v1225_v38 = vadd.f32 %v1224_v36, %v1223_v34  ;;  %v1273_v39 = vadd.f32 %v1272_v37, %v1271_v35  ;;  %v1226_v40 = vpop.f32.mrb[30].mxu0  ;;  %v1274_v41 = vpop.f32.mrb[30].mxu1 }
 0x135   : > { %v1227_v42 = vpop.f32.mrb[31].mxu0  ;;  %v1275_v43 = vpop.f32.mrb[31].mxu1 }
 0x136   : > { %v937_v44 = vadd.f32 %v1225_v38, %v1536_v51  ;;  %v953_v45 = vadd.f32 %v1273_v39, %v1536_v51  ;;  %v1228_v46 = vadd.f32 %v1227_v42, %v1226_v40  ;;  %v1276_v47 = vadd.f32 %v1275_v43, %v1274_v41 }
 0x138   : > { %969 = vst [vmem:[%s1543_s8 + $0x70] sm:$0xff] %v937_v44  ;;  %985 = vst [vmem:[%s1543_s8 + $0xf0] sm:$0xff] %v953_v45  ;;  %v938_v48 = vadd.f32 %v1228_v46, %v1536_v51  ;;  %v954_v49 = vadd.f32 %v1276_v47, %v1536_v51 }
 0x13a   : > { %970 = vst [vmem:[%s1543_s8 + $0x78] sm:$0xff] %v938_v48  ;;  %986 = vst [vmem:[%s1543_s8 + $0xf8] sm:$0xff] %v954_v49 }
 0x13b PF: > { %s13_s14 = sadd.s32 1, %s1403_s14   ;;  %s1622_s12 = smov %s1399_s13 }
 0x13c   : > { %p10_p5 = scmp.ge.s32.totalorder %s13_s14, 4   ;;  %s1623_s13 = smov %s1625_s15 }
 0x13e   :  { %12 = sbr.rel (!%p10_p5) target bundleno = 2 (0x2), region = 76 }

// kernel: default_generator_forward.55
= control target key start
LH: loop header
LB: loop body
LE: loop exit
PB: predicated region body
PF: predicated region fallthrough
CT: control target
= control target key end

     0   :  { %s1181_s12 = smov 0   ;;  %s1183_s13 = smov 0   ;;  %s1353_s0 = inlined_call_operand.vmem [shape: bf16[128,768], index: 0, kind: input, shape index: {}]   ;;  %s1354_s1 = inlined_call_operand.vmem [shape: bf16[768,128], index: 1, kind: input, shape index: {}]   ;;  %s1355_s2 = inlined_call_operand.vmem [shape: f32[1,128], index: 2, kind: input, shape index: {}]   ;;  %s1356_s3 = inlined_call_operand.vmem [shape: f32[128,128], index: 3, kind: output, shape index: {}]  }
   0x1   :  { %s1185_s14 = smov 0   ;;  %s1187_s15 = smov 0  }
   0x2   :  { %s1189_s16 = smov 0  }
   0x3 LB: > { %s25_s17 = sadd.s32 1, %s1154_s15  ;;  %p48_p1 = scmp.ne.s32.totalorder %s1146_s13, %s1142_s12  ;;  %s1158_s16 = sphi %s1189_s16, %s13_s16   ;;  %s1154_s15 = sphi %s1187_s15, %s1360_s15   ;;  %s1150_s14 = sphi %s1185_s14, %s1359_s14   ;;  %s1146_s13 = sphi %s1183_s13, %s1358_s13   ;;  %s1142_s12 = sphi %s1181_s12, %s1357_s12  }
   0x4   : > { %p26_p0 = scmp.ge.s32.totalorder %s25_s17, 3  ;;  %p49_p2 = scmp.eq.s32.totalorder %s1158_s16, 0 }
   0x5   : > { %s41_s19 = sadd.s32 1, %s1146_s13  ;;  %p911_p5 = scmp.ge.s32.totalorder %s1158_s16, 3 }
   0x6   : > { %s1362_s17 = smov (%p26_p0, %s25_s17), 0  ;;  %p50_p3 = por %p49_p2, %p48_p1 }
   0x7   : > { %s37_s18 = ssub.s32 %s1154_s15, %s1362_s17  ;;  %162 = sbr.rel (%p911_p5) target bundleno = 26 (0x1a), region = 20 }
   0x8   : > { %p39_p4 = scmp.eq.s32.totalorder %s37_s18, 0 }
   0xa   : > { %s1216_s20 = scalar_select %p39_p4, %s1146_s13, %s41_s19  }
   0xe   : > { %165 = sbr.rel (!%p50_p3) target bundleno = 26 (0x1a), region = 24  ;;  %s167_s21 = sand.u32 (%p50_p3), 1, %s1146_s13  }
   0xf   : > { %s958_s22 = sshll.u32 (%p50_p3), %s1154_s15, 3  ;;  %s912_s23 = sshll.u32 (%p50_p3), %s167_s21, 7 }
  0x10   : > { %s1224_s26 = scalar_lea.vmem (%p50_p3), %s1353_s0, %s958_s22  ;;  %s169_s27 = scalar_lea.vmem (%p50_p3), [#allocation3], %s912_s23 }
  0x11   : > { %v233_v0 = vld [vmem:[%s1224_s26] sm:$0xff] (%p50_p3)  ;;  %v235_v1 = vld [vmem:[%s1224_s26 + $0x18] sm:$0xff] (%p50_p3)  ;;  %v237_v2 = vld [vmem:[%s1224_s26 + $0x30] sm:$0xff] (%p50_p3) }
  0x12   : > { %234 = vst [vmem:[%s169_s27] sm:$0xff] (%p50_p3), %v233_v0  ;;  %236 = vst [vmem:[%s169_s27 + $0x8] sm:$0xff] (%p50_p3), %v235_v1  ;;  %v239_v3 = vld [vmem:[%s1224_s26 + $0x48] sm:$0xff] (%p50_p3)  ;;  %v241_v4 = vld [vmem:[%s1224_s26 + $0x60] sm:$0xff] (%p50_p3) }
  0x13   : > { %238 = vst [vmem:[%s169_s27 + $0x10] sm:$0xff] (%p50_p3), %v237_v2  ;;  %v243_v5 = vld [vmem:[%s1224_s26 + $0x78] sm:$0xff] (%p50_p3)  ;;  %240 = vst [vmem:[%s169_s27 + $0x18] sm:$0xff] (%p50_p3), %v239_v3  ;;  %v245_v6 = vld [vmem:[%s1224_s26 + $0x90] sm:$0xff] (%p50_p3) }
  0x14   : > { %242 = vst [vmem:[%s169_s27 + $0x20] sm:$0xff] (%p50_p3), %v241_v4  ;;  %244 = vst [vmem:[%s169_s27 + $0x28] sm:$0xff] (%p50_p3), %v243_v5  ;;  %v247_v7 = vld [vmem:[%s1224_s26 + $0xa8] sm:$0xff] (%p50_p3)  ;;  %v249_v8 = vld [vmem:[%s1224_s26 + $0xc0] sm:$0xff] (%p50_p3) }
  0x15   : > { %246 = vst [vmem:[%s169_s27 + $0x30] sm:$0xff] %v245_v6  ;;  %248 = vst [vmem:[%s169_s27 + $0x38] sm:$0xff] %v247_v7  ;;  %v251_v9 = vld [vmem:[%s1224_s26 + $0xd8] sm:$0xff]  ;;  %v253_v10 = vld [vmem:[%s1224_s26 + $0xf0] sm:$0xff] }
  0x16   : > { %250 = vst [vmem:[%s169_s27 + $0x40] sm:$0xff] %v249_v8  ;;  %v255_v11 = vld [vmem:[%s1224_s26 + $0x108] sm:$0xff]  ;;  %252 = vst [vmem:[%s169_s27 + $0x48] sm:$0xff] %v251_v9  ;;  %v257_v12 = vld [vmem:[%s1224_s26 + $0x120] sm:$0xff] }
  0x17   : > { %254 = vst [vmem:[%s169_s27 + $0x50] sm:$0xff] %v253_v10  ;;  %256 = vst [vmem:[%s169_s27 + $0x58] sm:$0xff] %v255_v11  ;;  %v259_v13 = vld [vmem:[%s1224_s26 + $0x138] sm:$0xff]  ;;  %v261_v14 = vld [vmem:[%s1224_s26 + $0x150] sm:$0xff] }
  0x18   : > { %258 = vst [vmem:[%s169_s27 + $0x60] sm:$0xff] %v257_v12  ;;  %260 = vst [vmem:[%s169_s27 + $0x68] sm:$0xff] %v259_v13  ;;  %v263_v15 = vld [vmem:[%s1224_s26 + $0x168] sm:$0xff] }
  0x19   : > { %262 = vst [vmem:[%s169_s27 + $0x70] sm:$0xff] %v261_v14  ;;  %264 = vst [vmem:[%s169_s27 + $0x78] sm:$0xff] %v263_v15 }
  0x1a PF: > { %p915_p6 = scmp.ge.s32.totalorder %s1158_s16, 1  ;;  %p281_p7 = scmp.lt.s32.totalorder %s1158_s16, 4 }
  0x1c   : > { %p282_p8 = pnand %p915_p6, %p281_p7 }
  0x1d   : > { %s288_s28 = sand.u32 (!%p282_p8), 1, %s1142_s12   ;;  %s917_s29 = sshll.u32 (!%p282_p8), %s1150_s14, 5 }
  0x1e   : > { %285 = sbr.rel (%p282_p8) target bundleno = 335 (0x14f), region = 66  ;;  %s916_s30 = sshll.u32 (!%p282_p8), %s288_s28, 7 }
  0x1f   : > { %p328_p9 = scmp.lt.s32.totalorder (!%p282_p8), %s917_s29, 95  ;;  %s1251_s8 = scalar_lea.vmem (!%p282_p8), [#allocation3], %s916_s30 }
  0x20   : > { %p919_p10 = scmp.ne.s32.totalorder (!%p282_p8), %s1150_s14, 0 }
  0x25   : > { %s1364_s29 = smov (!%p328_p9, %s917_s29), 95  ;;  %352 = sbr.rel (%p919_p10) target bundleno = 47 (0x2f), region = 74 }
  0x26   : > { %s918_s4 = sshll.u32 %s1364_s29, 2  ;;  %v1160_v16 = vmov (!%p919_p10), 0.0  }
  0x27   : > { %s1249_s7 = scalar_lea.vmem %s1354_s1, %s918_s4  ;;  %353 = vst [vmem:[#allocation2] sm:$0xff] (!%p919_p10), %v1160_v16  ;;  %354 = vst [vmem:[#allocation2 + $0x8] sm:$0xff] (!%p919_p10), %v1160_v16 }
  0x28   : > { %355 = vst [vmem:[#allocation2 + $0x10] sm:$0xff] (!%p919_p10), %v1160_v16  ;;  %356 = vst [vmem:[#allocation2 + $0x18] sm:$0xff] (!%p919_p10), %v1160_v16 }
  0x29   : > { %357 = vst [vmem:[#allocation2 + $0x20] sm:$0xff] (!%p919_p10), %v1160_v16  ;;  %358 = vst [vmem:[#allocation2 + $0x28] sm:$0xff] (!%p919_p10), %v1160_v16 }
  0x2a   : > { %359 = vst [vmem:[#allocation2 + $0x30] sm:$0xff] (!%p919_p10), %v1160_v16  ;;  %360 = vst [vmem:[#allocation2 + $0x38] sm:$0xff] (!%p919_p10), %v1160_v16 }
  0x2b   : > { %361 = vst [vmem:[#allocation2 + $0x40] sm:$0xff] (!%p919_p10), %v1160_v16  ;;  %362 = vst [vmem:[#allocation2 + $0x48] sm:$0xff] (!%p919_p10), %v1160_v16 }
  0x2c   : > { %363 = vst [vmem:[#allocation2 + $0x50] sm:$0xff] %v1160_v16  ;;  %364 = vst [vmem:[#allocation2 + $0x58] sm:$0xff] %v1160_v16 }
  0x2d   : > { %365 = vst [vmem:[#allocation2 + $0x60] sm:$0xff] %v1160_v16  ;;  %366 = vst [vmem:[#allocation2 + $0x68] sm:$0xff] %v1160_v16 }
  0x2e   : > { %367 = vst [vmem:[#allocation2 + $0x70] sm:$0xff] %v1160_v16  ;;  %368 = vst [vmem:[#allocation2 + $0x78] sm:$0xff] %v1160_v16 }
  0x2f PF: > { %v1080_v17 = vld [vmem:[%s1249_s7 + $0x40] sm:$0xff]   ;;  %v1082_v19 = vld [vmem:[%s1249_s7 + $0x48] sm:$0xff]   ;;  %v1084_v21 = vld [vmem:[%s1249_s7 + $0x50] sm:$0xff]   ;;  %p952_p11 = scmp.ne.s32.totalorder %s1150_s14, 2 }
  0x30   : > { %v1081_v18 = vld [vmem:[%s1249_s7] sm:$0xff]   ;;  %959 = vmatprep.subr.bf16.mxu0 %v1080_v17  ;;  %1023 = vmatprep.subr.bf16.mxu1 %v1080_v17  ;;  %v1083_v20 = vld [vmem:[%s1249_s7 + $0x8] sm:$0xff]   ;;  %v1085_v22 = vld [vmem:[%s1249_s7 + $0x10] sm:$0xff]  }
  0x31   : > { %960 = vmatpush3.bf16.msra.mxu0 %v1081_v18  ;;  %1031 = vmatpush3.bf16.msra.mxu1 %v1081_v18  ;;  %v1086_v23 = vld [vmem:[%s1249_s7 + $0x58] sm:$0xff]   ;;  %v1088_v25 = vld [vmem:[%s1249_s7 + $0x60] sm:$0xff]   ;;  %v1090_v27 = vld [vmem:[%s1249_s7 + $0x68] sm:$0xff]  }
  0x32   : > { %961 = vmatprep.subr.bf16.mxu0 %v1082_v19  ;;  %1024 = vmatprep.subr.bf16.mxu1 %v1082_v19  ;;  %v1087_v24 = vld [vmem:[%s1249_s7 + $0x18] sm:$0xff]   ;;  %v1089_v26 = vld [vmem:[%s1249_s7 + $0x20] sm:$0xff]   ;;  %v1091_v30 = vld [vmem:[%s1249_s7 + $0x28] sm:$0xff]  }
  0x33   : > { %v1098_v28 = vld [vmem:[%s1251_s8 + $0x4] ss:$8 sps:$4 sm:$0xff]   ;;  %v1092_v31 = vld [vmem:[%s1249_s7 + $0x70] sm:$0xff]   ;;  %v1094_v33 = vld [vmem:[%s1249_s7 + $0x78] sm:$0xff]  }
  0x34   : > { %v1101_v29 = vld [vmem:[%s1251_s8 + $0x44] ss:$8 sps:$4 sm:$0xff]   ;;  %641 = vmatprep.mubr.bf16.mxu0 %v1098_v28  ;;  %v1093_v32 = vld [vmem:[%s1249_s7 + $0x30] sm:$0xff]   ;;  %v1095_v34 = vld [vmem:[%s1249_s7 + $0x38] sm:$0xff]  }
  0x35   : > { %962 = vmatpush3.bf16.msra.mxu0 %v1083_v20  ;;  %1032 = vmatpush3.bf16.msra.mxu1 %v1083_v20  ;;  %v1096_v35 = vld [vmem:[%s1251_s8] ss:$8 sps:$4 sm:$0xff]   ;;  %v1102_v37 = vld [vmem:[%s1251_s8 + $0x14] ss:$8 sps:$4 sm:$0xff]   ;;  %v1106_v39 = vld [vmem:[%s1251_s8 + $0x10] ss:$8 sps:$4 sm:$0xff]  }
  0x36   : > { %963 = vmatprep.subr.bf16.mxu0 %v1084_v21  ;;  %1025 = vmatprep.subr.bf16.mxu1 %v1084_v21  ;;  %v1099_v36 = vld [vmem:[%s1251_s8 + $0x40] ss:$8 sps:$4 sm:$0xff]   ;;  %v1104_v38 = vld [vmem:[%s1251_s8 + $0x54] ss:$8 sps:$4 sm:$0xff]   ;;  %v1107_v40 = vld [vmem:[%s1251_s8 + $0x50] ss:$8 sps:$4 sm:$0xff]  }
  0x37   : > { %673 = vmatprep.mubr.bf16.mxu1 %v1101_v29  ;;  %v1108_v41 = vld [vmem:[%s1251_s8 + $0x24] ss:$8 sps:$4 sm:$0xff]   ;;  %v1112_v43 = vld [vmem:[%s1251_s8 + $0x20] ss:$8 sps:$4 sm:$0xff]   ;;  %v1114_v45 = vld [vmem:[%s1251_s8 + $0x34] ss:$8 sps:$4 sm:$0xff]  }
  0x38   : > { %v1110_v42 = vld [vmem:[%s1251_s8 + $0x64] ss:$8 sps:$4 sm:$0xff]   ;;  %v1113_v44 = vld [vmem:[%s1251_s8 + $0x60] ss:$8 sps:$4 sm:$0xff]   ;;  %v1116_v46 = vld [vmem:[%s1251_s8 + $0x74] ss:$8 sps:$4 sm:$0xff]  }
  0x39   : > { %964 = vmatpush3.bf16.msra.mxu0 %v1085_v22  ;;  %1033 = vmatpush3.bf16.msra.mxu1 %v1085_v22  ;;  %v1118_v47 = vld [vmem:[%s1251_s8 + $0x30] ss:$8 sps:$4 sm:$0xff]   ;;  %v369_v51 = vld [vmem:[#allocation2] sm:$0xff]  ;;  %v370_v59 = vld [vmem:[#allocation2 + $0x8] sm:$0xff] }
  0x3a   : > { %965 = vmatprep.subr.bf16.mxu0 %v1086_v23  ;;  %1026 = vmatprep.subr.bf16.mxu1 %v1086_v23  ;;  %v1119_v48 = vld [vmem:[%s1251_s8 + $0x70] ss:$8 sps:$4 sm:$0xff]   ;;  %v377_v53 = vld [vmem:[#allocation2 + $0x40] sm:$0xff]  ;;  %v378_v61 = vld [vmem:[#allocation2 + $0x48] sm:$0xff] }
  0x3b   : > { %v371_v7 = vld [vmem:[#allocation2 + $0x10] sm:$0xff]  ;;  %v372_v15 = vld [vmem:[#allocation2 + $0x18] sm:$0xff]  ;;  %v381_v29 = vld [vmem:[#allocation2 + $0x60] sm:$0xff] }
  0x3c   : > { %v379_v9 = vld [vmem:[#allocation2 + $0x50] sm:$0xff]  ;;  %v380_v17 = vld [vmem:[#allocation2 + $0x58] sm:$0xff] }
  0x3d   : > { %966 = vmatpush3.bf16.msra.mxu0 %v1087_v24  ;;  %1034 = vmatpush3.bf16.msra.mxu1 %v1087_v24 }
  0x3e   : > { %967 = vmatprep.subr.bf16.mxu0 %v1088_v25  ;;  %1027 = vmatprep.subr.bf16.mxu1 %v1088_v25 }
  0x41   : > { %968 = vmatpush3.bf16.msra.mxu0 %v1089_v26  ;;  %1035 = vmatpush3.bf16.msra.mxu1 %v1089_v26 }
  0x42   : > { %969 = vmatprep.subr.bf16.mxu0 %v1090_v27  ;;  %1028 = vmatprep.subr.bf16.mxu1 %v1090_v27  ;;  %v373_v27 = vld [vmem:[#allocation2 + $0x20] sm:$0xff] }
  0x45   : > { %970 = vmatpush3.bf16.msra.mxu0 %v1091_v30  ;;  %1036 = vmatpush3.bf16.msra.mxu1 %v1091_v30 }
  0x46   : > { %971 = vmatprep.subr.bf16.mxu0 %v1092_v31  ;;  %1029 = vmatprep.subr.bf16.mxu1 %v1092_v31 }
  0x49   : > { %972 = vmatpush3.bf16.msra.mxu0 %v1093_v32  ;;  %1037 = vmatpush3.bf16.msra.mxu1 %v1093_v32 }
  0x4a   : > { %973 = vmatprep.subr.bf16.mxu0 %v1094_v33  ;;  %1030 = vmatprep.subr.bf16.mxu1 %v1094_v33 }
  0x4d   : > { %974 = vmatpush3.bf16.msra.mxu0 %v1095_v34  ;;  %1038 = vmatpush3.bf16.msra.mxu1 %v1095_v34 }
  0x50   : > { %642 = vmatmul.mubr.bf16.vlgmr.msra.gmra.mrb[0].mxu0 %v1096_v35  ;;  %674 = vmatmul.mubr.bf16.vlgmr.msra.gmra.mrb[0].mxu1 %v1099_v36  ;;  %v374_v35 = vld [vmem:[#allocation2 + $0x28] sm:$0xff] }
  0x51   : > { %649 = vmatprep.mubr.bf16.mxu0 %v1102_v37  ;;  %681 = vmatprep.mubr.bf16.mxu1 %v1104_v38  ;;  %v382_v37 = vld [vmem:[#allocation2 + $0x68] sm:$0xff] }
  0x58   : > { %650 = vmatmul.mubr.bf16.gmra.mrb[4].mxu0 %v1106_v39  ;;  %682 = vmatmul.mubr.bf16.gmra.mrb[4].mxu1 %v1107_v40 }
  0x59   : > { %657 = vmatprep.mubr.bf16.mxu0 %v1108_v41  ;;  %689 = vmatprep.mubr.bf16.mxu1 %v1110_v42 }
  0x60   : > { %658 = vmatmul.mubr.bf16.gmra.mrb[8].mxu0 %v1112_v43  ;;  %690 = vmatmul.mubr.bf16.gmra.mrb[8].mxu1 %v1113_v44 }
  0x61   : > { %665 = vmatprep.mubr.bf16.mxu0 %v1114_v45  ;;  %697 = vmatprep.mubr.bf16.mxu1 %v1116_v46 }
  0x68   : > { %666 = vmatmul.mubr.bf16.gmra.mrb[12].mxu0 %v1118_v47  ;;  %698 = vmatmul.mubr.bf16.gmra.mrb[12].mxu1 %v1119_v48  ;;  %v375_v47 = vld [vmem:[#allocation2 + $0x30] sm:$0xff] }
 0x123   : > { %v975_v49 = vpop.f32.mrb[0].mxu0  ;;  %v999_v50 = vpop.f32.mrb[0].mxu1 }
 0x124   : > { %v976_v52 = vpop.f32.mrb[1].mxu0  ;;  %v1000_v54 = vpop.f32.mrb[1].mxu1 }
 0x125   : > { %v977_v55 = vadd.f32 %v976_v52, %v975_v49  ;;  %v1001_v56 = vadd.f32 %v1000_v54, %v999_v50  ;;  %v978_v57 = vpop.f32.mrb[2].mxu0  ;;  %v1002_v58 = vpop.f32.mrb[2].mxu1  ;;  %v383_v49 = vld [vmem:[#allocation2 + $0x70] sm:$0xff] }
 0x126   : > { %v979_v60 = vpop.f32.mrb[3].mxu0  ;;  %v1003_v62 = vpop.f32.mrb[3].mxu1 }
 0x127   : > { %v706_v63 = vadd.f32 %v977_v55, %v369_v51  ;;  %v714_v0 = vadd.f32 %v1001_v56, %v377_v53  ;;  %v980_v1 = vadd.f32 %v979_v60, %v978_v57  ;;  %v1004_v2 = vadd.f32 %v1003_v62, %v1002_v58  ;;  %v376_v55 = vld [vmem:[#allocation2 + $0x38] sm:$0xff] }
 0x128   : > { %v384_v57 = vld [vmem:[#allocation2 + $0x78] sm:$0xff] }
 0x129   : > { %722 = vst [vmem:[#allocation2] sm:$0xff] %v706_v63  ;;  %730 = vst [vmem:[#allocation2 + $0x40] sm:$0xff] %v714_v0  ;;  %v707_v3 = vadd.f32 %v980_v1, %v370_v59  ;;  %v715_v4 = vadd.f32 %v1004_v2, %v378_v61  ;;  %v953_v2 = vld [vmem:[%s1355_s2] ss:$0 sm:$0xff] (!%p952_p11) }
 0x12b   : > { %723 = vst [vmem:[#allocation2 + $0x8] sm:$0xff] %v707_v3  ;;  %731 = vst [vmem:[#allocation2 + $0x48] sm:$0xff] %v715_v4  ;;  %v981_v5 = vpop.f32.mrb[4].mxu0  ;;  %v1005_v6 = vpop.f32.mrb[4].mxu1 }
 0x12c   : > { %v982_v8 = vpop.f32.mrb[5].mxu0  ;;  %v1006_v10 = vpop.f32.mrb[5].mxu1 }
 0x12d   : > { %v983_v11 = vadd.f32 %v982_v8, %v981_v5  ;;  %v1007_v12 = vadd.f32 %v1006_v10, %v1005_v6  ;;  %v984_v13 = vpop.f32.mrb[6].mxu0  ;;  %v1008_v14 = vpop.f32.mrb[6].mxu1 }
 0x12e   : > { %v985_v16 = vpop.f32.mrb[7].mxu0  ;;  %v1009_v18 = vpop.f32.mrb[7].mxu1 }
 0x12f   : > { %v708_v19 = vadd.f32 %v983_v11, %v371_v7  ;;  %v716_v20 = vadd.f32 %v1007_v12, %v379_v9  ;;  %v986_v21 = vadd.f32 %v985_v16, %v984_v13  ;;  %v1010_v22 = vadd.f32 %v1009_v18, %v1008_v14 }
 0x130   : > { %v742_v1 = vld [vmem:[#allocation2] sm:$0xff] (!%p952_p11) }
 0x131   : > { %724 = vst [vmem:[#allocation2 + $0x10] sm:$0xff] %v708_v19  ;;  %732 = vst [vmem:[#allocation2 + $0x50] sm:$0xff] %v716_v20  ;;  %v709_v23 = vadd.f32 %v986_v21, %v372_v15  ;;  %v717_v24 = vadd.f32 %v1010_v22, %v380_v17  ;;  %v765_v4 = vadd.f32 (!%p952_p11), %v953_v2, %v742_v1  ;;  %v750_v18 = vld [vmem:[#allocation2 + $0x40] sm:$0xff] (!%p952_p11) }
 0x132   : > { %v743_v3 = vld [vmem:[#allocation2 + $0x8] sm:$0xff] (!%p952_p11)  ;;  %v773_v21 = vadd.f32 (!%p952_p11), %v953_v2, %v750_v18 }
 0x133   : > { %725 = vst [vmem:[#allocation2 + $0x18] sm:$0xff] %v709_v23  ;;  %733 = vst [vmem:[#allocation2 + $0x58] sm:$0xff] %v717_v24  ;;  %v987_v25 = vpop.f32.mrb[8].mxu0  ;;  %v1011_v26 = vpop.f32.mrb[8].mxu1  ;;  %v766_v5 = vadd.f32 (!%p952_p11), %v953_v2, %v743_v3  ;;  %v751_v19 = vld [vmem:[#allocation2 + $0x48] sm:$0xff] (!%p952_p11) }
 0x134   : > { %v988_v28 = vpop.f32.mrb[9].mxu0  ;;  %v1012_v30 = vpop.f32.mrb[9].mxu1  ;;  %781 = vst [vmem:[%s1356_s3] sm:$0xff] (!%p952_p11), %v765_v4  ;;  %v774_v22 = vadd.f32 (!%p952_p11), %v953_v2, %v751_v19  ;;  %789 = vst [vmem:[%s1356_s3 + $0x40] sm:$0xff] (!%p952_p11), %v773_v21 }
 0x135   : > { %v989_v31 = vadd.f32 %v988_v28, %v987_v25  ;;  %v1013_v32 = vadd.f32 %v1012_v30, %v1011_v26  ;;  %v990_v33 = vpop.f32.mrb[10].mxu0  ;;  %v1014_v34 = vpop.f32.mrb[10].mxu1  ;;  %782 = vst [vmem:[%s1356_s3 + $0x8] sm:$0xff] (!%p952_p11), %v766_v5 }
 0x136   : > { %v991_v36 = vpop.f32.mrb[11].mxu0  ;;  %v1015_v38 = vpop.f32.mrb[11].mxu1  ;;  %790 = vst [vmem:[%s1356_s3 + $0x48] sm:$0xff] (!%p952_p11), %v774_v22 }
 0x137   : > { %v710_v39 = vadd.f32 %v989_v31, %v373_v27  ;;  %v718_v40 = vadd.f32 %v1013_v32, %v381_v29  ;;  %v992_v41 = vadd.f32 %v991_v36, %v990_v33  ;;  %v1016_v42 = vadd.f32 %v1015_v38, %v1014_v34 }
 0x138   : > { %v744_v6 = vld [vmem:[#allocation2 + $0x10] sm:$0xff] (!%p952_p11) }
 0x139   : > { %726 = vst [vmem:[#allocation2 + $0x20] sm:$0xff] %v710_v39  ;;  %734 = vst [vmem:[#allocation2 + $0x60] sm:$0xff] %v718_v40  ;;  %v711_v43 = vadd.f32 %v992_v41, %v374_v35  ;;  %v719_v44 = vadd.f32 %v1016_v42, %v382_v37  ;;  %v767_v9 = vadd.f32 (!%p952_p11), %v953_v2, %v744_v6  ;;  %v752_v20 = vld [vmem:[#allocation2 + $0x50] sm:$0xff] (!%p952_p11) }
 0x13a   : > { %v745_v7 = vld [vmem:[#allocation2 + $0x18] sm:$0xff] (!%p952_p11)  ;;  %v775_v23 = vadd.f32 (!%p952_p11), %v953_v2, %v752_v20 }
 0x13b   : > { %727 = vst [vmem:[#allocation2 + $0x28] sm:$0xff] %v711_v43  ;;  %735 = vst [vmem:[#allocation2 + $0x68] sm:$0xff] %v719_v44  ;;  %v993_v45 = vpop.f32.mrb[12].mxu0  ;;  %v1017_v46 = vpop.f32.mrb[12].mxu1  ;;  %v768_v10 = vadd.f32 (!%p952_p11), %v953_v2, %v745_v7  ;;  %v753_v24 = vld [vmem:[#allocation2 + $0x58] sm:$0xff] (!%p952_p11) }
 0x13c   : > { %v994_v48 = vpop.f32.mrb[13].mxu0  ;;  %v1018_v50 = vpop.f32.mrb[13].mxu1  ;;  %783 = vst [vmem:[%s1356_s3 + $0x10] sm:$0xff] (!%p952_p11), %v767_v9  ;;  %v776_v27 = vadd.f32 (!%p952_p11), %v953_v2, %v753_v24  ;;  %791 = vst [vmem:[%s1356_s3 + $0x50] sm:$0xff] (!%p952_p11), %v775_v23 }
 0x13d   : > { %v995_v51 = vadd.f32 %v994_v48, %v993_v45  ;;  %v1019_v52 = vadd.f32 %v1018_v50, %v1017_v46  ;;  %v996_v53 = vpop.f32.mrb[14].mxu0  ;;  %v1020_v54 = vpop.f32.mrb[14].mxu1  ;;  %741 = sbr.rel (%p952_p11) target bundleno = 335 (0x14f), region = 78  ;;  %784 = vst [vmem:[%s1356_s3 + $0x18] sm:$0xff] (!%p952_p11), %v768_v10 }
 0x13e   : > { %v997_v56 = vpop.f32.mrb[15].mxu0  ;;  %v1021_v58 = vpop.f32.mrb[15].mxu1  ;;  %792 = vst [vmem:[%s1356_s3 + $0x58] sm:$0xff] (!%p952_p11), %v776_v27 }
 0x13f   : > { %v712_v59 = vadd.f32 %v995_v51, %v375_v47  ;;  %v720_v60 = vadd.f32 %v1019_v52, %v383_v49  ;;  %v998_v61 = vadd.f32 %v997_v56, %v996_v53  ;;  %v1022_v62 = vadd.f32 %v1021_v58, %v1020_v54 }
 0x140   : > { %v746_v8 = vld [vmem:[#allocation2 + $0x20] sm:$0xff] (!%p952_p11) }
 0x141   : > { %728 = vst [vmem:[#allocation2 + $0x30] sm:$0xff] %v712_v59  ;;  %736 = vst [vmem:[#allocation2 + $0x70] sm:$0xff] %v720_v60  ;;  %v713_v63 = vadd.f32 %v998_v61, %v376_v55  ;;  %v721_v0 = vadd.f32 %v1022_v62, %v384_v57  ;;  %v769_v11 = vadd.f32 (!%p952_p11), %v953_v2, %v746_v8  ;;  %v754_v25 = vld [vmem:[#allocation2 + $0x60] sm:$0xff] (!%p952_p11) }
 0x142   : > { %v747_v12 = vld [vmem:[#allocation2 + $0x28] sm:$0xff] (!%p952_p11)  ;;  %v777_v28 = vadd.f32 (!%p952_p11), %v953_v2, %v754_v25 }
 0x143   : > { %729 = vst [vmem:[#allocation2 + $0x38] sm:$0xff] %v713_v63  ;;  %737 = vst [vmem:[#allocation2 + $0x78] sm:$0xff] %v721_v0  ;;  %v770_v15 = vadd.f32 (!%p952_p11), %v953_v2, %v747_v12  ;;  %v755_v26 = vld [vmem:[#allocation2 + $0x68] sm:$0xff] (!%p952_p11) }
 0x144   : > { %785 = vst [vmem:[%s1356_s3 + $0x20] sm:$0xff] %v769_v11  ;;  %v778_v29 = vadd.f32 %v953_v2, %v755_v26  ;;  %793 = vst [vmem:[%s1356_s3 + $0x60] sm:$0xff] %v777_v28 }
 0x145   : > { %786 = vst [vmem:[%s1356_s3 + $0x28] sm:$0xff] %v770_v15 }
 0x146   : > { %794 = vst [vmem:[%s1356_s3 + $0x68] sm:$0xff] %v778_v29 }
 0x148   : > { %v748_v13 = vld [vmem:[#allocation2 + $0x30] sm:$0xff] }
 0x149   : > { %v771_v16 = vadd.f32 %v953_v2, %v748_v13  ;;  %v756_v30 = vld [vmem:[#allocation2 + $0x70] sm:$0xff] }
 0x14a   : > { %v749_v14 = vld [vmem:[#allocation2 + $0x38] sm:$0xff]  ;;  %v779_v32 = vadd.f32 %v953_v2, %v756_v30 }
 0x14b   : > { %v772_v17 = vadd.f32 %v953_v2, %v749_v14  ;;  %787 = vst [vmem:[%s1356_s3 + $0x30] sm:$0xff] %v771_v16  ;;  %v757_v31 = vld [vmem:[#allocation2 + $0x78] sm:$0xff] }
 0x14c   : > { %v780_v33 = vadd.f32 %v953_v2, %v757_v31  ;;  %795 = vst [vmem:[%s1356_s3 + $0x70] sm:$0xff] %v779_v32 }
 0x14d   : > { %788 = vst [vmem:[%s1356_s3 + $0x38] sm:$0xff] %v772_v17 }
 0x14e   : > { %796 = vst [vmem:[%s1356_s3 + $0x78] sm:$0xff] %v780_v33 }
 0x14f PF: > { %s13_s16 = sadd.s32 1, %s1158_s16   ;;  %s1357_s12 = smov %s1146_s13 }
 0x150   : > { %p10_p12 = scmp.ge.s32.totalorder %s13_s16, 5   ;;  %s1358_s13 = smov %s1216_s20 }
 0x151   : > { %s1359_s14 = smov %s1154_s15  ;;  %s1360_s15 = smov %s1362_s17 }
 0x152   :  { %12 = sbr.rel (!%p10_p12) target bundleno = 3 (0x3), region = 119 }

// kernel: default_generator_forward.56
= control target key start
LH: loop header
LB: loop body
LE: loop exit
PB: predicated region body
PF: predicated region fallthrough
CT: control target
= control target key end

     0   :  { %s456_s6 = smov 0   ;;  %s458_s7 = smov 0   ;;  %s493_s0 = inlined_call_operand.vmem [shape: f32[2,64,128], index: 0, kind: input, shape index: {}]   ;;  %s494_s1 = inlined_call_operand.vmem [shape: bf16[2,64,128], index: 1, kind: output, shape index: {}]  }
   0x1   :  { %s460_s8 = smov 0  }
   0x2 LB: > { %s23_s9 = sadd.s32 1, %s440_s7  ;;  %p348_p0 = scmp.ge.s32.totalorder %s444_s8, 1  ;;  %s444_s8 = sphi %s460_s8, %s11_s8   ;;  %s440_s7 = sphi %s458_s7, %s496_s7   ;;  %s436_s6 = sphi %s456_s6, %s495_s6  }
   0x3   : > { %p25_p1 = scmp.ge.s32.totalorder %s23_s9, 2  ;;  %p106_p2 = scmp.lt.s32.totalorder %s444_s8, 3 }
   0x5   : > { %s498_s9 = smov (%p25_p1, %s23_s9), 0  ;;  %p107_p3 = pnand %p348_p0, %p106_p2 }
   0x6   : > { %p132_p4 = scmp.lt.s32.totalorder (!%p107_p3), %s436_s6, 1 }
   0x7   : > { %110 = sbr.rel (%p107_p3) target bundleno = 73 (0x49), region = 24 }
   0xe   : > { %s500_s6 = smov (!%p132_p4, %s436_s6), 1 }
   0xf   : > { %s363_s10 = sshll.u32 %s500_s6, 6  ;;  %s364_s14 = sshll.u32 %s500_s6, 5 }
  0x10   : > { %s139_s13 = scalar_lea.vmem %s493_s0, %s363_s10  ;;  %s147_s17 = scalar_lea.vmem %s494_s1, %s364_s14 }
  0x11   : > { %v148_v0 = vld [vmem:[%s139_s13] sm:$0xff]  ;;  %v149_v1 = vld [vmem:[%s139_s13 + $0x8] sm:$0xff]  ;;  %v150_v2 = vld [vmem:[%s139_s13 + $0x10] sm:$0xff] }
  0x12   : > { %v151_v3 = vld [vmem:[%s139_s13 + $0x18] sm:$0xff]  ;;  %v156_v4 = vadd.f32 %v149_v1, %v148_v0  ;;  %v169_v5 = vmul.f32 %v148_v0, %v148_v0  ;;  %v170_v6 = vmul.f32 %v149_v1, %v149_v1  ;;  %v171_v7 = vmul.f32 %v150_v2, %v150_v2  ;;  %v152_v8 = vld [vmem:[%s139_s13 + $0x20] sm:$0xff]  ;;  %v153_v12 = vld [vmem:[%s139_s13 + $0x28] sm:$0xff] }
  0x13   : > { %v172_v10 = vmul.f32 %v151_v3, %v151_v3  ;;  %v173_v14 = vmul.f32 %v152_v8, %v152_v8  ;;  %v154_v16 = vld [vmem:[%s139_s13 + $0x30] sm:$0xff]  ;;  %v174_v18 = vmul.f32 %v153_v12, %v153_v12  ;;  %v155_v20 = vld [vmem:[%s139_s13 + $0x38] sm:$0xff] }
  0x14   : > { %v157_v9 = vadd.f32 %v156_v4, %v150_v2  ;;  %v177_v11 = vadd.f32 %v170_v6, %v169_v5  ;;  %v175_v22 = vmul.f32 %v154_v16, %v154_v16  ;;  %v176_v25 = vmul.f32 %v155_v20, %v155_v20 }
  0x16   : > { %v158_v13 = vadd.f32 %v157_v9, %v151_v3  ;;  %v178_v15 = vadd.f32 %v177_v11, %v171_v7 }
  0x18   : > { %v159_v17 = vadd.f32 %v158_v13, %v152_v8  ;;  %v179_v19 = vadd.f32 %v178_v15, %v172_v10 }
  0x1a   : > { %v160_v21 = vadd.f32 %v159_v17, %v153_v12  ;;  %v180_v23 = vadd.f32 %v179_v19, %v173_v14 }
  0x1c   : > { %v161_v24 = vadd.f32 %v160_v21, %v154_v16  ;;  %v181_v26 = vadd.f32 %v180_v23, %v174_v18 }
  0x1e   : > { %v162_v27 = vadd.f32 %v161_v24, %v155_v20  ;;  %v182_v28 = vadd.f32 %v181_v26, %v175_v22 }
  0x20   : > { %v163_v29 = vrot.slane %v162_v27, 4  ;;  %v183_v30 = vadd.f32 %v182_v28, %v176_v25 }
  0x22   : > { %v164_v31 = vadd.f32 %v163_v29, %v162_v27  ;;  %v184_v32 = vrot.slane %v183_v30, 4 }
  0x24   : > { %v165_v33 = vrot.slane %v164_v31, 2  ;;  %v185_v34 = vadd.f32 %v184_v32, %v183_v30 }
  0x26   : > { %v166_v35 = vadd.f32 %v165_v33, %v164_v31  ;;  %v186_v36 = vrot.slane %v185_v34, 2 }
  0x28   : > { %v167_v37 = vrot.slane %v166_v35, 1  ;;  %v187_v38 = vadd.f32 %v186_v36, %v185_v34 }
  0x2a   : > { %v168_v39 = vadd.f32 %v167_v37, %v166_v35  ;;  %v188_v40 = vrot.slane %v187_v38, 1 }
  0x2c   : > { %v189_v41 = vadd.f32 %v188_v40, %v187_v38  ;;  %v190_v42 = vmul.f32 0.015625, %v168_v39 }
  0x2e   : > { %v191_v43 = vmul.f32 0.015625, %v189_v41  ;;  %v192_v44 = vmul.f32 %v190_v42, %v190_v42  ;;  %v195_v48 = vsub.f32 %v148_v0, %v190_v42  ;;  %v196_v49 = vsub.f32 %v149_v1, %v190_v42 }
  0x2f   : > { %v197_v50 = vsub.f32 %v150_v2, %v190_v42  ;;  %v198_v51 = vsub.f32 %v151_v3, %v190_v42  ;;  %v199_v52 = vsub.f32 %v152_v8, %v190_v42  ;;  %v200_v53 = vsub.f32 %v153_v12, %v190_v42 }
  0x30   : > { %v193_v45 = vsub.f32 %v191_v43, %v192_v44  ;;  %v201_v54 = vsub.f32 %v154_v16, %v190_v42  ;;  %v202_v55 = vsub.f32 %v155_v20, %v190_v42 }
  0x32   : > { %v194_v46 = vmax.f32 %v193_v45, 0.0 }
  0x34   : > { %v203_v47 = vadd.f32 1e-05, %v194_v46 }
  0x36   : > { %420 = vrsqrt.f32 %v203_v47 }
  0x40   : > { %v421_v56 = vpop.eup %420 }
  0x41   : > { %v205_v57 = vmul.f32 %v421_v56, %v195_v48  ;;  %v206_v58 = vmul.f32 %v421_v56, %v196_v49  ;;  %v207_v59 = vmul.f32 %v421_v56, %v197_v50  ;;  %v208_v60 = vmul.f32 %v421_v56, %v198_v51 }
  0x42   : > { %v209_v61 = vmul.f32 %v421_v56, %v199_v52  ;;  %v210_v62 = vmul.f32 %v421_v56, %v200_v53  ;;  %v211_v63 = vmul.f32 %v421_v56, %v201_v54  ;;  %v212_v4 = vmul.f32 %v421_v56, %v202_v55 }
  0x43   : > { %v213_v5 = vmax.f32 %v205_v57, 0.0  ;;  %v214_v6 = vmax.f32 %v206_v58, 0.0  ;;  %v215_v0 = vmax.f32 %v207_v59, 0.0  ;;  %v216_v1 = vmax.f32 %v208_v60, 0.0 }
  0x44   : > { %v217_v2 = vmax.f32 %v209_v61, 0.0  ;;  %v218_v3 = vmax.f32 %v210_v62, 0.0  ;;  %v219_v7 = vmax.f32 %v211_v63, 0.0  ;;  %v220_v8 = vmax.f32 %v212_v4, 0.0 }
  0x45   : > { %v376_v9 = vpack.c.bf16 %v214_v6, %v213_v5  ;;  %v381_v10 = vpack.c.bf16 %v216_v1, %v215_v0 }
  0x46   : > { %v386_v11 = vpack.c.bf16 %v218_v3, %v217_v2  ;;  %v391_v12 = vpack.c.bf16 %v220_v8, %v219_v7 }
  0x47   : > { %377 = vst [vmem:[%s147_s17] sm:$0xff] %v376_v9   ;;  %393 = vst [vmem:[%s147_s17 + $0x8] sm:$0xff] %v381_v10  }
  0x48   : > { %394 = vst [vmem:[%s147_s17 + $0x10] sm:$0xff] %v386_v11   ;;  %395 = vst [vmem:[%s147_s17 + $0x18] sm:$0xff] %v391_v12  }
  0x49 PF: > { %s11_s8 = sadd.s32 1, %s444_s8   ;;  %s495_s6 = smov %s440_s7 }
  0x4a   : > { %p8_p5 = scmp.ge.s32.totalorder %s11_s8, 4   ;;  %s496_s7 = smov %s498_s9 }
  0x4c   :  { %10 = sbr.rel (!%p8_p5) target bundleno = 2 (0x2), region = 54 }

// kernel: default_generator_forward.57
= control target key start
LH: loop header
LB: loop body
LE: loop exit
PB: predicated region body
PF: predicated region fallthrough
CT: control target
= control target key end

     0   :  { %s1030_s12 = smov 0   ;;  %s1032_s13 = smov 0   ;;  %s1164_s0 = inlined_call_operand.vmem [shape: bf16[32,1280], index: 0, kind: input, shape index: {}]   ;;  %s1165_s1 = inlined_call_operand.vmem [shape: bf16[1280,256], index: 1, kind: input, shape index: {}]   ;;  %s1166_s2 = inlined_call_operand.vmem [shape: f32[1,256], index: 2, kind: input, shape index: {}]   ;;  %s1167_s3 = inlined_call_operand.vmem [shape: f32[32,256], index: 3, kind: output, shape index: {}]  }
   0x1   :  { %s1034_s14 = smov 0   ;;  %s1036_s15 = smov 0  }
   0x2   :  { %s1038_s16 = smov 0  }
   0x3 LB: > { %s25_s17 = sadd.s32 1, %s1003_s15  ;;  %p48_p1 = scmp.ne.s32.totalorder %s995_s13, %s991_s12  ;;  %s1007_s16 = sphi %s1038_s16, %s13_s16   ;;  %s1003_s15 = sphi %s1036_s15, %s1171_s15   ;;  %s999_s14 = sphi %s1034_s14, %s1170_s14   ;;  %s995_s13 = sphi %s1032_s13, %s1169_s13   ;;  %s991_s12 = sphi %s1030_s12, %s1168_s12  }
   0x4   : > { %p26_p0 = scmp.ge.s32.totalorder %s25_s17, 5  ;;  %p49_p2 = scmp.eq.s32.totalorder %s1007_s16, 0 }
   0x5   : > { %s41_s19 = sadd.s32 1, %s995_s13  ;;  %p789_p5 = scmp.ge.s32.totalorder %s1007_s16, 5 }
   0x6   : > { %s1173_s17 = smov (%p26_p0, %s25_s17), 0  ;;  %p50_p3 = por %p49_p2, %p48_p1 }
   0x7   : > { %s37_s18 = ssub.s32 %s1003_s15, %s1173_s17  ;;  %164 = sbr.rel (%p789_p5) target bundleno = 21 (0x15), region = 20 }
   0x8   : > { %p39_p4 = scmp.eq.s32.totalorder %s37_s18, 0 }
   0xa   : > { %s1065_s20 = scalar_select %p39_p4, %s995_s13, %s41_s19  }
   0xe   : > { %167 = sbr.rel (!%p50_p3) target bundleno = 21 (0x15), region = 24  ;;  %s169_s21 = sand.u32 (%p50_p3), 1, %s995_s13  }
   0xf   : > { %s840_s22 = sshll.u32 (%p50_p3), %s1003_s15, 3  ;;  %s790_s23 = sshll.u32 (%p50_p3), %s169_s21, 5 }
  0x10   : > { %s177_s26 = scalar_lea.vmem (%p50_p3), %s1164_s0, %s840_s22  ;;  %s171_s27 = scalar_lea.vmem (%p50_p3), [#allocation3], %s790_s23 }
  0x11   : > { %v211_v0 = vld [vmem:[%s177_s26] sm:$0xff] (%p50_p3)  ;;  %v213_v1 = vld [vmem:[%s177_s26 + $0x28] sm:$0xff] (%p50_p3)  ;;  %v215_v2 = vld [vmem:[%s177_s26 + $0x50] sm:$0xff] (%p50_p3) }
  0x12   : > { %212 = vst [vmem:[%s171_s27] sm:$0xff] (%p50_p3), %v211_v0  ;;  %214 = vst [vmem:[%s171_s27 + $0x8] sm:$0xff] (%p50_p3), %v213_v1  ;;  %v217_v3 = vld [vmem:[%s177_s26 + $0x78] sm:$0xff] (%p50_p3) }
  0x13   : > { %216 = vst [vmem:[%s171_s27 + $0x10] sm:$0xff] (%p50_p3), %v215_v2  ;;  %218 = vst [vmem:[%s171_s27 + $0x18] sm:$0xff] (%p50_p3), %v217_v3 }
  0x15 PF: > { %p793_p6 = scmp.ge.s32.totalorder %s1007_s16, 1  ;;  %p238_p7 = scmp.lt.s32.totalorder %s1007_s16, 6 }
  0x17   : > { %p239_p8 = pnand %p793_p6, %p238_p7 }
  0x18   : > { %s245_s28 = sand.u32 (!%p239_p8), 1, %s991_s12   ;;  %s795_s29 = sshll.u32 (!%p239_p8), %s999_s14, 5 }
  0x19   : > { %242 = sbr.rel (%p239_p8) target bundleno = 333 (0x14d), region = 66  ;;  %s794_s30 = sshll.u32 (!%p239_p8), %s245_s28, 5 }
  0x1a   : > { %p291_p9 = scmp.lt.s32.totalorder (!%p239_p8), %s795_s29, 159  ;;  %s1082_s8 = scalar_lea.vmem (!%p239_p8), [#allocation3], %s794_s30 }
  0x1b   : > { %p798_p10 = scmp.ne.s32.totalorder (!%p239_p8), %s999_s14, 0 }
  0x20   : > { %s1175_s29 = smov (!%p291_p9, %s795_s29), 159  ;;  %321 = sbr.rel (%p798_p10) target bundleno = 39 (0x27), region = 74 }
  0x21   : > { %s841_s4 = sshll.u32 %s1175_s29, 3  ;;  %v1009_v4 = vmov (!%p798_p10), 0.0  }
  0x22   : > { %s1080_s7 = scalar_lea.vmem %s1165_s1, %s841_s4  ;;  %322 = vst [vmem:[#allocation2] sm:$0xff] (!%p798_p10), %v1009_v4  ;;  %323 = vst [vmem:[#allocation2 + $0x8] sm:$0xff] (!%p798_p10), %v1009_v4 }
  0x23   : > { %324 = vst [vmem:[#allocation2 + $0x10] sm:$0xff] (!%p798_p10), %v1009_v4  ;;  %325 = vst [vmem:[#allocation2 + $0x18] sm:$0xff] (!%p798_p10), %v1009_v4 }
  0x24   : > { %326 = vst [vmem:[#allocation2 + $0x20] sm:$0xff] (!%p798_p10), %v1009_v4  ;;  %327 = vst [vmem:[#allocation2 + $0x28] sm:$0xff] (!%p798_p10), %v1009_v4 }
  0x25   : > { %328 = vst [vmem:[#allocation2 + $0x30] sm:$0xff] (!%p798_p10), %v1009_v4  ;;  %329 = vst [vmem:[#allocation2 + $0x38] sm:$0xff] (!%p798_p10), %v1009_v4 }
  0x27 PF: > { %v915_v5 = vld [vmem:[%s1080_s7 + $0x4] ss:$8 sps:$4 sm:$0xff]   ;;  %v917_v6 = vld [vmem:[%s1080_s7] ss:$8 sps:$4 sm:$0xff]   ;;  %v918_v7 = vld [vmem:[%s1080_s7 + $0x14] ss:$8 sps:$4 sm:$0xff]  }
  0x28   : > { %554 = vmatprep.subr.bf16.mxu0 %v915_v5  ;;  %842 = vmatprep.subr.bf16.mxu1 %v915_v5  ;;  %v920_v8 = vld [vmem:[%s1080_s7 + $0x10] ss:$8 sps:$4 sm:$0xff]   ;;  %v921_v9 = vld [vmem:[%s1080_s7 + $0x24] ss:$8 sps:$4 sm:$0xff]   ;;  %v923_v10 = vld [vmem:[%s1080_s7 + $0x20] ss:$8 sps:$4 sm:$0xff]  }
  0x29   : > { %555 = vmatpush1.bf16.msra.mxu0 %v917_v6  ;;  %858 = vmatpush1.bf16.msra.mxu1 %v917_v6  ;;  %v924_v11 = vld [vmem:[%s1080_s7 + $0x34] ss:$8 sps:$4 sm:$0xff]   ;;  %v926_v12 = vld [vmem:[%s1080_s7 + $0x30] ss:$8 sps:$4 sm:$0xff]   ;;  %v927_v13 = vld [vmem:[%s1080_s7 + $0x44] ss:$8 sps:$4 sm:$0xff]  }
  0x2a   : > { %556 = vmatprep.subr.bf16.mxu0 %v918_v7  ;;  %843 = vmatprep.subr.bf16.mxu1 %v918_v7  ;;  %v929_v14 = vld [vmem:[%s1080_s7 + $0x40] ss:$8 sps:$4 sm:$0xff]   ;;  %v930_v15 = vld [vmem:[%s1080_s7 + $0x54] ss:$8 sps:$4 sm:$0xff]   ;;  %v932_v16 = vld [vmem:[%s1080_s7 + $0x50] ss:$8 sps:$4 sm:$0xff]  }
  0x2b   : > { %v933_v17 = vld [vmem:[%s1080_s7 + $0x64] ss:$8 sps:$4 sm:$0xff]   ;;  %v935_v19 = vld [vmem:[%s1080_s7 + $0x60] ss:$8 sps:$4 sm:$0xff]   ;;  %v968_v20 = vld [vmem:[%s1082_s8 + $0x14] ss:$8 sps:$4 sm:$0xff]  }
  0x2c   : > { %v965_v18 = vld [vmem:[%s1082_s8 + $0x4] ss:$8 sps:$4 sm:$0xff]   ;;  %v936_v21 = vld [vmem:[%s1080_s7 + $0x74] ss:$8 sps:$4 sm:$0xff]   ;;  %596 = vmatprep.mubr.bf16.mxu1 %v968_v20  ;;  %v938_v22 = vld [vmem:[%s1080_s7 + $0x70] ss:$8 sps:$4 sm:$0xff]  }
  0x2d   : > { %557 = vmatpush1.bf16.msra.mxu0 %v920_v8  ;;  %859 = vmatpush1.bf16.msra.mxu1 %v920_v8  ;;  %v939_v23 = vld [vmem:[%s1080_s7 + $0x84] ss:$8 sps:$4 sm:$0xff]   ;;  %v941_v24 = vld [vmem:[%s1080_s7 + $0x80] ss:$8 sps:$4 sm:$0xff]   ;;  %v942_v25 = vld [vmem:[%s1080_s7 + $0x94] ss:$8 sps:$4 sm:$0xff]  }
  0x2e   : > { %558 = vmatprep.subr.bf16.mxu0 %v921_v9  ;;  %844 = vmatprep.subr.bf16.mxu1 %v921_v9  ;;  %v944_v26 = vld [vmem:[%s1080_s7 + $0x90] ss:$8 sps:$4 sm:$0xff]   ;;  %v945_v27 = vld [vmem:[%s1080_s7 + $0xa4] ss:$8 sps:$4 sm:$0xff]   ;;  %v947_v28 = vld [vmem:[%s1080_s7 + $0xa0] ss:$8 sps:$4 sm:$0xff]  }
  0x2f   : > { %586 = vmatprep.mubr.bf16.mxu0 %v965_v18  ;;  %v948_v29 = vld [vmem:[%s1080_s7 + $0xb4] ss:$8 sps:$4 sm:$0xff]   ;;  %v950_v30 = vld [vmem:[%s1080_s7 + $0xb0] ss:$8 sps:$4 sm:$0xff]   ;;  %v951_v31 = vld [vmem:[%s1080_s7 + $0xc4] ss:$8 sps:$4 sm:$0xff]  }
  0x30   : > { %v953_v32 = vld [vmem:[%s1080_s7 + $0xc0] ss:$8 sps:$4 sm:$0xff]   ;;  %v954_v33 = vld [vmem:[%s1080_s7 + $0xd4] ss:$8 sps:$4 sm:$0xff]   ;;  %v956_v34 = vld [vmem:[%s1080_s7 + $0xd0] ss:$8 sps:$4 sm:$0xff]  }
  0x31   : > { %559 = vmatpush1.bf16.msra.mxu0 %v923_v10  ;;  %860 = vmatpush1.bf16.msra.mxu1 %v923_v10  ;;  %v957_v35 = vld [vmem:[%s1080_s7 + $0xe4] ss:$8 sps:$4 sm:$0xff]   ;;  %v959_v36 = vld [vmem:[%s1080_s7 + $0xe0] ss:$8 sps:$4 sm:$0xff]   ;;  %v960_v37 = vld [vmem:[%s1080_s7 + $0xf4] ss:$8 sps:$4 sm:$0xff]  }
  0x32   : > { %560 = vmatprep.subr.bf16.mxu0 %v924_v11  ;;  %845 = vmatprep.subr.bf16.mxu1 %v924_v11  ;;  %v962_v38 = vld [vmem:[%s1080_s7 + $0xf0] ss:$8 sps:$4 sm:$0xff]   ;;  %v963_v39 = vld [vmem:[%s1082_s8] ss:$8 sps:$4 sm:$0xff]   ;;  %p835_p11 = scmp.ne.s32.totalorder %s999_s14, 4 }
  0x33   : > { %v966_v40 = vld [vmem:[%s1082_s8 + $0x10] ss:$8 sps:$4 sm:$0xff]   ;;  %v330_v41 = vld [vmem:[#allocation2] sm:$0xff]  ;;  %v331_v43 = vld [vmem:[#allocation2 + $0x8] sm:$0xff]  ;;  %v637_v1 = vlaneseq (!%p835_p11) }
  0x34   : > { %v334_v42 = vld [vmem:[#allocation2 + $0x20] sm:$0xff]  ;;  %v335_v44 = vld [vmem:[#allocation2 + $0x28] sm:$0xff]  ;;  %v332_v47 = vld [vmem:[#allocation2 + $0x10] sm:$0xff] }
  0x35   : > { %561 = vmatpush1.bf16.msra.mxu0 %v926_v12  ;;  %861 = vmatpush1.bf16.msra.mxu1 %v926_v12  ;;  %v336_v48 = vld [vmem:[#allocation2 + $0x30] sm:$0xff]  ;;  %v333_v53 = vld [vmem:[#allocation2 + $0x18] sm:$0xff]  ;;  %v638_v2 = vshrl.u32 (!%p835_p11), %v637_v1, 7  ;;  %v635_v3 = vld [vmem:[%s1166_s2] sm:$0x3] (!%p835_p11) }
  0x36   : > { %562 = vmatprep.subr.bf16.mxu0 %v927_v13  ;;  %846 = vmatprep.subr.bf16.mxu1 %v927_v13  ;;  %v337_v54 = vld [vmem:[#allocation2 + $0x38] sm:$0xff] }
  0x37   : > { %v639_v5 = vsub.s32 (!%p835_p11), 0, %v638_v2  ;;  %v643_v7 = vsub.s32 (!%p835_p11), 1, %v638_v2 }
  0x39   : > { %563 = vmatpush1.bf16.msra.mxu0 %v929_v14  ;;  %862 = vmatpush1.bf16.msra.mxu1 %v929_v14  ;;  %v640_v11 = vrot.slane (!%p835_p11), %v635_v3, %v639_v5  ;;  %v644_v12 = vrot.slane (!%p835_p11), %v635_v3, %v643_v7 }
  0x3a   : > { %564 = vmatprep.subr.bf16.mxu0 %v930_v15  ;;  %847 = vmatprep.subr.bf16.mxu1 %v930_v15 }
  0x3d   : > { %565 = vmatpush1.bf16.msra.mxu0 %v932_v16  ;;  %863 = vmatpush1.bf16.msra.mxu1 %v932_v16 }
  0x3e   : > { %566 = vmatprep.subr.bf16.mxu0 %v933_v17  ;;  %848 = vmatprep.subr.bf16.mxu1 %v933_v17 }
  0x41   : > { %567 = vmatpush1.bf16.msra.mxu0 %v935_v19  ;;  %864 = vmatpush1.bf16.msra.mxu1 %v935_v19 }
  0x42   : > { %568 = vmatprep.subr.bf16.mxu0 %v936_v21  ;;  %849 = vmatprep.subr.bf16.mxu1 %v936_v21 }
  0x45   : > { %569 = vmatpush1.bf16.msra.mxu0 %v938_v22  ;;  %865 = vmatpush1.bf16.msra.mxu1 %v938_v22 }
  0x46   : > { %570 = vmatprep.subr.bf16.mxu0 %v939_v23  ;;  %850 = vmatprep.subr.bf16.mxu1 %v939_v23 }
  0x49   : > { %571 = vmatpush1.bf16.msra.mxu0 %v941_v24  ;;  %866 = vmatpush1.bf16.msra.mxu1 %v941_v24 }
  0x4a   : > { %572 = vmatprep.subr.bf16.mxu0 %v942_v25  ;;  %851 = vmatprep.subr.bf16.mxu1 %v942_v25 }
  0x4d   : > { %573 = vmatpush1.bf16.msra.mxu0 %v944_v26  ;;  %867 = vmatpush1.bf16.msra.mxu1 %v944_v26 }
  0x4e   : > { %574 = vmatprep.subr.bf16.mxu0 %v945_v27  ;;  %852 = vmatprep.subr.bf16.mxu1 %v945_v27 }
  0x51   : > { %575 = vmatpush1.bf16.msra.mxu0 %v947_v28  ;;  %868 = vmatpush1.bf16.msra.mxu1 %v947_v28 }
  0x52   : > { %576 = vmatprep.subr.bf16.mxu0 %v948_v29  ;;  %853 = vmatprep.subr.bf16.mxu1 %v948_v29 }
  0x55   : > { %577 = vmatpush1.bf16.msra.mxu0 %v950_v30  ;;  %869 = vmatpush1.bf16.msra.mxu1 %v950_v30 }
  0x56   : > { %578 = vmatprep.subr.bf16.mxu0 %v951_v31  ;;  %854 = vmatprep.subr.bf16.mxu1 %v951_v31 }
  0x59   : > { %579 = vmatpush1.bf16.msra.mxu0 %v953_v32  ;;  %870 = vmatpush1.bf16.msra.mxu1 %v953_v32 }
  0x5a   : > { %580 = vmatprep.subr.bf16.mxu0 %v954_v33  ;;  %855 = vmatprep.subr.bf16.mxu1 %v954_v33 }
  0x5d   : > { %581 = vmatpush1.bf16.msra.mxu0 %v956_v34  ;;  %871 = vmatpush1.bf16.msra.mxu1 %v956_v34 }
  0x5e   : > { %582 = vmatprep.subr.bf16.mxu0 %v957_v35  ;;  %856 = vmatprep.subr.bf16.mxu1 %v957_v35 }
  0x61   : > { %583 = vmatpush1.bf16.msra.mxu0 %v959_v36  ;;  %872 = vmatpush1.bf16.msra.mxu1 %v959_v36 }
  0x62   : > { %584 = vmatprep.subr.bf16.mxu0 %v960_v37  ;;  %857 = vmatprep.subr.bf16.mxu1 %v960_v37 }
  0x65   : > { %585 = vmatpush1.bf16.msra.mxu0 %v962_v38  ;;  %873 = vmatpush1.bf16.msra.mxu1 %v962_v38 }
  0x68   : > { %587 = vmatmul.mubr.bf16.vlgmr.msra.gmra.mrb[0].mxu0 %v963_v39  ;;  %597 = vmatmul.mubr.bf16.vlgmr.msra.gmra.mrb[0].mxu1 %v966_v40 }
 0x13b   : > { %v588_v45 = vpop.f32.mrb[0].mxu0  ;;  %v598_v46 = vpop.f32.mrb[0].mxu1  ;;  %626 = sbr.rel (%p835_p11) target bundleno = 333 (0x14d), region = 78 }
 0x13c   : > { %v607_v49 = vadd.f32 %v588_v45, %v330_v41  ;;  %v611_v50 = vadd.f32 %v598_v46, %v334_v42  ;;  %v590_v51 = vpop.f32.mrb[1].mxu0  ;;  %v600_v52 = vpop.f32.mrb[1].mxu1 }
 0x13d   : > { %v608_v55 = vadd.f32 %v590_v51, %v331_v43  ;;  %v612_v56 = vadd.f32 %v600_v52, %v335_v44  ;;  %v592_v57 = vpop.f32.mrb[2].mxu0  ;;  %v602_v58 = vpop.f32.mrb[2].mxu1 }
 0x13e   : > { %615 = vst [vmem:[#allocation2] sm:$0xff] %v607_v49  ;;  %619 = vst [vmem:[#allocation2 + $0x20] sm:$0xff] %v611_v50  ;;  %v609_v59 = vadd.f32 %v592_v57, %v332_v47  ;;  %v613_v60 = vadd.f32 %v602_v58, %v336_v48  ;;  %v594_v61 = vpop.f32.mrb[3].mxu0  ;;  %v604_v62 = vpop.f32.mrb[3].mxu1 }
 0x13f   : > { %616 = vst [vmem:[#allocation2 + $0x8] sm:$0xff] %v608_v55  ;;  %620 = vst [vmem:[#allocation2 + $0x28] sm:$0xff] %v612_v56  ;;  %v610_v63 = vadd.f32 %v594_v61, %v333_v53  ;;  %v614_v0 = vadd.f32 %v604_v62, %v337_v54 }
 0x140   : > { %617 = vst [vmem:[#allocation2 + $0x10] sm:$0xff] %v609_v59  ;;  %621 = vst [vmem:[#allocation2 + $0x30] sm:$0xff] %v613_v60 }
 0x141   : > { %618 = vst [vmem:[#allocation2 + $0x18] sm:$0xff] %v610_v63  ;;  %622 = vst [vmem:[#allocation2 + $0x38] sm:$0xff] %v614_v0 }
 0x145   : > { %v627_v4 = vld [vmem:[#allocation2] sm:$0xff] }
 0x146   : > { %v628_v6 = vld [vmem:[#allocation2 + $0x8] sm:$0xff]  ;;  %v631_v10 = vld [vmem:[#allocation2 + $0x20] sm:$0xff]  ;;  %v647_v16 = vadd.f32 %v640_v11, %v627_v4 }
 0x147   : > { %v629_v8 = vld [vmem:[#allocation2 + $0x10] sm:$0xff]  ;;  %v632_v13 = vld [vmem:[#allocation2 + $0x28] sm:$0xff]  ;;  %v648_v17 = vadd.f32 %v644_v12, %v628_v6  ;;  %v651_v20 = vadd.f32 %v640_v11, %v631_v10 }
 0x148   : > { %v630_v9 = vld [vmem:[#allocation2 + $0x18] sm:$0xff]  ;;  %v633_v14 = vld [vmem:[#allocation2 + $0x30] sm:$0xff]  ;;  %v649_v18 = vadd.f32 %v640_v11, %v629_v8  ;;  %v652_v21 = vadd.f32 %v644_v12, %v632_v13  ;;  %655 = vst [vmem:[%s1167_s3] sm:$0xff] %v647_v16 }
 0x149   : > { %v634_v15 = vld [vmem:[#allocation2 + $0x38] sm:$0xff]  ;;  %v650_v19 = vadd.f32 %v644_v12, %v630_v9  ;;  %v653_v22 = vadd.f32 %v640_v11, %v633_v14  ;;  %656 = vst [vmem:[%s1167_s3 + $0x8] sm:$0xff] %v648_v17  ;;  %659 = vst [vmem:[%s1167_s3 + $0x20] sm:$0xff] %v651_v20 }
 0x14a   : > { %v654_v23 = vadd.f32 %v644_v12, %v634_v15  ;;  %657 = vst [vmem:[%s1167_s3 + $0x10] sm:$0xff] %v649_v18  ;;  %660 = vst [vmem:[%s1167_s3 + $0x28] sm:$0xff] %v652_v21 }
 0x14b   : > { %658 = vst [vmem:[%s1167_s3 + $0x18] sm:$0xff] %v650_v19  ;;  %661 = vst [vmem:[%s1167_s3 + $0x30] sm:$0xff] %v653_v22 }
 0x14c   : > { %662 = vst [vmem:[%s1167_s3 + $0x38] sm:$0xff] %v654_v23 }
 0x14d PF: > { %s13_s16 = sadd.s32 1, %s1007_s16   ;;  %s1168_s12 = smov %s995_s13 }
 0x14e   : > { %p10_p12 = scmp.ge.s32.totalorder %s13_s16, 7   ;;  %s1169_s13 = smov %s1065_s20 }
 0x14f   : > { %s1170_s14 = smov %s1003_s15  ;;  %s1171_s15 = smov %s1173_s17 }
 0x150   :  { %12 = sbr.rel (!%p10_p12) target bundleno = 3 (0x3), region = 119 }

// kernel: default_generator_forward.58
= control target key start
LH: loop header
LB: loop body
LE: loop exit
PB: predicated region body
PF: predicated region fallthrough
CT: control target
= control target key end

     0   :  { %s482_s6 = smov 0   ;;  %s484_s7 = smov 0   ;;  %s582_s0 = inlined_call_operand.vmem [shape: f32[2,16,256], index: 0, kind: input, shape index: {}]   ;;  %s583_s1 = inlined_call_operand.vmem [shape: bf16[2,16,256], index: 1, kind: output, shape index: {}]  }
   0x1   :  { %s486_s8 = smov 0   ;;  %s488_s9 = smov 0  }
   0x2   :  { %s490_s10 = smov 0   ;;  %s492_s11 = smov 0  }
   0x3   :  { %s494_s12 = smov 0  }
   0x4 LB: > { %s20_s13 = sadd.s32 1, %s462_s10  ;;  %s23_s14 = sadd.s32 1, %s466_s11  ;;  %s470_s12 = sphi %s494_s12, %s11_s12   ;;  %s466_s11 = sphi %s492_s11, %s590_s11   ;;  %s462_s10 = sphi %s490_s10, %s589_s10   ;;  %s458_s9 = sphi %s488_s9, %s588_s9   ;;  %s454_s8 = sphi %s486_s8, %s587_s8   ;;  %s450_s7 = sphi %s484_s7, %s586_s7   ;;  %s446_s6 = sphi %s482_s6, %s585_s6  }
   0x5   : > { %p21_p0 = scmp.ge.s32.totalorder %s20_s13, 2  ;;  %s334_s15 = sadd.s32 4294967295, %s470_s12  }
   0x6   : > { %p39_p1 = scmp.ne.s32.totalorder %s450_s7, %s446_s6  ;;  %p40_p2 = scmp.eq.s32.totalorder %s470_s12, 0 }
   0x7   : > { %s592_s13 = smov (%p21_p0, %s20_s13), 0  ;;  %s594_s14 = smov (!%p21_p0, %s23_s14), %s466_s11 }
   0x8   : > { %p25_p3 = scmp.ge.s32.totalorder %s594_s14, 2  ;;  %p71_p4 = scmp.eq.s32.totalorder %s334_s15, 3 }
   0x9   : > { %s28_s16 = ssub.s32 %s462_s10, %s592_s13  ;;  %p41_p5 = por %p40_p2, %p39_p1 }
   0xa   : > { %s596_s14 = smov (%p25_p3, %s594_s14), 0  ;;  %p530_p6 = por %p71_p4, %p39_p1 }
   0xb   : > { %s27_s18 = ssub.s32 %s466_s11, %s596_s14  ;;  %s32_s20 = sadd.s32 1, %s450_s7 }
   0xc   : > { %s29_s19 = sor.u32 %s28_s16, %s27_s18  ;;  %p337_p8 = scmp.ge.s32.totalorder %s470_s12, 4 }
   0xd   : > { %p30_p7 = scmp.eq.s32.totalorder %s29_s19, 0 }
   0xe   : > { %93 = sbr.rel (%p337_p8) target bundleno = 28 (0x1c), region = 16 }
   0xf   : > { %s538_s21 = scalar_select %p30_p7, %s450_s7, %s32_s20  }
  0x15   : > { %96 = sbr.rel (!%p41_p5) target bundleno = 28 (0x1c), region = 20  ;;  %s98_s22 = sand.u32 (%p41_p5), 1, %s450_s7  }
  0x16   : > { %s339_s23 = sshll.u32 (%p41_p5), %s466_s11, 2  ;;  %s338_s24 = sshll.u32 (%p41_p5), %s98_s22, 4 }
  0x17   : > { %s102_s25 = sadd.s32 (%p41_p5), %s462_s10, %s339_s23  ;;  %s100_s30 = scalar_lea.vmem (%p41_p5), [#allocation2], %s338_s24 }
  0x18   : > { %s340_s26 = sshll.u32 (%p41_p5), %s102_s25, 3 }
  0x19   : > { %s104_s29 = scalar_lea.vmem (%p41_p5), %s582_s0, %s340_s26 }
  0x1a   : > { %v134_v0 = vld [vmem:[%s104_s29] sm:$0xff] (%p41_p5)  ;;  %v136_v1 = vld [vmem:[%s104_s29 + $0x10] sm:$0xff] (%p41_p5) }
  0x1b   : > { %135 = vst [vmem:[%s100_s30] sm:$0xff] (%p41_p5), %v134_v0  ;;  %137 = vst [vmem:[%s100_s30 + $0x8] sm:$0xff] (%p41_p5), %v136_v1 }
  0x1c PF: > { %p341_p9 = scmp.ge.s32.totalorder %s470_s12, 1  ;;  %p142_p10 = scmp.lt.s32.totalorder %s470_s12, 5 }
  0x1e   : > { %p143_p11 = pnand %p341_p9, %p142_p10 }
  0x1f   : > { %s149_s2 = sand.u32 (!%p143_p11), 1, %s446_s6  }
  0x20   : > { %146 = sbr.rel (%p143_p11) target bundleno = 85 (0x55), region = 58  ;;  %s342_s3 = sshll.u32 (!%p143_p11), %s149_s2, 4 }
  0x21   : > { %s151_s4 = scalar_lea.vmem (!%p143_p11), [#allocation2], %s342_s3  ;;  %s343_s5 = sshll.u32 (!%p143_p11), %s149_s2, 3 }
  0x22   : > { %v167_v2 = vld [vmem:[%s151_s4] sm:$0xff] (!%p143_p11)  ;;  %v168_v3 = vld [vmem:[%s151_s4 + $0x8] sm:$0xff] (!%p143_p11)  ;;  %s166_s15 = scalar_lea.vmem (!%p143_p11), [#allocation3], %s343_s5 }
  0x23   : > { %v169_v4 = vadd.f32 (!%p143_p11), %v168_v3, %v167_v2  ;;  %v176_v5 = vmul.f32 (!%p143_p11), %v167_v2, %v167_v2  ;;  %v177_v6 = vmul.f32 (!%p143_p11), %v168_v3, %v168_v3 }
  0x25   : > { %v170_v7 = vrot.slane (!%p143_p11), %v169_v4, 4  ;;  %v178_v8 = vadd.f32 (!%p143_p11), %v177_v6, %v176_v5 }
  0x27   : > { %v171_v9 = vadd.f32 %v170_v7, %v169_v4  ;;  %v179_v10 = vrot.slane %v178_v8, 4  ;;  %s347_s16 = sshll.u32 (%p530_p6), %s458_s9, 2 }
  0x28   : > { %s216_s18 = sadd.s32 (%p530_p6), %s454_s8, %s347_s16 }
  0x29   : > { %v172_v11 = vrot.slane %v171_v9, 2  ;;  %v180_v12 = vadd.f32 %v179_v10, %v178_v8  ;;  %s348_s19 = sshll.u32 (%p530_p6), %s216_s18, 2 }
  0x2a   : > { %s218_s22 = scalar_lea.vmem (%p530_p6), %s583_s1, %s348_s19 }
  0x2b   : > { %v173_v13 = vadd.f32 %v172_v11, %v171_v9  ;;  %v181_v14 = vrot.slane %v180_v12, 2 }
  0x2d   : > { %v174_v15 = vrot.slane %v173_v13, 1  ;;  %v182_v16 = vadd.f32 %v181_v14, %v180_v12 }
  0x2f   : > { %v175_v17 = vadd.f32 %v174_v15, %v173_v13  ;;  %v183_v18 = vrot.slane %v182_v16, 1 }
  0x31   : > { %v184_v19 = vadd.f32 %v183_v18, %v182_v16  ;;  %v185_v20 = vmul.f32 0.0625, %v175_v17 }
  0x33   : > { %v186_v21 = vmul.f32 0.0625, %v184_v19  ;;  %v187_v22 = vmul.f32 %v185_v20, %v185_v20  ;;  %v190_v26 = vsub.f32 %v167_v2, %v185_v20  ;;  %v191_v27 = vsub.f32 %v168_v3, %v185_v20 }
  0x35   : > { %v188_v23 = vsub.f32 %v186_v21, %v187_v22 }
  0x37   : > { %v189_v24 = vmax.f32 %v188_v23, 0.0 }
  0x39   : > { %v192_v25 = vadd.f32 1e-05, %v189_v24 }
  0x3b   : > { %414 = vrsqrt.f32 %v192_v25 }
  0x45   : > { %v415_v28 = vpop.eup %414 }
  0x46   : > { %v194_v29 = vmul.f32 %v415_v28, %v190_v26  ;;  %v195_v30 = vmul.f32 %v415_v28, %v191_v27  ;;  %214 = sbr.rel (!%p530_p6) target bundleno = 85 (0x55), region = 66 }
  0x48   : > { %v196_v31 = vmax.f32 %v194_v29, 0.0  ;;  %v197_v32 = vmax.f32 %v195_v30, 0.0 }
  0x4a   : > { %v356_v33 = vpack.c.bf16 %v197_v32, %v196_v31 }
  0x4c   : > { %357 = vst [vmem:[%s166_s15] sm:$0xff] %v356_v33  }
  0x53   : > { %v234_v34 = vld [vmem:[%s166_s15] sm:$0xf]  ;;  %v236_v35 = vld [vmem:[%s166_s15 + $0x4] sm:$0xf] }
  0x54   : > { %235 = vst [vmem:[%s218_s22] sm:$0xf] %v234_v34  ;;  %237 = vst [vmem:[%s218_s22 + $0x8] sm:$0xf] %v236_v35 }
  0x55 PF: > { %s11_s12 = sadd.s32 1, %s470_s12   ;;  %s585_s6 = smov %s450_s7 }
  0x56   : > { %p8_p12 = scmp.ge.s32.totalorder %s11_s12, 6   ;;  %s586_s7 = smov %s538_s21 }
  0x57   : > { %s587_s8 = smov %s462_s10  ;;  %s588_s9 = smov %s466_s11 }
  0x58   : > { %s589_s10 = smov %s592_s13  ;;  %s590_s11 = smov %s596_s14 }
  0x59   :  { %10 = sbr.rel (!%p8_p12) target bundleno = 4 (0x4), region = 138 }

// kernel: default_generator_forward.59
= control target key start
LH: loop header
LB: loop body
LE: loop exit
PB: predicated region body
PF: predicated region fallthrough
CT: control target
= control target key end

     0   :  { %8 = vsyncpa [#allocation4], 0  ;;  %s1266_s0 = inlined_call_operand.hbm [shape: bf16[32,2304], index: 0, kind: input, shape index: {}]   ;;  %s1267_s1 = inlined_call_operand.vmem [shape: bf16[2304,256], index: 1, kind: input, shape index: {}]   ;;  %s1268_s2 = inlined_call_operand.vmem [shape: f32[1,256], index: 2, kind: input, shape index: {}]   ;;  %s1269_s3 = inlined_call_operand.vmem [shape: f32[32,256], index: 3, kind: output, shape index: {}]  }
   0x1   :  { %10 = vsyncpa [#allocation4 + $0x1], 0  ;;  %s1072_s12 = smov 0   ;;  %s1074_s13 = smov 0  }
   0x2   :  { %s1076_s14 = smov 0   ;;  %s1078_s15 = smov 0  }
   0x3   :  { %s1080_s16 = smov 0   ;;  %s1082_s17 = smov 0  }
   0x4 LB: > { %s764_s18 = sadd.s32 4294967295, %s1045_s17   ;;  %s28_s19 = sadd.s32 1, %s1041_s16  ;;  %s1045_s17 = sphi %s1082_s17, %s16_s17   ;;  %s1041_s16 = sphi %s1080_s16, %s1278_s16   ;;  %s1037_s15 = sphi %s1078_s15, %s1277_s15   ;;  %s1033_s14 = sphi %s1076_s14, %s1276_s14   ;;  %s1029_s13 = sphi %s1074_s13, %s1275_s13   ;;  %s1025_s12 = sphi %s1072_s12, %s1274_s12  }
   0x5   : > { %p29_p0 = scmp.ge.s32.totalorder %s28_s19, 9  ;;  %s44_s20 = sadd.s32 1, %s1033_s14 }
   0x6   : > { %p51_p1 = scmp.ne.s32.totalorder %s1033_s14, %s1029_s13  ;;  %p52_p2 = scmp.eq.s32.totalorder %s1045_s17, 0 }
   0x7   : > { %s1280_s19 = smov (%p29_p0, %s28_s19), 0  ;;  %p57_p4 = scmp.ne.s32.totalorder %s1029_s13, %s1025_s12 }
   0x8   : > { %p1108_p3 = por %p52_p2, %p51_p1  ;;  %s40_s22 = ssub.s32 %s1041_s16, %s1280_s19 }
   0x9   : > { %p58_p5 = scmp.eq.s32.totalorder %s764_s18, 0  ;;  %p42_p6 = scmp.eq.s32.totalorder %s40_s22, 0 }
   0xa   : > { %p858_p8 = scmp.lt.s32.totalorder %s1045_s17, 9  ;;  %s171_s25 = sand.u32 1, %s1033_s14  }
   0xb   : > { %p1115_p7 = por %p58_p5, %p57_p4  ;;  %s818_s26 = sshll.u32 %s1041_s16, 7 }
   0xc   : > { %s1121_s24 = scalar_select %p42_p6, %s1033_s14, %s44_s20  }
   0xd   : > { %s768_s27 = sshll.u32 %s171_s25, 5  ;;  %s1128_s30 = scalar_lea.hbm %s1266_s0, %s818_s26 }
   0xe   : > { %s175_s4 = scalar_lea.vmem [#allocation3], %s768_s27  ;;  %p1132_p9 = pnand %p858_p8, %p1108_p3 }
   0xf   : > { %s185_s5 = sshll.u32 %s175_s4, 4  ;;  %s1139_s7 = scalar_lea.sflag [#allocation4], %s171_s25  ;;  %s1136_s5 = int_to_ptr.vmem [resolvable:$true] %s185_s5 }
  0x10   : > { %s965_s8 = scalar_lea.hbm %s1128_s30, 512  ;;  %p967_p12 = pneg %p1132_p9 }
  0x11   : > { %p966_p11 = scmp.ne.s32.totalorder %s1128_s30, %s965_s8  ;;  %s970_s11 = scalar_lea.hbm %s1266_s0, 4608 }
  0x12   : > { %p971_p1 = scmp.lt.u32.totalorder %s1128_s30, %s1266_s0  ;;  %p972_p2 = scmp.lt.u32.totalorder %s970_s11, %s965_s8 }
  0x13   : > { %p968_p13 = pnand %p967_p12, %p966_p11  ;;  %p974_p4 = scmp.lt.u32.totalorder %s965_s8, %s1128_s30 }
  0x14   : > { %p973_p3 = por %p972_p2, %p971_p1 }
  0x15   : > { %p969_p0 = pneg %p968_p13 }
  0x16   : > { %p975_p5 = por %p974_p4, %p973_p3 }
  0x18   : > { %p976_p6 = pnand %p975_p5, %p969_p0 }
  0x1a   : > { %979 = shalt.err (!%p976_p6)
}
  0x1b   : > { %s980_s20 = scalar_lea.vmem %s1136_s5, 512  ;;  %s1047_s21 = smov [#allocation3]  }
  0x1c   : > { %p981_p8 = scmp.ne.s32.totalorder %s1136_s5, %s980_s20  ;;  %s985_s22 = sshll.u32 %s1047_s21, 4  ;;  %s986_s22 = int_to_ptr.vmem [resolvable:$false] %s985_s22 }
  0x1d   : > { %s987_s25 = scalar_lea.vmem %s986_s22, 1024  ;;  %p988_p10 = scmp.lt.s32.totalorder %s1136_s5, %s986_s22 }
  0x1e   : > { %p983_p11 = pnand %p981_p8, %p967_p12  ;;  %p989_p1 = scmp.lt.s32.totalorder %s987_s25, %s980_s20 }
  0x20   : > { %p984_p13 = pneg %p983_p11  ;;  %p990_p2 = por %p989_p1, %p988_p10 }
  0x22   : > { %p991_p3 = pnand %p990_p2, %p984_p13 }
  0x24   : > { %994 = shalt.err (!%p991_p3)
}
  0x25   : > { %s1048_s26 = smov 1152   ;;  %s1049_s27 = smov 128  }
  0x26   : > { %s1050_s28 = smov 8   ;;  %p208_p12 = scmp.lt.s32.totalorder %s1045_s17, 10 }
  0x27   : > { %857 = dma.hbm_to_vmem [thread:$0]  (!%p1132_p9), %s1128_s30, 512, %s1136_s5, %s1139_s7, %s1048_s26, %s1049_s27, %s1050_s28  }
  0x28   : > { %p1273_p0 = scmp.ge.s32.totalorder %s1045_s17, 1 }
  0x2a   : > { %p209_p4 = pnand %p1273_p0, %p208_p12 }
  0x2b   : > { %s214_s29 = sand.u32 (!%p209_p4), 1, %s1029_s13  }
  0x2c   : > { %212 = sbr.rel (%p209_p4) target bundleno = 355 (0x163), region = 32  ;;  %s772_s4 = sshll.u32 (!%p209_p4), %s214_s29, 5 }
  0x2d   : > { %s215_s8 = scalar_lea.sflag (!%p209_p4), [#allocation4], %s214_s29  ;;  %s1171_s9 = scalar_lea.vmem (!%p209_p4), [#allocation3], %s772_s4 }
  0x33   : > { %1020 = dma.done.wait (%p1115_p7), %s215_s8, 512  }
  0x34   : > { %1022 = vsyncadd (%p1115_p7), %s215_s8, 4294966784  ;;  %s773_s10 = sshll.u32 %s1037_s15, 5  ;;  %p776_p9 = scmp.ne.s32.totalorder %s1037_s15, 0 }
  0x35   : > { %p264_p10 = scmp.lt.s32.totalorder %s773_s10, 287  ;;  %v1051_v0 = vmov (!%p776_p9), 0.0  }
  0x36   : > { %294 = sbr.rel (%p776_p9) target bundleno = 61 (0x3d), region = 40  ;;  %295 = vst [vmem:[#allocation2] sm:$0xff] (!%p776_p9), %v1051_v0  ;;  %296 = vst [vmem:[#allocation2 + $0x8] sm:$0xff] (!%p776_p9), %v1051_v0 }
  0x37   : > { %s1282_s10 = smov (!%p264_p10, %s773_s10), 287  ;;  %297 = vst [vmem:[#allocation2 + $0x10] sm:$0xff] (!%p776_p9), %v1051_v0  ;;  %298 = vst [vmem:[#allocation2 + $0x18] sm:$0xff] (!%p776_p9), %v1051_v0 }
  0x38   : > { %s819_s30 = sshll.u32 %s1282_s10, 3  ;;  %299 = vst [vmem:[#allocation2 + $0x20] sm:$0xff] (!%p776_p9), %v1051_v0  ;;  %300 = vst [vmem:[#allocation2 + $0x28] sm:$0xff] (!%p776_p9), %v1051_v0 }
  0x39   : > { %s1181_s7 = scalar_lea.vmem %s1267_s1, %s819_s30  ;;  %301 = vst [vmem:[#allocation2 + $0x30] sm:$0xff] (!%p776_p9), %v1051_v0  ;;  %302 = vst [vmem:[#allocation2 + $0x38] sm:$0xff] (!%p776_p9), %v1051_v0 }
  0x3d PF: > { %v911_v1 = vld [vmem:[%s1181_s7 + $0x4] ss:$8 sps:$4 sm:$0xff]   ;;  %v913_v2 = vld [vmem:[%s1181_s7] ss:$8 sps:$4 sm:$0xff]   ;;  %v914_v3 = vld [vmem:[%s1181_s7 + $0x14] ss:$8 sps:$4 sm:$0xff]  }
  0x3e   : > { %527 = vmatprep.subr.bf16.mxu0 %v911_v1  ;;  %820 = vmatprep.subr.bf16.mxu1 %v911_v1  ;;  %v916_v4 = vld [vmem:[%s1181_s7 + $0x10] ss:$8 sps:$4 sm:$0xff]   ;;  %v917_v5 = vld [vmem:[%s1181_s7 + $0x24] ss:$8 sps:$4 sm:$0xff]   ;;  %v919_v6 = vld [vmem:[%s1181_s7 + $0x20] ss:$8 sps:$4 sm:$0xff]  }
  0x3f   : > { %528 = vmatpush1.bf16.msra.mxu0 %v913_v2  ;;  %836 = vmatpush1.bf16.msra.mxu1 %v913_v2  ;;  %v920_v7 = vld [vmem:[%s1181_s7 + $0x34] ss:$8 sps:$4 sm:$0xff]   ;;  %v922_v8 = vld [vmem:[%s1181_s7 + $0x30] ss:$8 sps:$4 sm:$0xff]   ;;  %v923_v9 = vld [vmem:[%s1181_s7 + $0x44] ss:$8 sps:$4 sm:$0xff]  }
  0x40   : > { %529 = vmatprep.subr.bf16.mxu0 %v914_v3  ;;  %821 = vmatprep.subr.bf16.mxu1 %v914_v3  ;;  %v925_v10 = vld [vmem:[%s1181_s7 + $0x40] ss:$8 sps:$4 sm:$0xff]   ;;  %v926_v11 = vld [vmem:[%s1181_s7 + $0x54] ss:$8 sps:$4 sm:$0xff]   ;;  %v928_v12 = vld [vmem:[%s1181_s7 + $0x50] ss:$8 sps:$4 sm:$0xff]  }
  0x41   : > { %v929_v13 = vld [vmem:[%s1181_s7 + $0x64] ss:$8 sps:$4 sm:$0xff]   ;;  %v931_v15 = vld [vmem:[%s1181_s7 + $0x60] ss:$8 sps:$4 sm:$0xff]   ;;  %v964_v16 = vld [vmem:[%s1171_s9 + $0x14] ss:$8 sps:$4 sm:$0xff]  }
  0x42   : > { %v961_v14 = vld [vmem:[%s1171_s9 + $0x4] ss:$8 sps:$4 sm:$0xff]   ;;  %v932_v17 = vld [vmem:[%s1181_s7 + $0x74] ss:$8 sps:$4 sm:$0xff]   ;;  %569 = vmatprep.mubr.bf16.mxu1 %v964_v16  ;;  %v934_v18 = vld [vmem:[%s1181_s7 + $0x70] ss:$8 sps:$4 sm:$0xff]  }
  0x43   : > { %530 = vmatpush1.bf16.msra.mxu0 %v916_v4  ;;  %837 = vmatpush1.bf16.msra.mxu1 %v916_v4  ;;  %v935_v19 = vld [vmem:[%s1181_s7 + $0x84] ss:$8 sps:$4 sm:$0xff]   ;;  %v937_v20 = vld [vmem:[%s1181_s7 + $0x80] ss:$8 sps:$4 sm:$0xff]   ;;  %v938_v21 = vld [vmem:[%s1181_s7 + $0x94] ss:$8 sps:$4 sm:$0xff]  }
  0x44   : > { %531 = vmatprep.subr.bf16.mxu0 %v917_v5  ;;  %822 = vmatprep.subr.bf16.mxu1 %v917_v5  ;;  %v940_v22 = vld [vmem:[%s1181_s7 + $0x90] ss:$8 sps:$4 sm:$0xff]   ;;  %v941_v23 = vld [vmem:[%s1181_s7 + $0xa4] ss:$8 sps:$4 sm:$0xff]   ;;  %v943_v24 = vld [vmem:[%s1181_s7 + $0xa0] ss:$8 sps:$4 sm:$0xff]  }
  0x45   : > { %559 = vmatprep.mubr.bf16.mxu0 %v961_v14  ;;  %v944_v25 = vld [vmem:[%s1181_s7 + $0xb4] ss:$8 sps:$4 sm:$0xff]   ;;  %v946_v26 = vld [vmem:[%s1181_s7 + $0xb0] ss:$8 sps:$4 sm:$0xff]   ;;  %v947_v27 = vld [vmem:[%s1181_s7 + $0xc4] ss:$8 sps:$4 sm:$0xff]  }
  0x46   : > { %v949_v28 = vld [vmem:[%s1181_s7 + $0xc0] ss:$8 sps:$4 sm:$0xff]   ;;  %v950_v29 = vld [vmem:[%s1181_s7 + $0xd4] ss:$8 sps:$4 sm:$0xff]   ;;  %v952_v30 = vld [vmem:[%s1181_s7 + $0xd0] ss:$8 sps:$4 sm:$0xff]  }
  0x47   : > { %532 = vmatpush1.bf16.msra.mxu0 %v919_v6  ;;  %838 = vmatpush1.bf16.msra.mxu1 %v919_v6  ;;  %v953_v31 = vld [vmem:[%s1181_s7 + $0xe4] ss:$8 sps:$4 sm:$0xff]   ;;  %v955_v32 = vld [vmem:[%s1181_s7 + $0xe0] ss:$8 sps:$4 sm:$0xff]   ;;  %v956_v33 = vld [vmem:[%s1181_s7 + $0xf4] ss:$8 sps:$4 sm:$0xff]  }
  0x48   : > { %533 = vmatprep.subr.bf16.mxu0 %v920_v7  ;;  %823 = vmatprep.subr.bf16.mxu1 %v920_v7  ;;  %v958_v34 = vld [vmem:[%s1181_s7 + $0xf0] ss:$8 sps:$4 sm:$0xff]   ;;  %v959_v35 = vld [vmem:[%s1171_s9] ss:$8 sps:$4 sm:$0xff]   ;;  %p813_p7 = scmp.ne.s32.totalorder %s1037_s15, 8 }
  0x49   : > { %v962_v36 = vld [vmem:[%s1171_s9 + $0x10] ss:$8 sps:$4 sm:$0xff]   ;;  %v303_v37 = vld [vmem:[#allocation2] sm:$0xff]  ;;  %v304_v39 = vld [vmem:[#allocation2 + $0x8] sm:$0xff]  ;;  %v610_v61 = vlaneseq (!%p813_p7) }
  0x4a   : > { %v307_v38 = vld [vmem:[#allocation2 + $0x20] sm:$0xff]  ;;  %v308_v40 = vld [vmem:[#allocation2 + $0x28] sm:$0xff]  ;;  %v305_v43 = vld [vmem:[#allocation2 + $0x10] sm:$0xff] }
  0x4b   : > { %534 = vmatpush1.bf16.msra.mxu0 %v922_v8  ;;  %839 = vmatpush1.bf16.msra.mxu1 %v922_v8  ;;  %v309_v44 = vld [vmem:[#allocation2 + $0x30] sm:$0xff]  ;;  %v306_v49 = vld [vmem:[#allocation2 + $0x18] sm:$0xff]  ;;  %v611_v62 = vshrl.u32 (!%p813_p7), %v610_v61, 7  ;;  %v608_v63 = vld [vmem:[%s1268_s2] sm:$0x3] (!%p813_p7) }
  0x4c   : > { %535 = vmatprep.subr.bf16.mxu0 %v923_v9  ;;  %824 = vmatprep.subr.bf16.mxu1 %v923_v9  ;;  %v310_v50 = vld [vmem:[#allocation2 + $0x38] sm:$0xff] }
  0x4d   : > { %v612_v1 = vsub.s32 (!%p813_p7), 0, %v611_v62  ;;  %v616_v3 = vsub.s32 (!%p813_p7), 1, %v611_v62 }
  0x4f   : > { %536 = vmatpush1.bf16.msra.mxu0 %v925_v10  ;;  %840 = vmatpush1.bf16.msra.mxu1 %v925_v10  ;;  %v613_v7 = vrot.slane (!%p813_p7), %v608_v63, %v612_v1  ;;  %v617_v8 = vrot.slane (!%p813_p7), %v608_v63, %v616_v3 }
  0x50   : > { %537 = vmatprep.subr.bf16.mxu0 %v926_v11  ;;  %825 = vmatprep.subr.bf16.mxu1 %v926_v11 }
  0x53   : > { %538 = vmatpush1.bf16.msra.mxu0 %v928_v12  ;;  %841 = vmatpush1.bf16.msra.mxu1 %v928_v12 }
  0x54   : > { %539 = vmatprep.subr.bf16.mxu0 %v929_v13  ;;  %826 = vmatprep.subr.bf16.mxu1 %v929_v13 }
  0x57   : > { %540 = vmatpush1.bf16.msra.mxu0 %v931_v15  ;;  %842 = vmatpush1.bf16.msra.mxu1 %v931_v15 }
  0x58   : > { %541 = vmatprep.subr.bf16.mxu0 %v932_v17  ;;  %827 = vmatprep.subr.bf16.mxu1 %v932_v17 }
  0x5b   : > { %542 = vmatpush1.bf16.msra.mxu0 %v934_v18  ;;  %843 = vmatpush1.bf16.msra.mxu1 %v934_v18 }
  0x5c   : > { %543 = vmatprep.subr.bf16.mxu0 %v935_v19  ;;  %828 = vmatprep.subr.bf16.mxu1 %v935_v19 }
  0x5f   : > { %544 = vmatpush1.bf16.msra.mxu0 %v937_v20  ;;  %844 = vmatpush1.bf16.msra.mxu1 %v937_v20 }
  0x60   : > { %545 = vmatprep.subr.bf16.mxu0 %v938_v21  ;;  %829 = vmatprep.subr.bf16.mxu1 %v938_v21 }
  0x63   : > { %546 = vmatpush1.bf16.msra.mxu0 %v940_v22  ;;  %845 = vmatpush1.bf16.msra.mxu1 %v940_v22 }
  0x64   : > { %547 = vmatprep.subr.bf16.mxu0 %v941_v23  ;;  %830 = vmatprep.subr.bf16.mxu1 %v941_v23 }
  0x67   : > { %548 = vmatpush1.bf16.msra.mxu0 %v943_v24  ;;  %846 = vmatpush1.bf16.msra.mxu1 %v943_v24 }
  0x68   : > { %549 = vmatprep.subr.bf16.mxu0 %v944_v25  ;;  %831 = vmatprep.subr.bf16.mxu1 %v944_v25 }
  0x6b   : > { %550 = vmatpush1.bf16.msra.mxu0 %v946_v26  ;;  %847 = vmatpush1.bf16.msra.mxu1 %v946_v26 }
  0x6c   : > { %551 = vmatprep.subr.bf16.mxu0 %v947_v27  ;;  %832 = vmatprep.subr.bf16.mxu1 %v947_v27 }
  0x6f   : > { %552 = vmatpush1.bf16.msra.mxu0 %v949_v28  ;;  %848 = vmatpush1.bf16.msra.mxu1 %v949_v28 }
  0x70   : > { %553 = vmatprep.subr.bf16.mxu0 %v950_v29  ;;  %833 = vmatprep.subr.bf16.mxu1 %v950_v29 }
  0x73   : > { %554 = vmatpush1.bf16.msra.mxu0 %v952_v30  ;;  %849 = vmatpush1.bf16.msra.mxu1 %v952_v30 }
  0x74   : > { %555 = vmatprep.subr.bf16.mxu0 %v953_v31  ;;  %834 = vmatprep.subr.bf16.mxu1 %v953_v31 }
  0x77   : > { %556 = vmatpush1.bf16.msra.mxu0 %v955_v32  ;;  %850 = vmatpush1.bf16.msra.mxu1 %v955_v32 }
  0x78   : > { %557 = vmatprep.subr.bf16.mxu0 %v956_v33  ;;  %835 = vmatprep.subr.bf16.mxu1 %v956_v33 }
  0x7b   : > { %558 = vmatpush1.bf16.msra.mxu0 %v958_v34  ;;  %851 = vmatpush1.bf16.msra.mxu1 %v958_v34 }
  0x7e   : > { %560 = vmatmul.mubr.bf16.vlgmr.msra.gmra.mrb[0].mxu0 %v959_v35  ;;  %570 = vmatmul.mubr.bf16.vlgmr.msra.gmra.mrb[0].mxu1 %v962_v36 }
 0x151   : > { %v561_v41 = vpop.f32.mrb[0].mxu0  ;;  %v571_v42 = vpop.f32.mrb[0].mxu1  ;;  %599 = sbr.rel (%p813_p7) target bundleno = 355 (0x163), region = 44 }
 0x152   : > { %v580_v45 = vadd.f32 %v561_v41, %v303_v37  ;;  %v584_v46 = vadd.f32 %v571_v42, %v307_v38  ;;  %v563_v47 = vpop.f32.mrb[1].mxu0  ;;  %v573_v48 = vpop.f32.mrb[1].mxu1 }
 0x153   : > { %v581_v51 = vadd.f32 %v563_v47, %v304_v39  ;;  %v585_v52 = vadd.f32 %v573_v48, %v308_v40  ;;  %v565_v53 = vpop.f32.mrb[2].mxu0  ;;  %v575_v54 = vpop.f32.mrb[2].mxu1 }
 0x154   : > { %588 = vst [vmem:[#allocation2] sm:$0xff] %v580_v45  ;;  %592 = vst [vmem:[#allocation2 + $0x20] sm:$0xff] %v584_v46  ;;  %v582_v55 = vadd.f32 %v565_v53, %v305_v43  ;;  %v586_v56 = vadd.f32 %v575_v54, %v309_v44  ;;  %v567_v57 = vpop.f32.mrb[3].mxu0  ;;  %v577_v58 = vpop.f32.mrb[3].mxu1 }
 0x155   : > { %589 = vst [vmem:[#allocation2 + $0x8] sm:$0xff] %v581_v51  ;;  %593 = vst [vmem:[#allocation2 + $0x28] sm:$0xff] %v585_v52  ;;  %v583_v59 = vadd.f32 %v567_v57, %v306_v49  ;;  %v587_v60 = vadd.f32 %v577_v58, %v310_v50 }
 0x156   : > { %590 = vst [vmem:[#allocation2 + $0x10] sm:$0xff] %v582_v55  ;;  %594 = vst [vmem:[#allocation2 + $0x30] sm:$0xff] %v586_v56 }
 0x157   : > { %591 = vst [vmem:[#allocation2 + $0x18] sm:$0xff] %v583_v59  ;;  %595 = vst [vmem:[#allocation2 + $0x38] sm:$0xff] %v587_v60 }
 0x15b   : > { %v600_v0 = vld [vmem:[#allocation2] sm:$0xff] }
 0x15c   : > { %v601_v2 = vld [vmem:[#allocation2 + $0x8] sm:$0xff]  ;;  %v604_v6 = vld [vmem:[#allocation2 + $0x20] sm:$0xff]  ;;  %v620_v12 = vadd.f32 %v613_v7, %v600_v0 }
 0x15d   : > { %v602_v4 = vld [vmem:[#allocation2 + $0x10] sm:$0xff]  ;;  %v605_v9 = vld [vmem:[#allocation2 + $0x28] sm:$0xff]  ;;  %v621_v13 = vadd.f32 %v617_v8, %v601_v2  ;;  %v624_v16 = vadd.f32 %v613_v7, %v604_v6 }
 0x15e   : > { %v603_v5 = vld [vmem:[#allocation2 + $0x18] sm:$0xff]  ;;  %v606_v10 = vld [vmem:[#allocation2 + $0x30] sm:$0xff]  ;;  %v622_v14 = vadd.f32 %v613_v7, %v602_v4  ;;  %v625_v17 = vadd.f32 %v617_v8, %v605_v9  ;;  %628 = vst [vmem:[%s1269_s3] sm:$0xff] %v620_v12 }
 0x15f   : > { %v607_v11 = vld [vmem:[#allocation2 + $0x38] sm:$0xff]  ;;  %v623_v15 = vadd.f32 %v617_v8, %v603_v5  ;;  %v626_v18 = vadd.f32 %v613_v7, %v606_v10  ;;  %629 = vst [vmem:[%s1269_s3 + $0x8] sm:$0xff] %v621_v13  ;;  %632 = vst [vmem:[%s1269_s3 + $0x20] sm:$0xff] %v624_v16 }
 0x160   : > { %v627_v19 = vadd.f32 %v617_v8, %v607_v11  ;;  %630 = vst [vmem:[%s1269_s3 + $0x10] sm:$0xff] %v622_v14  ;;  %633 = vst [vmem:[%s1269_s3 + $0x28] sm:$0xff] %v625_v17 }
 0x161   : > { %631 = vst [vmem:[%s1269_s3 + $0x18] sm:$0xff] %v623_v15  ;;  %634 = vst [vmem:[%s1269_s3 + $0x30] sm:$0xff] %v626_v18 }
 0x162   : > { %635 = vst [vmem:[%s1269_s3 + $0x38] sm:$0xff] %v627_v19 }
 0x163 PF: > { %s16_s17 = sadd.s32 1, %s1045_s17   ;;  %s1274_s12 = smov %s1029_s13 }
 0x164   : > { %p13_p5 = scmp.ge.s32.totalorder %s16_s17, 11   ;;  %s1275_s13 = smov %s1033_s14 }
 0x165   : > { %s1276_s14 = smov %s1121_s24  ;;  %s1277_s15 = smov %s1041_s16 }
 0x166   : > { %s1278_s16 = smov %s1280_s19  ;;  %15 = sbr.rel (!%p13_p5) target bundleno = 4 (0x4), region = 86 }
 0x16d   :  { %669 = vsyncpa [#allocation4], 1 }
 0x16e   :  { %671 = vsyncpa [#allocation4 + $0x1], 1 }

// kernel: default_generator_forward.62
= control target key start
LH: loop header
LB: loop body
LE: loop exit
PB: predicated region body
PF: predicated region fallthrough
CT: control target
= control target key end

     0   :  { %s617_s9 = smov 0   ;;  %s619_s10 = smov 0   ;;  %s727_s0 = inlined_call_operand.vmem [shape: f32[2,16,256], index: 0, kind: input, shape index: {}]   ;;  %s728_s1 = inlined_call_operand.vmem [shape: bf16[2,16,256], index: 1, kind: input, shape index: {}]   ;;  %s729_s2 = inlined_call_operand.vmem [shape: bf16[2,16,256], index: 2, kind: output, shape index: {}]  }
   0x1   :  { %s621_s11 = smov 0   ;;  %s623_s12 = smov 0  }
   0x2   :  { %s625_s13 = smov 0   ;;  %s627_s14 = smov 0  }
   0x3   :  { %s629_s15 = smov 0  }
   0x4 LB: > { %s21_s16 = sadd.s32 1, %s592_s13  ;;  %s24_s17 = sadd.s32 1, %s596_s14  ;;  %s600_s15 = sphi %s629_s15, %s12_s15   ;;  %s596_s14 = sphi %s627_s14, %s737_s14   ;;  %s592_s13 = sphi %s625_s13, %s736_s13   ;;  %s588_s12 = sphi %s623_s12, %s735_s12   ;;  %s584_s11 = sphi %s621_s11, %s734_s11   ;;  %s580_s10 = sphi %s619_s10, %s733_s10   ;;  %s576_s9 = sphi %s617_s9, %s732_s9  }
   0x5   : > { %p22_p0 = scmp.ge.s32.totalorder %s21_s16, 2  ;;  %s456_s18 = sadd.s32 4294967295, %s600_s15  }
   0x6   : > { %p40_p1 = scmp.ne.s32.totalorder %s580_s10, %s576_s9  ;;  %p41_p2 = scmp.eq.s32.totalorder %s600_s15, 0 }
   0x7   : > { %s739_s16 = smov (%p22_p0, %s21_s16), 0  ;;  %s741_s17 = smov (!%p22_p0, %s24_s17), %s596_s14 }
   0x8   : > { %p26_p3 = scmp.ge.s32.totalorder %s741_s17, 2  ;;  %p100_p4 = scmp.eq.s32.totalorder %s456_s18, 3 }
   0x9   : > { %s29_s19 = ssub.s32 %s592_s13, %s739_s16  ;;  %p663_p5 = por %p41_p2, %p40_p1 }
   0xa   : > { %s743_s17 = smov (%p26_p3, %s741_s17), 0  ;;  %p669_p6 = por %p100_p4, %p40_p1 }
   0xb   : > { %s28_s22 = ssub.s32 %s596_s14, %s743_s17  ;;  %s33_s24 = sadd.s32 1, %s580_s10 }
   0xc   : > { %s30_s23 = sor.u32 %s29_s19, %s28_s22  ;;  %p459_p8 = scmp.ge.s32.totalorder %s600_s15, 4 }
   0xd   : > { %p31_p7 = scmp.eq.s32.totalorder %s30_s23, 0 }
   0xe   : > { %122 = sbr.rel (%p459_p8) target bundleno = 35 (0x23), region = 16 }
   0xf   : > { %s677_s25 = scalar_select %p31_p7, %s580_s10, %s33_s24  }
  0x15   : > { %125 = sbr.rel (!%p663_p5) target bundleno = 28 (0x1c), region = 20  ;;  %s127_s26 = sand.u32 (%p663_p5), 1, %s580_s10  }
  0x16   : > { %s461_s27 = sshll.u32 (%p663_p5), %s596_s14, 2  ;;  %s460_s28 = sshll.u32 (%p663_p5), %s127_s26, 4 }
  0x17   : > { %s131_s29 = sadd.s32 (%p663_p5), %s592_s13, %s461_s27  ;;  %s129_s6 = scalar_lea.vmem (%p663_p5), [#allocation2], %s460_s28 }
  0x18   : > { %s462_s30 = sshll.u32 (%p663_p5), %s131_s29, 3 }
  0x19   : > { %s133_s5 = scalar_lea.vmem (%p663_p5), %s727_s0, %s462_s30 }
  0x1a   : > { %v163_v0 = vld [vmem:[%s133_s5] sm:$0xff] (%p663_p5)  ;;  %v165_v1 = vld [vmem:[%s133_s5 + $0x10] sm:$0xff] (%p663_p5) }
  0x1b   : > { %164 = vst [vmem:[%s129_s6] sm:$0xff] (%p663_p5), %v163_v0  ;;  %166 = vst [vmem:[%s129_s6 + $0x8] sm:$0xff] (%p663_p5), %v165_v1 }
  0x1c PF: > { %172 = sbr.rel (!%p663_p5) target bundleno = 35 (0x23), region = 58  ;;  %s174_s7 = sand.u32 (%p663_p5), 1, %s580_s10  }
  0x1d   : > { %s464_s8 = sshll.u32 (%p663_p5), %s596_s14, 2  ;;  %s463_s18 = sshll.u32 (%p663_p5), %s174_s7, 3 }
  0x1e   : > { %s178_s19 = sadd.s32 (%p663_p5), %s592_s13, %s464_s8  ;;  %s176_s27 = scalar_lea.vmem (%p663_p5), [#allocation3], %s463_s18 }
  0x1f   : > { %s465_s22 = sshll.u32 (%p663_p5), %s178_s19, 2 }
  0x20   : > { %s180_s26 = scalar_lea.vmem (%p663_p5), %s728_s1, %s465_s22 }
  0x21   : > { %v196_v2 = vld [vmem:[%s180_s26] sm:$0xf] (%p663_p5)  ;;  %v198_v3 = vld [vmem:[%s180_s26 + $0x8] sm:$0xf] (%p663_p5) }
  0x22   : > { %197 = vst [vmem:[%s176_s27] sm:$0xf] (%p663_p5), %v196_v2  ;;  %199 = vst [vmem:[%s176_s27 + $0x4] sm:$0xf] (%p663_p5), %v198_v3 }
  0x23 PF: > { %p466_p9 = scmp.ge.s32.totalorder %s600_s15, 1  ;;  %p225_p10 = scmp.lt.s32.totalorder %s600_s15, 5 }
  0x25   : > { %p226_p11 = pnand %p466_p9, %p225_p10 }
  0x26   : > { %s232_s20 = sand.u32 (!%p226_p11), 1, %s576_s9  }
  0x27   : > { %229 = sbr.rel (%p226_p11) target bundleno = 94 (0x5e), region = 99  ;;  %s467_s28 = sshll.u32 (!%p226_p11), %s232_s20, 4 }
  0x28   : > { %s234_s29 = scalar_lea.vmem (!%p226_p11), [#allocation2], %s467_s28  ;;  %s468_s9 = sshll.u32 (!%p226_p11), %s232_s20, 3 }
  0x29   : > { %v263_v4 = vld [vmem:[%s234_s29] sm:$0xff] (!%p226_p11)  ;;  %v264_v5 = vld [vmem:[%s234_s29 + $0x8] sm:$0xff] (!%p226_p11)  ;;  %s241_s30 = scalar_lea.vmem (!%p226_p11), [#allocation3], %s468_s9  ;;  %s262_s3 = scalar_lea.vmem (!%p226_p11), [#allocation4], %s468_s9 }
  0x2a   : > { %v265_v6 = vadd.f32 (!%p226_p11), %v264_v5, %v263_v4  ;;  %v272_v7 = vmul.f32 (!%p226_p11), %v263_v4, %v263_v4  ;;  %v273_v8 = vmul.f32 (!%p226_p11), %v264_v5, %v264_v5  ;;  %v480_v28 = vld [vmem:[%s241_s30] sm:$0xff] (!%p226_p11)  }
  0x2b   : > { %v481_v31 = vunpack.c.l.bf16 (!%p226_p11), %v480_v28  ;;  %v482_v32 = vunpack.c.h.bf16 (!%p226_p11), %v480_v28 }
  0x2c   : > { %v266_v9 = vrot.slane (!%p226_p11), %v265_v6, 4  ;;  %v274_v10 = vadd.f32 (!%p226_p11), %v273_v8, %v272_v7 }
  0x2e   : > { %v267_v11 = vadd.f32 %v266_v9, %v265_v6  ;;  %v275_v12 = vrot.slane %v274_v10, 4  ;;  %s473_s4 = sshll.u32 (%p669_p6), %s588_s12, 2 }
  0x2f   : > { %s318_s5 = sadd.s32 (%p669_p6), %s584_s11, %s473_s4 }
  0x30   : > { %v268_v13 = vrot.slane %v267_v11, 2  ;;  %v276_v14 = vadd.f32 %v275_v12, %v274_v10  ;;  %s474_s6 = sshll.u32 (%p669_p6), %s318_s5, 2 }
  0x31   : > { %s320_s18 = scalar_lea.vmem (%p669_p6), %s729_s2, %s474_s6 }
  0x32   : > { %v269_v15 = vadd.f32 %v268_v13, %v267_v11  ;;  %v277_v16 = vrot.slane %v276_v14, 2 }
  0x34   : > { %v270_v17 = vrot.slane %v269_v15, 1  ;;  %v278_v18 = vadd.f32 %v277_v16, %v276_v14 }
  0x36   : > { %v271_v19 = vadd.f32 %v270_v17, %v269_v15  ;;  %v279_v20 = vrot.slane %v278_v18, 1 }
  0x38   : > { %v280_v21 = vadd.f32 %v279_v20, %v278_v18  ;;  %v281_v22 = vmul.f32 0.0625, %v271_v19 }
  0x3a   : > { %v282_v23 = vmul.f32 0.0625, %v280_v21  ;;  %v283_v24 = vmul.f32 %v281_v22, %v281_v22  ;;  %v286_v29 = vsub.f32 %v263_v4, %v281_v22  ;;  %v287_v30 = vsub.f32 %v264_v5, %v281_v22 }
  0x3c   : > { %v284_v25 = vsub.f32 %v282_v23, %v283_v24 }
  0x3e   : > { %v285_v26 = vmax.f32 %v284_v25, 0.0 }
  0x40   : > { %v288_v27 = vadd.f32 1e-05, %v285_v26 }
  0x42   : > { %544 = vrsqrt.f32 %v288_v27 }
  0x4c   : > { %v545_v33 = vpop.eup %544 }
  0x4d   : > { %v290_v34 = vmul.f32 %v545_v33, %v286_v29  ;;  %v291_v35 = vmul.f32 %v545_v33, %v287_v30 }
  0x4f   : > { %v296_v36 = vadd.f32 %v481_v31, %v290_v34  ;;  %v297_v37 = vadd.f32 %v482_v32, %v291_v35  ;;  %316 = sbr.rel (!%p669_p6) target bundleno = 94 (0x5e), region = 111 }
  0x51   : > { %v298_v38 = vmax.f32 %v296_v36, 0.0  ;;  %v299_v39 = vmax.f32 %v297_v37, 0.0 }
  0x53   : > { %v486_v40 = vpack.c.bf16 %v299_v39, %v298_v38 }
  0x55   : > { %487 = vst [vmem:[%s262_s3] sm:$0xff] %v486_v40  }
  0x5c   : > { %v336_v41 = vld [vmem:[%s262_s3] sm:$0xf]  ;;  %v338_v42 = vld [vmem:[%s262_s3 + $0x4] sm:$0xf] }
  0x5d   : > { %337 = vst [vmem:[%s320_s18] sm:$0xf] %v336_v41  ;;  %339 = vst [vmem:[%s320_s18 + $0x8] sm:$0xf] %v338_v42 }
  0x5e PF: > { %s12_s15 = sadd.s32 1, %s600_s15   ;;  %s732_s9 = smov %s580_s10 }
  0x5f   : > { %p9_p12 = scmp.ge.s32.totalorder %s12_s15, 6   ;;  %s733_s10 = smov %s677_s25 }
  0x60   : > { %s734_s11 = smov %s592_s13  ;;  %s735_s12 = smov %s596_s14 }
  0x61   : > { %s736_s13 = smov %s739_s16  ;;  %s737_s14 = smov %s743_s17 }
  0x62   :  { %11 = sbr.rel (!%p9_p12) target bundleno = 4 (0x4), region = 191 }

// kernel: default_generator_forward.96
= control target key start
LH: loop header
LB: loop body
LE: loop exit
PB: predicated region body
PF: predicated region fallthrough
CT: control target
= control target key end

     0   :  { %s863_s12 = smov 0   ;;  %s865_s13 = smov 0   ;;  %s969_s0 = inlined_call_operand.vmem [shape: bf16[32,512], index: 0, kind: input, shape index: {}]   ;;  %s970_s1 = inlined_call_operand.vmem [shape: bf16[512,128], index: 1, kind: input, shape index: {}]   ;;  %s971_s2 = inlined_call_operand.vmem [shape: f32[1,128], index: 2, kind: input, shape index: {}]   ;;  %s972_s3 = inlined_call_operand.vmem [shape: f32[32,128], index: 3, kind: output, shape index: {}]  }
   0x1   :  { %s867_s14 = smov 0   ;;  %s869_s15 = smov 0  }
   0x2   :  { %s871_s16 = smov 0  }
   0x3 LB: > { %s25_s17 = sadd.s32 1, %s836_s15  ;;  %p48_p1 = scmp.ne.s32.totalorder %s828_s13, %s824_s12  ;;  %s840_s16 = sphi %s871_s16, %s13_s16   ;;  %s836_s15 = sphi %s869_s15, %s976_s15   ;;  %s832_s14 = sphi %s867_s14, %s975_s14   ;;  %s828_s13 = sphi %s865_s13, %s974_s13   ;;  %s824_s12 = sphi %s863_s12, %s973_s12  }
   0x4   : > { %p26_p0 = scmp.ge.s32.totalorder %s25_s17, 2  ;;  %p49_p2 = scmp.eq.s32.totalorder %s840_s16, 0 }
   0x5   : > { %s41_s19 = sadd.s32 1, %s828_s13  ;;  %p659_p5 = scmp.ge.s32.totalorder %s840_s16, 2 }
   0x6   : > { %s978_s17 = smov (%p26_p0, %s25_s17), 0  ;;  %p50_p3 = por %p49_p2, %p48_p1 }
   0x7   : > { %s37_s18 = ssub.s32 %s836_s15, %s978_s17  ;;  %162 = sbr.rel (%p659_p5) target bundleno = 21 (0x15), region = 20 }
   0x8   : > { %p39_p4 = scmp.eq.s32.totalorder %s37_s18, 0 }
   0xa   : > { %s898_s20 = scalar_select %p39_p4, %s828_s13, %s41_s19  }
   0xe   : > { %165 = sbr.rel (!%p50_p3) target bundleno = 21 (0x15), region = 24  ;;  %s167_s21 = sand.u32 (%p50_p3), 1, %s828_s13  }
   0xf   : > { %s694_s22 = sshll.u32 (%p50_p3), %s836_s15, 3  ;;  %s660_s23 = sshll.u32 (%p50_p3), %s167_s21, 5 }
  0x10   : > { %s175_s26 = scalar_lea.vmem (%p50_p3), %s969_s0, %s694_s22  ;;  %s169_s27 = scalar_lea.vmem (%p50_p3), [#allocation3], %s660_s23 }
  0x11   : > { %v209_v0 = vld [vmem:[%s175_s26] sm:$0xff] (%p50_p3)  ;;  %v211_v1 = vld [vmem:[%s175_s26 + $0x10] sm:$0xff] (%p50_p3) }
  0x12   : > { %v213_v2 = vld [vmem:[%s175_s26 + $0x20] sm:$0xff] (%p50_p3)  ;;  %210 = vst [vmem:[%s169_s27] sm:$0xff] (%p50_p3), %v209_v0  ;;  %212 = vst [vmem:[%s169_s27 + $0x8] sm:$0xff] (%p50_p3), %v211_v1  ;;  %v215_v3 = vld [vmem:[%s175_s26 + $0x30] sm:$0xff] (%p50_p3) }
  0x13   : > { %214 = vst [vmem:[%s169_s27 + $0x10] sm:$0xff] (%p50_p3), %v213_v2  ;;  %216 = vst [vmem:[%s169_s27 + $0x18] sm:$0xff] (%p50_p3), %v215_v3 }
  0x15 PF: > { %p663_p6 = scmp.ge.s32.totalorder %s840_s16, 1  ;;  %p233_p7 = scmp.lt.s32.totalorder %s840_s16, 3 }
  0x17   : > { %p234_p8 = pnand %p663_p6, %p233_p7 }
  0x18   : > { %s240_s28 = sand.u32 (!%p234_p8), 1, %s824_s12   ;;  %s665_s29 = sshll.u32 (!%p234_p8), %s832_s14, 5 }
  0x19   : > { %237 = sbr.rel (%p234_p8) target bundleno = 302 (0x12e), region = 66  ;;  %s664_s30 = sshll.u32 (!%p234_p8), %s240_s28, 5 }
  0x1a   : > { %p280_p9 = scmp.lt.s32.totalorder (!%p234_p8), %s665_s29, 63  ;;  %s915_s8 = scalar_lea.vmem (!%p234_p8), [#allocation3], %s664_s30 }
  0x1b   : > { %p667_p10 = scmp.ne.s32.totalorder (!%p234_p8), %s832_s14, 0 }
  0x20   : > { %s980_s29 = smov (!%p280_p9, %s665_s29), 63  ;;  %304 = sbr.rel (%p667_p10) target bundleno = 39 (0x27), region = 74 }
  0x21   : > { %s666_s4 = sshll.u32 %s980_s29, 2  ;;  %v842_v4 = vmov (!%p667_p10), 0.0  }
  0x22   : > { %s913_s7 = scalar_lea.vmem %s970_s1, %s666_s4  ;;  %305 = vst [vmem:[#allocation2] sm:$0xff] (!%p667_p10), %v842_v4  ;;  %306 = vst [vmem:[#allocation2 + $0x8] sm:$0xff] (!%p667_p10), %v842_v4 }
  0x23   : > { %307 = vst [vmem:[#allocation2 + $0x10] sm:$0xff] (!%p667_p10), %v842_v4  ;;  %308 = vst [vmem:[#allocation2 + $0x18] sm:$0xff] (!%p667_p10), %v842_v4 }
  0x27 PF: > { %v780_v5 = vld [vmem:[%s913_s7 + $0x40] sm:$0xff]   ;;  %v782_v7 = vld [vmem:[%s913_s7 + $0x48] sm:$0xff]   ;;  %v784_v9 = vld [vmem:[%s913_s7 + $0x50] sm:$0xff]   ;;  %p688_p11 = scmp.ne.s32.totalorder %s832_s14, 1 }
  0x28   : > { %v781_v6 = vld [vmem:[%s913_s7] sm:$0xff]   ;;  %695 = vmatprep.subr.bf16.mxu0 %v780_v5  ;;  %723 = vmatprep.subr.bf16.mxu1 %v780_v5  ;;  %v783_v8 = vld [vmem:[%s913_s7 + $0x8] sm:$0xff]   ;;  %v785_v10 = vld [vmem:[%s913_s7 + $0x10] sm:$0xff]  }
  0x29   : > { %696 = vmatpush3.bf16.msra.mxu0 %v781_v6  ;;  %731 = vmatpush3.bf16.msra.mxu1 %v781_v6  ;;  %v786_v11 = vld [vmem:[%s913_s7 + $0x58] sm:$0xff]   ;;  %v788_v13 = vld [vmem:[%s913_s7 + $0x60] sm:$0xff]   ;;  %v790_v15 = vld [vmem:[%s913_s7 + $0x68] sm:$0xff]  }
  0x2a   : > { %697 = vmatprep.subr.bf16.mxu0 %v782_v7  ;;  %724 = vmatprep.subr.bf16.mxu1 %v782_v7  ;;  %v787_v12 = vld [vmem:[%s913_s7 + $0x18] sm:$0xff]   ;;  %v789_v14 = vld [vmem:[%s913_s7 + $0x20] sm:$0xff]   ;;  %v791_v18 = vld [vmem:[%s913_s7 + $0x28] sm:$0xff]  }
  0x2b   : > { %v798_v16 = vld [vmem:[%s915_s8 + $0x4] ss:$8 sps:$4 sm:$0xff]   ;;  %v801_v17 = vld [vmem:[%s915_s8 + $0x14] ss:$8 sps:$4 sm:$0xff]   ;;  %v796_v23 = vld [vmem:[%s915_s8] ss:$8 sps:$4 sm:$0xff]  }
  0x2c   : > { %v792_v19 = vld [vmem:[%s913_s7 + $0x70] sm:$0xff]   ;;  %497 = vmatprep.mubr.bf16.mxu0 %v798_v16  ;;  %505 = vmatprep.mubr.bf16.mxu1 %v801_v17  ;;  %v794_v21 = vld [vmem:[%s913_s7 + $0x78] sm:$0xff]   ;;  %v309_v27 = vld [vmem:[#allocation2] sm:$0xff] }
  0x2d   : > { %698 = vmatpush3.bf16.msra.mxu0 %v783_v8  ;;  %732 = vmatpush3.bf16.msra.mxu1 %v783_v8  ;;  %v793_v20 = vld [vmem:[%s913_s7 + $0x30] sm:$0xff]   ;;  %v795_v22 = vld [vmem:[%s913_s7 + $0x38] sm:$0xff]   ;;  %v310_v35 = vld [vmem:[#allocation2 + $0x8] sm:$0xff] }
  0x2e   : > { %699 = vmatprep.subr.bf16.mxu0 %v784_v9  ;;  %725 = vmatprep.subr.bf16.mxu1 %v784_v9  ;;  %v799_v24 = vld [vmem:[%s915_s8 + $0x10] ss:$8 sps:$4 sm:$0xff]   ;;  %v689_v46 = vld [vmem:[%s971_s2] ss:$0 sm:$0xff] (!%p688_p11) }
  0x2f   : > { %v311_v29 = vld [vmem:[#allocation2 + $0x10] sm:$0xff]  ;;  %v312_v37 = vld [vmem:[#allocation2 + $0x18] sm:$0xff] }
  0x31   : > { %700 = vmatpush3.bf16.msra.mxu0 %v785_v10  ;;  %733 = vmatpush3.bf16.msra.mxu1 %v785_v10 }
  0x32   : > { %701 = vmatprep.subr.bf16.mxu0 %v786_v11  ;;  %726 = vmatprep.subr.bf16.mxu1 %v786_v11 }
  0x35   : > { %702 = vmatpush3.bf16.msra.mxu0 %v787_v12  ;;  %734 = vmatpush3.bf16.msra.mxu1 %v787_v12 }
  0x36   : > { %703 = vmatprep.subr.bf16.mxu0 %v788_v13  ;;  %727 = vmatprep.subr.bf16.mxu1 %v788_v13 }
  0x39   : > { %704 = vmatpush3.bf16.msra.mxu0 %v789_v14  ;;  %735 = vmatpush3.bf16.msra.mxu1 %v789_v14 }
  0x3a   : > { %705 = vmatprep.subr.bf16.mxu0 %v790_v15  ;;  %728 = vmatprep.subr.bf16.mxu1 %v790_v15 }
  0x3d   : > { %706 = vmatpush3.bf16.msra.mxu0 %v791_v18  ;;  %736 = vmatpush3.bf16.msra.mxu1 %v791_v18 }
  0x3e   : > { %707 = vmatprep.subr.bf16.mxu0 %v792_v19  ;;  %729 = vmatprep.subr.bf16.mxu1 %v792_v19 }
  0x41   : > { %708 = vmatpush3.bf16.msra.mxu0 %v793_v20  ;;  %737 = vmatpush3.bf16.msra.mxu1 %v793_v20 }
  0x42   : > { %709 = vmatprep.subr.bf16.mxu0 %v794_v21  ;;  %730 = vmatprep.subr.bf16.mxu1 %v794_v21 }
  0x45   : > { %710 = vmatpush3.bf16.msra.mxu0 %v795_v22  ;;  %738 = vmatpush3.bf16.msra.mxu1 %v795_v22 }
  0x48   : > { %498 = vmatmul.mubr.bf16.vlgmr.msra.gmra.mrb[0].mxu0 %v796_v23  ;;  %506 = vmatmul.mubr.bf16.vlgmr.msra.gmra.mrb[0].mxu1 %v799_v24 }
 0x11b   : > { %v711_v25 = vpop.f32.mrb[0].mxu0  ;;  %v717_v26 = vpop.f32.mrb[0].mxu1 }
 0x11c   : > { %v712_v28 = vpop.f32.mrb[1].mxu0  ;;  %v718_v30 = vpop.f32.mrb[1].mxu1 }
 0x11d   : > { %v713_v31 = vadd.f32 %v712_v28, %v711_v25  ;;  %v719_v32 = vadd.f32 %v718_v30, %v717_v26  ;;  %v714_v33 = vpop.f32.mrb[2].mxu0  ;;  %v720_v34 = vpop.f32.mrb[2].mxu1  ;;  %525 = sbr.rel (%p688_p11) target bundleno = 302 (0x12e), region = 78 }
 0x11e   : > { %v715_v36 = vpop.f32.mrb[3].mxu0  ;;  %v721_v38 = vpop.f32.mrb[3].mxu1 }
 0x11f   : > { %v514_v39 = vadd.f32 %v713_v31, %v309_v27  ;;  %v516_v40 = vadd.f32 %v719_v32, %v311_v29  ;;  %v716_v41 = vadd.f32 %v715_v36, %v714_v33  ;;  %v722_v42 = vadd.f32 %v721_v38, %v720_v34 }
 0x121   : > { %518 = vst [vmem:[#allocation2] sm:$0xff] %v514_v39  ;;  %520 = vst [vmem:[#allocation2 + $0x10] sm:$0xff] %v516_v40  ;;  %v515_v43 = vadd.f32 %v716_v41, %v310_v35  ;;  %v517_v44 = vadd.f32 %v722_v42, %v312_v37 }
 0x123   : > { %519 = vst [vmem:[#allocation2 + $0x8] sm:$0xff] %v515_v43  ;;  %521 = vst [vmem:[#allocation2 + $0x18] sm:$0xff] %v517_v44 }
 0x128   : > { %v526_v45 = vld [vmem:[#allocation2] sm:$0xff]  ;;  %v528_v50 = vld [vmem:[#allocation2 + $0x10] sm:$0xff] }
 0x129   : > { %v537_v48 = vadd.f32 %v689_v46, %v526_v45  ;;  %v539_v52 = vadd.f32 %v689_v46, %v528_v50 }
 0x12a   : > { %v527_v47 = vld [vmem:[#allocation2 + $0x8] sm:$0xff]  ;;  %v529_v51 = vld [vmem:[#allocation2 + $0x18] sm:$0xff] }
 0x12b   : > { %v538_v49 = vadd.f32 %v689_v46, %v527_v47  ;;  %v540_v53 = vadd.f32 %v689_v46, %v529_v51  ;;  %541 = vst [vmem:[%s972_s3] sm:$0xff] %v537_v48  ;;  %543 = vst [vmem:[%s972_s3 + $0x10] sm:$0xff] %v539_v52 }
 0x12d   : > { %542 = vst [vmem:[%s972_s3 + $0x8] sm:$0xff] %v538_v49  ;;  %544 = vst [vmem:[%s972_s3 + $0x18] sm:$0xff] %v540_v53 }
 0x12e PF: > { %s13_s16 = sadd.s32 1, %s840_s16   ;;  %s973_s12 = smov %s828_s13 }
 0x12f   : > { %p10_p12 = scmp.ge.s32.totalorder %s13_s16, 4   ;;  %s974_s13 = smov %s898_s20 }
 0x130   : > { %s975_s14 = smov %s836_s15  ;;  %s976_s15 = smov %s978_s17 }
 0x131   :  { %12 = sbr.rel (!%p10_p12) target bundleno = 3 (0x3), region = 119 }

// kernel: default_generator_forward.98
= control target key start
LH: loop header
LB: loop body
LE: loop exit
PB: predicated region body
PF: predicated region fallthrough
CT: control target
= control target key end

     0   :  { %s863_s12 = smov 0   ;;  %s865_s13 = smov 0   ;;  %s969_s0 = inlined_call_operand.vmem [shape: bf16[32,1024], index: 0, kind: input, shape index: {}]   ;;  %s970_s1 = inlined_call_operand.vmem [shape: bf16[1024,128], index: 1, kind: input, shape index: {}]   ;;  %s971_s2 = inlined_call_operand.vmem [shape: f32[1,128], index: 2, kind: input, shape index: {}]   ;;  %s972_s3 = inlined_call_operand.vmem [shape: f32[32,128], index: 3, kind: output, shape index: {}]  }
   0x1   :  { %s867_s14 = smov 0   ;;  %s869_s15 = smov 0  }
   0x2   :  { %s871_s16 = smov 0  }
   0x3 LB: > { %s25_s17 = sadd.s32 1, %s836_s15  ;;  %p48_p1 = scmp.ne.s32.totalorder %s828_s13, %s824_s12  ;;  %s840_s16 = sphi %s871_s16, %s13_s16   ;;  %s836_s15 = sphi %s869_s15, %s976_s15   ;;  %s832_s14 = sphi %s867_s14, %s975_s14   ;;  %s828_s13 = sphi %s865_s13, %s974_s13   ;;  %s824_s12 = sphi %s863_s12, %s973_s12  }
   0x4   : > { %p26_p0 = scmp.ge.s32.totalorder %s25_s17, 4  ;;  %p49_p2 = scmp.eq.s32.totalorder %s840_s16, 0 }
   0x5   : > { %s41_s19 = sadd.s32 1, %s828_s13  ;;  %p659_p5 = scmp.ge.s32.totalorder %s840_s16, 4 }
   0x6   : > { %s978_s17 = smov (%p26_p0, %s25_s17), 0  ;;  %p50_p3 = por %p49_p2, %p48_p1 }
   0x7   : > { %s37_s18 = ssub.s32 %s836_s15, %s978_s17  ;;  %162 = sbr.rel (%p659_p5) target bundleno = 22 (0x16), region = 20 }
   0x8   : > { %p39_p4 = scmp.eq.s32.totalorder %s37_s18, 0 }
   0xa   : > { %s898_s20 = scalar_select %p39_p4, %s828_s13, %s41_s19  }
   0xe   : > { %165 = sbr.rel (!%p50_p3) target bundleno = 22 (0x16), region = 24  ;;  %s167_s21 = sand.u32 (%p50_p3), 1, %s828_s13  }
   0xf   : > { %s694_s22 = sshll.u32 (%p50_p3), %s836_s15, 3  ;;  %s660_s23 = sshll.u32 (%p50_p3), %s167_s21, 5 }
  0x10   : > { %s175_s26 = scalar_lea.vmem (%p50_p3), %s969_s0, %s694_s22  ;;  %s169_s27 = scalar_lea.vmem (%p50_p3), [#allocation3], %s660_s23 }
  0x11   : > { %v209_v0 = vld [vmem:[%s175_s26] sm:$0xff] (%p50_p3) }
  0x12   : > { %v211_v1 = vld [vmem:[%s175_s26 + $0x20] sm:$0xff] (%p50_p3)  ;;  %210 = vst [vmem:[%s169_s27] sm:$0xff] (%p50_p3), %v209_v0 }
  0x13   : > { %v213_v2 = vld [vmem:[%s175_s26 + $0x40] sm:$0xff] (%p50_p3)  ;;  %212 = vst [vmem:[%s169_s27 + $0x8] sm:$0xff] (%p50_p3), %v211_v1 }
  0x14   : > { %214 = vst [vmem:[%s169_s27 + $0x10] sm:$0xff] (%p50_p3), %v213_v2  ;;  %v215_v3 = vld [vmem:[%s175_s26 + $0x60] sm:$0xff] (%p50_p3) }
  0x15   : > { %216 = vst [vmem:[%s169_s27 + $0x18] sm:$0xff] %v215_v3 }
  0x16 PF: > { %p663_p6 = scmp.ge.s32.totalorder %s840_s16, 1  ;;  %p233_p7 = scmp.lt.s32.totalorder %s840_s16, 5 }
  0x18   : > { %p234_p8 = pnand %p663_p6, %p233_p7 }
  0x19   : > { %s240_s28 = sand.u32 (!%p234_p8), 1, %s824_s12   ;;  %s665_s29 = sshll.u32 (!%p234_p8), %s832_s14, 5 }
  0x1a   : > { %237 = sbr.rel (%p234_p8) target bundleno = 303 (0x12f), region = 66  ;;  %s664_s30 = sshll.u32 (!%p234_p8), %s240_s28, 5 }
  0x1b   : > { %p280_p9 = scmp.lt.s32.totalorder (!%p234_p8), %s665_s29, 127  ;;  %s915_s8 = scalar_lea.vmem (!%p234_p8), [#allocation3], %s664_s30 }
  0x1c   : > { %p667_p10 = scmp.ne.s32.totalorder (!%p234_p8), %s832_s14, 0 }
  0x21   : > { %s980_s29 = smov (!%p280_p9, %s665_s29), 127  ;;  %304 = sbr.rel (%p667_p10) target bundleno = 40 (0x28), region = 74 }
  0x22   : > { %s666_s4 = sshll.u32 %s980_s29, 2  ;;  %v842_v4 = vmov (!%p667_p10), 0.0  }
  0x23   : > { %s913_s7 = scalar_lea.vmem %s970_s1, %s666_s4  ;;  %305 = vst [vmem:[#allocation2] sm:$0xff] (!%p667_p10), %v842_v4  ;;  %306 = vst [vmem:[#allocation2 + $0x8] sm:$0xff] (!%p667_p10), %v842_v4 }
  0x24   : > { %307 = vst [vmem:[#allocation2 + $0x10] sm:$0xff] (!%p667_p10), %v842_v4  ;;  %308 = vst [vmem:[#allocation2 + $0x18] sm:$0xff] (!%p667_p10), %v842_v4 }
  0x28 PF: > { %v780_v5 = vld [vmem:[%s913_s7 + $0x40] sm:$0xff]   ;;  %v782_v7 = vld [vmem:[%s913_s7 + $0x48] sm:$0xff]   ;;  %v784_v9 = vld [vmem:[%s913_s7 + $0x50] sm:$0xff]   ;;  %p688_p11 = scmp.ne.s32.totalorder %s832_s14, 3 }
  0x29   : > { %v781_v6 = vld [vmem:[%s913_s7] sm:$0xff]   ;;  %695 = vmatprep.subr.bf16.mxu0 %v780_v5  ;;  %723 = vmatprep.subr.bf16.mxu1 %v780_v5  ;;  %v783_v8 = vld [vmem:[%s913_s7 + $0x8] sm:$0xff]   ;;  %v785_v10 = vld [vmem:[%s913_s7 + $0x10] sm:$0xff]  }
  0x2a   : > { %696 = vmatpush3.bf16.msra.mxu0 %v781_v6  ;;  %731 = vmatpush3.bf16.msra.mxu1 %v781_v6  ;;  %v786_v11 = vld [vmem:[%s913_s7 + $0x58] sm:$0xff]   ;;  %v788_v13 = vld [vmem:[%s913_s7 + $0x60] sm:$0xff]   ;;  %v790_v15 = vld [vmem:[%s913_s7 + $0x68] sm:$0xff]  }
  0x2b   : > { %697 = vmatprep.subr.bf16.mxu0 %v782_v7  ;;  %724 = vmatprep.subr.bf16.mxu1 %v782_v7  ;;  %v787_v12 = vld [vmem:[%s913_s7 + $0x18] sm:$0xff]   ;;  %v789_v14 = vld [vmem:[%s913_s7 + $0x20] sm:$0xff]   ;;  %v791_v18 = vld [vmem:[%s913_s7 + $0x28] sm:$0xff]  }
  0x2c   : > { %v798_v16 = vld [vmem:[%s915_s8 + $0x4] ss:$8 sps:$4 sm:$0xff]   ;;  %v801_v17 = vld [vmem:[%s915_s8 + $0x14] ss:$8 sps:$4 sm:$0xff]   ;;  %v796_v23 = vld [vmem:[%s915_s8] ss:$8 sps:$4 sm:$0xff]  }
  0x2d   : > { %v792_v19 = vld [vmem:[%s913_s7 + $0x70] sm:$0xff]   ;;  %497 = vmatprep.mubr.bf16.mxu0 %v798_v16  ;;  %505 = vmatprep.mubr.bf16.mxu1 %v801_v17  ;;  %v794_v21 = vld [vmem:[%s913_s7 + $0x78] sm:$0xff]   ;;  %v309_v27 = vld [vmem:[#allocation2] sm:$0xff] }
  0x2e   : > { %698 = vmatpush3.bf16.msra.mxu0 %v783_v8  ;;  %732 = vmatpush3.bf16.msra.mxu1 %v783_v8  ;;  %v793_v20 = vld [vmem:[%s913_s7 + $0x30] sm:$0xff]   ;;  %v795_v22 = vld [vmem:[%s913_s7 + $0x38] sm:$0xff]   ;;  %v310_v35 = vld [vmem:[#allocation2 + $0x8] sm:$0xff] }
  0x2f   : > { %699 = vmatprep.subr.bf16.mxu0 %v784_v9  ;;  %725 = vmatprep.subr.bf16.mxu1 %v784_v9  ;;  %v799_v24 = vld [vmem:[%s915_s8 + $0x10] ss:$8 sps:$4 sm:$0xff]   ;;  %v689_v46 = vld [vmem:[%s971_s2] ss:$0 sm:$0xff] (!%p688_p11) }
  0x30   : > { %v311_v29 = vld [vmem:[#allocation2 + $0x10] sm:$0xff]  ;;  %v312_v37 = vld [vmem:[#allocation2 + $0x18] sm:$0xff] }
  0x32   : > { %700 = vmatpush3.bf16.msra.mxu0 %v785_v10  ;;  %733 = vmatpush3.bf16.msra.mxu1 %v785_v10 }
  0x33   : > { %701 = vmatprep.subr.bf16.mxu0 %v786_v11  ;;  %726 = vmatprep.subr.bf16.mxu1 %v786_v11 }
  0x36   : > { %702 = vmatpush3.bf16.msra.mxu0 %v787_v12  ;;  %734 = vmatpush3.bf16.msra.mxu1 %v787_v12 }
  0x37   : > { %703 = vmatprep.subr.bf16.mxu0 %v788_v13  ;;  %727 = vmatprep.subr.bf16.mxu1 %v788_v13 }
  0x3a   : > { %704 = vmatpush3.bf16.msra.mxu0 %v789_v14  ;;  %735 = vmatpush3.bf16.msra.mxu1 %v789_v14 }
  0x3b   : > { %705 = vmatprep.subr.bf16.mxu0 %v790_v15  ;;  %728 = vmatprep.subr.bf16.mxu1 %v790_v15 }
  0x3e   : > { %706 = vmatpush3.bf16.msra.mxu0 %v791_v18  ;;  %736 = vmatpush3.bf16.msra.mxu1 %v791_v18 }
  0x3f   : > { %707 = vmatprep.subr.bf16.mxu0 %v792_v19  ;;  %729 = vmatprep.subr.bf16.mxu1 %v792_v19 }
  0x42   : > { %708 = vmatpush3.bf16.msra.mxu0 %v793_v20  ;;  %737 = vmatpush3.bf16.msra.mxu1 %v793_v20 }
  0x43   : > { %709 = vmatprep.subr.bf16.mxu0 %v794_v21  ;;  %730 = vmatprep.subr.bf16.mxu1 %v794_v21 }
  0x46   : > { %710 = vmatpush3.bf16.msra.mxu0 %v795_v22  ;;  %738 = vmatpush3.bf16.msra.mxu1 %v795_v22 }
  0x49   : > { %498 = vmatmul.mubr.bf16.vlgmr.msra.gmra.mrb[0].mxu0 %v796_v23  ;;  %506 = vmatmul.mubr.bf16.vlgmr.msra.gmra.mrb[0].mxu1 %v799_v24 }
 0x11c   : > { %v711_v25 = vpop.f32.mrb[0].mxu0  ;;  %v717_v26 = vpop.f32.mrb[0].mxu1 }
 0x11d   : > { %v712_v28 = vpop.f32.mrb[1].mxu0  ;;  %v718_v30 = vpop.f32.mrb[1].mxu1 }
 0x11e   : > { %v713_v31 = vadd.f32 %v712_v28, %v711_v25  ;;  %v719_v32 = vadd.f32 %v718_v30, %v717_v26  ;;  %v714_v33 = vpop.f32.mrb[2].mxu0  ;;  %v720_v34 = vpop.f32.mrb[2].mxu1  ;;  %525 = sbr.rel (%p688_p11) target bundleno = 303 (0x12f), region = 78 }
 0x11f   : > { %v715_v36 = vpop.f32.mrb[3].mxu0  ;;  %v721_v38 = vpop.f32.mrb[3].mxu1 }
 0x120   : > { %v514_v39 = vadd.f32 %v713_v31, %v309_v27  ;;  %v516_v40 = vadd.f32 %v719_v32, %v311_v29  ;;  %v716_v41 = vadd.f32 %v715_v36, %v714_v33  ;;  %v722_v42 = vadd.f32 %v721_v38, %v720_v34 }
 0x122   : > { %518 = vst [vmem:[#allocation2] sm:$0xff] %v514_v39  ;;  %520 = vst [vmem:[#allocation2 + $0x10] sm:$0xff] %v516_v40  ;;  %v515_v43 = vadd.f32 %v716_v41, %v310_v35  ;;  %v517_v44 = vadd.f32 %v722_v42, %v312_v37 }
 0x124   : > { %519 = vst [vmem:[#allocation2 + $0x8] sm:$0xff] %v515_v43  ;;  %521 = vst [vmem:[#allocation2 + $0x18] sm:$0xff] %v517_v44 }
 0x129   : > { %v526_v45 = vld [vmem:[#allocation2] sm:$0xff]  ;;  %v528_v50 = vld [vmem:[#allocation2 + $0x10] sm:$0xff] }
 0x12a   : > { %v537_v48 = vadd.f32 %v689_v46, %v526_v45  ;;  %v539_v52 = vadd.f32 %v689_v46, %v528_v50 }
 0x12b   : > { %v527_v47 = vld [vmem:[#allocation2 + $0x8] sm:$0xff]  ;;  %v529_v51 = vld [vmem:[#allocation2 + $0x18] sm:$0xff] }
 0x12c   : > { %v538_v49 = vadd.f32 %v689_v46, %v527_v47  ;;  %v540_v53 = vadd.f32 %v689_v46, %v529_v51  ;;  %541 = vst [vmem:[%s972_s3] sm:$0xff] %v537_v48  ;;  %543 = vst [vmem:[%s972_s3 + $0x10] sm:$0xff] %v539_v52 }
 0x12e   : > { %542 = vst [vmem:[%s972_s3 + $0x8] sm:$0xff] %v538_v49  ;;  %544 = vst [vmem:[%s972_s3 + $0x18] sm:$0xff] %v540_v53 }
 0x12f PF: > { %s13_s16 = sadd.s32 1, %s840_s16   ;;  %s973_s12 = smov %s828_s13 }
 0x130   : > { %p10_p12 = scmp.ge.s32.totalorder %s13_s16, 6   ;;  %s974_s13 = smov %s898_s20 }
 0x131   : > { %s975_s14 = smov %s836_s15  ;;  %s976_s15 = smov %s978_s17 }
 0x132   :  { %12 = sbr.rel (!%p10_p12) target bundleno = 3 (0x3), region = 119 }

// kernel: default_generator_forward.95
= control target key start
LH: loop header
LB: loop body
LE: loop exit
PB: predicated region body
PF: predicated region fallthrough
CT: control target
= control target key end

     0   :  { %s444_s1 = inlined_call_operand.vmem [shape: bf16[256,128], index: 1, kind: input, shape index: {}]   ;;  %s445_s0 = inlined_call_operand.vmem [shape: bf16[32,256], index: 0, kind: input, shape index: {}]   ;;  %s446_s2 = inlined_call_operand.vmem [shape: f32[1,128], index: 2, kind: input, shape index: {}]   ;;  %s447_s3 = inlined_call_operand.vmem [shape: f32[32,128], index: 3, kind: output, shape index: {}]  }
   0x1   :  { %v327_v0 = vld [vmem:[%s444_s1 + $0x40] sm:$0xff]   ;;  %v329_v2 = vld [vmem:[%s444_s1 + $0x48] sm:$0xff]   ;;  %v331_v4 = vld [vmem:[%s444_s1 + $0x50] sm:$0xff]  }
   0x2   :  { %v328_v1 = vld [vmem:[%s444_s1] sm:$0xff]   ;;  %283 = vmatprep.subr.bf16.mxu0 %v327_v0  ;;  %311 = vmatprep.subr.bf16.mxu1 %v327_v0  ;;  %v330_v3 = vld [vmem:[%s444_s1 + $0x8] sm:$0xff]   ;;  %v332_v5 = vld [vmem:[%s444_s1 + $0x10] sm:$0xff]  }
   0x3   :  { %284 = vmatpush3.bf16.msra.mxu0 %v328_v1  ;;  %319 = vmatpush3.bf16.msra.mxu1 %v328_v1  ;;  %v333_v6 = vld [vmem:[%s444_s1 + $0x58] sm:$0xff]   ;;  %v335_v8 = vld [vmem:[%s444_s1 + $0x60] sm:$0xff]   ;;  %v337_v10 = vld [vmem:[%s444_s1 + $0x68] sm:$0xff]  }
   0x4   :  { %285 = vmatprep.subr.bf16.mxu0 %v329_v2  ;;  %312 = vmatprep.subr.bf16.mxu1 %v329_v2  ;;  %v334_v7 = vld [vmem:[%s444_s1 + $0x18] sm:$0xff]   ;;  %v336_v9 = vld [vmem:[%s444_s1 + $0x20] sm:$0xff]   ;;  %v338_v13 = vld [vmem:[%s444_s1 + $0x28] sm:$0xff]  }
   0x5   :  { %v345_v11 = vld [vmem:[%s445_s0 + $0x4] ss:$8 sps:$4 sm:$0xff]   ;;  %v348_v12 = vld [vmem:[%s445_s0 + $0x14] ss:$8 sps:$4 sm:$0xff]   ;;  %v343_v18 = vld [vmem:[%s445_s0] ss:$8 sps:$4 sm:$0xff]  }
   0x6   :  { %v339_v14 = vld [vmem:[%s444_s1 + $0x70] sm:$0xff]   ;;  %211 = vmatprep.mubr.bf16.mxu0 %v345_v11  ;;  %219 = vmatprep.mubr.bf16.mxu1 %v348_v12  ;;  %v341_v16 = vld [vmem:[%s444_s1 + $0x78] sm:$0xff]   ;;  %v282_v23 = vld [vmem:[%s446_s2] ss:$0 sm:$0xff] }
   0x7   :  { %286 = vmatpush3.bf16.msra.mxu0 %v330_v3  ;;  %320 = vmatpush3.bf16.msra.mxu1 %v330_v3  ;;  %v340_v15 = vld [vmem:[%s444_s1 + $0x30] sm:$0xff]   ;;  %v342_v17 = vld [vmem:[%s444_s1 + $0x38] sm:$0xff]  }
   0x8   :  { %287 = vmatprep.subr.bf16.mxu0 %v331_v4  ;;  %313 = vmatprep.subr.bf16.mxu1 %v331_v4  ;;  %v346_v19 = vld [vmem:[%s445_s0 + $0x10] ss:$8 sps:$4 sm:$0xff]  }
   0xb   :  { %288 = vmatpush3.bf16.msra.mxu0 %v332_v5  ;;  %321 = vmatpush3.bf16.msra.mxu1 %v332_v5 }
   0xc   :  { %289 = vmatprep.subr.bf16.mxu0 %v333_v6  ;;  %314 = vmatprep.subr.bf16.mxu1 %v333_v6 }
   0xf   :  { %290 = vmatpush3.bf16.msra.mxu0 %v334_v7  ;;  %322 = vmatpush3.bf16.msra.mxu1 %v334_v7 }
  0x10   :  { %291 = vmatprep.subr.bf16.mxu0 %v335_v8  ;;  %315 = vmatprep.subr.bf16.mxu1 %v335_v8 }
  0x13   :  { %292 = vmatpush3.bf16.msra.mxu0 %v336_v9  ;;  %323 = vmatpush3.bf16.msra.mxu1 %v336_v9 }
  0x14   :  { %293 = vmatprep.subr.bf16.mxu0 %v337_v10  ;;  %316 = vmatprep.subr.bf16.mxu1 %v337_v10 }
  0x17   :  { %294 = vmatpush3.bf16.msra.mxu0 %v338_v13  ;;  %324 = vmatpush3.bf16.msra.mxu1 %v338_v13 }
  0x18   :  { %295 = vmatprep.subr.bf16.mxu0 %v339_v14  ;;  %317 = vmatprep.subr.bf16.mxu1 %v339_v14 }
  0x1b   :  { %296 = vmatpush3.bf16.msra.mxu0 %v340_v15  ;;  %325 = vmatpush3.bf16.msra.mxu1 %v340_v15 }
  0x1c   :  { %297 = vmatprep.subr.bf16.mxu0 %v341_v16  ;;  %318 = vmatprep.subr.bf16.mxu1 %v341_v16 }
  0x1f   :  { %298 = vmatpush3.bf16.msra.mxu0 %v342_v17  ;;  %326 = vmatpush3.bf16.msra.mxu1 %v342_v17 }
  0x22   :  { %212 = vmatmul.mubr.bf16.vlgmr.msra.gmra.mrb[0].mxu0 %v343_v18  ;;  %220 = vmatmul.mubr.bf16.vlgmr.msra.gmra.mrb[0].mxu1 %v346_v19 }
  0xf5   :  { %v299_v20 = vpop.f32.mrb[0].mxu0  ;;  %v305_v21 = vpop.f32.mrb[0].mxu1 }
  0xf6   :  { %v300_v22 = vpop.f32.mrb[1].mxu0  ;;  %v306_v24 = vpop.f32.mrb[1].mxu1 }
  0xf7   :  { %v301_v25 = vadd.f32 %v300_v22, %v299_v20  ;;  %v307_v26 = vadd.f32 %v306_v24, %v305_v21  ;;  %v302_v27 = vpop.f32.mrb[2].mxu0  ;;  %v308_v28 = vpop.f32.mrb[2].mxu1 }
  0xf8   :  { %v303_v29 = vpop.f32.mrb[3].mxu0  ;;  %v309_v30 = vpop.f32.mrb[3].mxu1 }
  0xf9   :  { %v250_v31 = vadd.f32 %v301_v25, %v282_v23  ;;  %v252_v32 = vadd.f32 %v307_v26, %v282_v23  ;;  %v304_v33 = vadd.f32 %v303_v29, %v302_v27  ;;  %v310_v34 = vadd.f32 %v309_v30, %v308_v28 }
  0xfb   :  { %254 = vst [vmem:[%s447_s3] sm:$0xff] %v250_v31  ;;  %256 = vst [vmem:[%s447_s3 + $0x10] sm:$0xff] %v252_v32  ;;  %v251_v35 = vadd.f32 %v304_v33, %v282_v23  ;;  %v253_v36 = vadd.f32 %v310_v34, %v282_v23 }
  0xfd   :  { %255 = vst [vmem:[%s447_s3 + $0x8] sm:$0xff] %v251_v35  ;;  %257 = vst [vmem:[%s447_s3 + $0x18] sm:$0xff] %v253_v36 }

// kernel: default_generator_forward.100
= control target key start
LH: loop header
LB: loop body
LE: loop exit
PB: predicated region body
PF: predicated region fallthrough
CT: control target
= control target key end

     0   :  { %s586_s1 = inlined_call_operand.vmem [shape: bf16[128,128], index: 1, kind: input, shape index: {}]   ;;  %s587_s0 = inlined_call_operand.vmem [shape: bf16[128,128], index: 0, kind: input, shape index: {}]   ;;  %s588_s2 = inlined_call_operand.vmem [shape: f32[1,128], index: 2, kind: input, shape index: {}]   ;;  %s589_s3 = inlined_call_operand.vmem [shape: f32[128,128], index: 3, kind: output, shape index: {}]  }
   0x1   :  { %v451_v0 = vld [vmem:[%s586_s1] sm:$0xff]   ;;  %v452_v1 = vld [vmem:[%s586_s1 + $0x8] sm:$0xff]   ;;  %v453_v2 = vld [vmem:[%s586_s1 + $0x10] sm:$0xff]  }
   0x2   :  { %403 = vmatprep.subr.bf16.mxu0 %v451_v0  ;;  %435 = vmatprep.subr.bf16.mxu1 %v451_v0  ;;  %v454_v3 = vld [vmem:[%s586_s1 + $0x18] sm:$0xff]   ;;  %v459_v4 = vld [vmem:[%s587_s0] sm:$0xff]   ;;  %v456_v7 = vld [vmem:[%s586_s1 + $0x28] sm:$0xff]  }
   0x3   :  { %404 = vmatpush3.bf16.msra.mxu0 %v451_v0  ;;  %443 = vmatpush3.bf16.msra.mxu1 %v451_v0  ;;  %v460_v5 = vld [vmem:[%s587_s0 + $0x20] sm:$0xff]   ;;  %v457_v8 = vld [vmem:[%s586_s1 + $0x30] sm:$0xff]   ;;  %v458_v9 = vld [vmem:[%s586_s1 + $0x38] sm:$0xff]  }
   0x4   :  { %405 = vmatprep.subr.bf16.mxu0 %v452_v1  ;;  %436 = vmatprep.subr.bf16.mxu1 %v452_v1  ;;  %v455_v6 = vld [vmem:[%s586_s1 + $0x20] sm:$0xff]   ;;  %v461_v10 = vld [vmem:[%s587_s0 + $0x8] sm:$0xff]   ;;  %v463_v12 = vld [vmem:[%s587_s0 + $0x10] sm:$0xff]  }
   0x5   :  { %419 = vmatprep.mubr.bf16.mxu0 %v459_v4  ;;  %427 = vmatprep.mubr.bf16.mxu1 %v460_v5  ;;  %v462_v11 = vld [vmem:[%s587_s0 + $0x28] sm:$0xff]   ;;  %v464_v13 = vld [vmem:[%s587_s0 + $0x30] sm:$0xff]   ;;  %v465_v14 = vld [vmem:[%s587_s0 + $0x18] sm:$0xff]  }
   0x6   :  { %v466_v15 = vld [vmem:[%s587_s0 + $0x38] sm:$0xff]   ;;  %v386_v16 = vld [vmem:[%s588_s2] ss:$0 sm:$0xff] }
   0x7   :  { %406 = vmatpush3.bf16.msra.mxu0 %v452_v1  ;;  %444 = vmatpush3.bf16.msra.mxu1 %v452_v1 }
   0x8   :  { %407 = vmatprep.subr.bf16.mxu0 %v453_v2  ;;  %437 = vmatprep.subr.bf16.mxu1 %v453_v2 }
   0xb   :  { %408 = vmatpush3.bf16.msra.mxu0 %v453_v2  ;;  %445 = vmatpush3.bf16.msra.mxu1 %v453_v2 }
   0xc   :  { %409 = vmatprep.subr.bf16.mxu0 %v454_v3  ;;  %438 = vmatprep.subr.bf16.mxu1 %v454_v3 }
   0xf   :  { %410 = vmatpush3.bf16.msra.mxu0 %v454_v3  ;;  %446 = vmatpush3.bf16.msra.mxu1 %v454_v3 }
  0x10   :  { %411 = vmatprep.subr.bf16.mxu0 %v455_v6  ;;  %439 = vmatprep.subr.bf16.mxu1 %v455_v6 }
  0x13   :  { %412 = vmatpush3.bf16.msra.mxu0 %v455_v6  ;;  %447 = vmatpush3.bf16.msra.mxu1 %v455_v6 }
  0x14   :  { %413 = vmatprep.subr.bf16.mxu0 %v456_v7  ;;  %440 = vmatprep.subr.bf16.mxu1 %v456_v7 }
  0x17   :  { %414 = vmatpush3.bf16.msra.mxu0 %v456_v7  ;;  %448 = vmatpush3.bf16.msra.mxu1 %v456_v7 }
  0x18   :  { %415 = vmatprep.subr.bf16.mxu0 %v457_v8  ;;  %441 = vmatprep.subr.bf16.mxu1 %v457_v8 }
  0x1b   :  { %416 = vmatpush3.bf16.msra.mxu0 %v457_v8  ;;  %449 = vmatpush3.bf16.msra.mxu1 %v457_v8 }
  0x1c   :  { %417 = vmatprep.subr.bf16.mxu0 %v458_v9  ;;  %442 = vmatprep.subr.bf16.mxu1 %v458_v9 }
  0x1f   :  { %418 = vmatpush3.bf16.msra.mxu0 %v458_v9  ;;  %450 = vmatpush3.bf16.msra.mxu1 %v458_v9 }
  0x22   :  { %420 = vmatmul.mubr.bf16.vlgmr.msra.gmra.mrb[0].mxu0 %v461_v10  ;;  %428 = vmatmul.mubr.bf16.vlgmr.msra.gmra.mrb[0].mxu1 %v462_v11 }
  0x23   :  { %423 = vmatprep.mubr.bf16.mxu0 %v463_v12  ;;  %431 = vmatprep.mubr.bf16.mxu1 %v464_v13 }
  0x2a   :  { %424 = vmatmul.mubr.bf16.gmra.mrb[4].mxu0 %v465_v14  ;;  %432 = vmatmul.mubr.bf16.gmra.mrb[4].mxu1 %v466_v15 }
  0xf5   :  { %v421_v17 = vpop.f32.mrb[0].mxu0  ;;  %v429_v18 = vpop.f32.mrb[0].mxu1 }
  0xf6   :  { %v336_v19 = vadd.f32 %v421_v17, %v386_v16  ;;  %v344_v20 = vadd.f32 %v429_v18, %v386_v16  ;;  %v213_v21 = vpop.f32.mrb[1].mxu0  ;;  %v245_v22 = vpop.f32.mrb[1].mxu1 }
  0xf7   :  { %v334_v23 = vadd.f32 %v386_v16, %v213_v21  ;;  %v342_v24 = vadd.f32 %v386_v16, %v245_v22  ;;  %v422_v25 = vpop.f32.mrb[2].mxu0  ;;  %v430_v26 = vpop.f32.mrb[2].mxu1 }
  0xf8   :  { %352 = vst [vmem:[%s589_s3 + $0x10] sm:$0xff] %v336_v19  ;;  %360 = vst [vmem:[%s589_s3 + $0x50] sm:$0xff] %v344_v20  ;;  %v337_v27 = vadd.f32 %v422_v25, %v386_v16  ;;  %v345_v28 = vadd.f32 %v430_v26, %v386_v16  ;;  %v216_v29 = vpop.f32.mrb[3].mxu0  ;;  %v248_v30 = vpop.f32.mrb[3].mxu1 }
  0xf9   :  { %350 = vst [vmem:[%s589_s3] sm:$0xff] %v334_v23  ;;  %358 = vst [vmem:[%s589_s3 + $0x40] sm:$0xff] %v342_v24  ;;  %v335_v31 = vadd.f32 %v386_v16, %v216_v29  ;;  %v343_v32 = vadd.f32 %v386_v16, %v248_v30 }
  0xfa   :  { %353 = vst [vmem:[%s589_s3 + $0x18] sm:$0xff] %v337_v27  ;;  %361 = vst [vmem:[%s589_s3 + $0x58] sm:$0xff] %v345_v28 }
  0xfb   :  { %351 = vst [vmem:[%s589_s3 + $0x8] sm:$0xff] %v335_v31  ;;  %359 = vst [vmem:[%s589_s3 + $0x48] sm:$0xff] %v343_v32 }
  0xfd   :  { %v425_v33 = vpop.f32.mrb[4].mxu0  ;;  %v433_v34 = vpop.f32.mrb[4].mxu1 }
  0xfe   :  { %v340_v35 = vadd.f32 %v425_v33, %v386_v16  ;;  %v348_v36 = vadd.f32 %v433_v34, %v386_v16  ;;  %v229_v37 = vpop.f32.mrb[5].mxu0  ;;  %v261_v38 = vpop.f32.mrb[5].mxu1 }
  0xff   :  { %v338_v39 = vadd.f32 %v386_v16, %v229_v37  ;;  %v346_v40 = vadd.f32 %v386_v16, %v261_v38  ;;  %v426_v41 = vpop.f32.mrb[6].mxu0  ;;  %v434_v42 = vpop.f32.mrb[6].mxu1 }
 0x100   :  { %356 = vst [vmem:[%s589_s3 + $0x30] sm:$0xff] %v340_v35  ;;  %364 = vst [vmem:[%s589_s3 + $0x70] sm:$0xff] %v348_v36  ;;  %v341_v43 = vadd.f32 %v426_v41, %v386_v16  ;;  %v349_v44 = vadd.f32 %v434_v42, %v386_v16  ;;  %v232_v45 = vpop.f32.mrb[7].mxu0  ;;  %v264_v46 = vpop.f32.mrb[7].mxu1 }
 0x101   :  { %354 = vst [vmem:[%s589_s3 + $0x20] sm:$0xff] %v338_v39  ;;  %362 = vst [vmem:[%s589_s3 + $0x60] sm:$0xff] %v346_v40  ;;  %v339_v47 = vadd.f32 %v386_v16, %v232_v45  ;;  %v347_v48 = vadd.f32 %v386_v16, %v264_v46 }
 0x102   :  { %357 = vst [vmem:[%s589_s3 + $0x38] sm:$0xff] %v341_v43  ;;  %365 = vst [vmem:[%s589_s3 + $0x78] sm:$0xff] %v349_v44 }
 0x103   :  { %355 = vst [vmem:[%s589_s3 + $0x28] sm:$0xff] %v339_v47  ;;  %363 = vst [vmem:[%s589_s3 + $0x68] sm:$0xff] %v347_v48 }

// kernel: default_generator_forward.101
= control target key start
LH: loop header
LB: loop body
LE: loop exit
PB: predicated region body
PF: predicated region fallthrough
CT: control target
= control target key end

     0   :  { %s804_s1 = inlined_call_operand.vmem [shape: bf16[256,128], index: 1, kind: input, shape index: {}]   ;;  %s805_s0 = inlined_call_operand.vmem [shape: bf16[128,256], index: 0, kind: input, shape index: {}]   ;;  %s806_s2 = inlined_call_operand.vmem [shape: f32[1,128], index: 2, kind: input, shape index: {}]   ;;  %s807_s3 = inlined_call_operand.vmem [shape: f32[128,128], index: 3, kind: output, shape index: {}]  }
   0x1   :  { %v579_v0 = vld [vmem:[%s804_s1 + $0x40] sm:$0xff]   ;;  %v581_v2 = vld [vmem:[%s804_s1 + $0x48] sm:$0xff]   ;;  %v583_v4 = vld [vmem:[%s804_s1 + $0x50] sm:$0xff]  }
   0x2   :  { %v580_v1 = vld [vmem:[%s804_s1] sm:$0xff]   ;;  %499 = vmatprep.subr.bf16.mxu0 %v579_v0  ;;  %563 = vmatprep.subr.bf16.mxu1 %v579_v0  ;;  %v582_v3 = vld [vmem:[%s804_s1 + $0x8] sm:$0xff]   ;;  %v584_v5 = vld [vmem:[%s804_s1 + $0x10] sm:$0xff]  }
   0x3   :  { %500 = vmatpush3.bf16.msra.mxu0 %v580_v1  ;;  %571 = vmatpush3.bf16.msra.mxu1 %v580_v1  ;;  %v585_v6 = vld [vmem:[%s804_s1 + $0x58] sm:$0xff]   ;;  %v587_v8 = vld [vmem:[%s804_s1 + $0x60] sm:$0xff]   ;;  %v589_v10 = vld [vmem:[%s804_s1 + $0x68] sm:$0xff]  }
   0x4   :  { %501 = vmatprep.subr.bf16.mxu0 %v581_v2  ;;  %564 = vmatprep.subr.bf16.mxu1 %v581_v2  ;;  %v586_v7 = vld [vmem:[%s804_s1 + $0x18] sm:$0xff]   ;;  %v588_v9 = vld [vmem:[%s804_s1 + $0x20] sm:$0xff]   ;;  %v590_v13 = vld [vmem:[%s804_s1 + $0x28] sm:$0xff]  }
   0x5   :  { %v597_v11 = vld [vmem:[%s805_s0 + $0x4] ss:$8 sps:$4 sm:$0xff]   ;;  %v591_v14 = vld [vmem:[%s804_s1 + $0x70] sm:$0xff]   ;;  %v593_v16 = vld [vmem:[%s804_s1 + $0x78] sm:$0xff]  }
   0x6   :  { %v600_v12 = vld [vmem:[%s805_s0 + $0x44] ss:$8 sps:$4 sm:$0xff]   ;;  %307 = vmatprep.mubr.bf16.mxu0 %v597_v11  ;;  %v592_v15 = vld [vmem:[%s804_s1 + $0x30] sm:$0xff]   ;;  %v594_v17 = vld [vmem:[%s804_s1 + $0x38] sm:$0xff]  }
   0x7   :  { %502 = vmatpush3.bf16.msra.mxu0 %v582_v3  ;;  %572 = vmatpush3.bf16.msra.mxu1 %v582_v3  ;;  %v595_v18 = vld [vmem:[%s805_s0] ss:$8 sps:$4 sm:$0xff]   ;;  %v601_v20 = vld [vmem:[%s805_s0 + $0x14] ss:$8 sps:$4 sm:$0xff]   ;;  %v605_v22 = vld [vmem:[%s805_s0 + $0x10] ss:$8 sps:$4 sm:$0xff]  }
   0x8   :  { %503 = vmatprep.subr.bf16.mxu0 %v583_v4  ;;  %565 = vmatprep.subr.bf16.mxu1 %v583_v4  ;;  %v598_v19 = vld [vmem:[%s805_s0 + $0x40] ss:$8 sps:$4 sm:$0xff]   ;;  %v603_v21 = vld [vmem:[%s805_s0 + $0x54] ss:$8 sps:$4 sm:$0xff]   ;;  %v606_v23 = vld [vmem:[%s805_s0 + $0x50] ss:$8 sps:$4 sm:$0xff]  }
   0x9   :  { %339 = vmatprep.mubr.bf16.mxu1 %v600_v12  ;;  %v607_v24 = vld [vmem:[%s805_s0 + $0x24] ss:$8 sps:$4 sm:$0xff]   ;;  %v611_v26 = vld [vmem:[%s805_s0 + $0x20] ss:$8 sps:$4 sm:$0xff]   ;;  %v613_v28 = vld [vmem:[%s805_s0 + $0x34] ss:$8 sps:$4 sm:$0xff]  }
   0xa   :  { %v609_v25 = vld [vmem:[%s805_s0 + $0x64] ss:$8 sps:$4 sm:$0xff]   ;;  %v612_v27 = vld [vmem:[%s805_s0 + $0x60] ss:$8 sps:$4 sm:$0xff]   ;;  %v615_v29 = vld [vmem:[%s805_s0 + $0x74] ss:$8 sps:$4 sm:$0xff]  }
   0xb   :  { %504 = vmatpush3.bf16.msra.mxu0 %v584_v5  ;;  %573 = vmatpush3.bf16.msra.mxu1 %v584_v5  ;;  %v617_v30 = vld [vmem:[%s805_s0 + $0x30] ss:$8 sps:$4 sm:$0xff]   ;;  %v738_v35 = vld [vmem:[%s806_s2] ss:$0 sm:$0xff] }
   0xc   :  { %505 = vmatprep.subr.bf16.mxu0 %v585_v6  ;;  %566 = vmatprep.subr.bf16.mxu1 %v585_v6  ;;  %v618_v31 = vld [vmem:[%s805_s0 + $0x70] ss:$8 sps:$4 sm:$0xff]  }
   0xf   :  { %506 = vmatpush3.bf16.msra.mxu0 %v586_v7  ;;  %574 = vmatpush3.bf16.msra.mxu1 %v586_v7 }
  0x10   :  { %507 = vmatprep.subr.bf16.mxu0 %v587_v8  ;;  %567 = vmatprep.subr.bf16.mxu1 %v587_v8 }
  0x13   :  { %508 = vmatpush3.bf16.msra.mxu0 %v588_v9  ;;  %575 = vmatpush3.bf16.msra.mxu1 %v588_v9 }
  0x14   :  { %509 = vmatprep.subr.bf16.mxu0 %v589_v10  ;;  %568 = vmatprep.subr.bf16.mxu1 %v589_v10 }
  0x17   :  { %510 = vmatpush3.bf16.msra.mxu0 %v590_v13  ;;  %576 = vmatpush3.bf16.msra.mxu1 %v590_v13 }
  0x18   :  { %511 = vmatprep.subr.bf16.mxu0 %v591_v14  ;;  %569 = vmatprep.subr.bf16.mxu1 %v591_v14 }
  0x1b   :  { %512 = vmatpush3.bf16.msra.mxu0 %v592_v15  ;;  %577 = vmatpush3.bf16.msra.mxu1 %v592_v15 }
  0x1c   :  { %513 = vmatprep.subr.bf16.mxu0 %v593_v16  ;;  %570 = vmatprep.subr.bf16.mxu1 %v593_v16 }
  0x1f   :  { %514 = vmatpush3.bf16.msra.mxu0 %v594_v17  ;;  %578 = vmatpush3.bf16.msra.mxu1 %v594_v17 }
  0x22   :  { %308 = vmatmul.mubr.bf16.vlgmr.msra.gmra.mrb[0].mxu0 %v595_v18  ;;  %340 = vmatmul.mubr.bf16.vlgmr.msra.gmra.mrb[0].mxu1 %v598_v19 }
  0x23   :  { %315 = vmatprep.mubr.bf16.mxu0 %v601_v20  ;;  %347 = vmatprep.mubr.bf16.mxu1 %v603_v21 }
  0x2a   :  { %316 = vmatmul.mubr.bf16.gmra.mrb[4].mxu0 %v605_v22  ;;  %348 = vmatmul.mubr.bf16.gmra.mrb[4].mxu1 %v606_v23 }
  0x2b   :  { %323 = vmatprep.mubr.bf16.mxu0 %v607_v24  ;;  %355 = vmatprep.mubr.bf16.mxu1 %v609_v25 }
  0x32   :  { %324 = vmatmul.mubr.bf16.gmra.mrb[8].mxu0 %v611_v26  ;;  %356 = vmatmul.mubr.bf16.gmra.mrb[8].mxu1 %v612_v27 }
  0x33   :  { %331 = vmatprep.mubr.bf16.mxu0 %v613_v28  ;;  %363 = vmatprep.mubr.bf16.mxu1 %v615_v29 }
  0x3a   :  { %332 = vmatmul.mubr.bf16.gmra.mrb[12].mxu0 %v617_v30  ;;  %364 = vmatmul.mubr.bf16.gmra.mrb[12].mxu1 %v618_v31 }
  0xf5   :  { %v515_v32 = vpop.f32.mrb[0].mxu0  ;;  %v539_v33 = vpop.f32.mrb[0].mxu1 }
  0xf6   :  { %v516_v34 = vpop.f32.mrb[1].mxu0  ;;  %v540_v36 = vpop.f32.mrb[1].mxu1 }
  0xf7   :  { %v517_v37 = vadd.f32 %v516_v34, %v515_v32  ;;  %v541_v38 = vadd.f32 %v540_v36, %v539_v33  ;;  %v518_v39 = vpop.f32.mrb[2].mxu0  ;;  %v542_v40 = vpop.f32.mrb[2].mxu1 }
  0xf8   :  { %v519_v41 = vpop.f32.mrb[3].mxu0  ;;  %v543_v42 = vpop.f32.mrb[3].mxu1 }
  0xf9   :  { %v430_v43 = vadd.f32 %v517_v37, %v738_v35  ;;  %v438_v44 = vadd.f32 %v541_v38, %v738_v35  ;;  %v520_v45 = vadd.f32 %v519_v41, %v518_v39  ;;  %v544_v46 = vadd.f32 %v543_v42, %v542_v40 }
  0xfb   :  { %446 = vst [vmem:[%s807_s3] sm:$0xff] %v430_v43  ;;  %454 = vst [vmem:[%s807_s3 + $0x40] sm:$0xff] %v438_v44  ;;  %v431_v47 = vadd.f32 %v520_v45, %v738_v35  ;;  %v439_v48 = vadd.f32 %v544_v46, %v738_v35 }
  0xfd   :  { %447 = vst [vmem:[%s807_s3 + $0x8] sm:$0xff] %v431_v47  ;;  %455 = vst [vmem:[%s807_s3 + $0x48] sm:$0xff] %v439_v48  ;;  %v521_v49 = vpop.f32.mrb[4].mxu0  ;;  %v545_v50 = vpop.f32.mrb[4].mxu1 }
  0xfe   :  { %v522_v51 = vpop.f32.mrb[5].mxu0  ;;  %v546_v52 = vpop.f32.mrb[5].mxu1 }
  0xff   :  { %v523_v53 = vadd.f32 %v522_v51, %v521_v49  ;;  %v547_v54 = vadd.f32 %v546_v52, %v545_v50  ;;  %v524_v55 = vpop.f32.mrb[6].mxu0  ;;  %v548_v56 = vpop.f32.mrb[6].mxu1 }
 0x100   :  { %v525_v57 = vpop.f32.mrb[7].mxu0  ;;  %v549_v58 = vpop.f32.mrb[7].mxu1 }
 0x101   :  { %v432_v59 = vadd.f32 %v523_v53, %v738_v35  ;;  %v440_v60 = vadd.f32 %v547_v54, %v738_v35  ;;  %v526_v61 = vadd.f32 %v525_v57, %v524_v55  ;;  %v550_v62 = vadd.f32 %v549_v58, %v548_v56 }
 0x103   :  { %448 = vst [vmem:[%s807_s3 + $0x10] sm:$0xff] %v432_v59  ;;  %456 = vst [vmem:[%s807_s3 + $0x50] sm:$0xff] %v440_v60  ;;  %v433_v63 = vadd.f32 %v526_v61, %v738_v35  ;;  %v441_v0 = vadd.f32 %v550_v62, %v738_v35 }
 0x105   :  { %449 = vst [vmem:[%s807_s3 + $0x18] sm:$0xff] %v433_v63  ;;  %457 = vst [vmem:[%s807_s3 + $0x58] sm:$0xff] %v441_v0  ;;  %v527_v1 = vpop.f32.mrb[8].mxu0  ;;  %v551_v2 = vpop.f32.mrb[8].mxu1 }
 0x106   :  { %v528_v3 = vpop.f32.mrb[9].mxu0  ;;  %v552_v4 = vpop.f32.mrb[9].mxu1 }
 0x107   :  { %v529_v5 = vadd.f32 %v528_v3, %v527_v1  ;;  %v553_v6 = vadd.f32 %v552_v4, %v551_v2  ;;  %v530_v7 = vpop.f32.mrb[10].mxu0  ;;  %v554_v8 = vpop.f32.mrb[10].mxu1 }
 0x108   :  { %v531_v9 = vpop.f32.mrb[11].mxu0  ;;  %v555_v10 = vpop.f32.mrb[11].mxu1 }
 0x109   :  { %v434_v11 = vadd.f32 %v529_v5, %v738_v35  ;;  %v442_v12 = vadd.f32 %v553_v6, %v738_v35  ;;  %v532_v13 = vadd.f32 %v531_v9, %v530_v7  ;;  %v556_v14 = vadd.f32 %v555_v10, %v554_v8 }
 0x10b   :  { %450 = vst [vmem:[%s807_s3 + $0x20] sm:$0xff] %v434_v11  ;;  %458 = vst [vmem:[%s807_s3 + $0x60] sm:$0xff] %v442_v12  ;;  %v435_v15 = vadd.f32 %v532_v13, %v738_v35  ;;  %v443_v16 = vadd.f32 %v556_v14, %v738_v35 }
 0x10d   :  { %451 = vst [vmem:[%s807_s3 + $0x28] sm:$0xff] %v435_v15  ;;  %459 = vst [vmem:[%s807_s3 + $0x68] sm:$0xff] %v443_v16  ;;  %v533_v17 = vpop.f32.mrb[12].mxu0  ;;  %v557_v18 = vpop.f32.mrb[12].mxu1 }
 0x10e   :  { %v534_v19 = vpop.f32.mrb[13].mxu0  ;;  %v558_v20 = vpop.f32.mrb[13].mxu1 }
 0x10f   :  { %v535_v21 = vadd.f32 %v534_v19, %v533_v17  ;;  %v559_v22 = vadd.f32 %v558_v20, %v557_v18  ;;  %v536_v23 = vpop.f32.mrb[14].mxu0  ;;  %v560_v24 = vpop.f32.mrb[14].mxu1 }
 0x110   :  { %v537_v25 = vpop.f32.mrb[15].mxu0  ;;  %v561_v26 = vpop.f32.mrb[15].mxu1 }
 0x111   :  { %v436_v27 = vadd.f32 %v535_v21, %v738_v35  ;;  %v444_v28 = vadd.f32 %v559_v22, %v738_v35  ;;  %v538_v29 = vadd.f32 %v537_v25, %v536_v23  ;;  %v562_v30 = vadd.f32 %v561_v26, %v560_v24 }
 0x113   :  { %452 = vst [vmem:[%s807_s3 + $0x30] sm:$0xff] %v436_v27  ;;  %460 = vst [vmem:[%s807_s3 + $0x70] sm:$0xff] %v444_v28  ;;  %v437_v31 = vadd.f32 %v538_v29, %v738_v35  ;;  %v445_v32 = vadd.f32 %v562_v30, %v738_v35 }
 0x115   :  { %453 = vst [vmem:[%s807_s3 + $0x38] sm:$0xff] %v437_v31  ;;  %461 = vst [vmem:[%s807_s3 + $0x78] sm:$0xff] %v445_v32 }

// kernel: default_generator_forward.103
= control target key start
LH: loop header
LB: loop body
LE: loop exit
PB: predicated region body
PF: predicated region fallthrough
CT: control target
= control target key end

     0   :  { %s1181_s12 = smov 0   ;;  %s1183_s13 = smov 0   ;;  %s1353_s0 = inlined_call_operand.vmem [shape: bf16[128,512], index: 0, kind: input, shape index: {}]   ;;  %s1354_s1 = inlined_call_operand.vmem [shape: bf16[512,128], index: 1, kind: input, shape index: {}]   ;;  %s1355_s2 = inlined_call_operand.vmem [shape: f32[1,128], index: 2, kind: input, shape index: {}]   ;;  %s1356_s3 = inlined_call_operand.vmem [shape: f32[128,128], index: 3, kind: output, shape index: {}]  }
   0x1   :  { %s1185_s14 = smov 0   ;;  %s1187_s15 = smov 0  }
   0x2   :  { %s1189_s16 = smov 0  }
   0x3 LB: > { %s25_s17 = sadd.s32 1, %s1154_s15  ;;  %p48_p1 = scmp.ne.s32.totalorder %s1146_s13, %s1142_s12  ;;  %s1158_s16 = sphi %s1189_s16, %s13_s16   ;;  %s1154_s15 = sphi %s1187_s15, %s1360_s15   ;;  %s1150_s14 = sphi %s1185_s14, %s1359_s14   ;;  %s1146_s13 = sphi %s1183_s13, %s1358_s13   ;;  %s1142_s12 = sphi %s1181_s12, %s1357_s12  }
   0x4   : > { %p26_p0 = scmp.ge.s32.totalorder %s25_s17, 2  ;;  %p49_p2 = scmp.eq.s32.totalorder %s1158_s16, 0 }
   0x5   : > { %s41_s19 = sadd.s32 1, %s1146_s13  ;;  %p911_p5 = scmp.ge.s32.totalorder %s1158_s16, 2 }
   0x6   : > { %s1362_s17 = smov (%p26_p0, %s25_s17), 0  ;;  %p50_p3 = por %p49_p2, %p48_p1 }
   0x7   : > { %s37_s18 = ssub.s32 %s1154_s15, %s1362_s17  ;;  %162 = sbr.rel (%p911_p5) target bundleno = 26 (0x1a), region = 20 }
   0x8   : > { %p39_p4 = scmp.eq.s32.totalorder %s37_s18, 0 }
   0xa   : > { %s1216_s20 = scalar_select %p39_p4, %s1146_s13, %s41_s19  }
   0xe   : > { %165 = sbr.rel (!%p50_p3) target bundleno = 26 (0x1a), region = 24  ;;  %s167_s21 = sand.u32 (%p50_p3), 1, %s1146_s13  }
   0xf   : > { %s958_s22 = sshll.u32 (%p50_p3), %s1154_s15, 3  ;;  %s912_s23 = sshll.u32 (%p50_p3), %s167_s21, 7 }
  0x10   : > { %s1224_s26 = scalar_lea.vmem (%p50_p3), %s1353_s0, %s958_s22  ;;  %s169_s27 = scalar_lea.vmem (%p50_p3), [#allocation3], %s912_s23 }
  0x11   : > { %v233_v0 = vld [vmem:[%s1224_s26] sm:$0xff] (%p50_p3)  ;;  %v235_v1 = vld [vmem:[%s1224_s26 + $0x10] sm:$0xff] (%p50_p3) }
  0x12   : > { %v237_v2 = vld [vmem:[%s1224_s26 + $0x20] sm:$0xff] (%p50_p3)  ;;  %234 = vst [vmem:[%s169_s27] sm:$0xff] (%p50_p3), %v233_v0  ;;  %236 = vst [vmem:[%s169_s27 + $0x8] sm:$0xff] (%p50_p3), %v235_v1  ;;  %v239_v3 = vld [vmem:[%s1224_s26 + $0x30] sm:$0xff] (%p50_p3) }
  0x13   : > { %238 = vst [vmem:[%s169_s27 + $0x10] sm:$0xff] (%p50_p3), %v237_v2  ;;  %v241_v4 = vld [vmem:[%s1224_s26 + $0x40] sm:$0xff] (%p50_p3)  ;;  %v243_v5 = vld [vmem:[%s1224_s26 + $0x50] sm:$0xff] (%p50_p3)  ;;  %240 = vst [vmem:[%s169_s27 + $0x18] sm:$0xff] (%p50_p3), %v239_v3 }
  0x14   : > { %242 = vst [vmem:[%s169_s27 + $0x20] sm:$0xff] (%p50_p3), %v241_v4  ;;  %244 = vst [vmem:[%s169_s27 + $0x28] sm:$0xff] (%p50_p3), %v243_v5  ;;  %v245_v6 = vld [vmem:[%s1224_s26 + $0x60] sm:$0xff] (%p50_p3)  ;;  %v247_v7 = vld [vmem:[%s1224_s26 + $0x70] sm:$0xff] (%p50_p3) }
  0x15   : > { %v249_v8 = vld [vmem:[%s1224_s26 + $0x80] sm:$0xff]  ;;  %246 = vst [vmem:[%s169_s27 + $0x30] sm:$0xff] %v245_v6  ;;  %248 = vst [vmem:[%s169_s27 + $0x38] sm:$0xff] %v247_v7  ;;  %v251_v9 = vld [vmem:[%s1224_s26 + $0x90] sm:$0xff] }
  0x16   : > { %250 = vst [vmem:[%s169_s27 + $0x40] sm:$0xff] %v249_v8  ;;  %v253_v10 = vld [vmem:[%s1224_s26 + $0xa0] sm:$0xff]  ;;  %v255_v11 = vld [vmem:[%s1224_s26 + $0xb0] sm:$0xff]  ;;  %252 = vst [vmem:[%s169_s27 + $0x48] sm:$0xff] %v251_v9 }
  0x17   : > { %254 = vst [vmem:[%s169_s27 + $0x50] sm:$0xff] %v253_v10  ;;  %256 = vst [vmem:[%s169_s27 + $0x58] sm:$0xff] %v255_v11  ;;  %v257_v12 = vld [vmem:[%s1224_s26 + $0xc0] sm:$0xff]  ;;  %v259_v13 = vld [vmem:[%s1224_s26 + $0xd0] sm:$0xff] }
  0x18   : > { %v261_v14 = vld [vmem:[%s1224_s26 + $0xe0] sm:$0xff]  ;;  %258 = vst [vmem:[%s169_s27 + $0x60] sm:$0xff] %v257_v12  ;;  %260 = vst [vmem:[%s169_s27 + $0x68] sm:$0xff] %v259_v13  ;;  %v263_v15 = vld [vmem:[%s1224_s26 + $0xf0] sm:$0xff] }
  0x19   : > { %262 = vst [vmem:[%s169_s27 + $0x70] sm:$0xff] %v261_v14  ;;  %264 = vst [vmem:[%s169_s27 + $0x78] sm:$0xff] %v263_v15 }
  0x1a PF: > { %p915_p6 = scmp.ge.s32.totalorder %s1158_s16, 1  ;;  %p281_p7 = scmp.lt.s32.totalorder %s1158_s16, 3 }
  0x1c   : > { %p282_p8 = pnand %p915_p6, %p281_p7 }
  0x1d   : > { %s288_s28 = sand.u32 (!%p282_p8), 1, %s1142_s12   ;;  %s917_s29 = sshll.u32 (!%p282_p8), %s1150_s14, 5 }
  0x1e   : > { %285 = sbr.rel (%p282_p8) target bundleno = 335 (0x14f), region = 66  ;;  %s916_s30 = sshll.u32 (!%p282_p8), %s288_s28, 7 }
  0x1f   : > { %p328_p9 = scmp.lt.s32.totalorder (!%p282_p8), %s917_s29, 63  ;;  %s1251_s8 = scalar_lea.vmem (!%p282_p8), [#allocation3], %s916_s30 }
  0x20   : > { %p919_p10 = scmp.ne.s32.totalorder (!%p282_p8), %s1150_s14, 0 }
  0x25   : > { %s1364_s29 = smov (!%p328_p9, %s917_s29), 63  ;;  %352 = sbr.rel (%p919_p10) target bundleno = 47 (0x2f), region = 74 }
  0x26   : > { %s918_s4 = sshll.u32 %s1364_s29, 2  ;;  %v1160_v16 = vmov (!%p919_p10), 0.0  }
  0x27   : > { %s1249_s7 = scalar_lea.vmem %s1354_s1, %s918_s4  ;;  %353 = vst [vmem:[#allocation2] sm:$0xff] (!%p919_p10), %v1160_v16  ;;  %354 = vst [vmem:[#allocation2 + $0x8] sm:$0xff] (!%p919_p10), %v1160_v16 }
  0x28   : > { %355 = vst [vmem:[#allocation2 + $0x10] sm:$0xff] (!%p919_p10), %v1160_v16  ;;  %356 = vst [vmem:[#allocation2 + $0x18] sm:$0xff] (!%p919_p10), %v1160_v16 }
  0x29   : > { %357 = vst [vmem:[#allocation2 + $0x20] sm:$0xff] (!%p919_p10), %v1160_v16  ;;  %358 = vst [vmem:[#allocation2 + $0x28] sm:$0xff] (!%p919_p10), %v1160_v16 }
  0x2a   : > { %359 = vst [vmem:[#allocation2 + $0x30] sm:$0xff] (!%p919_p10), %v1160_v16  ;;  %360 = vst [vmem:[#allocation2 + $0x38] sm:$0xff] (!%p919_p10), %v1160_v16 }
  0x2b   : > { %361 = vst [vmem:[#allocation2 + $0x40] sm:$0xff] (!%p919_p10), %v1160_v16  ;;  %362 = vst [vmem:[#allocation2 + $0x48] sm:$0xff] (!%p919_p10), %v1160_v16 }
  0x2c   : > { %363 = vst [vmem:[#allocation2 + $0x50] sm:$0xff] %v1160_v16  ;;  %364 = vst [vmem:[#allocation2 + $0x58] sm:$0xff] %v1160_v16 }
  0x2d   : > { %365 = vst [vmem:[#allocation2 + $0x60] sm:$0xff] %v1160_v16  ;;  %366 = vst [vmem:[#allocation2 + $0x68] sm:$0xff] %v1160_v16 }
  0x2e   : > { %367 = vst [vmem:[#allocation2 + $0x70] sm:$0xff] %v1160_v16  ;;  %368 = vst [vmem:[#allocation2 + $0x78] sm:$0xff] %v1160_v16 }
  0x2f PF: > { %v1080_v17 = vld [vmem:[%s1249_s7 + $0x40] sm:$0xff]   ;;  %v1082_v19 = vld [vmem:[%s1249_s7 + $0x48] sm:$0xff]   ;;  %v1084_v21 = vld [vmem:[%s1249_s7 + $0x50] sm:$0xff]   ;;  %p952_p11 = scmp.ne.s32.totalorder %s1150_s14, 1 }
  0x30   : > { %v1081_v18 = vld [vmem:[%s1249_s7] sm:$0xff]   ;;  %959 = vmatprep.subr.bf16.mxu0 %v1080_v17  ;;  %1023 = vmatprep.subr.bf16.mxu1 %v1080_v17  ;;  %v1083_v20 = vld [vmem:[%s1249_s7 + $0x8] sm:$0xff]   ;;  %v1085_v22 = vld [vmem:[%s1249_s7 + $0x10] sm:$0xff]  }
  0x31   : > { %960 = vmatpush3.bf16.msra.mxu0 %v1081_v18  ;;  %1031 = vmatpush3.bf16.msra.mxu1 %v1081_v18  ;;  %v1086_v23 = vld [vmem:[%s1249_s7 + $0x58] sm:$0xff]   ;;  %v1088_v25 = vld [vmem:[%s1249_s7 + $0x60] sm:$0xff]   ;;  %v1090_v27 = vld [vmem:[%s1249_s7 + $0x68] sm:$0xff]  }
  0x32   : > { %961 = vmatprep.subr.bf16.mxu0 %v1082_v19  ;;  %1024 = vmatprep.subr.bf16.mxu1 %v1082_v19  ;;  %v1087_v24 = vld [vmem:[%s1249_s7 + $0x18] sm:$0xff]   ;;  %v1089_v26 = vld [vmem:[%s1249_s7 + $0x20] sm:$0xff]   ;;  %v1091_v30 = vld [vmem:[%s1249_s7 + $0x28] sm:$0xff]  }
  0x33   : > { %v1098_v28 = vld [vmem:[%s1251_s8 + $0x4] ss:$8 sps:$4 sm:$0xff]   ;;  %v1092_v31 = vld [vmem:[%s1249_s7 + $0x70] sm:$0xff]   ;;  %v1094_v33 = vld [vmem:[%s1249_s7 + $0x78] sm:$0xff]  }
  0x34   : > { %v1101_v29 = vld [vmem:[%s1251_s8 + $0x44] ss:$8 sps:$4 sm:$0xff]   ;;  %641 = vmatprep.mubr.bf16.mxu0 %v1098_v28  ;;  %v1093_v32 = vld [vmem:[%s1249_s7 + $0x30] sm:$0xff]   ;;  %v1095_v34 = vld [vmem:[%s1249_s7 + $0x38] sm:$0xff]  }
  0x35   : > { %962 = vmatpush3.bf16.msra.mxu0 %v1083_v20  ;;  %1032 = vmatpush3.bf16.msra.mxu1 %v1083_v20  ;;  %v1096_v35 = vld [vmem:[%s1251_s8] ss:$8 sps:$4 sm:$0xff]   ;;  %v1102_v37 = vld [vmem:[%s1251_s8 + $0x14] ss:$8 sps:$4 sm:$0xff]   ;;  %v1106_v39 = vld [vmem:[%s1251_s8 + $0x10] ss:$8 sps:$4 sm:$0xff]  }
  0x36   : > { %963 = vmatprep.subr.bf16.mxu0 %v1084_v21  ;;  %1025 = vmatprep.subr.bf16.mxu1 %v1084_v21  ;;  %v1099_v36 = vld [vmem:[%s1251_s8 + $0x40] ss:$8 sps:$4 sm:$0xff]   ;;  %v1104_v38 = vld [vmem:[%s1251_s8 + $0x54] ss:$8 sps:$4 sm:$0xff]   ;;  %v1107_v40 = vld [vmem:[%s1251_s8 + $0x50] ss:$8 sps:$4 sm:$0xff]  }
  0x37   : > { %673 = vmatprep.mubr.bf16.mxu1 %v1101_v29  ;;  %v1108_v41 = vld [vmem:[%s1251_s8 + $0x24] ss:$8 sps:$4 sm:$0xff]   ;;  %v1112_v43 = vld [vmem:[%s1251_s8 + $0x20] ss:$8 sps:$4 sm:$0xff]   ;;  %v1114_v45 = vld [vmem:[%s1251_s8 + $0x34] ss:$8 sps:$4 sm:$0xff]  }
  0x38   : > { %v1110_v42 = vld [vmem:[%s1251_s8 + $0x64] ss:$8 sps:$4 sm:$0xff]   ;;  %v1113_v44 = vld [vmem:[%s1251_s8 + $0x60] ss:$8 sps:$4 sm:$0xff]   ;;  %v1116_v46 = vld [vmem:[%s1251_s8 + $0x74] ss:$8 sps:$4 sm:$0xff]  }
  0x39   : > { %964 = vmatpush3.bf16.msra.mxu0 %v1085_v22  ;;  %1033 = vmatpush3.bf16.msra.mxu1 %v1085_v22  ;;  %v1118_v47 = vld [vmem:[%s1251_s8 + $0x30] ss:$8 sps:$4 sm:$0xff]   ;;  %v369_v51 = vld [vmem:[#allocation2] sm:$0xff]  ;;  %v370_v59 = vld [vmem:[#allocation2 + $0x8] sm:$0xff] }
  0x3a   : > { %965 = vmatprep.subr.bf16.mxu0 %v1086_v23  ;;  %1026 = vmatprep.subr.bf16.mxu1 %v1086_v23  ;;  %v1119_v48 = vld [vmem:[%s1251_s8 + $0x70] ss:$8 sps:$4 sm:$0xff]   ;;  %v377_v53 = vld [vmem:[#allocation2 + $0x40] sm:$0xff]  ;;  %v378_v61 = vld [vmem:[#allocation2 + $0x48] sm:$0xff] }
  0x3b   : > { %v371_v7 = vld [vmem:[#allocation2 + $0x10] sm:$0xff]  ;;  %v372_v15 = vld [vmem:[#allocation2 + $0x18] sm:$0xff]  ;;  %v381_v29 = vld [vmem:[#allocation2 + $0x60] sm:$0xff] }
  0x3c   : > { %v379_v9 = vld [vmem:[#allocation2 + $0x50] sm:$0xff]  ;;  %v380_v17 = vld [vmem:[#allocation2 + $0x58] sm:$0xff] }
  0x3d   : > { %966 = vmatpush3.bf16.msra.mxu0 %v1087_v24  ;;  %1034 = vmatpush3.bf16.msra.mxu1 %v1087_v24 }
  0x3e   : > { %967 = vmatprep.subr.bf16.mxu0 %v1088_v25  ;;  %1027 = vmatprep.subr.bf16.mxu1 %v1088_v25 }
  0x41   : > { %968 = vmatpush3.bf16.msra.mxu0 %v1089_v26  ;;  %1035 = vmatpush3.bf16.msra.mxu1 %v1089_v26 }
  0x42   : > { %969 = vmatprep.subr.bf16.mxu0 %v1090_v27  ;;  %1028 = vmatprep.subr.bf16.mxu1 %v1090_v27  ;;  %v373_v27 = vld [vmem:[#allocation2 + $0x20] sm:$0xff] }
  0x45   : > { %970 = vmatpush3.bf16.msra.mxu0 %v1091_v30  ;;  %1036 = vmatpush3.bf16.msra.mxu1 %v1091_v30 }
  0x46   : > { %971 = vmatprep.subr.bf16.mxu0 %v1092_v31  ;;  %1029 = vmatprep.subr.bf16.mxu1 %v1092_v31 }
  0x49   : > { %972 = vmatpush3.bf16.msra.mxu0 %v1093_v32  ;;  %1037 = vmatpush3.bf16.msra.mxu1 %v1093_v32 }
  0x4a   : > { %973 = vmatprep.subr.bf16.mxu0 %v1094_v33  ;;  %1030 = vmatprep.subr.bf16.mxu1 %v1094_v33 }
  0x4d   : > { %974 = vmatpush3.bf16.msra.mxu0 %v1095_v34  ;;  %1038 = vmatpush3.bf16.msra.mxu1 %v1095_v34 }
  0x50   : > { %642 = vmatmul.mubr.bf16.vlgmr.msra.gmra.mrb[0].mxu0 %v1096_v35  ;;  %674 = vmatmul.mubr.bf16.vlgmr.msra.gmra.mrb[0].mxu1 %v1099_v36  ;;  %v374_v35 = vld [vmem:[#allocation2 + $0x28] sm:$0xff] }
  0x51   : > { %649 = vmatprep.mubr.bf16.mxu0 %v1102_v37  ;;  %681 = vmatprep.mubr.bf16.mxu1 %v1104_v38  ;;  %v382_v37 = vld [vmem:[#allocation2 + $0x68] sm:$0xff] }
  0x58   : > { %650 = vmatmul.mubr.bf16.gmra.mrb[4].mxu0 %v1106_v39  ;;  %682 = vmatmul.mubr.bf16.gmra.mrb[4].mxu1 %v1107_v40 }
  0x59   : > { %657 = vmatprep.mubr.bf16.mxu0 %v1108_v41  ;;  %689 = vmatprep.mubr.bf16.mxu1 %v1110_v42 }
  0x60   : > { %658 = vmatmul.mubr.bf16.gmra.mrb[8].mxu0 %v1112_v43  ;;  %690 = vmatmul.mubr.bf16.gmra.mrb[8].mxu1 %v1113_v44 }
  0x61   : > { %665 = vmatprep.mubr.bf16.mxu0 %v1114_v45  ;;  %697 = vmatprep.mubr.bf16.mxu1 %v1116_v46 }
  0x68   : > { %666 = vmatmul.mubr.bf16.gmra.mrb[12].mxu0 %v1118_v47  ;;  %698 = vmatmul.mubr.bf16.gmra.mrb[12].mxu1 %v1119_v48  ;;  %v375_v47 = vld [vmem:[#allocation2 + $0x30] sm:$0xff] }
 0x123   : > { %v975_v49 = vpop.f32.mrb[0].mxu0  ;;  %v999_v50 = vpop.f32.mrb[0].mxu1 }
 0x124   : > { %v976_v52 = vpop.f32.mrb[1].mxu0  ;;  %v1000_v54 = vpop.f32.mrb[1].mxu1 }
 0x125   : > { %v977_v55 = vadd.f32 %v976_v52, %v975_v49  ;;  %v1001_v56 = vadd.f32 %v1000_v54, %v999_v50  ;;  %v978_v57 = vpop.f32.mrb[2].mxu0  ;;  %v1002_v58 = vpop.f32.mrb[2].mxu1  ;;  %v383_v49 = vld [vmem:[#allocation2 + $0x70] sm:$0xff] }
 0x126   : > { %v979_v60 = vpop.f32.mrb[3].mxu0  ;;  %v1003_v62 = vpop.f32.mrb[3].mxu1 }
 0x127   : > { %v706_v63 = vadd.f32 %v977_v55, %v369_v51  ;;  %v714_v0 = vadd.f32 %v1001_v56, %v377_v53  ;;  %v980_v1 = vadd.f32 %v979_v60, %v978_v57  ;;  %v1004_v2 = vadd.f32 %v1003_v62, %v1002_v58  ;;  %v376_v55 = vld [vmem:[#allocation2 + $0x38] sm:$0xff] }
 0x128   : > { %v384_v57 = vld [vmem:[#allocation2 + $0x78] sm:$0xff] }
 0x129   : > { %722 = vst [vmem:[#allocation2] sm:$0xff] %v706_v63  ;;  %730 = vst [vmem:[#allocation2 + $0x40] sm:$0xff] %v714_v0  ;;  %v707_v3 = vadd.f32 %v980_v1, %v370_v59  ;;  %v715_v4 = vadd.f32 %v1004_v2, %v378_v61  ;;  %v953_v2 = vld [vmem:[%s1355_s2] ss:$0 sm:$0xff] (!%p952_p11) }
 0x12b   : > { %723 = vst [vmem:[#allocation2 + $0x8] sm:$0xff] %v707_v3  ;;  %731 = vst [vmem:[#allocation2 + $0x48] sm:$0xff] %v715_v4  ;;  %v981_v5 = vpop.f32.mrb[4].mxu0  ;;  %v1005_v6 = vpop.f32.mrb[4].mxu1 }
 0x12c   : > { %v982_v8 = vpop.f32.mrb[5].mxu0  ;;  %v1006_v10 = vpop.f32.mrb[5].mxu1 }
 0x12d   : > { %v983_v11 = vadd.f32 %v982_v8, %v981_v5  ;;  %v1007_v12 = vadd.f32 %v1006_v10, %v1005_v6  ;;  %v984_v13 = vpop.f32.mrb[6].mxu0  ;;  %v1008_v14 = vpop.f32.mrb[6].mxu1 }
 0x12e   : > { %v985_v16 = vpop.f32.mrb[7].mxu0  ;;  %v1009_v18 = vpop.f32.mrb[7].mxu1 }
 0x12f   : > { %v708_v19 = vadd.f32 %v983_v11, %v371_v7  ;;  %v716_v20 = vadd.f32 %v1007_v12, %v379_v9  ;;  %v986_v21 = vadd.f32 %v985_v16, %v984_v13  ;;  %v1010_v22 = vadd.f32 %v1009_v18, %v1008_v14 }
 0x130   : > { %v742_v1 = vld [vmem:[#allocation2] sm:$0xff] (!%p952_p11) }
 0x131   : > { %724 = vst [vmem:[#allocation2 + $0x10] sm:$0xff] %v708_v19  ;;  %732 = vst [vmem:[#allocation2 + $0x50] sm:$0xff] %v716_v20  ;;  %v709_v23 = vadd.f32 %v986_v21, %v372_v15  ;;  %v717_v24 = vadd.f32 %v1010_v22, %v380_v17  ;;  %v765_v4 = vadd.f32 (!%p952_p11), %v953_v2, %v742_v1  ;;  %v750_v18 = vld [vmem:[#allocation2 + $0x40] sm:$0xff] (!%p952_p11) }
 0x132   : > { %v743_v3 = vld [vmem:[#allocation2 + $0x8] sm:$0xff] (!%p952_p11)  ;;  %v773_v21 = vadd.f32 (!%p952_p11), %v953_v2, %v750_v18 }
 0x133   : > { %725 = vst [vmem:[#allocation2 + $0x18] sm:$0xff] %v709_v23  ;;  %733 = vst [vmem:[#allocation2 + $0x58] sm:$0xff] %v717_v24  ;;  %v987_v25 = vpop.f32.mrb[8].mxu0  ;;  %v1011_v26 = vpop.f32.mrb[8].mxu1  ;;  %v766_v5 = vadd.f32 (!%p952_p11), %v953_v2, %v743_v3  ;;  %v751_v19 = vld [vmem:[#allocation2 + $0x48] sm:$0xff] (!%p952_p11) }
 0x134   : > { %v988_v28 = vpop.f32.mrb[9].mxu0  ;;  %v1012_v30 = vpop.f32.mrb[9].mxu1  ;;  %781 = vst [vmem:[%s1356_s3] sm:$0xff] (!%p952_p11), %v765_v4  ;;  %v774_v22 = vadd.f32 (!%p952_p11), %v953_v2, %v751_v19  ;;  %789 = vst [vmem:[%s1356_s3 + $0x40] sm:$0xff] (!%p952_p11), %v773_v21 }
 0x135   : > { %v989_v31 = vadd.f32 %v988_v28, %v987_v25  ;;  %v1013_v32 = vadd.f32 %v1012_v30, %v1011_v26  ;;  %v990_v33 = vpop.f32.mrb[10].mxu0  ;;  %v1014_v34 = vpop.f32.mrb[10].mxu1  ;;  %782 = vst [vmem:[%s1356_s3 + $0x8] sm:$0xff] (!%p952_p11), %v766_v5 }
 0x136   : > { %v991_v36 = vpop.f32.mrb[11].mxu0  ;;  %v1015_v38 = vpop.f32.mrb[11].mxu1  ;;  %790 = vst [vmem:[%s1356_s3 + $0x48] sm:$0xff] (!%p952_p11), %v774_v22 }
 0x137   : > { %v710_v39 = vadd.f32 %v989_v31, %v373_v27  ;;  %v718_v40 = vadd.f32 %v1013_v32, %v381_v29  ;;  %v992_v41 = vadd.f32 %v991_v36, %v990_v33  ;;  %v1016_v42 = vadd.f32 %v1015_v38, %v1014_v34 }
 0x138   : > { %v744_v6 = vld [vmem:[#allocation2 + $0x10] sm:$0xff] (!%p952_p11) }
 0x139   : > { %726 = vst [vmem:[#allocation2 + $0x20] sm:$0xff] %v710_v39  ;;  %734 = vst [vmem:[#allocation2 + $0x60] sm:$0xff] %v718_v40  ;;  %v711_v43 = vadd.f32 %v992_v41, %v374_v35  ;;  %v719_v44 = vadd.f32 %v1016_v42, %v382_v37  ;;  %v767_v9 = vadd.f32 (!%p952_p11), %v953_v2, %v744_v6  ;;  %v752_v20 = vld [vmem:[#allocation2 + $0x50] sm:$0xff] (!%p952_p11) }
 0x13a   : > { %v745_v7 = vld [vmem:[#allocation2 + $0x18] sm:$0xff] (!%p952_p11)  ;;  %v775_v23 = vadd.f32 (!%p952_p11), %v953_v2, %v752_v20 }
 0x13b   : > { %727 = vst [vmem:[#allocation2 + $0x28] sm:$0xff] %v711_v43  ;;  %735 = vst [vmem:[#allocation2 + $0x68] sm:$0xff] %v719_v44  ;;  %v993_v45 = vpop.f32.mrb[12].mxu0  ;;  %v1017_v46 = vpop.f32.mrb[12].mxu1  ;;  %v768_v10 = vadd.f32 (!%p952_p11), %v953_v2, %v745_v7  ;;  %v753_v24 = vld [vmem:[#allocation2 + $0x58] sm:$0xff] (!%p952_p11) }
 0x13c   : > { %v994_v48 = vpop.f32.mrb[13].mxu0  ;;  %v1018_v50 = vpop.f32.mrb[13].mxu1  ;;  %783 = vst [vmem:[%s1356_s3 + $0x10] sm:$0xff] (!%p952_p11), %v767_v9  ;;  %v776_v27 = vadd.f32 (!%p952_p11), %v953_v2, %v753_v24  ;;  %791 = vst [vmem:[%s1356_s3 + $0x50] sm:$0xff] (!%p952_p11), %v775_v23 }
 0x13d   : > { %v995_v51 = vadd.f32 %v994_v48, %v993_v45  ;;  %v1019_v52 = vadd.f32 %v1018_v50, %v1017_v46  ;;  %v996_v53 = vpop.f32.mrb[14].mxu0  ;;  %v1020_v54 = vpop.f32.mrb[14].mxu1  ;;  %741 = sbr.rel (%p952_p11) target bundleno = 335 (0x14f), region = 78  ;;  %784 = vst [vmem:[%s1356_s3 + $0x18] sm:$0xff] (!%p952_p11), %v768_v10 }
 0x13e   : > { %v997_v56 = vpop.f32.mrb[15].mxu0  ;;  %v1021_v58 = vpop.f32.mrb[15].mxu1  ;;  %792 = vst [vmem:[%s1356_s3 + $0x58] sm:$0xff] (!%p952_p11), %v776_v27 }
 0x13f   : > { %v712_v59 = vadd.f32 %v995_v51, %v375_v47  ;;  %v720_v60 = vadd.f32 %v1019_v52, %v383_v49  ;;  %v998_v61 = vadd.f32 %v997_v56, %v996_v53  ;;  %v1022_v62 = vadd.f32 %v1021_v58, %v1020_v54 }
 0x140   : > { %v746_v8 = vld [vmem:[#allocation2 + $0x20] sm:$0xff] (!%p952_p11) }
 0x141   : > { %728 = vst [vmem:[#allocation2 + $0x30] sm:$0xff] %v712_v59  ;;  %736 = vst [vmem:[#allocation2 + $0x70] sm:$0xff] %v720_v60  ;;  %v713_v63 = vadd.f32 %v998_v61, %v376_v55  ;;  %v721_v0 = vadd.f32 %v1022_v62, %v384_v57  ;;  %v769_v11 = vadd.f32 (!%p952_p11), %v953_v2, %v746_v8  ;;  %v754_v25 = vld [vmem:[#allocation2 + $0x60] sm:$0xff] (!%p952_p11) }
 0x142   : > { %v747_v12 = vld [vmem:[#allocation2 + $0x28] sm:$0xff] (!%p952_p11)  ;;  %v777_v28 = vadd.f32 (!%p952_p11), %v953_v2, %v754_v25 }
 0x143   : > { %729 = vst [vmem:[#allocation2 + $0x38] sm:$0xff] %v713_v63  ;;  %737 = vst [vmem:[#allocation2 + $0x78] sm:$0xff] %v721_v0  ;;  %v770_v15 = vadd.f32 (!%p952_p11), %v953_v2, %v747_v12  ;;  %v755_v26 = vld [vmem:[#allocation2 + $0x68] sm:$0xff] (!%p952_p11) }
 0x144   : > { %785 = vst [vmem:[%s1356_s3 + $0x20] sm:$0xff] %v769_v11  ;;  %v778_v29 = vadd.f32 %v953_v2, %v755_v26  ;;  %793 = vst [vmem:[%s1356_s3 + $0x60] sm:$0xff] %v777_v28 }
 0x145   : > { %786 = vst [vmem:[%s1356_s3 + $0x28] sm:$0xff] %v770_v15 }
 0x146   : > { %794 = vst [vmem:[%s1356_s3 + $0x68] sm:$0xff] %v778_v29 }
 0x148   : > { %v748_v13 = vld [vmem:[#allocation2 + $0x30] sm:$0xff] }
 0x149   : > { %v771_v16 = vadd.f32 %v953_v2, %v748_v13  ;;  %v756_v30 = vld [vmem:[#allocation2 + $0x70] sm:$0xff] }
 0x14a   : > { %v749_v14 = vld [vmem:[#allocation2 + $0x38] sm:$0xff]  ;;  %v779_v32 = vadd.f32 %v953_v2, %v756_v30 }
 0x14b   : > { %v772_v17 = vadd.f32 %v953_v2, %v749_v14  ;;  %787 = vst [vmem:[%s1356_s3 + $0x30] sm:$0xff] %v771_v16  ;;  %v757_v31 = vld [vmem:[#allocation2 + $0x78] sm:$0xff] }
 0x14c   : > { %v780_v33 = vadd.f32 %v953_v2, %v757_v31  ;;  %795 = vst [vmem:[%s1356_s3 + $0x70] sm:$0xff] %v779_v32 }
 0x14d   : > { %788 = vst [vmem:[%s1356_s3 + $0x38] sm:$0xff] %v772_v17 }
 0x14e   : > { %796 = vst [vmem:[%s1356_s3 + $0x78] sm:$0xff] %v780_v33 }
 0x14f PF: > { %s13_s16 = sadd.s32 1, %s1158_s16   ;;  %s1357_s12 = smov %s1146_s13 }
 0x150   : > { %p10_p12 = scmp.ge.s32.totalorder %s13_s16, 4   ;;  %s1358_s13 = smov %s1216_s20 }
 0x151   : > { %s1359_s14 = smov %s1154_s15  ;;  %s1360_s15 = smov %s1362_s17 }
 0x152   :  { %12 = sbr.rel (!%p10_p12) target bundleno = 3 (0x3), region = 119 }

// kernel: default_generator_forward.105
= control target key start
LH: loop header
LB: loop body
LE: loop exit
PB: predicated region body
PF: predicated region fallthrough
CT: control target
= control target key end

     0   :  { %s1742_s12 = smov 0   ;;  %s1744_s13 = smov 0   ;;  %s2027_s0 = inlined_call_operand.vmem [shape: bf16[512,5376], index: 0, kind: input, shape index: {}]   ;;  %s2028_s1 = inlined_call_operand.vmem [shape: bf16[5376,128], index: 1, kind: input, shape index: {}]   ;;  %s2029_s2 = inlined_call_operand.vmem [shape: f32[1,128], index: 2, kind: input, shape index: {}]   ;;  %s2030_s3 = inlined_call_operand.vmem [shape: f32[512,128], index: 3, kind: output, shape index: {}]  }
   0x1   :  { %s1746_s14 = smov 0   ;;  %s1748_s15 = smov 0  }
   0x2   :  { %s1750_s16 = smov 0   ;;  %s1752_s17 = smov 0  }
   0x3   :  { %s1754_s18 = smov 0  }
   0x4 LB: > { %s25_s19 = sadd.s32 1, %s1711_s16  ;;  %s32_s20 = sadd.s32 1, %s1715_s17  ;;  %s1719_s18 = sphi %s1754_s18, %s13_s18   ;;  %s1715_s17 = sphi %s1752_s17, %s2036_s17   ;;  %s1711_s16 = sphi %s1750_s16, %s2035_s16   ;;  %s1707_s15 = sphi %s1748_s15, %s2034_s15   ;;  %s1703_s14 = sphi %s1746_s14, %s2033_s14   ;;  %s1699_s13 = sphi %s1744_s13, %s2032_s13   ;;  %s1695_s12 = sphi %s1742_s12, %s2031_s12  }
   0x5   : > { %p26_p0 = scmp.ge.s32.totalorder %s25_s19, 21  ;;  %p48_p1 = scmp.ne.s32.totalorder %s1699_s13, %s1695_s12 }
   0x6   : > { %p49_p2 = scmp.eq.s32.totalorder %s1719_s18, 0  ;;  %s41_s24 = sadd.s32 1, %s1699_s13 }
   0x7   : > { %s2038_s19 = smov (%p26_p0, %s25_s19), 0  ;;  %s2040_s20 = smov (!%p26_p0, %s32_s20), %s1715_s17 }
   0x8   : > { %p50_p3 = por %p49_p2, %p48_p1  ;;  %p34_p4 = scmp.ge.s32.totalorder %s2040_s20, 2 }
   0x9   : > { %s37_s21 = ssub.s32 %s1711_s16, %s2038_s19  ;;  %p1286_p6 = scmp.ge.s32.totalorder %s1719_s18, 42 }
   0xa   : > { %s2042_s20 = smov (%p34_p4, %s2040_s20), 0 }
   0xb   : > { %s36_s22 = ssub.s32 %s1715_s17, %s2042_s20  ;;  %162 = sbr.rel (%p1286_p6) target bundleno = 42 (0x2a), region = 20 }
   0xc   : > { %s38_s23 = sor.u32 %s37_s21, %s36_s22 }
   0xd   : > { %p39_p5 = scmp.eq.s32.totalorder %s38_s23, 0 }
   0xf   : > { %s1793_s25 = scalar_select %p39_p5, %s1699_s13, %s41_s24  }
  0x12   : > { %165 = sbr.rel (!%p50_p3) target bundleno = 42 (0x2a), region = 24  ;;  %s167_s26 = sand.u32 (%p50_p3), 1, %s1699_s13  }
  0x13   : > { %s1289_s27 = sshll.u32 (%p50_p3), %s1711_s16, 1  ;;  %s1287_s28 = sshll.u32 (%p50_p3), %s167_s26, 8 }
  0x14   : > { %s1479_s29 = smul.u32 (%p50_p3), 1344, %s1715_s17  ;;  %s1807_s8 = scalar_lea.vmem (%p50_p3), [#allocation3], %s1287_s28 }
  0x16   : > { %s173_s30 = sadd.s32 (%p50_p3), %s1479_s29, %s1289_s27 }
  0x17   : > { %s1291_s4 = sshll.u32 (%p50_p3), %s173_s30, 2 }
  0x18   : > { %s1802_s7 = scalar_lea.vmem (%p50_p3), %s2027_s0, %s1291_s4 }
  0x19   : > { %v265_v0 = vld [vmem:[%s1802_s7] sm:$0xff]  ;;  %v267_v1 = vld [vmem:[%s1802_s7 + $0xa8] sm:$0xff]  ;;  %v269_v2 = vld [vmem:[%s1802_s7 + $0x150] sm:$0xff] }
  0x1a   : > { %266 = vst [vmem:[%s1807_s8] sm:$0xff] %v265_v0  ;;  %268 = vst [vmem:[%s1807_s8 + $0x8] sm:$0xff] %v267_v1  ;;  %v271_v3 = vld [vmem:[%s1802_s7 + $0x1f8] sm:$0xff]  ;;  %v273_v4 = vld [vmem:[%s1802_s7 + $0x2a0] sm:$0xff] }
  0x1b   : > { %270 = vst [vmem:[%s1807_s8 + $0x10] sm:$0xff] %v269_v2  ;;  %v275_v5 = vld [vmem:[%s1802_s7 + $0x348] sm:$0xff]  ;;  %272 = vst [vmem:[%s1807_s8 + $0x18] sm:$0xff] %v271_v3  ;;  %v277_v6 = vld [vmem:[%s1802_s7 + $0x3f0] sm:$0xff] }
  0x1c   : > { %274 = vst [vmem:[%s1807_s8 + $0x20] sm:$0xff] %v273_v4  ;;  %276 = vst [vmem:[%s1807_s8 + $0x28] sm:$0xff] %v275_v5  ;;  %v279_v7 = vld [vmem:[%s1802_s7 + $0x498] sm:$0xff]  ;;  %v281_v8 = vld [vmem:[%s1802_s7 + $0x540] sm:$0xff] }
  0x1d   : > { %278 = vst [vmem:[%s1807_s8 + $0x30] sm:$0xff] %v277_v6  ;;  %280 = vst [vmem:[%s1807_s8 + $0x38] sm:$0xff] %v279_v7  ;;  %v283_v9 = vld [vmem:[%s1802_s7 + $0x5e8] sm:$0xff]  ;;  %v285_v10 = vld [vmem:[%s1802_s7 + $0x690] sm:$0xff] }
  0x1e   : > { %282 = vst [vmem:[%s1807_s8 + $0x40] sm:$0xff] %v281_v8  ;;  %v287_v11 = vld [vmem:[%s1802_s7 + $0x738] sm:$0xff]  ;;  %284 = vst [vmem:[%s1807_s8 + $0x48] sm:$0xff] %v283_v9  ;;  %v289_v12 = vld [vmem:[%s1802_s7 + $0x7e0] sm:$0xff] }
  0x1f   : > { %286 = vst [vmem:[%s1807_s8 + $0x50] sm:$0xff] %v285_v10  ;;  %288 = vst [vmem:[%s1807_s8 + $0x58] sm:$0xff] %v287_v11  ;;  %v291_v13 = vld [vmem:[%s1802_s7 + $0x888] sm:$0xff]  ;;  %v293_v14 = vld [vmem:[%s1802_s7 + $0x930] sm:$0xff] }
  0x20   : > { %290 = vst [vmem:[%s1807_s8 + $0x60] sm:$0xff] %v289_v12  ;;  %292 = vst [vmem:[%s1807_s8 + $0x68] sm:$0xff] %v291_v13  ;;  %v295_v15 = vld [vmem:[%s1802_s7 + $0x9d8] sm:$0xff]  ;;  %v297_v16 = vld [vmem:[%s1802_s7 + $0xa80] sm:$0xff] }
  0x21   : > { %294 = vst [vmem:[%s1807_s8 + $0x70] sm:$0xff] %v293_v14  ;;  %v299_v17 = vld [vmem:[%s1802_s7 + $0xb28] sm:$0xff]  ;;  %296 = vst [vmem:[%s1807_s8 + $0x78] sm:$0xff] %v295_v15  ;;  %v301_v18 = vld [vmem:[%s1802_s7 + $0xbd0] sm:$0xff] }
  0x22   : > { %298 = vst [vmem:[%s1807_s8 + $0x80] sm:$0xff] %v297_v16  ;;  %300 = vst [vmem:[%s1807_s8 + $0x88] sm:$0xff] %v299_v17  ;;  %v303_v19 = vld [vmem:[%s1802_s7 + $0xc78] sm:$0xff]  ;;  %v305_v20 = vld [vmem:[%s1802_s7 + $0xd20] sm:$0xff] }
  0x23   : > { %302 = vst [vmem:[%s1807_s8 + $0x90] sm:$0xff] %v301_v18  ;;  %304 = vst [vmem:[%s1807_s8 + $0x98] sm:$0xff] %v303_v19  ;;  %v307_v21 = vld [vmem:[%s1802_s7 + $0xdc8] sm:$0xff]  ;;  %v309_v22 = vld [vmem:[%s1802_s7 + $0xe70] sm:$0xff] }
  0x24   : > { %306 = vst [vmem:[%s1807_s8 + $0xa0] sm:$0xff] %v305_v20  ;;  %v311_v23 = vld [vmem:[%s1802_s7 + $0xf18] sm:$0xff]  ;;  %308 = vst [vmem:[%s1807_s8 + $0xa8] sm:$0xff] %v307_v21  ;;  %v313_v24 = vld [vmem:[%s1802_s7 + $0xfc0] sm:$0xff] }
  0x25   : > { %310 = vst [vmem:[%s1807_s8 + $0xb0] sm:$0xff] %v309_v22  ;;  %312 = vst [vmem:[%s1807_s8 + $0xb8] sm:$0xff] %v311_v23  ;;  %v315_v25 = vld [vmem:[%s1802_s7 + $0x1068] sm:$0xff]  ;;  %v317_v26 = vld [vmem:[%s1802_s7 + $0x1110] sm:$0xff] }
  0x26   : > { %314 = vst [vmem:[%s1807_s8 + $0xc0] sm:$0xff] %v313_v24  ;;  %316 = vst [vmem:[%s1807_s8 + $0xc8] sm:$0xff] %v315_v25  ;;  %v319_v27 = vld [vmem:[%s1802_s7 + $0x11b8] sm:$0xff]  ;;  %v321_v28 = vld [vmem:[%s1802_s7 + $0x1260] sm:$0xff] }
  0x27   : > { %318 = vst [vmem:[%s1807_s8 + $0xd0] sm:$0xff] %v317_v26  ;;  %v323_v29 = vld [vmem:[%s1802_s7 + $0x1308] sm:$0xff]  ;;  %320 = vst [vmem:[%s1807_s8 + $0xd8] sm:$0xff] %v319_v27  ;;  %v325_v30 = vld [vmem:[%s1802_s7 + $0x13b0] sm:$0xff] }
  0x28   : > { %322 = vst [vmem:[%s1807_s8 + $0xe0] sm:$0xff] %v321_v28  ;;  %324 = vst [vmem:[%s1807_s8 + $0xe8] sm:$0xff] %v323_v29  ;;  %v327_v31 = vld [vmem:[%s1802_s7 + $0x1458] sm:$0xff] }
  0x29   : > { %326 = vst [vmem:[%s1807_s8 + $0xf0] sm:$0xff] %v325_v30  ;;  %328 = vst [vmem:[%s1807_s8 + $0xf8] sm:$0xff] %v327_v31 }
  0x2a PF: > { %p1292_p7 = scmp.ge.s32.totalorder %s1719_s18, 1  ;;  %p345_p8 = scmp.lt.s32.totalorder %s1719_s18, 43 }
  0x2c   : > { %p346_p9 = pnand %p1292_p7, %p345_p8 }
  0x2d   : > { %s352_s9 = sand.u32 (!%p346_p9), 1, %s1695_s12   ;;  %s1294_s10 = sshll.u32 (!%p346_p9), %s1703_s14, 5 }
  0x2e   : > { %349 = sbr.rel (%p346_p9) target bundleno = 417 (0x1a1), region = 66  ;;  %s1293_s11 = sshll.u32 (!%p346_p9), %s352_s9, 8 }
  0x2f   : > { %p392_p10 = scmp.lt.s32.totalorder (!%p346_p9), %s1294_s10, 671  ;;  %s1296_s21 = sshll.u32 (!%p346_p9), %s1707_s15, 5 }
  0x30   : > { %p404_p11 = scmp.lt.s32.totalorder (!%p346_p9), %s1296_s21, 63  ;;  %s1885_s12 = scalar_lea.vmem (!%p346_p9), [#allocation3], %s1293_s11 }
  0x31   : > { %p1298_p12 = scmp.ne.s32.totalorder (!%p346_p9), %s1703_s14, 0 }
  0x35   : > { %s2044_s10 = smov (!%p392_p10, %s1294_s10), 671  ;;  %s2046_s21 = smov (!%p404_p11, %s1296_s21), 63 }
  0x36   : > { %s1295_s22 = sshll.u32 %s2044_s10, 2  ;;  %s1297_s27 = sshll.u32 %s2046_s21, 3  ;;  %v1721_v32 = vmov (!%p1298_p12), 0.0  }
  0x37   : > { %s1878_s26 = scalar_lea.vmem %s2028_s1, %s1295_s22  ;;  %s1883_s30 = scalar_lea.vmem %s2030_s3, %s1297_s27  ;;  %417 = vst [vmem:[#allocation2] sm:$0xff] (!%p1298_p12), %v1721_v32  ;;  %418 = vst [vmem:[#allocation2 + $0x8] sm:$0xff] (!%p1298_p12), %v1721_v32 }
  0x38   : > { %416 = sbr.rel (%p1298_p12) target bundleno = 71 (0x47), region = 74  ;;  %419 = vst [vmem:[#allocation2 + $0x10] sm:$0xff] (!%p1298_p12), %v1721_v32  ;;  %420 = vst [vmem:[#allocation2 + $0x18] sm:$0xff] (!%p1298_p12), %v1721_v32 }
  0x39   : > { %421 = vst [vmem:[#allocation2 + $0x20] sm:$0xff] (!%p1298_p12), %v1721_v32  ;;  %422 = vst [vmem:[#allocation2 + $0x28] sm:$0xff] (!%p1298_p12), %v1721_v32 }
  0x3a   : > { %423 = vst [vmem:[#allocation2 + $0x30] sm:$0xff] (!%p1298_p12), %v1721_v32  ;;  %424 = vst [vmem:[#allocation2 + $0x38] sm:$0xff] (!%p1298_p12), %v1721_v32 }
  0x3b   : > { %425 = vst [vmem:[#allocation2 + $0x40] sm:$0xff] (!%p1298_p12), %v1721_v32  ;;  %426 = vst [vmem:[#allocation2 + $0x48] sm:$0xff] (!%p1298_p12), %v1721_v32 }
  0x3c   : > { %427 = vst [vmem:[#allocation2 + $0x50] sm:$0xff] (!%p1298_p12), %v1721_v32  ;;  %428 = vst [vmem:[#allocation2 + $0x58] sm:$0xff] (!%p1298_p12), %v1721_v32 }
  0x3d   : > { %429 = vst [vmem:[#allocation2 + $0x60] sm:$0xff] (!%p1298_p12), %v1721_v32  ;;  %430 = vst [vmem:[#allocation2 + $0x68] sm:$0xff] (!%p1298_p12), %v1721_v32 }
  0x3e   : > { %431 = vst [vmem:[#allocation2 + $0x70] sm:$0xff] (!%p1298_p12), %v1721_v32  ;;  %432 = vst [vmem:[#allocation2 + $0x78] sm:$0xff] (!%p1298_p12), %v1721_v32 }
  0x3f   : > { %433 = vst [vmem:[#allocation2 + $0x80] sm:$0xff] %v1721_v32  ;;  %434 = vst [vmem:[#allocation2 + $0x88] sm:$0xff] %v1721_v32 }
  0x40   : > { %435 = vst [vmem:[#allocation2 + $0x90] sm:$0xff] %v1721_v32  ;;  %436 = vst [vmem:[#allocation2 + $0x98] sm:$0xff] %v1721_v32 }
  0x41   : > { %437 = vst [vmem:[#allocation2 + $0xa0] sm:$0xff] %v1721_v32  ;;  %438 = vst [vmem:[#allocation2 + $0xa8] sm:$0xff] %v1721_v32 }
  0x42   : > { %439 = vst [vmem:[#allocation2 + $0xb0] sm:$0xff] %v1721_v32  ;;  %440 = vst [vmem:[#allocation2 + $0xb8] sm:$0xff] %v1721_v32 }
  0x43   : > { %441 = vst [vmem:[#allocation2 + $0xc0] sm:$0xff] %v1721_v32  ;;  %442 = vst [vmem:[#allocation2 + $0xc8] sm:$0xff] %v1721_v32 }
  0x44   : > { %443 = vst [vmem:[#allocation2 + $0xd0] sm:$0xff] %v1721_v32  ;;  %444 = vst [vmem:[#allocation2 + $0xd8] sm:$0xff] %v1721_v32 }
  0x45   : > { %445 = vst [vmem:[#allocation2 + $0xe0] sm:$0xff] %v1721_v32  ;;  %446 = vst [vmem:[#allocation2 + $0xe8] sm:$0xff] %v1721_v32 }
  0x46   : > { %447 = vst [vmem:[#allocation2 + $0xf0] sm:$0xff] %v1721_v32  ;;  %448 = vst [vmem:[#allocation2 + $0xf8] sm:$0xff] %v1721_v32 }
  0x47 PF: > { %v1537_v33 = vld [vmem:[%s1878_s26 + $0x40] sm:$0xff]   ;;  %v1539_v35 = vld [vmem:[%s1878_s26 + $0x48] sm:$0xff]   ;;  %v1541_v37 = vld [vmem:[%s1878_s26 + $0x50] sm:$0xff]   ;;  %p1347_p13 = scmp.ne.s32.totalorder %s1703_s14, 20 }
  0x48   : > { %v1538_v34 = vld [vmem:[%s1878_s26] sm:$0xff]   ;;  %1351 = vmatprep.subr.bf16.mxu0 %v1537_v33  ;;  %1463 = vmatprep.subr.bf16.mxu1 %v1537_v33  ;;  %v1540_v36 = vld [vmem:[%s1878_s26 + $0x8] sm:$0xff]   ;;  %v1542_v38 = vld [vmem:[%s1878_s26 + $0x10] sm:$0xff]  }
  0x49   : > { %1352 = vmatpush3.bf16.msra.mxu0 %v1538_v34  ;;  %1471 = vmatpush3.bf16.msra.mxu1 %v1538_v34  ;;  %v1543_v39 = vld [vmem:[%s1878_s26 + $0x58] sm:$0xff]   ;;  %v1545_v41 = vld [vmem:[%s1878_s26 + $0x60] sm:$0xff]   ;;  %v1547_v43 = vld [vmem:[%s1878_s26 + $0x68] sm:$0xff]  }
  0x4a   : > { %1353 = vmatprep.subr.bf16.mxu0 %v1539_v35  ;;  %1464 = vmatprep.subr.bf16.mxu1 %v1539_v35  ;;  %v1544_v40 = vld [vmem:[%s1878_s26 + $0x18] sm:$0xff]   ;;  %v1546_v42 = vld [vmem:[%s1878_s26 + $0x20] sm:$0xff]   ;;  %v1548_v46 = vld [vmem:[%s1878_s26 + $0x28] sm:$0xff]  }
  0x4b   : > { %v1555_v44 = vld [vmem:[%s1885_s12 + $0x4] ss:$8 sps:$4 sm:$0xff]   ;;  %v1549_v47 = vld [vmem:[%s1878_s26 + $0x70] sm:$0xff]   ;;  %v1551_v49 = vld [vmem:[%s1878_s26 + $0x78] sm:$0xff]  }
  0x4c   : > { %v1558_v45 = vld [vmem:[%s1885_s12 + $0x84] ss:$8 sps:$4 sm:$0xff]   ;;  %833 = vmatprep.mubr.bf16.mxu0 %v1555_v44  ;;  %v1550_v48 = vld [vmem:[%s1878_s26 + $0x30] sm:$0xff]   ;;  %v1552_v50 = vld [vmem:[%s1878_s26 + $0x38] sm:$0xff]  }
  0x4d   : > { %1354 = vmatpush3.bf16.msra.mxu0 %v1540_v36  ;;  %1472 = vmatpush3.bf16.msra.mxu1 %v1540_v36  ;;  %v1553_v51 = vld [vmem:[%s1885_s12] ss:$8 sps:$4 sm:$0xff]   ;;  %v1559_v53 = vld [vmem:[%s1885_s12 + $0x14] ss:$8 sps:$4 sm:$0xff]   ;;  %v1563_v55 = vld [vmem:[%s1885_s12 + $0x10] ss:$8 sps:$4 sm:$0xff]  }
  0x4e   : > { %1355 = vmatprep.subr.bf16.mxu0 %v1541_v37  ;;  %1465 = vmatprep.subr.bf16.mxu1 %v1541_v37  ;;  %v1556_v52 = vld [vmem:[%s1885_s12 + $0x80] ss:$8 sps:$4 sm:$0xff]   ;;  %v1561_v54 = vld [vmem:[%s1885_s12 + $0x94] ss:$8 sps:$4 sm:$0xff]   ;;  %v1564_v56 = vld [vmem:[%s1885_s12 + $0x90] ss:$8 sps:$4 sm:$0xff]  }
  0x4f   : > { %897 = vmatprep.mubr.bf16.mxu1 %v1558_v45  ;;  %v1565_v57 = vld [vmem:[%s1885_s12 + $0x24] ss:$8 sps:$4 sm:$0xff]   ;;  %v1569_v59 = vld [vmem:[%s1885_s12 + $0x20] ss:$8 sps:$4 sm:$0xff]   ;;  %v1571_v61 = vld [vmem:[%s1885_s12 + $0x34] ss:$8 sps:$4 sm:$0xff]  }
  0x50   : > { %v1567_v58 = vld [vmem:[%s1885_s12 + $0xa4] ss:$8 sps:$4 sm:$0xff]   ;;  %v1570_v60 = vld [vmem:[%s1885_s12 + $0xa0] ss:$8 sps:$4 sm:$0xff]   ;;  %v1573_v62 = vld [vmem:[%s1885_s12 + $0xb4] ss:$8 sps:$4 sm:$0xff]  }
  0x51   : > { %1356 = vmatpush3.bf16.msra.mxu0 %v1542_v38  ;;  %1473 = vmatpush3.bf16.msra.mxu1 %v1542_v38  ;;  %v1575_v63 = vld [vmem:[%s1885_s12 + $0x30] ss:$8 sps:$4 sm:$0xff]   ;;  %v1577_v1 = vld [vmem:[%s1885_s12 + $0x44] ss:$8 sps:$4 sm:$0xff]   ;;  %v1581_v3 = vld [vmem:[%s1885_s12 + $0x40] ss:$8 sps:$4 sm:$0xff]  }
  0x52   : > { %1357 = vmatprep.subr.bf16.mxu0 %v1543_v39  ;;  %1466 = vmatprep.subr.bf16.mxu1 %v1543_v39  ;;  %v1576_v0 = vld [vmem:[%s1885_s12 + $0xb0] ss:$8 sps:$4 sm:$0xff]   ;;  %v1579_v2 = vld [vmem:[%s1885_s12 + $0xc4] ss:$8 sps:$4 sm:$0xff]   ;;  %v1582_v4 = vld [vmem:[%s1885_s12 + $0xc0] ss:$8 sps:$4 sm:$0xff]  }
  0x53   : > { %v1583_v5 = vld [vmem:[%s1885_s12 + $0x54] ss:$8 sps:$4 sm:$0xff]   ;;  %v1587_v7 = vld [vmem:[%s1885_s12 + $0x50] ss:$8 sps:$4 sm:$0xff]   ;;  %v1589_v9 = vld [vmem:[%s1885_s12 + $0x64] ss:$8 sps:$4 sm:$0xff]  }
  0x54   : > { %v1585_v6 = vld [vmem:[%s1885_s12 + $0xd4] ss:$8 sps:$4 sm:$0xff]   ;;  %v1588_v8 = vld [vmem:[%s1885_s12 + $0xd0] ss:$8 sps:$4 sm:$0xff]   ;;  %v1591_v10 = vld [vmem:[%s1885_s12 + $0xe4] ss:$8 sps:$4 sm:$0xff]  }
  0x55   : > { %1358 = vmatpush3.bf16.msra.mxu0 %v1544_v40  ;;  %1474 = vmatpush3.bf16.msra.mxu1 %v1544_v40  ;;  %v1593_v11 = vld [vmem:[%s1885_s12 + $0x60] ss:$8 sps:$4 sm:$0xff]   ;;  %v1595_v13 = vld [vmem:[%s1885_s12 + $0x74] ss:$8 sps:$4 sm:$0xff]   ;;  %v1599_v15 = vld [vmem:[%s1885_s12 + $0x70] ss:$8 sps:$4 sm:$0xff]  }
  0x56   : > { %1359 = vmatprep.subr.bf16.mxu0 %v1545_v41  ;;  %1467 = vmatprep.subr.bf16.mxu1 %v1545_v41  ;;  %v1594_v12 = vld [vmem:[%s1885_s12 + $0xe0] ss:$8 sps:$4 sm:$0xff]   ;;  %v1597_v14 = vld [vmem:[%s1885_s12 + $0xf4] ss:$8 sps:$4 sm:$0xff]   ;;  %v1600_v16 = vld [vmem:[%s1885_s12 + $0xf0] ss:$8 sps:$4 sm:$0xff]  }
  0x57   : > { %v449_v19 = vld [vmem:[#allocation2] sm:$0xff]  ;;  %v450_v27 = vld [vmem:[#allocation2 + $0x8] sm:$0xff]  ;;  %v451_v39 = vld [vmem:[#allocation2 + $0x10] sm:$0xff] }
  0x58   : > { %v465_v21 = vld [vmem:[#allocation2 + $0x80] sm:$0xff]  ;;  %v466_v29 = vld [vmem:[#allocation2 + $0x88] sm:$0xff]  ;;  %v467_v41 = vld [vmem:[#allocation2 + $0x90] sm:$0xff] }
  0x59   : > { %1360 = vmatpush3.bf16.msra.mxu0 %v1546_v42  ;;  %1475 = vmatpush3.bf16.msra.mxu1 %v1546_v42 }
  0x5a   : > { %1361 = vmatprep.subr.bf16.mxu0 %v1547_v43  ;;  %1468 = vmatprep.subr.bf16.mxu1 %v1547_v43 }
  0x5d   : > { %1362 = vmatpush3.bf16.msra.mxu0 %v1548_v46  ;;  %1476 = vmatpush3.bf16.msra.mxu1 %v1548_v46 }
  0x5e   : > { %1363 = vmatprep.subr.bf16.mxu0 %v1549_v47  ;;  %1469 = vmatprep.subr.bf16.mxu1 %v1549_v47  ;;  %v452_v47 = vld [vmem:[#allocation2 + $0x18] sm:$0xff] }
  0x61   : > { %1364 = vmatpush3.bf16.msra.mxu0 %v1550_v48  ;;  %1477 = vmatpush3.bf16.msra.mxu1 %v1550_v48 }
  0x62   : > { %1365 = vmatprep.subr.bf16.mxu0 %v1551_v49  ;;  %1470 = vmatprep.subr.bf16.mxu1 %v1551_v49  ;;  %v468_v49 = vld [vmem:[#allocation2 + $0x98] sm:$0xff] }
  0x65   : > { %1366 = vmatpush3.bf16.msra.mxu0 %v1552_v50  ;;  %1478 = vmatpush3.bf16.msra.mxu1 %v1552_v50 }
  0x68   : > { %834 = vmatmul.mubr.bf16.vlgmr.msra.gmra.mrb[0].mxu0 %v1553_v51  ;;  %898 = vmatmul.mubr.bf16.vlgmr.msra.gmra.mrb[0].mxu1 %v1556_v52 }
  0x69   : > { %841 = vmatprep.mubr.bf16.mxu0 %v1559_v53  ;;  %905 = vmatprep.mubr.bf16.mxu1 %v1561_v54 }
  0x70   : > { %842 = vmatmul.mubr.bf16.gmra.mrb[4].mxu0 %v1563_v55  ;;  %906 = vmatmul.mubr.bf16.gmra.mrb[4].mxu1 %v1564_v56 }
  0x71   : > { %849 = vmatprep.mubr.bf16.mxu0 %v1565_v57  ;;  %913 = vmatprep.mubr.bf16.mxu1 %v1567_v58 }
  0x78   : > { %850 = vmatmul.mubr.bf16.gmra.mrb[8].mxu0 %v1569_v59  ;;  %914 = vmatmul.mubr.bf16.gmra.mrb[8].mxu1 %v1570_v60  ;;  %v453_v59 = vld [vmem:[#allocation2 + $0x20] sm:$0xff] }
  0x79   : > { %857 = vmatprep.mubr.bf16.mxu0 %v1571_v61  ;;  %921 = vmatprep.mubr.bf16.mxu1 %v1573_v62  ;;  %v469_v61 = vld [vmem:[#allocation2 + $0xa0] sm:$0xff] }
  0x80   : > { %858 = vmatmul.mubr.bf16.gmra.mrb[12].mxu0 %v1575_v63  ;;  %922 = vmatmul.mubr.bf16.gmra.mrb[12].mxu1 %v1576_v0 }
  0x81   : > { %865 = vmatprep.mubr.bf16.mxu0 %v1577_v1  ;;  %929 = vmatprep.mubr.bf16.mxu1 %v1579_v2 }
  0x88   : > { %866 = vmatmul.mubr.bf16.gmra.mrb[16].mxu0 %v1581_v3  ;;  %930 = vmatmul.mubr.bf16.gmra.mrb[16].mxu1 %v1582_v4  ;;  %v454_v3 = vld [vmem:[#allocation2 + $0x28] sm:$0xff] }
  0x89   : > { %873 = vmatprep.mubr.bf16.mxu0 %v1583_v5  ;;  %937 = vmatprep.mubr.bf16.mxu1 %v1585_v6  ;;  %v470_v5 = vld [vmem:[#allocation2 + $0xa8] sm:$0xff] }
  0x90   : > { %874 = vmatmul.mubr.bf16.gmra.mrb[20].mxu0 %v1587_v7  ;;  %938 = vmatmul.mubr.bf16.gmra.mrb[20].mxu1 %v1588_v8 }
  0x91   : > { %881 = vmatprep.mubr.bf16.mxu0 %v1589_v9  ;;  %945 = vmatprep.mubr.bf16.mxu1 %v1591_v10 }
  0x98   : > { %882 = vmatmul.mubr.bf16.gmra.mrb[24].mxu0 %v1593_v11  ;;  %946 = vmatmul.mubr.bf16.gmra.mrb[24].mxu1 %v1594_v12 }
  0x99   : > { %889 = vmatprep.mubr.bf16.mxu0 %v1595_v13  ;;  %953 = vmatprep.mubr.bf16.mxu1 %v1597_v14 }
  0xa0   : > { %890 = vmatmul.mubr.bf16.gmra.mrb[28].mxu0 %v1599_v15  ;;  %954 = vmatmul.mubr.bf16.gmra.mrb[28].mxu1 %v1600_v16  ;;  %v455_v15 = vld [vmem:[#allocation2 + $0x30] sm:$0xff] }
 0x13b   : > { %v1367_v17 = vpop.f32.mrb[0].mxu0  ;;  %v1415_v18 = vpop.f32.mrb[0].mxu1 }
 0x13c   : > { %v1368_v20 = vpop.f32.mrb[1].mxu0  ;;  %v1416_v22 = vpop.f32.mrb[1].mxu1 }
 0x13d   : > { %v1369_v23 = vadd.f32 %v1368_v20, %v1367_v17  ;;  %v1417_v24 = vadd.f32 %v1416_v22, %v1415_v18  ;;  %v1370_v25 = vpop.f32.mrb[2].mxu0  ;;  %v1418_v26 = vpop.f32.mrb[2].mxu1  ;;  %v471_v17 = vld [vmem:[#allocation2 + $0xb0] sm:$0xff] }
 0x13e   : > { %v1371_v28 = vpop.f32.mrb[3].mxu0  ;;  %v1419_v30 = vpop.f32.mrb[3].mxu1 }
 0x13f   : > { %v962_v31 = vadd.f32 %v1369_v23, %v449_v19  ;;  %v978_v32 = vadd.f32 %v1417_v24, %v465_v21  ;;  %v1372_v33 = vadd.f32 %v1371_v28, %v1370_v25  ;;  %v1420_v34 = vadd.f32 %v1419_v30, %v1418_v26  ;;  %v456_v23 = vld [vmem:[#allocation2 + $0x38] sm:$0xff] }
 0x140   : > { %v472_v25 = vld [vmem:[#allocation2 + $0xb8] sm:$0xff] }
 0x141   : > { %994 = vst [vmem:[#allocation2] sm:$0xff] %v962_v31  ;;  %1010 = vst [vmem:[#allocation2 + $0x80] sm:$0xff] %v978_v32  ;;  %v963_v35 = vadd.f32 %v1372_v33, %v450_v27  ;;  %v979_v36 = vadd.f32 %v1420_v34, %v466_v29 }
 0x143   : > { %995 = vst [vmem:[#allocation2 + $0x8] sm:$0xff] %v963_v35  ;;  %1011 = vst [vmem:[#allocation2 + $0x88] sm:$0xff] %v979_v36  ;;  %v1373_v37 = vpop.f32.mrb[4].mxu0  ;;  %v1421_v38 = vpop.f32.mrb[4].mxu1  ;;  %v457_v35 = vld [vmem:[#allocation2 + $0x40] sm:$0xff] }
 0x144   : > { %v1374_v40 = vpop.f32.mrb[5].mxu0  ;;  %v1422_v42 = vpop.f32.mrb[5].mxu1 }
 0x145   : > { %v1375_v43 = vadd.f32 %v1374_v40, %v1373_v37  ;;  %v1423_v44 = vadd.f32 %v1422_v42, %v1421_v38  ;;  %v1376_v45 = vpop.f32.mrb[6].mxu0  ;;  %v1424_v46 = vpop.f32.mrb[6].mxu1  ;;  %v473_v37 = vld [vmem:[#allocation2 + $0xc0] sm:$0xff] }
 0x146   : > { %v1377_v48 = vpop.f32.mrb[7].mxu0  ;;  %v1425_v50 = vpop.f32.mrb[7].mxu1 }
 0x147   : > { %v964_v51 = vadd.f32 %v1375_v43, %v451_v39  ;;  %v980_v52 = vadd.f32 %v1423_v44, %v467_v41  ;;  %v1378_v53 = vadd.f32 %v1377_v48, %v1376_v45  ;;  %v1426_v54 = vadd.f32 %v1425_v50, %v1424_v46  ;;  %v458_v43 = vld [vmem:[#allocation2 + $0x48] sm:$0xff] }
 0x148   : > { %v474_v45 = vld [vmem:[#allocation2 + $0xc8] sm:$0xff] }
 0x149   : > { %996 = vst [vmem:[#allocation2 + $0x10] sm:$0xff] %v964_v51  ;;  %1012 = vst [vmem:[#allocation2 + $0x90] sm:$0xff] %v980_v52  ;;  %v965_v55 = vadd.f32 %v1378_v53, %v452_v47  ;;  %v981_v56 = vadd.f32 %v1426_v54, %v468_v49 }
 0x14b   : > { %997 = vst [vmem:[#allocation2 + $0x18] sm:$0xff] %v965_v55  ;;  %1013 = vst [vmem:[#allocation2 + $0x98] sm:$0xff] %v981_v56  ;;  %v1379_v57 = vpop.f32.mrb[8].mxu0  ;;  %v1427_v58 = vpop.f32.mrb[8].mxu1  ;;  %v459_v55 = vld [vmem:[#allocation2 + $0x50] sm:$0xff] }
 0x14c   : > { %v1380_v60 = vpop.f32.mrb[9].mxu0  ;;  %v1428_v62 = vpop.f32.mrb[9].mxu1 }
 0x14d   : > { %v1381_v63 = vadd.f32 %v1380_v60, %v1379_v57  ;;  %v1429_v0 = vadd.f32 %v1428_v62, %v1427_v58  ;;  %v1382_v1 = vpop.f32.mrb[10].mxu0  ;;  %v1430_v2 = vpop.f32.mrb[10].mxu1  ;;  %v475_v57 = vld [vmem:[#allocation2 + $0xd0] sm:$0xff] }
 0x14e   : > { %v1383_v4 = vpop.f32.mrb[11].mxu0  ;;  %v1431_v6 = vpop.f32.mrb[11].mxu1 }
 0x14f   : > { %v966_v7 = vadd.f32 %v1381_v63, %v453_v59  ;;  %v982_v8 = vadd.f32 %v1429_v0, %v469_v61  ;;  %v1384_v9 = vadd.f32 %v1383_v4, %v1382_v1  ;;  %v1432_v10 = vadd.f32 %v1431_v6, %v1430_v2  ;;  %v460_v63 = vld [vmem:[#allocation2 + $0x58] sm:$0xff] }
 0x150   : > { %v476_v1 = vld [vmem:[#allocation2 + $0xd8] sm:$0xff] }
 0x151   : > { %998 = vst [vmem:[#allocation2 + $0x20] sm:$0xff] %v966_v7  ;;  %1014 = vst [vmem:[#allocation2 + $0xa0] sm:$0xff] %v982_v8  ;;  %v967_v11 = vadd.f32 %v1384_v9, %v454_v3  ;;  %v983_v12 = vadd.f32 %v1432_v10, %v470_v5 }
 0x153   : > { %999 = vst [vmem:[#allocation2 + $0x28] sm:$0xff] %v967_v11  ;;  %1015 = vst [vmem:[#allocation2 + $0xa8] sm:$0xff] %v983_v12  ;;  %v1385_v13 = vpop.f32.mrb[12].mxu0  ;;  %v1433_v14 = vpop.f32.mrb[12].mxu1  ;;  %v461_v11 = vld [vmem:[#allocation2 + $0x60] sm:$0xff] }
 0x154   : > { %v1386_v16 = vpop.f32.mrb[13].mxu0  ;;  %v1434_v18 = vpop.f32.mrb[13].mxu1 }
 0x155   : > { %v1387_v19 = vadd.f32 %v1386_v16, %v1385_v13  ;;  %v1435_v20 = vadd.f32 %v1434_v18, %v1433_v14  ;;  %v1388_v21 = vpop.f32.mrb[14].mxu0  ;;  %v1436_v22 = vpop.f32.mrb[14].mxu1  ;;  %v477_v13 = vld [vmem:[#allocation2 + $0xe0] sm:$0xff] }
 0x156   : > { %v1389_v24 = vpop.f32.mrb[15].mxu0  ;;  %v1437_v26 = vpop.f32.mrb[15].mxu1 }
 0x157   : > { %v968_v27 = vadd.f32 %v1387_v19, %v455_v15  ;;  %v984_v28 = vadd.f32 %v1435_v20, %v471_v17  ;;  %v1390_v29 = vadd.f32 %v1389_v24, %v1388_v21  ;;  %v1438_v30 = vadd.f32 %v1437_v26, %v1436_v22  ;;  %v462_v19 = vld [vmem:[#allocation2 + $0x68] sm:$0xff] }
 0x158   : > { %v478_v21 = vld [vmem:[#allocation2 + $0xe8] sm:$0xff] }
 0x159   : > { %1000 = vst [vmem:[#allocation2 + $0x30] sm:$0xff] %v968_v27  ;;  %1016 = vst [vmem:[#allocation2 + $0xb0] sm:$0xff] %v984_v28  ;;  %v969_v31 = vadd.f32 %v1390_v29, %v456_v23  ;;  %v985_v32 = vadd.f32 %v1438_v30, %v472_v25 }
 0x15b   : > { %1001 = vst [vmem:[#allocation2 + $0x38] sm:$0xff] %v969_v31  ;;  %1017 = vst [vmem:[#allocation2 + $0xb8] sm:$0xff] %v985_v32  ;;  %v1391_v33 = vpop.f32.mrb[16].mxu0  ;;  %v1439_v34 = vpop.f32.mrb[16].mxu1  ;;  %v463_v31 = vld [vmem:[#allocation2 + $0x70] sm:$0xff] }
 0x15c   : > { %v1392_v36 = vpop.f32.mrb[17].mxu0  ;;  %v1440_v38 = vpop.f32.mrb[17].mxu1 }
 0x15d   : > { %v1393_v39 = vadd.f32 %v1392_v36, %v1391_v33  ;;  %v1441_v40 = vadd.f32 %v1440_v38, %v1439_v34  ;;  %v1394_v41 = vpop.f32.mrb[18].mxu0  ;;  %v1442_v42 = vpop.f32.mrb[18].mxu1  ;;  %v479_v33 = vld [vmem:[#allocation2 + $0xf0] sm:$0xff] }
 0x15e   : > { %v1395_v44 = vpop.f32.mrb[19].mxu0  ;;  %v1443_v46 = vpop.f32.mrb[19].mxu1 }
 0x15f   : > { %v970_v47 = vadd.f32 %v1393_v39, %v457_v35  ;;  %v986_v48 = vadd.f32 %v1441_v40, %v473_v37  ;;  %v1396_v49 = vadd.f32 %v1395_v44, %v1394_v41  ;;  %v1444_v50 = vadd.f32 %v1443_v46, %v1442_v42  ;;  %v464_v39 = vld [vmem:[#allocation2 + $0x78] sm:$0xff] }
 0x160   : > { %v480_v41 = vld [vmem:[#allocation2 + $0xf8] sm:$0xff] }
 0x161   : > { %1002 = vst [vmem:[#allocation2 + $0x40] sm:$0xff] %v970_v47  ;;  %1018 = vst [vmem:[#allocation2 + $0xc0] sm:$0xff] %v986_v48  ;;  %v971_v51 = vadd.f32 %v1396_v49, %v458_v43  ;;  %v987_v52 = vadd.f32 %v1444_v50, %v474_v45  ;;  %v1030_v49 = vld [vmem:[#allocation2] sm:$0xff] (!%p1347_p13) }
 0x162   : > { %v1940_v50 = vld [vmem:[%s2029_s2] ss:$0 sm:$0xff] (!%p1347_p13) }
 0x163   : > { %1003 = vst [vmem:[#allocation2 + $0x48] sm:$0xff] %v971_v51  ;;  %1019 = vst [vmem:[#allocation2 + $0xc8] sm:$0xff] %v987_v52  ;;  %v1397_v53 = vpop.f32.mrb[20].mxu0  ;;  %v1445_v54 = vpop.f32.mrb[20].mxu1  ;;  %v1031_v51 = vld [vmem:[#allocation2 + $0x8] sm:$0xff] (!%p1347_p13)  ;;  %v1069_v52 = vadd.f32 (!%p1347_p13), %v1940_v50, %v1030_v49 }
 0x164   : > { %v1398_v56 = vpop.f32.mrb[21].mxu0  ;;  %v1446_v58 = vpop.f32.mrb[21].mxu1 }
 0x165   : > { %v1399_v59 = vadd.f32 %v1398_v56, %v1397_v53  ;;  %v1447_v60 = vadd.f32 %v1446_v58, %v1445_v54  ;;  %v1400_v61 = vpop.f32.mrb[22].mxu0  ;;  %v1448_v62 = vpop.f32.mrb[22].mxu1  ;;  %v1070_v53 = vadd.f32 (!%p1347_p13), %v1940_v50, %v1031_v51  ;;  %v1032_v54 = vld [vmem:[#allocation2 + $0x10] sm:$0xff] (!%p1347_p13)  ;;  %v1034_v56 = vld [vmem:[#allocation2 + $0x20] sm:$0xff] (!%p1347_p13)  ;;  %1601 = vtanh.f32 (!%p1347_p13), %v1069_v52 }
 0x166   : > { %v1401_v0 = vpop.f32.mrb[23].mxu0  ;;  %v1449_v2 = vpop.f32.mrb[23].mxu1 }
 0x167   : > { %v972_v3 = vadd.f32 %v1399_v59, %v459_v55  ;;  %v988_v4 = vadd.f32 %v1447_v60, %v475_v57  ;;  %v1402_v5 = vadd.f32 %v1401_v0, %v1400_v61  ;;  %v1450_v6 = vadd.f32 %v1449_v2, %v1448_v62  ;;  %v1033_v55 = vld [vmem:[#allocation2 + $0x18] sm:$0xff] (!%p1347_p13)  ;;  %v1035_v59 = vld [vmem:[#allocation2 + $0x28] sm:$0xff] (!%p1347_p13)  ;;  %v1036_v60 = vld [vmem:[#allocation2 + $0x30] sm:$0xff] (!%p1347_p13) }
 0x168   : > { %v1071_v57 = vadd.f32 (!%p1347_p13), %v1940_v50, %v1032_v54  ;;  %v1072_v58 = vadd.f32 (!%p1347_p13), %v1940_v50, %v1033_v55  ;;  %v1073_v61 = vadd.f32 (!%p1347_p13), %v1940_v50, %v1034_v56  ;;  %v1037_v62 = vld [vmem:[#allocation2 + $0x38] sm:$0xff] (!%p1347_p13)  ;;  %1603 = vtanh.f32 (!%p1347_p13), %v1070_v53  ;;  %v1038_v0 = vld [vmem:[#allocation2 + $0x40] sm:$0xff] (!%p1347_p13) }
 0x169   : > { %1004 = vst [vmem:[#allocation2 + $0x50] sm:$0xff] %v972_v3  ;;  %1020 = vst [vmem:[#allocation2 + $0xd0] sm:$0xff] %v988_v4  ;;  %v973_v7 = vadd.f32 %v1402_v5, %v460_v63  ;;  %v989_v8 = vadd.f32 %v1450_v6, %v476_v1  ;;  %v1074_v63 = vadd.f32 (!%p1347_p13), %v1940_v50, %v1035_v59 }
 0x16a   : > { %1605 = vtanh.f32 (!%p1347_p13), %v1071_v57  ;;  %v1075_v1 = vadd.f32 (!%p1347_p13), %v1940_v50, %v1036_v60  ;;  %v1039_v2 = vld [vmem:[#allocation2 + $0x48] sm:$0xff] (!%p1347_p13)  ;;  %v1076_v3 = vadd.f32 (!%p1347_p13), %v1940_v50, %v1037_v62  ;;  %v1077_v5 = vadd.f32 (!%p1347_p13), %v1940_v50, %v1038_v0 }
 0x16b   : > { %1005 = vst [vmem:[#allocation2 + $0x58] sm:$0xff] %v973_v7  ;;  %1021 = vst [vmem:[#allocation2 + $0xd8] sm:$0xff] %v989_v8  ;;  %v1403_v9 = vpop.f32.mrb[24].mxu0  ;;  %v1451_v10 = vpop.f32.mrb[24].mxu1  ;;  %1607 = vtanh.f32 (!%p1347_p13), %v1072_v58  ;;  %v1078_v7 = vadd.f32 (!%p1347_p13), %v1940_v50, %v1039_v2 }
 0x16c   : > { %v1404_v12 = vpop.f32.mrb[25].mxu0  ;;  %v1452_v14 = vpop.f32.mrb[25].mxu1  ;;  %1609 = vtanh.f32 (!%p1347_p13), %v1073_v61 }
 0x16d   : > { %v1405_v15 = vadd.f32 %v1404_v12, %v1403_v9  ;;  %v1453_v16 = vadd.f32 %v1452_v14, %v1451_v10  ;;  %v1406_v17 = vpop.f32.mrb[26].mxu0  ;;  %v1454_v18 = vpop.f32.mrb[26].mxu1  ;;  %1611 = vtanh.f32 (!%p1347_p13), %v1074_v63 }
 0x16e   : > { %v1407_v20 = vpop.f32.mrb[27].mxu0  ;;  %v1455_v22 = vpop.f32.mrb[27].mxu1  ;;  %1613 = vtanh.f32 (!%p1347_p13), %v1075_v1 }
 0x16f   : > { %v974_v23 = vadd.f32 %v1405_v15, %v461_v11  ;;  %v990_v24 = vadd.f32 %v1453_v16, %v477_v13  ;;  %v1408_v25 = vadd.f32 %v1407_v20, %v1406_v17  ;;  %v1456_v26 = vadd.f32 %v1455_v22, %v1454_v18  ;;  %v1046_v16 = vld [vmem:[#allocation2 + $0x80] sm:$0xff] (!%p1347_p13)  ;;  %v1602_v17 = vpop.eup (!%p1347_p13), %1601  ;;  %v1048_v22 = vld [vmem:[#allocation2 + $0x90] sm:$0xff] (!%p1347_p13) }
 0x170   : > { %v1040_v4 = vld [vmem:[#allocation2 + $0x50] sm:$0xff] (!%p1347_p13)  ;;  %1615 = vtanh.f32 (!%p1347_p13), %v1076_v3  ;;  %1133 = vst [vmem:[%s1883_s30] sm:$0xff] (!%p1347_p13), %v1602_v17 }
 0x171   : > { %1006 = vst [vmem:[#allocation2 + $0x60] sm:$0xff] %v974_v23  ;;  %1022 = vst [vmem:[#allocation2 + $0xe0] sm:$0xff] %v990_v24  ;;  %v975_v27 = vadd.f32 %v1408_v25, %v462_v19  ;;  %v991_v28 = vadd.f32 %v1456_v26, %v478_v21  ;;  %v1079_v9 = vadd.f32 (!%p1347_p13), %v1940_v50, %v1040_v4  ;;  %1617 = vtanh.f32 (!%p1347_p13), %v1077_v5  ;;  %v1047_v19 = vld [vmem:[#allocation2 + $0x88] sm:$0xff] (!%p1347_p13)  ;;  %v1049_v25 = vld [vmem:[#allocation2 + $0x98] sm:$0xff] (!%p1347_p13) }
 0x172   : > { %v1041_v6 = vld [vmem:[#allocation2 + $0x58] sm:$0xff] (!%p1347_p13)  ;;  %1619 = vtanh.f32 (!%p1347_p13), %v1078_v7  ;;  %v1604_v20 = vpop.eup (!%p1347_p13), %1603  ;;  %v1085_v24 = vadd.f32 (!%p1347_p13), %v1940_v50, %v1046_v16 }
 0x173   : > { %1007 = vst [vmem:[#allocation2 + $0x68] sm:$0xff] %v975_v27  ;;  %1023 = vst [vmem:[#allocation2 + $0xe8] sm:$0xff] %v991_v28  ;;  %v1409_v29 = vpop.f32.mrb[28].mxu0  ;;  %v1457_v30 = vpop.f32.mrb[28].mxu1  ;;  %v1080_v11 = vadd.f32 (!%p1347_p13), %v1940_v50, %v1041_v6  ;;  %1621 = vtanh.f32 (!%p1347_p13), %v1079_v9  ;;  %v1086_v27 = vadd.f32 (!%p1347_p13), %v1940_v50, %v1047_v19  ;;  %v1050_v28 = vld [vmem:[#allocation2 + $0xa0] sm:$0xff] (!%p1347_p13)  ;;  %v1057_v49 = vld [vmem:[#allocation2 + $0xd8] sm:$0xff] (!%p1347_p13) }
 0x174   : > { %v1410_v32 = vpop.f32.mrb[29].mxu0  ;;  %v1458_v34 = vpop.f32.mrb[29].mxu1  ;;  %1134 = vst [vmem:[%s1883_s30 + $0x8] sm:$0xff] (!%p1347_p13), %v1604_v20  ;;  %v1096_v58 = vadd.f32 (!%p1347_p13), %v1940_v50, %v1057_v49 }
 0x175   : > { %v1411_v35 = vadd.f32 %v1410_v32, %v1409_v29  ;;  %v1459_v36 = vadd.f32 %v1458_v34, %v1457_v30  ;;  %v1412_v37 = vpop.f32.mrb[30].mxu0  ;;  %v1460_v38 = vpop.f32.mrb[30].mxu1  ;;  %1029 = sbr.rel (%p1347_p13) target bundleno = 417 (0x1a1), region = 78  ;;  %1623 = vtanh.f32 (!%p1347_p13), %v1080_v11  ;;  %v1087_v30 = vadd.f32 (!%p1347_p13), %v1940_v50, %v1048_v22  ;;  %v1052_v34 = vld [vmem:[#allocation2 + $0xb0] sm:$0xff] (!%p1347_p13) }
 0x176   : > { %v1413_v40 = vpop.f32.mrb[31].mxu0  ;;  %v1461_v42 = vpop.f32.mrb[31].mxu1 }
 0x177   : > { %v976_v43 = vadd.f32 %v1411_v35, %v463_v31  ;;  %v992_v44 = vadd.f32 %v1459_v36, %v479_v33  ;;  %v1414_v45 = vadd.f32 %v1413_v40, %v1412_v37  ;;  %v1462_v46 = vadd.f32 %v1461_v42, %v1460_v38  ;;  %v1606_v23 = vpop.eup (!%p1347_p13), %1605  ;;  %v1051_v31 = vld [vmem:[#allocation2 + $0xa8] sm:$0xff] (!%p1347_p13)  ;;  %v1053_v37 = vld [vmem:[#allocation2 + $0xb8] sm:$0xff] (!%p1347_p13)  ;;  %v1054_v40 = vld [vmem:[#allocation2 + $0xc0] sm:$0xff] (!%p1347_p13) }
 0x178   : > { %v1042_v8 = vld [vmem:[#allocation2 + $0x60] sm:$0xff] (!%p1347_p13)  ;;  %v1608_v26 = vpop.eup (!%p1347_p13), %1607  ;;  %1135 = vst [vmem:[%s1883_s30 + $0x10] sm:$0xff] (!%p1347_p13), %v1606_v23  ;;  %v1088_v33 = vadd.f32 (!%p1347_p13), %v1940_v50, %v1049_v25  ;;  %v1089_v36 = vadd.f32 (!%p1347_p13), %v1940_v50, %v1050_v28  ;;  %v1091_v42 = vadd.f32 (!%p1347_p13), %v1940_v50, %v1052_v34 }
 0x179   : > { %1008 = vst [vmem:[#allocation2 + $0x70] sm:$0xff] %v976_v43  ;;  %1024 = vst [vmem:[#allocation2 + $0xf0] sm:$0xff] %v992_v44  ;;  %v977_v47 = vadd.f32 %v1414_v45, %v464_v39  ;;  %v993_v48 = vadd.f32 %v1462_v46, %v480_v41  ;;  %v1081_v13 = vadd.f32 (!%p1347_p13), %v1940_v50, %v1042_v8  ;;  %v1610_v29 = vpop.eup (!%p1347_p13), %1609  ;;  %v1055_v43 = vld [vmem:[#allocation2 + $0xc8] sm:$0xff] (!%p1347_p13)  ;;  %v1056_v46 = vld [vmem:[#allocation2 + $0xd0] sm:$0xff] (!%p1347_p13) }
 0x17a   : > { %v1043_v10 = vld [vmem:[#allocation2 + $0x68] sm:$0xff] (!%p1347_p13)  ;;  %1136 = vst [vmem:[%s1883_s30 + $0x18] sm:$0xff] (!%p1347_p13), %v1608_v26  ;;  %v1612_v32 = vpop.eup (!%p1347_p13), %1611  ;;  %1137 = vst [vmem:[%s1883_s30 + $0x20] sm:$0xff] (!%p1347_p13), %v1610_v29  ;;  %v1090_v39 = vadd.f32 (!%p1347_p13), %v1940_v50, %v1051_v31  ;;  %v1092_v45 = vadd.f32 (!%p1347_p13), %v1940_v50, %v1053_v37  ;;  %v1094_v52 = vadd.f32 (!%p1347_p13), %v1940_v50, %v1055_v43  ;;  %v1058_v53 = vld [vmem:[#allocation2 + $0xe0] sm:$0xff] (!%p1347_p13) }
 0x17b   : > { %1009 = vst [vmem:[#allocation2 + $0x78] sm:$0xff] %v977_v47  ;;  %1025 = vst [vmem:[#allocation2 + $0xf8] sm:$0xff] %v993_v48  ;;  %v1082_v15 = vadd.f32 (!%p1347_p13), %v1940_v50, %v1043_v10  ;;  %1625 = vtanh.f32 (!%p1347_p13), %v1081_v13  ;;  %v1614_v35 = vpop.eup (!%p1347_p13), %1613  ;;  %v1093_v48 = vadd.f32 (!%p1347_p13), %v1940_v50, %v1054_v40  ;;  %v1095_v55 = vadd.f32 (!%p1347_p13), %v1940_v50, %v1056_v46  ;;  %v1059_v56 = vld [vmem:[#allocation2 + $0xe8] sm:$0xff] (!%p1347_p13) }
 0x17c   : > { %1138 = vst [vmem:[%s1883_s30 + $0x28] sm:$0xff] %v1612_v32  ;;  %v1616_v38 = vpop.eup %1615  ;;  %1139 = vst [vmem:[%s1883_s30 + $0x30] sm:$0xff] %v1614_v35  ;;  %v1097_v61 = vadd.f32 %v1940_v50, %v1058_v53  ;;  %v1098_v0 = vadd.f32 %v1940_v50, %v1059_v56 }
 0x17d   : > { %1627 = vtanh.f32 %v1082_v15  ;;  %v1618_v41 = vpop.eup %1617  ;;  %1140 = vst [vmem:[%s1883_s30 + $0x38] sm:$0xff] %v1616_v38 }
 0x17e   : > { %v1620_v44 = vpop.eup %1619  ;;  %1141 = vst [vmem:[%s1883_s30 + $0x40] sm:$0xff] %v1618_v41 }
 0x17f   : > { %v1622_v47 = vpop.eup %1621  ;;  %1142 = vst [vmem:[%s1883_s30 + $0x48] sm:$0xff] %v1620_v44 }
 0x180   : > { %v1044_v12 = vld [vmem:[#allocation2 + $0x70] sm:$0xff]  ;;  %v1624_v51 = vpop.eup %1623  ;;  %1143 = vst [vmem:[%s1883_s30 + $0x50] sm:$0xff] %v1622_v47 }
 0x181   : > { %v1083_v18 = vadd.f32 %v1940_v50, %v1044_v12  ;;  %1144 = vst [vmem:[%s1883_s30 + $0x58] sm:$0xff] %v1624_v51  ;;  %v1060_v59 = vld [vmem:[#allocation2 + $0xf0] sm:$0xff] }
 0x182   : > { %v1045_v14 = vld [vmem:[#allocation2 + $0x78] sm:$0xff]  ;;  %v1099_v2 = vadd.f32 %v1940_v50, %v1060_v59 }
 0x183   : > { %v1084_v21 = vadd.f32 %v1940_v50, %v1045_v14  ;;  %1629 = vtanh.f32 %v1083_v18  ;;  %v1061_v62 = vld [vmem:[#allocation2 + $0xf8] sm:$0xff] }
 0x184   : > { %v1100_v4 = vadd.f32 %v1940_v50, %v1061_v62 }
 0x185   : > { %1631 = vtanh.f32 %v1084_v21  ;;  %v1626_v54 = vpop.eup %1625 }
 0x186   : > { %1633 = vtanh.f32 %v1085_v24  ;;  %1145 = vst [vmem:[%s1883_s30 + $0x60] sm:$0xff] %v1626_v54 }
 0x187   : > { %1635 = vtanh.f32 %v1086_v27  ;;  %v1628_v57 = vpop.eup %1627 }
 0x188   : > { %1637 = vtanh.f32 %v1087_v30  ;;  %1146 = vst [vmem:[%s1883_s30 + $0x68] sm:$0xff] %v1628_v57 }
 0x189   : > { %1639 = vtanh.f32 %v1088_v33 }
 0x18a   : > { %1641 = vtanh.f32 %v1089_v36 }
 0x18b   : > { %1643 = vtanh.f32 %v1090_v39 }
 0x18c   : > { %1645 = vtanh.f32 %v1091_v42 }
 0x18d   : > { %1647 = vtanh.f32 %v1092_v45  ;;  %v1630_v60 = vpop.eup %1629 }
 0x18e   : > { %1649 = vtanh.f32 %v1093_v48  ;;  %1147 = vst [vmem:[%s1883_s30 + $0x70] sm:$0xff] %v1630_v60 }
 0x18f   : > { %v1632_v63 = vpop.eup %1631  ;;  %1651 = vtanh.f32 %v1094_v52 }
 0x190   : > { %v1634_v1 = vpop.eup %1633  ;;  %1148 = vst [vmem:[%s1883_s30 + $0x78] sm:$0xff] %v1632_v63  ;;  %1653 = vtanh.f32 %v1095_v55 }
 0x191   : > { %v1636_v3 = vpop.eup %1635  ;;  %1149 = vst [vmem:[%s1883_s30 + $0x80] sm:$0xff] %v1634_v1  ;;  %1655 = vtanh.f32 %v1096_v58 }
 0x192   : > { %v1638_v5 = vpop.eup %1637  ;;  %1150 = vst [vmem:[%s1883_s30 + $0x88] sm:$0xff] %v1636_v3  ;;  %1657 = vtanh.f32 %v1097_v61 }
 0x193   : > { %v1640_v6 = vpop.eup %1639  ;;  %1151 = vst [vmem:[%s1883_s30 + $0x90] sm:$0xff] %v1638_v5  ;;  %1659 = vtanh.f32 %v1098_v0 }
 0x194   : > { %v1642_v7 = vpop.eup %1641  ;;  %1152 = vst [vmem:[%s1883_s30 + $0x98] sm:$0xff] %v1640_v6  ;;  %1661 = vtanh.f32 %v1099_v2 }
 0x195   : > { %v1644_v8 = vpop.eup %1643  ;;  %1153 = vst [vmem:[%s1883_s30 + $0xa0] sm:$0xff] %v1642_v7  ;;  %1663 = vtanh.f32 %v1100_v4 }
 0x196   : > { %v1646_v50 = vpop.eup %1645  ;;  %1154 = vst [vmem:[%s1883_s30 + $0xa8] sm:$0xff] %v1644_v8 }
 0x197   : > { %v1648_v9 = vpop.eup %1647  ;;  %1155 = vst [vmem:[%s1883_s30 + $0xb0] sm:$0xff] %v1646_v50 }
 0x198   : > { %v1650_v10 = vpop.eup %1649  ;;  %1156 = vst [vmem:[%s1883_s30 + $0xb8] sm:$0xff] %v1648_v9 }
 0x199   : > { %v1652_v11 = vpop.eup %1651  ;;  %1157 = vst [vmem:[%s1883_s30 + $0xc0] sm:$0xff] %v1650_v10 }
 0x19a   : > { %v1654_v12 = vpop.eup %1653  ;;  %1158 = vst [vmem:[%s1883_s30 + $0xc8] sm:$0xff] %v1652_v11 }
 0x19b   : > { %v1656_v13 = vpop.eup %1655  ;;  %1159 = vst [vmem:[%s1883_s30 + $0xd0] sm:$0xff] %v1654_v12 }
 0x19c   : > { %v1658_v14 = vpop.eup %1657  ;;  %1160 = vst [vmem:[%s1883_s30 + $0xd8] sm:$0xff] %v1656_v13 }
 0x19d   : > { %v1660_v15 = vpop.eup %1659  ;;  %1161 = vst [vmem:[%s1883_s30 + $0xe0] sm:$0xff] %v1658_v14 }
 0x19e   : > { %v1662_v16 = vpop.eup %1661  ;;  %1162 = vst [vmem:[%s1883_s30 + $0xe8] sm:$0xff] %v1660_v15 }
 0x19f   : > { %v1664_v17 = vpop.eup %1663  ;;  %1163 = vst [vmem:[%s1883_s30 + $0xf0] sm:$0xff] %v1662_v16 }
 0x1a0   : > { %1164 = vst [vmem:[%s1883_s30 + $0xf8] sm:$0xff] %v1664_v17 }
 0x1a1 PF: > { %s13_s18 = sadd.s32 1, %s1719_s18   ;;  %s2031_s12 = smov %s1699_s13 }
 0x1a2   : > { %p10_p0 = scmp.ge.s32.totalorder %s13_s18, 44   ;;  %s2032_s13 = smov %s1793_s25 }
 0x1a3   : > { %s2033_s14 = smov %s1711_s16  ;;  %s2034_s15 = smov %s1715_s17 }
 0x1a4   : > { %s2035_s16 = smov %s2038_s19  ;;  %s2036_s17 = smov %s2042_s20 }
 0x1a5   :  { %12 = sbr.rel (!%p10_p0) target bundleno = 4 (0x4), region = 119 }

</bundles_post_ra>
